<compile_context>
chip_gen: v7x
topology: tpu7x:2x2x1
jax: 0.10.0
libtpu: 0.0.40
codegen_flags: <defaults>
</compile_context>

<pallas_src>
import functools

import numpy as np
import jax
import jax.numpy as jnp
from jax.experimental import pallas as pl
from jax.experimental.pallas import tpu as pltpu

# ----------------------------------------------------------------------------
# Constants / small helpers
# ----------------------------------------------------------------------------
LANE = 128
ACT_NONE, ACT_RELU, ACT_HSWISH, ACT_HSIG = 0, 1, 2, 3
VMEM_SPEC = pl.BlockSpec(memory_space=pltpu.MemorySpace.VMEM)
VMEM_LIMIT = 32 * 1024 * 1024


def _cpad(c):
    return ((c + LANE - 1) // LANE) * LANE


def _round_up(x, m):
    return ((x + m - 1) // m) * m


def _apply_act(y, act_id):
    if act_id == ACT_NONE:
        return y
    if act_id == ACT_RELU:
        return jnp.maximum(y, 0.0)
    if act_id == ACT_HSWISH:          # x * relu6(x + 3) / 6
        return y * jnp.clip(y + 3.0, 0.0, 6.0) * (1.0 / 6.0)
    if act_id == ACT_HSIG:            # relu6(x + 3) / 6
        return jnp.clip(y + 3.0, 0.0, 6.0) * (1.0 / 6.0)
    raise ValueError(act_id)


def _make_divisible(ch, divisor=8, min_ch=None):
    if min_ch is None:
        min_ch = divisor
    new_ch = max(min_ch, int(ch + divisor / 2) // divisor * divisor)
    if new_ch < 0.9 * ch:
        new_ch += divisor
    return new_ch


# ----------------------------------------------------------------------------
# JAX-side layout glue (runs inside jit, on the *narrow* tensors only)
# ----------------------------------------------------------------------------
def _pad_and_split(x, ksize, stride):
    """Zero-pad for the conv and (stride>1) space-to-depth parity-decompose so
    every depthwise tap window is a plain static slice inside the kernel.
    Returns xs (N, G, Hs, Ws8, C), plus static geometry."""
    n, h, w, c = x.shape
    pad = (ksize - 1) // 2
    ho = (h + 2 * pad - ksize) // stride + 1
    wo = (w + 2 * pad - ksize) // stride + 1
    xp = jnp.pad(x, ((0, 0), (pad, pad), (pad, pad), (0, 0)))
    if stride == 1:
        subs = [xp]
    else:
        subs = [xp[:, a::stride, b::stride, :]
                for a in range(stride) for b in range(stride)]
    hs = max(t.shape[1] for t in subs)
    ws8 = _round_up(max(t.shape[2] for t in subs), 8)
    subs = [jnp.pad(t, ((0, 0), (0, hs - t.shape[1]),
                        (0, ws8 - t.shape[2]), (0, 0))) for t in subs]
    xs = jnp.stack(subs, axis=1)                      # (N, G, Hs, Ws8, C)
    return xs, hs, ws8, ho, wo, stride * stride, pad


def _parity_mask(g, hs, ws8, stride, pad, h, w):
    """1.0 where a (parity, row, col) position maps to a real (un-padded) input
    pixel, 0.0 on conv padding / alignment padding.  Static numpy constant."""
    gi = np.arange(g).reshape(g, 1, 1, 1)
    a, b = gi // stride, gi % stride
    qi = np.arange(hs).reshape(1, hs, 1, 1)
    qj = np.arange(ws8).reshape(1, 1, ws8, 1)
    ip, jp = qi * stride + a, qj * stride + b
    valid = (ip >= pad) & (ip < pad + h) & (jp >= pad) & (jp < pad + w)
    return jnp.asarray(valid, dtype=jnp.float32)


# ----------------------------------------------------------------------------
# Pallas kernels
# ----------------------------------------------------------------------------
def _first_conv_kernel(xs_ref, w_ref, b_ref, o_ref, *, out_hw):
    """Dense 3x3 stride-2 conv (in-kernel tap slicing) + folded BN + hardswish."""
    ho, wo = out_hw
    cin = xs_ref.shape[-1]
    cout = o_ref.shape[-1]
    acc = jnp.zeros((ho * wo, cout), jnp.float32)
    for ki in range(3):
        for kj in range(3):
            g = (ki % 2) * 2 + (kj % 2)
            qi, qj = ki // 2, kj // 2
            t = ki * 3 + kj
            win = xs_ref[0, g, qi:qi + ho, qj:qj + wo, :]       # (ho, wo, cin) bf16
            acc = acc + jnp.dot(win.reshape(ho * wo, cin), w_ref[t],
                                preferred_element_type=jnp.float32)
    y = _apply_act(acc + b_ref[...], ACT_HSWISH)
    o_ref[0] = y.reshape(ho, wo, cout).astype(o_ref.dtype)


def _block_kernel(*refs, ksize, stride, act_id, has_expand, use_se, has_res,
                  out_hw):
    """One fused MobileNetV3 inverted-residual block for a single sample:
    expand 1x1 -> depthwise KxK -> (SE) -> project 1x1 -> (+residual)."""
    it = iter(refs)
    xs_ref = next(it)
    if has_expand:
        mask_ref, wexp_ref, bexp_ref = next(it), next(it), next(it)
    wdw_ref, bdw_ref = next(it), next(it)
    if use_se:
        f1w_ref, f1b_ref, f2w_ref, f2b_ref = next(it), next(it), next(it), next(it)
    wproj_ref, bproj_ref = next(it), next(it)
    if has_res:
        res_ref = next(it)
    o_ref = next(it)
    exp_ref = next(it)                                 # (G, Hs, Ws8, Ce) bf16
    acc_ref = next(it)                                 # (Ho, Wo, Ce) f32

    ho, wo = out_hw
    g_dim, hs, ws, ce = exp_ref.shape

    # --- 1x1 expand conv (BN folded) + activation, computed directly in the
    #     padded / parity layout; pad positions are re-zeroed by the mask.
    if has_expand:
        xv = xs_ref[0]                                 # (G, Hs, Ws8, Cin) bf16
        cin = xv.shape[-1]
        e = jnp.dot(xv.reshape(g_dim * hs * ws, cin), wexp_ref[...],
                    preferred_element_type=jnp.float32)
        e = _apply_act(e + bexp_ref[...], act_id)
        e = e.reshape(g_dim, hs, ws, ce) * mask_ref[...]
        exp_ref[...] = e.astype(exp_ref.dtype)
    else:
        exp_ref[...] = xs_ref[0]

    # --- depthwise KxK conv (BN scale folded into taps), accumulated tap-by-tap
    #     into a VMEM scratch to bound live ranges (25 taps for k=5).
    acc_ref[...] = jnp.zeros_like(acc_ref)
    for ki in range(ksize):
        for kj in range(ksize):
            g = (ki % stride) * stride + (kj % stride)
            qi, qj = ki // stride, kj // stride
            t = ki * ksize + kj
            win = exp_ref[g, qi:qi + ho, qj:qj + wo, :].astype(jnp.float32)
            acc_ref[...] = acc_ref[...] + win * wdw_ref[t:t + 1, :]
    y = _apply_act(acc_ref[...] + bdw_ref[...], act_id)          # (Ho, Wo, Ce) f32

    # --- squeeze-excitation (avgpool -> fc1 -> relu -> fc2 -> hardsigmoid -> scale)
    if use_se:
        pooled = jnp.sum(jnp.sum(y, axis=0), axis=0, keepdims=True) \
            * (1.0 / float(ho * wo))                             # (1, Ce)
        sc = jnp.dot(pooled.astype(jnp.bfloat16), f1w_ref[...],
                     preferred_element_type=jnp.float32) + f1b_ref[...]
        sc = jnp.maximum(sc, 0.0)
        sc = jnp.dot(sc.astype(jnp.bfloat16), f2w_ref[...],
                     preferred_element_type=jnp.float32) + f2b_ref[...]
        sc = jnp.clip(sc + 3.0, 0.0, 6.0) * (1.0 / 6.0)          # hardsigmoid
        y = y * sc                                               # lane broadcast

    # --- 1x1 project conv (BN folded) + activation + residual.  NOTE: this
    #     reference model's projection ConvBNActivation applies the block
    #     activation (unlike torchvision's Identity), so we do too.
    cout = o_ref.shape[-1]
    out = jnp.dot(y.astype(jnp.bfloat16).reshape(ho * wo, ce), wproj_ref[...],
                  preferred_element_type=jnp.float32)
    out = _apply_act(out + bproj_ref[...], act_id).reshape(ho, wo, cout)
    if has_res:
        out = out + res_ref[0].astype(jnp.float32)
    o_ref[0] = out.astype(o_ref.dtype)


def _head_kernel(x_ref, wl_ref, bl_ref, w1_ref, b1_ref, w2_ref, b2_ref, o_ref):
    """last 1x1 conv + BN + hswish, global avgpool, Linear + hswish + Linear."""
    n, hf, wf, cin = x_ref.shape
    hw = hf * wf
    xv = x_ref[...].reshape(n * hw, cin)                         # bf16
    y = jnp.dot(xv, wl_ref[...], preferred_element_type=jnp.float32) + bl_ref[...]
    y = _apply_act(y, ACT_HSWISH)
    cl = y.shape[-1]
    pooled = jnp.mean(y.reshape(n, hw, cl), axis=1)              # (n, CL) f32
    h1 = jnp.dot(pooled.astype(jnp.bfloat16), w1_ref[...],
                 preferred_element_type=jnp.float32) + b1_ref[...]
    h1 = _apply_act(h1, ACT_HSWISH)
    # TODO(synk): nn.Dropout(p=0.2) between the two Linear layers is identity
    # under inference semantics.
    o_ref[...] = jnp.dot(h1.astype(jnp.bfloat16), w2_ref[...],
                         preferred_element_type=jnp.float32) + b2_ref[...]


# ----------------------------------------------------------------------------
# pallas_call wrappers
# ----------------------------------------------------------------------------
def first_conv(x, p):
    n = x.shape[0]
    cin = x.shape[-1]
    c0p = p["w"].shape[-1]
    xs, hs, ws8, ho, wo, g, _ = _pad_and_split(x, ksize=3, stride=2)
    return pl.pallas_call(
        functools.partial(_first_conv_kernel, out_hw=(ho, wo)),
        out_shape=jax.ShapeDtypeStruct((n, ho, wo, c0p), jnp.bfloat16),
        grid=(n,),
        in_specs=[pl.BlockSpec((1, g, hs, ws8, cin), lambda i: (i, 0, 0, 0, 0)),
                  pl.BlockSpec((9, cin, c0p), lambda i: (0, 0, 0)),
                  pl.BlockSpec((1, c0p), lambda i: (0, 0))],
        out_specs=pl.BlockSpec((1, ho, wo, c0p), lambda i: (i, 0, 0, 0)),
        compiler_params=pltpu.CompilerParams(
            dimension_semantics=("parallel",),
            vmem_limit_bytes=VMEM_LIMIT),
    )(xs, p["w"], p["b"])


def inverted_residual(x, cnf, p):
    n, h, w, cin_p = x.shape
    k, s = cnf.kernel_size, cnf.stride
    has_expand = cnf.expanded_c != cnf.in_channel
    has_res = (s == 1 and cnf.in_channel == cnf.out_channel)
    ce_p = _cpad(cnf.expanded_c)
    cout_p = _cpad(cnf.out_channel)
    act = ACT_HSWISH if cnf.use_hs else ACT_RELU

    xs, hs, ws8, ho, wo, g, pad = _pad_and_split(x, ksize=k, stride=s)

    args = [xs]
    in_specs = [pl.BlockSpec((1, g, hs, ws8, cin_p), lambda i: (i, 0, 0, 0, 0))]

    if has_expand:
        mask = _parity_mask(g, hs, ws8, s, pad, h, w)            # (G,Hs,Ws8,1)
        args += [mask, p["expand"]["w"], p["expand"]["b"]]
        in_specs += [pl.BlockSpec((g, hs, ws8, 1), lambda i: (0, 0, 0, 0)),
                     pl.BlockSpec((cin_p, ce_p), lambda i: (0, 0)),
                     pl.BlockSpec((1, ce_p), lambda i: (0, 0))]

    args += [p["dw"]["w"], p["dw"]["b"]]
    in_specs += [pl.BlockSpec((k * k, ce_p), lambda i: (0, 0)),
                 pl.BlockSpec((1, ce_p), lambda i: (0, 0))]

    if cnf.use_se:
        se = p["se"]
        sq_p = se["f1w"].shape[1]
        args += [se["f1w"], se["f1b"], se["f2w"], se["f2b"]]
        in_specs += [pl.BlockSpec((ce_p, sq_p), lambda i: (0, 0)),
                     pl.BlockSpec((1, sq_p), lambda i: (0, 0)),
                     pl.BlockSpec((sq_p, ce_p), lambda i: (0, 0)),
                     pl.BlockSpec((1, ce_p), lambda i: (0, 0))]

    args += [p["project"]["w"], p["project"]["b"]]
    in_specs += [pl.BlockSpec((ce_p, cout_p), lambda i: (0, 0)),
                 pl.BlockSpec((1, cout_p), lambda i: (0, 0))]

    if has_res:
        args.append(x)
        in_specs.append(pl.BlockSpec((1, h, w, cout_p), lambda i: (i, 0, 0, 0)))

    return pl.pallas_call(
        functools.partial(_block_kernel, ksize=k, stride=s, act_id=act,
                          has_expand=has_expand, use_se=cnf.use_se,
                          has_res=has_res, out_hw=(ho, wo)),
        out_shape=jax.ShapeDtypeStruct((n, ho, wo, cout_p), jnp.bfloat16),
        grid=(n,),
        in_specs=in_specs,
        out_specs=pl.BlockSpec((1, ho, wo, cout_p), lambda i: (i, 0, 0, 0)),
        scratch_shapes=[pltpu.VMEM((g, hs, ws8, ce_p), jnp.bfloat16),
                        pltpu.VMEM((ho, wo, ce_p), jnp.float32)],
        compiler_params=pltpu.CompilerParams(
            dimension_semantics=("parallel",),
            vmem_limit_bytes=VMEM_LIMIT),
    )(*args)


def head(x, p):
    n = x.shape[0]
    ncls_p = p["fc2_w"].shape[1]
    return pl.pallas_call(
        _head_kernel,
        out_shape=jax.ShapeDtypeStruct((n, ncls_p), jnp.float32),
        in_specs=[VMEM_SPEC] * 7,
        out_specs=VMEM_SPEC,
    )(x, p["last_w"], p["last_b"], p["fc1_w"], p["fc1_b"],
      p["fc2_w"], p["fc2_b"])


# ----------------------------------------------------------------------------
# Config + deterministic parameters (inference BN folded into weights, channels
# padded to 128 lanes with zeros)
# ----------------------------------------------------------------------------
class BneckCfg:
    def __init__(self, in_c, k, exp_c, out_c, use_se, activation, stride,
                 width_multi=1.0):
        self.in_channel = _make_divisible(in_c * width_multi)
        self.kernel_size = k
        self.expanded_c = _make_divisible(exp_c * width_multi)
        self.out_channel = _make_divisible(out_c * width_multi)
        self.use_se = use_se
        self.use_hs = activation == "HS"
        self.stride = stride


class ParamGen:
    def __init__(self, key):
        self.key = key

    def normal(self, shape, std=0.1):
        self.key, k = jax.random.split(self.key)
        return std * jax.random.normal(k, shape, dtype=jnp.float32)


def make_bn(pg, c, eps=1e-3):
    gamma = 1.0 + pg.normal((c,))
    beta = pg.normal((c,))
    mean = pg.normal((c,))
    var = jnp.abs(pg.normal((c,), std=0.2)) + 1.0
    scale = gamma / jnp.sqrt(var + eps)
    bias = beta - mean * scale
    return scale, bias


def make_conv_bn(pg, k_in, c_out, k_in_pad=None):
    """1x1 conv weights with BN scale folded in, zero-padded to lane multiples."""
    w = pg.normal((k_in, c_out))
    scale, bias = make_bn(pg, c_out)
    wf = w * scale[None, :]
    kp = k_in if k_in_pad is None else k_in_pad
    cp = _cpad(c_out)
    wp = jnp.zeros((kp, cp), jnp.float32).at[:k_in, :c_out].set(wf)
    bp = jnp.zeros((1, cp), jnp.float32).at[0, :c_out].set(bias)
    return dict(w=wp.astype(jnp.bfloat16), b=bp)


def make_first_conv(pg, c_out):
    w = pg.normal((9, 3, c_out))                       # 3x3 taps x 3 in-channels
    scale, bias = make_bn(pg, c_out)
    wf = w * scale[None, None, :]
    cp = _cpad(c_out)
    wp = jnp.zeros((9, 8, cp), jnp.float32).at[:, :3, :c_out].set(wf)
    bp = jnp.zeros((1, cp), jnp.float32).at[0, :c_out].set(bias)
    return dict(w=wp.astype(jnp.bfloat16), b=bp)


def make_dw_bn(pg, kk, c):
    w = pg.normal((kk, c))
    scale, bias = make_bn(pg, c)
    wf = w * scale[None, :]
    cp = _cpad(c)
    wp = jnp.zeros((kk, cp), jnp.float32).at[:, :c].set(wf)      # f32 (VPU MACs)
    bp = jnp.zeros((1, cp), jnp.float32).at[0, :c].set(bias)
    return dict(w=wp, b=bp)


def make_se(pg, c, sq):
    cp, sp = _cpad(c), _cpad(sq)
    f1w = jnp.zeros((cp, sp), jnp.float32).at[:c, :sq].set(pg.normal((c, sq)))
    f1b = jnp.zeros((1, sp), jnp.float32).at[0, :sq].set(pg.normal((sq,)))
    f2w = jnp.zeros((sp, cp), jnp.float32).at[:sq, :c].set(pg.normal((sq, c)))
    f2b = jnp.zeros((1, cp), jnp.float32).at[0, :c].set(pg.normal((c,)))
    return dict(f1w=f1w.astype(jnp.bfloat16), f1b=f1b,
                f2w=f2w.astype(jnp.bfloat16), f2b=f2b)


def make_block_params(pg, cnf):
    p = {}
    if cnf.expanded_c != cnf.in_channel:
        p["expand"] = make_conv_bn(pg, cnf.in_channel, cnf.expanded_c,
                                   k_in_pad=_cpad(cnf.in_channel))
    p["dw"] = make_dw_bn(pg, cnf.kernel_size ** 2, cnf.expanded_c)
    if cnf.use_se:
        sq = _make_divisible(cnf.expanded_c // 4)
        p["se"] = make_se(pg, cnf.expanded_c, sq)
    p["project"] = make_conv_bn(pg, cnf.expanded_c, cnf.out_channel,
                                k_in_pad=_cpad(cnf.expanded_c))
    return p


def make_params(pg, cfgs, last_channel, num_classes):
    params = {"first": make_first_conv(pg, cfgs[0].in_channel),
              "blocks": [make_block_params(pg, c) for c in cfgs]}
    c_last_in = cfgs[-1].out_channel
    c_last_out = 6 * c_last_in
    last_cb = make_conv_bn(pg, c_last_in, c_last_out, k_in_pad=_cpad(c_last_in))
    clo_p, lch_p, ncl_p = _cpad(c_last_out), _cpad(last_channel), _cpad(num_classes)
    head_p = {"last_w": last_cb["w"], "last_b": last_cb["b"]}
    head_p["fc1_w"] = (jnp.zeros((clo_p, lch_p), jnp.float32)
                       .at[:c_last_out, :last_channel]
                       .set(pg.normal((c_last_out, last_channel)))
                       .astype(jnp.bfloat16))
    head_p["fc1_b"] = (jnp.zeros((1, lch_p), jnp.float32)
                       .at[0, :last_channel].set(pg.normal((last_channel,))))
    head_p["fc2_w"] = (jnp.zeros((lch_p, ncl_p), jnp.float32)
                       .at[:last_channel, :num_classes]
                       .set(pg.normal((last_channel, num_classes)))
                       .astype(jnp.bfloat16))
    head_p["fc2_b"] = (jnp.zeros((1, ncl_p), jnp.float32)
                       .at[0, :num_classes].set(pg.normal((num_classes,))))
    params["head"] = head_p
    return params


# ----------------------------------------------------------------------------
# Full forward pass (jit-compiled; all reshape/pad glue fused by XLA)
# ----------------------------------------------------------------------------
def mobilenet_v3_forward(x_nchw, params, cfgs, num_classes):
    x = jnp.transpose(x_nchw, (0, 2, 3, 1)).astype(jnp.float32)  # NCHW -> NHWC
    x = jnp.pad(x, ((0, 0), (0, 0), (0, 0), (0, 8 - x.shape[-1])))
    x = x.astype(jnp.bfloat16)

    x = first_conv(x, params["first"])
    for cnf, bp in zip(cfgs, params["blocks"]):
        x = inverted_residual(x, cnf, bp)

    logits = head(x, params["head"])                  # (N, ncls_pad) f32
    return logits[:, :num_classes]


# ----------------------------------------------------------------------------
# Main
# ----------------------------------------------------------------------------
if __name__ == "__main__":
    # Small MobileNetV3-style setting (width_multi = 1.0).
    cfgs = [
        BneckCfg(16, 3, 16, 16, True, "RE", 2),   # SE, ReLU, stride 2 (no expand)
        BneckCfg(16, 3, 64, 24, False, "RE", 2),
        BneckCfg(24, 3, 72, 24, False, "RE", 1),  # residual connection
        BneckCfg(24, 5, 72, 40, True, "HS", 2),   # 5x5 depthwise, SE, Hardswish
    ]
    last_channel = 64
    num_classes = 10

    key = jax.random.PRNGKey(0)
    k_params, k_input = jax.random.split(key)
    pg = ParamGen(k_params)
    params = make_params(pg, cfgs, last_channel, num_classes)

    # PyTorch-convention NCHW input: batch=2, channels=3, spatial=16
    x = jax.random.normal(k_input, (2, 3, 16, 16), dtype=jnp.float32)

    forward = jax.jit(functools.partial(mobilenet_v3_forward,
                                        cfgs=cfgs, num_classes=num_classes))
    out = jax.block_until_ready(forward(x, params))
    assert out.shape == (2, num_classes), out.shape
    assert bool(jnp.all(jnp.isfinite(out)))
    print("KERNEL_OK")
</pallas_src>

<mosaic_0001>
module attributes {stable_mosaic.version = 11 : i64} {
  func.func @_first_conv_kernel(%arg0: i32, %arg1: memref<1x4x9x16x8xbf16, #tpu.memory_space<vmem>>, %arg2: memref<9x8x128xbf16, #tpu.memory_space<vmem>>, %arg3: memref<1x128xf32, #tpu.memory_space<vmem>>, %arg4: memref<1x8x8x128xbf16, #tpu.memory_space<vmem>>) attributes {dimension_semantics = [#tpu.dimension_semantics<parallel>], iteration_bounds = array<i64: 2>, scalar_prefetch = 0 : i64, scratch_operands = 0 : i64, tpu.core_type = #tpu.core_type<tc>, window_params = [{transform_indices = @transform_0, window_bounds = array<i64: 1, 4, 9, 16, 8>}, {pipeline_mode = #tpu.pipeline_mode<synchronous>, transform_indices = @transform_1, window_bounds = array<i64: 9, 8, 128>}, {pipeline_mode = #tpu.pipeline_mode<synchronous>, transform_indices = @transform_2, window_bounds = array<i64: 1, 128>}, {transform_indices = @transform_3, window_bounds = array<i64: 1, 8, 8, 128>}]} {
    %cst = arith.constant 0.000000e+00 : f32
    %0 = vector.broadcast %cst : f32 to vector<64x128xf32>
    %c0 = arith.constant 0 : index
    %c0_0 = arith.constant 0 : index
    %c0_1 = arith.constant 0 : index
    %c0_2 = arith.constant 0 : index
    %c0_3 = arith.constant 0 : index
    %1 = vector.load %arg1[%c0, %c0_0, %c0_1, %c0_2, %c0_3] : memref<1x4x9x16x8xbf16, #tpu.memory_space<vmem>>, vector<1x1x8x8x8xbf16>
    %2 = vector.shape_cast %1 : vector<1x1x8x8x8xbf16> to vector<8x8x8xbf16>
    %3 = vector.shape_cast %2 : vector<8x8x8xbf16> to vector<64x8xbf16>
    %c0_4 = arith.constant 0 : index
    %c0_5 = arith.constant 0 : index
    %c0_6 = arith.constant 0 : index
    %4 = vector.load %arg2[%c0_4, %c0_5, %c0_6] : memref<9x8x128xbf16, #tpu.memory_space<vmem>>, vector<1x8x128xbf16>
    %5 = vector.shape_cast %4 : vector<1x8x128xbf16> to vector<8x128xbf16>
    %cst_7 = arith.constant dense<0.000000e+00> : vector<64x128xf32>
    %6 = tpu.matmul %3, %5, %cst_7 {dimension_numbers = #tpu.dot_dimension_numbers<[1], [0], [0], [1], [0, 0, 1, 1], [], []>} : vector<64x8xbf16>, vector<8x128xbf16>, vector<64x128xf32> -> vector<64x128xf32>
    %7 = arith.addf %0, %6 : vector<64x128xf32>
    %c0_8 = arith.constant 0 : index
    %c1 = arith.constant 1 : index
    %c0_9 = arith.constant 0 : index
    %c0_10 = arith.constant 0 : index
    %c0_11 = arith.constant 0 : index
    %8 = vector.load %arg1[%c0_8, %c1, %c0_9, %c0_10, %c0_11] : memref<1x4x9x16x8xbf16, #tpu.memory_space<vmem>>, vector<1x1x8x8x8xbf16>
    %9 = vector.shape_cast %8 : vector<1x1x8x8x8xbf16> to vector<8x8x8xbf16>
    %10 = vector.shape_cast %9 : vector<8x8x8xbf16> to vector<64x8xbf16>
    %c1_12 = arith.constant 1 : index
    %c0_13 = arith.constant 0 : index
    %c0_14 = arith.constant 0 : index
    %11 = vector.load %arg2[%c1_12, %c0_13, %c0_14] : memref<9x8x128xbf16, #tpu.memory_space<vmem>>, vector<1x8x128xbf16>
    %12 = vector.shape_cast %11 : vector<1x8x128xbf16> to vector<8x128xbf16>
    %cst_15 = arith.constant dense<0.000000e+00> : vector<64x128xf32>
    %13 = tpu.matmul %10, %12, %cst_15 {dimension_numbers = #tpu.dot_dimension_numbers<[1], [0], [0], [1], [0, 0, 1, 1], [], []>} : vector<64x8xbf16>, vector<8x128xbf16>, vector<64x128xf32> -> vector<64x128xf32>
    %14 = arith.addf %7, %13 : vector<64x128xf32>
    %c0_16 = arith.constant 0 : index
    %c0_17 = arith.constant 0 : index
    %c0_18 = arith.constant 0 : index
    %c1_19 = arith.constant 1 : index
    %c0_20 = arith.constant 0 : index
    %15 = vector.load %arg1[%c0_16, %c0_17, %c0_18, %c1_19, %c0_20] : memref<1x4x9x16x8xbf16, #tpu.memory_space<vmem>>, vector<1x1x8x8x8xbf16>
    %16 = vector.shape_cast %15 : vector<1x1x8x8x8xbf16> to vector<8x8x8xbf16>
    %17 = vector.shape_cast %16 : vector<8x8x8xbf16> to vector<64x8xbf16>
    %c2 = arith.constant 2 : index
    %c0_21 = arith.constant 0 : index
    %c0_22 = arith.constant 0 : index
    %18 = vector.load %arg2[%c2, %c0_21, %c0_22] : memref<9x8x128xbf16, #tpu.memory_space<vmem>>, vector<1x8x128xbf16>
    %19 = vector.shape_cast %18 : vector<1x8x128xbf16> to vector<8x128xbf16>
    %cst_23 = arith.constant dense<0.000000e+00> : vector<64x128xf32>
    %20 = tpu.matmul %17, %19, %cst_23 {dimension_numbers = #tpu.dot_dimension_numbers<[1], [0], [0], [1], [0, 0, 1, 1], [], []>} : vector<64x8xbf16>, vector<8x128xbf16>, vector<64x128xf32> -> vector<64x128xf32>
    %21 = arith.addf %14, %20 : vector<64x128xf32>
    %c0_24 = arith.constant 0 : index
    %c2_25 = arith.constant 2 : index
    %c0_26 = arith.constant 0 : index
    %c0_27 = arith.constant 0 : index
    %c0_28 = arith.constant 0 : index
    %22 = vector.load %arg1[%c0_24, %c2_25, %c0_26, %c0_27, %c0_28] : memref<1x4x9x16x8xbf16, #tpu.memory_space<vmem>>, vector<1x1x8x8x8xbf16>
    %23 = vector.shape_cast %22 : vector<1x1x8x8x8xbf16> to vector<8x8x8xbf16>
    %24 = vector.shape_cast %23 : vector<8x8x8xbf16> to vector<64x8xbf16>
    %c3 = arith.constant 3 : index
    %c0_29 = arith.constant 0 : index
    %c0_30 = arith.constant 0 : index
    %25 = vector.load %arg2[%c3, %c0_29, %c0_30] : memref<9x8x128xbf16, #tpu.memory_space<vmem>>, vector<1x8x128xbf16>
    %26 = vector.shape_cast %25 : vector<1x8x128xbf16> to vector<8x128xbf16>
    %cst_31 = arith.constant dense<0.000000e+00> : vector<64x128xf32>
    %27 = tpu.matmul %24, %26, %cst_31 {dimension_numbers = #tpu.dot_dimension_numbers<[1], [0], [0], [1], [0, 0, 1, 1], [], []>} : vector<64x8xbf16>, vector<8x128xbf16>, vector<64x128xf32> -> vector<64x128xf32>
    %28 = arith.addf %21, %27 : vector<64x128xf32>
    %c0_32 = arith.constant 0 : index
    %c3_33 = arith.constant 3 : index
    %c0_34 = arith.constant 0 : index
    %c0_35 = arith.constant 0 : index
    %c0_36 = arith.constant 0 : index
    %29 = vector.load %arg1[%c0_32, %c3_33, %c0_34, %c0_35, %c0_36] : memref<1x4x9x16x8xbf16, #tpu.memory_space<vmem>>, vector<1x1x8x8x8xbf16>
    %30 = vector.shape_cast %29 : vector<1x1x8x8x8xbf16> to vector<8x8x8xbf16>
    %31 = vector.shape_cast %30 : vector<8x8x8xbf16> to vector<64x8xbf16>
    %c4 = arith.constant 4 : index
    %c0_37 = arith.constant 0 : index
    %c0_38 = arith.constant 0 : index
    %32 = vector.load %arg2[%c4, %c0_37, %c0_38] : memref<9x8x128xbf16, #tpu.memory_space<vmem>>, vector<1x8x128xbf16>
    %33 = vector.shape_cast %32 : vector<1x8x128xbf16> to vector<8x128xbf16>
    %cst_39 = arith.constant dense<0.000000e+00> : vector<64x128xf32>
    %34 = tpu.matmul %31, %33, %cst_39 {dimension_numbers = #tpu.dot_dimension_numbers<[1], [0], [0], [1], [0, 0, 1, 1], [], []>} : vector<64x8xbf16>, vector<8x128xbf16>, vector<64x128xf32> -> vector<64x128xf32>
    %35 = arith.addf %28, %34 : vector<64x128xf32>
    %c0_40 = arith.constant 0 : index
    %c2_41 = arith.constant 2 : index
    %c0_42 = arith.constant 0 : index
    %c1_43 = arith.constant 1 : index
    %c0_44 = arith.constant 0 : index
    %36 = vector.load %arg1[%c0_40, %c2_41, %c0_42, %c1_43, %c0_44] : memref<1x4x9x16x8xbf16, #tpu.memory_space<vmem>>, vector<1x1x8x8x8xbf16>
    %37 = vector.shape_cast %36 : vector<1x1x8x8x8xbf16> to vector<8x8x8xbf16>
    %38 = vector.shape_cast %37 : vector<8x8x8xbf16> to vector<64x8xbf16>
    %c5 = arith.constant 5 : index
    %c0_45 = arith.constant 0 : index
    %c0_46 = arith.constant 0 : index
    %39 = vector.load %arg2[%c5, %c0_45, %c0_46] : memref<9x8x128xbf16, #tpu.memory_space<vmem>>, vector<1x8x128xbf16>
    %40 = vector.shape_cast %39 : vector<1x8x128xbf16> to vector<8x128xbf16>
    %cst_47 = arith.constant dense<0.000000e+00> : vector<64x128xf32>
    %41 = tpu.matmul %38, %40, %cst_47 {dimension_numbers = #tpu.dot_dimension_numbers<[1], [0], [0], [1], [0, 0, 1, 1], [], []>} : vector<64x8xbf16>, vector<8x128xbf16>, vector<64x128xf32> -> vector<64x128xf32>
    %42 = arith.addf %35, %41 : vector<64x128xf32>
    %c0_48 = arith.constant 0 : index
    %c0_49 = arith.constant 0 : index
    %c1_50 = arith.constant 1 : index
    %c0_51 = arith.constant 0 : index
    %c0_52 = arith.constant 0 : index
    %43 = vector.load %arg1[%c0_48, %c0_49, %c1_50, %c0_51, %c0_52] : memref<1x4x9x16x8xbf16, #tpu.memory_space<vmem>>, vector<1x1x8x8x8xbf16>
    %44 = vector.shape_cast %43 : vector<1x1x8x8x8xbf16> to vector<8x8x8xbf16>
    %45 = vector.shape_cast %44 : vector<8x8x8xbf16> to vector<64x8xbf16>
    %c6 = arith.constant 6 : index
    %c0_53 = arith.constant 0 : index
    %c0_54 = arith.constant 0 : index
    %46 = vector.load %arg2[%c6, %c0_53, %c0_54] : memref<9x8x128xbf16, #tpu.memory_space<vmem>>, vector<1x8x128xbf16>
    %47 = vector.shape_cast %46 : vector<1x8x128xbf16> to vector<8x128xbf16>
    %cst_55 = arith.constant dense<0.000000e+00> : vector<64x128xf32>
    %48 = tpu.matmul %45, %47, %cst_55 {dimension_numbers = #tpu.dot_dimension_numbers<[1], [0], [0], [1], [0, 0, 1, 1], [], []>} : vector<64x8xbf16>, vector<8x128xbf16>, vector<64x128xf32> -> vector<64x128xf32>
    %49 = arith.addf %42, %48 : vector<64x128xf32>
    %c0_56 = arith.constant 0 : index
    %c1_57 = arith.constant 1 : index
    %c1_58 = arith.constant 1 : index
    %c0_59 = arith.constant 0 : index
    %c0_60 = arith.constant 0 : index
    %50 = vector.load %arg1[%c0_56, %c1_57, %c1_58, %c0_59, %c0_60] : memref<1x4x9x16x8xbf16, #tpu.memory_space<vmem>>, vector<1x1x8x8x8xbf16>
    %51 = vector.shape_cast %50 : vector<1x1x8x8x8xbf16> to vector<8x8x8xbf16>
    %52 = vector.shape_cast %51 : vector<8x8x8xbf16> to vector<64x8xbf16>
    %c7 = arith.constant 7 : index
    %c0_61 = arith.constant 0 : index
    %c0_62 = arith.constant 0 : index
    %53 = vector.load %arg2[%c7, %c0_61, %c0_62] : memref<9x8x128xbf16, #tpu.memory_space<vmem>>, vector<1x8x128xbf16>
    %54 = vector.shape_cast %53 : vector<1x8x128xbf16> to vector<8x128xbf16>
    %cst_63 = arith.constant dense<0.000000e+00> : vector<64x128xf32>
    %55 = tpu.matmul %52, %54, %cst_63 {dimension_numbers = #tpu.dot_dimension_numbers<[1], [0], [0], [1], [0, 0, 1, 1], [], []>} : vector<64x8xbf16>, vector<8x128xbf16>, vector<64x128xf32> -> vector<64x128xf32>
    %56 = arith.addf %49, %55 : vector<64x128xf32>
    %c0_64 = arith.constant 0 : index
    %c0_65 = arith.constant 0 : index
    %c1_66 = arith.constant 1 : index
    %c1_67 = arith.constant 1 : index
    %c0_68 = arith.constant 0 : index
    %57 = vector.load %arg1[%c0_64, %c0_65, %c1_66, %c1_67, %c0_68] : memref<1x4x9x16x8xbf16, #tpu.memory_space<vmem>>, vector<1x1x8x8x8xbf16>
    %58 = vector.shape_cast %57 : vector<1x1x8x8x8xbf16> to vector<8x8x8xbf16>
    %59 = vector.shape_cast %58 : vector<8x8x8xbf16> to vector<64x8xbf16>
    %c8 = arith.constant 8 : index
    %c0_69 = arith.constant 0 : index
    %c0_70 = arith.constant 0 : index
    %60 = vector.load %arg2[%c8, %c0_69, %c0_70] : memref<9x8x128xbf16, #tpu.memory_space<vmem>>, vector<1x8x128xbf16>
    %61 = vector.shape_cast %60 : vector<1x8x128xbf16> to vector<8x128xbf16>
    %cst_71 = arith.constant dense<0.000000e+00> : vector<64x128xf32>
    %62 = tpu.matmul %59, %61, %cst_71 {dimension_numbers = #tpu.dot_dimension_numbers<[1], [0], [0], [1], [0, 0, 1, 1], [], []>} : vector<64x8xbf16>, vector<8x128xbf16>, vector<64x128xf32> -> vector<64x128xf32>
    %63 = arith.addf %56, %62 : vector<64x128xf32>
    %c0_72 = arith.constant 0 : index
    %c0_73 = arith.constant 0 : index
    %64 = vector.load %arg3[%c0_72, %c0_73] : memref<1x128xf32, #tpu.memory_space<vmem>>, vector<1x128xf32>
    %65 = vector.broadcast %64 : vector<1x128xf32> to vector<64x128xf32>
    %66 = arith.addf %63, %65 : vector<64x128xf32>
    %cst_74 = arith.constant 3.000000e+00 : f32
    %67 = vector.broadcast %cst_74 : f32 to vector<64x128xf32>
    %68 = arith.addf %66, %67 : vector<64x128xf32>
    %cst_75 = arith.constant 0.000000e+00 : f32
    %cst_76 = arith.constant 6.000000e+00 : f32
    %69 = vector.broadcast %cst_75 : f32 to vector<64x128xf32>
    %70 = arith.maximumf %69, %68 : vector<64x128xf32>
    %71 = vector.broadcast %cst_76 : f32 to vector<64x128xf32>
    %72 = arith.minimumf %71, %70 : vector<64x128xf32>
    %73 = arith.mulf %66, %72 : vector<64x128xf32>
    %cst_77 = arith.constant 0.166666672 : f32
    %74 = vector.broadcast %cst_77 : f32 to vector<64x128xf32>
    %75 = arith.mulf %73, %74 : vector<64x128xf32>
    %76 = vector.shape_cast %75 : vector<64x128xf32> to vector<8x8x128xf32>
    %77 = arith.truncf %76 : vector<8x8x128xf32> to vector<8x8x128xbf16>
    %c0_78 = arith.constant 0 : index
    %c0_79 = arith.constant 0 : index
    %c0_80 = arith.constant 0 : index
    %c0_81 = arith.constant 0 : index
    %78 = vector.load %arg4[%c0_78, %c0_79, %c0_80, %c0_81] : memref<1x8x8x128xbf16, #tpu.memory_space<vmem>>, vector<1x8x8x128xbf16>
    %79 = vector.shape_cast %78 : vector<1x8x8x128xbf16> to vector<8x8x128xbf16>
    %80 = vector.shape_cast %77 : vector<8x8x128xbf16> to vector<1x8x8x128xbf16>
    tpu.vector_store %arg4[%c0_78, %c0_79, %c0_80, %c0_81], %80 {strides = array<i32>} : memref<1x8x8x128xbf16, #tpu.memory_space<vmem>>, vector<1x8x8x128xbf16>,
    return
  }
  func.func @transform_0(%arg0: i32) -> (i32, i32, i32, i32, i32) {
    %c0_i32 = arith.constant 0 : i32
    %c0_i32_0 = arith.constant 0 : i32
    %c0_i32_1 = arith.constant 0 : i32
    %c0_i32_2 = arith.constant 0 : i32
    %c0_i32_3 = arith.constant 0 : i32
    return %arg0, %c0_i32, %c0_i32_0, %c0_i32_1, %c0_i32_2 : i32, i32, i32, i32, i32
  }
  func.func @transform_1(%arg0: i32) -> (i32, i32, i32) {
    %c0_i32 = arith.constant 0 : i32
    %c0_i32_0 = arith.constant 0 : i32
    %c0_i32_1 = arith.constant 0 : i32
    %c0_i32_2 = arith.constant 0 : i32
    return %c0_i32, %c0_i32_0, %c0_i32_1 : i32, i32, i32
  }
  func.func @transform_2(%arg0: i32) -> (i32, i32) {
    %c0_i32 = arith.constant 0 : i32
    %c0_i32_0 = arith.constant 0 : i32
    %c0_i32_1 = arith.constant 0 : i32
    return %c0_i32, %c0_i32_0 : i32, i32
  }
  func.func @transform_3(%arg0: i32) -> (i32, i32, i32, i32) {
    %c0_i32 = arith.constant 0 : i32
    %c0_i32_0 = arith.constant 0 : i32
    %c0_i32_1 = arith.constant 0 : i32
    %c0_i32_2 = arith.constant 0 : i32
    return %arg0, %c0_i32, %c0_i32_0, %c0_i32_1 : i32, i32, i32, i32
  }
}

module attributes {stable_mosaic.version = 11 : i64} {
  func.func @_block_kernel(%arg0: i32, %arg1: memref<1x4x5x8x128xbf16, #tpu.memory_space<vmem>>, %arg2: memref<9x128xf32, #tpu.memory_space<vmem>>, %arg3: memref<1x128xf32, #tpu.memory_space<vmem>>, %arg4: memref<128x128xbf16, #tpu.memory_space<vmem>>, %arg5: memref<1x128xf32, #tpu.memory_space<vmem>>, %arg6: memref<128x128xbf16, #tpu.memory_space<vmem>>, %arg7: memref<1x128xf32, #tpu.memory_space<vmem>>, %arg8: memref<128x128xbf16, #tpu.memory_space<vmem>>, %arg9: memref<1x128xf32, #tpu.memory_space<vmem>>, %arg10: memref<1x4x4x128xbf16, #tpu.memory_space<vmem>>, %arg11: memref<4x5x8x128xbf16, #tpu.memory_space<vmem>>, %arg12: memref<4x4x128xf32, #tpu.memory_space<vmem>>) attributes {dimension_semantics = [#tpu.dimension_semantics<parallel>], iteration_bounds = array<i64: 2>, scalar_prefetch = 0 : i64, scratch_operands = 2 : i64, tpu.core_type = #tpu.core_type<tc>, window_params = [{transform_indices = @transform_0, window_bounds = array<i64: 1, 4, 5, 8, 128>}, {pipeline_mode = #tpu.pipeline_mode<synchronous>, transform_indices = @transform_1, window_bounds = array<i64: 9, 128>}, {pipeline_mode = #tpu.pipeline_mode<synchronous>, transform_indices = @transform_2, window_bounds = array<i64: 1, 128>}, {pipeline_mode = #tpu.pipeline_mode<synchronous>, transform_indices = @transform_3, window_bounds = array<i64: 128, 128>}, {pipeline_mode = #tpu.pipeline_mode<synchronous>, transform_indices = @transform_4, window_bounds = array<i64: 1, 128>}, {pipeline_mode = #tpu.pipeline_mode<synchronous>, transform_indices = @transform_5, window_bounds = array<i64: 128, 128>}, {pipeline_mode = #tpu.pipeline_mode<synchronous>, transform_indices = @transform_6, window_bounds = array<i64: 1, 128>}, {pipeline_mode = #tpu.pipeline_mode<synchronous>, transform_indices = @transform_7, window_bounds = array<i64: 128, 128>}, {pipeline_mode = #tpu.pipeline_mode<synchronous>, transform_indices = @transform_8, window_bounds = array<i64: 1, 128>}, {transform_indices = @transform_9, window_bounds = array<i64: 1, 4, 4, 128>}]} {
    %c0 = arith.constant 0 : index
    %c0_0 = arith.constant 0 : index
    %c0_1 = arith.constant 0 : index
    %c0_2 = arith.constant 0 : index
    %c0_3 = arith.constant 0 : index
    %0 = vector.load %arg1[%c0, %c0_0, %c0_1, %c0_2, %c0_3] : memref<1x4x5x8x128xbf16, #tpu.memory_space<vmem>>, vector<1x4x5x8x128xbf16>
    %1 = vector.shape_cast %0 : vector<1x4x5x8x128xbf16> to vector<4x5x8x128xbf16>
    %c0_4 = arith.constant 0 : index
    %c0_5 = arith.constant 0 : index
    %c0_6 = arith.constant 0 : index
    %c0_7 = arith.constant 0 : index
    %2 = vector.load %arg11[%c0_4, %c0_5, %c0_6, %c0_7] : memref<4x5x8x128xbf16, #tpu.memory_space<vmem>>, vector<4x5x8x128xbf16>
    tpu.vector_store %arg11[%c0_4, %c0_5, %c0_6, %c0_7], %1 {strides = array<i32>} : memref<4x5x8x128xbf16, #tpu.memory_space<vmem>>, vector<4x5x8x128xbf16>,
    %cst = arith.constant 0.000000e+00 : f32
    %3 = vector.broadcast %cst : f32 to vector<4x4x128xf32>
    %c0_8 = arith.constant 0 : index
    %c0_9 = arith.constant 0 : index
    %c0_10 = arith.constant 0 : index
    %4 = vector.load %arg12[%c0_8, %c0_9, %c0_10] : memref<4x4x128xf32, #tpu.memory_space<vmem>>, vector<4x4x128xf32>
    tpu.vector_store %arg12[%c0_8, %c0_9, %c0_10], %3 {strides = array<i32>} : memref<4x4x128xf32, #tpu.memory_space<vmem>>, vector<4x4x128xf32>,
    %c0_11 = arith.constant 0 : index
    %c0_12 = arith.constant 0 : index
    %c0_13 = arith.constant 0 : index
    %c0_14 = arith.constant 0 : index
    %5 = vector.load %arg11[%c0_11, %c0_12, %c0_13, %c0_14] : memref<4x5x8x128xbf16, #tpu.memory_space<vmem>>, vector<1x4x4x128xbf16>
    %6 = vector.shape_cast %5 : vector<1x4x4x128xbf16> to vector<4x4x128xbf16>
    %7 = arith.extf %6 : vector<4x4x128xbf16> to vector<4x4x128xf32>
    %c0_15 = arith.constant 0 : index
    %c0_16 = arith.constant 0 : index
    %c0_17 = arith.constant 0 : index
    %8 = vector.load %arg12[%c0_15, %c0_16, %c0_17] : memref<4x4x128xf32, #tpu.memory_space<vmem>>, vector<4x4x128xf32>
    %c0_18 = arith.constant 0 : index
    %c0_19 = arith.constant 0 : index
    %9 = vector.load %arg2[%c0_18, %c0_19] : memref<9x128xf32, #tpu.memory_space<vmem>>, vector<1x128xf32>
    %10 = vector.shape_cast %9 : vector<1x128xf32> to vector<1x1x128xf32>
    %11 = vector.broadcast %10 : vector<1x1x128xf32> to vector<4x4x128xf32>
    %12 = arith.mulf %7, %11 : vector<4x4x128xf32>
    %13 = arith.addf %8, %12 : vector<4x4x128xf32>
    %c0_20 = arith.constant 0 : index
    %c0_21 = arith.constant 0 : index
    %c0_22 = arith.constant 0 : index
    %14 = vector.load %arg12[%c0_20, %c0_21, %c0_22] : memref<4x4x128xf32, #tpu.memory_space<vmem>>, vector<4x4x128xf32>
    tpu.vector_store %arg12[%c0_20, %c0_21, %c0_22], %13 {strides = array<i32>} : memref<4x4x128xf32, #tpu.memory_space<vmem>>, vector<4x4x128xf32>,
    %c1 = arith.constant 1 : index
    %c0_23 = arith.constant 0 : index
    %c0_24 = arith.constant 0 : index
    %c0_25 = arith.constant 0 : index
    %15 = vector.load %arg11[%c1, %c0_23, %c0_24, %c0_25] : memref<4x5x8x128xbf16, #tpu.memory_space<vmem>>, vector<1x4x4x128xbf16>
    %16 = vector.shape_cast %15 : vector<1x4x4x128xbf16> to vector<4x4x128xbf16>
    %17 = arith.extf %16 : vector<4x4x128xbf16> to vector<4x4x128xf32>
    %c0_26 = arith.constant 0 : index
    %c0_27 = arith.constant 0 : index
    %c0_28 = arith.constant 0 : index
    %18 = vector.load %arg12[%c0_26, %c0_27, %c0_28] : memref<4x4x128xf32, #tpu.memory_space<vmem>>, vector<4x4x128xf32>
    %c1_29 = arith.constant 1 : index
    %c0_30 = arith.constant 0 : index
    %19 = vector.load %arg2[%c1_29, %c0_30] : memref<9x128xf32, #tpu.memory_space<vmem>>, vector<1x128xf32>
    %20 = vector.shape_cast %19 : vector<1x128xf32> to vector<1x1x128xf32>
    %21 = vector.broadcast %20 : vector<1x1x128xf32> to vector<4x4x128xf32>
    %22 = arith.mulf %17, %21 : vector<4x4x128xf32>
    %23 = arith.addf %18, %22 : vector<4x4x128xf32>
    %c0_31 = arith.constant 0 : index
    %c0_32 = arith.constant 0 : index
    %c0_33 = arith.constant 0 : index
    %24 = vector.load %arg12[%c0_31, %c0_32, %c0_33] : memref<4x4x128xf32, #tpu.memory_space<vmem>>, vector<4x4x128xf32>
    tpu.vector_store %arg12[%c0_31, %c0_32, %c0_33], %23 {strides = array<i32>} : memref<4x4x128xf32, #tpu.memory_space<vmem>>, vector<4x4x128xf32>,
    %c0_34 = arith.constant 0 : index
    %c0_35 = arith.constant 0 : index
    %c1_36 = arith.constant 1 : index
    %c0_37 = arith.constant 0 : index
    %25 = vector.load %arg11[%c0_34, %c0_35, %c1_36, %c0_37] : memref<4x5x8x128xbf16, #tpu.memory_space<vmem>>, vector<1x4x4x128xbf16>
    %26 = vector.shape_cast %25 : vector<1x4x4x128xbf16> to vector<4x4x128xbf16>
    %27 = arith.extf %26 : vector<4x4x128xbf16> to vector<4x4x128xf32>
    %c0_38 = arith.constant 0 : index
    %c0_39 = arith.constant 0 : index
    %c0_40 = arith.constant 0 : index
    %28 = vector.load %arg12[%c0_38, %c0_39, %c0_40] : memref<4x4x128xf32, #tpu.memory_space<vmem>>, vector<4x4x128xf32>
    %c2 = arith.constant 2 : index
    %c0_41 = arith.constant 0 : index
    %29 = vector.load %arg2[%c2, %c0_41] : memref<9x128xf32, #tpu.memory_space<vmem>>, vector<1x128xf32>
    %30 = vector.shape_cast %29 : vector<1x128xf32> to vector<1x1x128xf32>
    %31 = vector.broadcast %30 : vector<1x1x128xf32> to vector<4x4x128xf32>
    %32 = arith.mulf %27, %31 : vector<4x4x128xf32>
    %33 = arith.addf %28, %32 : vector<4x4x128xf32>
    %c0_42 = arith.constant 0 : index
    %c0_43 = arith.constant 0 : index
    %c0_44 = arith.constant 0 : index
    %34 = vector.load %arg12[%c0_42, %c0_43, %c0_44] : memref<4x4x128xf32, #tpu.memory_space<vmem>>, vector<4x4x128xf32>
    tpu.vector_store %arg12[%c0_42, %c0_43, %c0_44], %33 {strides = array<i32>} : memref<4x4x128xf32, #tpu.memory_space<vmem>>, vector<4x4x128xf32>,
    %c2_45 = arith.constant 2 : index
    %c0_46 = arith.constant 0 : index
    %c0_47 = arith.constant 0 : index
    %c0_48 = arith.constant 0 : index
    %35 = vector.load %arg11[%c2_45, %c0_46, %c0_47, %c0_48] : memref<4x5x8x128xbf16, #tpu.memory_space<vmem>>, vector<1x4x4x128xbf16>
    %36 = vector.shape_cast %35 : vector<1x4x4x128xbf16> to vector<4x4x128xbf16>
    %37 = arith.extf %36 : vector<4x4x128xbf16> to vector<4x4x128xf32>
    %c0_49 = arith.constant 0 : index
    %c0_50 = arith.constant 0 : index
    %c0_51 = arith.constant 0 : index
    %38 = vector.load %arg12[%c0_49, %c0_50, %c0_51] : memref<4x4x128xf32, #tpu.memory_space<vmem>>, vector<4x4x128xf32>
    %c3 = arith.constant 3 : index
    %c0_52 = arith.constant 0 : index
    %39 = vector.load %arg2[%c3, %c0_52] : memref<9x128xf32, #tpu.memory_space<vmem>>, vector<1x128xf32>
    %40 = vector.shape_cast %39 : vector<1x128xf32> to vector<1x1x128xf32>
    %41 = vector.broadcast %40 : vector<1x1x128xf32> to vector<4x4x128xf32>
    %42 = arith.mulf %37, %41 : vector<4x4x128xf32>
    %43 = arith.addf %38, %42 : vector<4x4x128xf32>
    %c0_53 = arith.constant 0 : index
    %c0_54 = arith.constant 0 : index
    %c0_55 = arith.constant 0 : index
    %44 = vector.load %arg12[%c0_53, %c0_54, %c0_55] : memref<4x4x128xf32, #tpu.memory_space<vmem>>, vector<4x4x128xf32>
    tpu.vector_store %arg12[%c0_53, %c0_54, %c0_55], %43 {strides = array<i32>} : memref<4x4x128xf32, #tpu.memory_space<vmem>>, vector<4x4x128xf32>,
    %c3_56 = arith.constant 3 : index
    %c0_57 = arith.constant 0 : index
    %c0_58 = arith.constant 0 : index
    %c0_59 = arith.constant 0 : index
    %45 = vector.load %arg11[%c3_56, %c0_57, %c0_58, %c0_59] : memref<4x5x8x128xbf16, #tpu.memory_space<vmem>>, vector<1x4x4x128xbf16>
    %46 = vector.shape_cast %45 : vector<1x4x4x128xbf16> to vector<4x4x128xbf16>
    %47 = arith.extf %46 : vector<4x4x128xbf16> to vector<4x4x128xf32>
    %c0_60 = arith.constant 0 : index
    %c0_61 = arith.constant 0 : index
    %c0_62 = arith.constant 0 : index
    %48 = vector.load %arg12[%c0_60, %c0_61, %c0_62] : memref<4x4x128xf32, #tpu.memory_space<vmem>>, vector<4x4x128xf32>
    %c4 = arith.constant 4 : index
    %c0_63 = arith.constant 0 : index
    %49 = vector.load %arg2[%c4, %c0_63] : memref<9x128xf32, #tpu.memory_space<vmem>>, vector<1x128xf32>
    %50 = vector.shape_cast %49 : vector<1x128xf32> to vector<1x1x128xf32>
    %51 = vector.broadcast %50 : vector<1x1x128xf32> to vector<4x4x128xf32>
    %52 = arith.mulf %47, %51 : vector<4x4x128xf32>
    %53 = arith.addf %48, %52 : vector<4x4x128xf32>
    %c0_64 = arith.constant 0 : index
    %c0_65 = arith.constant 0 : index
    %c0_66 = arith.constant 0 : index
    %54 = vector.load %arg12[%c0_64, %c0_65, %c0_66] : memref<4x4x128xf32, #tpu.memory_space<vmem>>, vector<4x4x128xf32>
    tpu.vector_store %arg12[%c0_64, %c0_65, %c0_66], %53 {strides = array<i32>} : memref<4x4x128xf32, #tpu.memory_space<vmem>>, vector<4x4x128xf32>,
    %c2_67 = arith.constant 2 : index
    %c0_68 = arith.constant 0 : index
    %c1_69 = arith.constant 1 : index
    %c0_70 = arith.constant 0 : index
    %55 = vector.load %arg11[%c2_67, %c0_68, %c1_69, %c0_70] : memref<4x5x8x128xbf16, #tpu.memory_space<vmem>>, vector<1x4x4x128xbf16>
    %56 = vector.shape_cast %55 : vector<1x4x4x128xbf16> to vector<4x4x128xbf16>
    %57 = arith.extf %56 : vector<4x4x128xbf16> to vector<4x4x128xf32>
    %c0_71 = arith.constant 0 : index
    %c0_72 = arith.constant 0 : index
    %c0_73 = arith.constant 0 : index
    %58 = vector.load %arg12[%c0_71, %c0_72, %c0_73] : memref<4x4x128xf32, #tpu.memory_space<vmem>>, vector<4x4x128xf32>
    %c5 = arith.constant 5 : index
    %c0_74 = arith.constant 0 : index
    %59 = vector.load %arg2[%c5, %c0_74] : memref<9x128xf32, #tpu.memory_space<vmem>>, vector<1x128xf32>
    %60 = vector.shape_cast %59 : vector<1x128xf32> to vector<1x1x128xf32>
    %61 = vector.broadcast %60 : vector<1x1x128xf32> to vector<4x4x128xf32>
    %62 = arith.mulf %57, %61 : vector<4x4x128xf32>
    %63 = arith.addf %58, %62 : vector<4x4x128xf32>
    %c0_75 = arith.constant 0 : index
    %c0_76 = arith.constant 0 : index
    %c0_77 = arith.constant 0 : index
    %64 = vector.load %arg12[%c0_75, %c0_76, %c0_77] : memref<4x4x128xf32, #tpu.memory_space<vmem>>, vector<4x4x128xf32>
    tpu.vector_store %arg12[%c0_75, %c0_76, %c0_77], %63 {strides = array<i32>} : memref<4x4x128xf32, #tpu.memory_space<vmem>>, vector<4x4x128xf32>,
    %c0_78 = arith.constant 0 : index
    %c1_79 = arith.constant 1 : index
    %c0_80 = arith.constant 0 : index
    %c0_81 = arith.constant 0 : index
    %65 = vector.load %arg11[%c0_78, %c1_79, %c0_80, %c0_81] : memref<4x5x8x128xbf16, #tpu.memory_space<vmem>>, vector<1x4x4x128xbf16>
    %66 = vector.shape_cast %65 : vector<1x4x4x128xbf16> to vector<4x4x128xbf16>
    %67 = arith.extf %66 : vector<4x4x128xbf16> to vector<4x4x128xf32>
    %c0_82 = arith.constant 0 : index
    %c0_83 = arith.constant 0 : index
    %c0_84 = arith.constant 0 : index
    %68 = vector.load %arg12[%c0_82, %c0_83, %c0_84] : memref<4x4x128xf32, #tpu.memory_space<vmem>>, vector<4x4x128xf32>
    %c6 = arith.constant 6 : index
    %c0_85 = arith.constant 0 : index
    %69 = vector.load %arg2[%c6, %c0_85] : memref<9x128xf32, #tpu.memory_space<vmem>>, vector<1x128xf32>
    %70 = vector.shape_cast %69 : vector<1x128xf32> to vector<1x1x128xf32>
    %71 = vector.broadcast %70 : vector<1x1x128xf32> to vector<4x4x128xf32>
    %72 = arith.mulf %67, %71 : vector<4x4x128xf32>
    %73 = arith.addf %68, %72 : vector<4x4x128xf32>
    %c0_86 = arith.constant 0 : index
    %c0_87 = arith.constant 0 : index
    %c0_88 = arith.constant 0 : index
    %74 = vector.load %arg12[%c0_86, %c0_87, %c0_88] : memref<4x4x128xf32, #tpu.memory_space<vmem>>, vector<4x4x128xf32>
    tpu.vector_store %arg12[%c0_86, %c0_87, %c0_88], %73 {strides = array<i32>} : memref<4x4x128xf32, #tpu.memory_space<vmem>>, vector<4x4x128xf32>,
    %c1_89 = arith.constant 1 : index
    %c1_90 = arith.constant 1 : index
    %c0_91 = arith.constant 0 : index
    %c0_92 = arith.constant 0 : index
    %75 = vector.load %arg11[%c1_89, %c1_90, %c0_91, %c0_92] : memref<4x5x8x128xbf16, #tpu.memory_space<vmem>>, vector<1x4x4x128xbf16>
    %76 = vector.shape_cast %75 : vector<1x4x4x128xbf16> to vector<4x4x128xbf16>
    %77 = arith.extf %76 : vector<4x4x128xbf16> to vector<4x4x128xf32>
    %c0_93 = arith.constant 0 : index
    %c0_94 = arith.constant 0 : index
    %c0_95 = arith.constant 0 : index
    %78 = vector.load %arg12[%c0_93, %c0_94, %c0_95] : memref<4x4x128xf32, #tpu.memory_space<vmem>>, vector<4x4x128xf32>
    %c7 = arith.constant 7 : index
    %c0_96 = arith.constant 0 : index
    %79 = vector.load %arg2[%c7, %c0_96] : memref<9x128xf32, #tpu.memory_space<vmem>>, vector<1x128xf32>
    %80 = vector.shape_cast %79 : vector<1x128xf32> to vector<1x1x128xf32>
    %81 = vector.broadcast %80 : vector<1x1x128xf32> to vector<4x4x128xf32>
    %82 = arith.mulf %77, %81 : vector<4x4x128xf32>
    %83 = arith.addf %78, %82 : vector<4x4x128xf32>
    %c0_97 = arith.constant 0 : index
    %c0_98 = arith.constant 0 : index
    %c0_99 = arith.constant 0 : index
    %84 = vector.load %arg12[%c0_97, %c0_98, %c0_99] : memref<4x4x128xf32, #tpu.memory_space<vmem>>, vector<4x4x128xf32>
    tpu.vector_store %arg12[%c0_97, %c0_98, %c0_99], %83 {strides = array<i32>} : memref<4x4x128xf32, #tpu.memory_space<vmem>>, vector<4x4x128xf32>,
    %c0_100 = arith.constant 0 : index
    %c1_101 = arith.constant 1 : index
    %c1_102 = arith.constant 1 : index
    %c0_103 = arith.constant 0 : index
    %85 = vector.load %arg11[%c0_100, %c1_101, %c1_102, %c0_103] : memref<4x5x8x128xbf16, #tpu.memory_space<vmem>>, vector<1x4x4x128xbf16>
    %86 = vector.shape_cast %85 : vector<1x4x4x128xbf16> to vector<4x4x128xbf16>
    %87 = arith.extf %86 : vector<4x4x128xbf16> to vector<4x4x128xf32>
    %c0_104 = arith.constant 0 : index
    %c0_105 = arith.constant 0 : index
    %c0_106 = arith.constant 0 : index
    %88 = vector.load %arg12[%c0_104, %c0_105, %c0_106] : memref<4x4x128xf32, #tpu.memory_space<vmem>>, vector<4x4x128xf32>
    %c8 = arith.constant 8 : index
    %c0_107 = arith.constant 0 : index
    %89 = vector.load %arg2[%c8, %c0_107] : memref<9x128xf32, #tpu.memory_space<vmem>>, vector<1x128xf32>
    %90 = vector.shape_cast %89 : vector<1x128xf32> to vector<1x1x128xf32>
    %91 = vector.broadcast %90 : vector<1x1x128xf32> to vector<4x4x128xf32>
    %92 = arith.mulf %87, %91 : vector<4x4x128xf32>
    %93 = arith.addf %88, %92 : vector<4x4x128xf32>
    %c0_108 = arith.constant 0 : index
    %c0_109 = arith.constant 0 : index
    %c0_110 = arith.constant 0 : index
    %94 = vector.load %arg12[%c0_108, %c0_109, %c0_110] : memref<4x4x128xf32, #tpu.memory_space<vmem>>, vector<4x4x128xf32>
    tpu.vector_store %arg12[%c0_108, %c0_109, %c0_110], %93 {strides = array<i32>} : memref<4x4x128xf32, #tpu.memory_space<vmem>>, vector<4x4x128xf32>,
    %c0_111 = arith.constant 0 : index
    %c0_112 = arith.constant 0 : index
    %c0_113 = arith.constant 0 : index
    %95 = vector.load %arg12[%c0_111, %c0_112, %c0_113] : memref<4x4x128xf32, #tpu.memory_space<vmem>>, vector<4x4x128xf32>
    %c0_114 = arith.constant 0 : index
    %c0_115 = arith.constant 0 : index
    %96 = vector.load %arg3[%c0_114, %c0_115] : memref<1x128xf32, #tpu.memory_space<vmem>>, vector<1x128xf32>
    %97 = vector.shape_cast %96 : vector<1x128xf32> to vector<1x1x128xf32>
    %98 = vector.broadcast %97 : vector<1x1x128xf32> to vector<4x4x128xf32>
    %99 = arith.addf %95, %98 : vector<4x4x128xf32>
    %cst_116 = arith.constant 0.000000e+00 : f32
    %100 = vector.broadcast %cst_116 : f32 to vector<4x4x128xf32>
    %101 = arith.maximumf %99, %100 : vector<4x4x128xf32>
    %cst_117 = arith.constant dense<0.000000e+00> : vector<4x128xf32>
    %102 = vector.multi_reduction <add>, %101, %cst_117 [0] : vector<4x4x128xf32> to vector<4x128xf32>
    %cst_118 = arith.constant dense<0.000000e+00> : vector<128xf32>
    %103 = vector.multi_reduction <add>, %102, %cst_118 [0] : vector<4x128xf32> to vector<128xf32>
    %104 = vector.shape_cast %103 : vector<128xf32> to vector<1x128xf32>
    %cst_119 = arith.constant 6.250000e-02 : f32
    %105 = vector.broadcast %cst_119 : f32 to vector<1x128xf32>
    %106 = arith.mulf %104, %105 : vector<1x128xf32>
    %107 = arith.truncf %106 : vector<1x128xf32> to vector<1x128xbf16>
    %c0_120 = arith.constant 0 : index
    %c0_121 = arith.constant 0 : index
    %108 = vector.load %arg4[%c0_120, %c0_121] : memref<128x128xbf16, #tpu.memory_space<vmem>>, vector<128x128xbf16>
    %cst_122 = arith.constant dense<0.000000e+00> : vector<1x128xf32>
    %109 = tpu.matmul %107, %108, %cst_122 {dimension_numbers = #tpu.dot_dimension_numbers<[1], [0], [0], [1], [0, 0, 1, 1], [], []>} : vector<1x128xbf16>, vector<128x128xbf16>, vector<1x128xf32> -> vector<1x128xf32>
    %c0_123 = arith.constant 0 : index
    %c0_124 = arith.constant 0 : index
    %110 = vector.load %arg5[%c0_123, %c0_124] : memref<1x128xf32, #tpu.memory_space<vmem>>, vector<1x128xf32>
    %111 = arith.addf %109, %110 : vector<1x128xf32>
    %cst_125 = arith.constant 0.000000e+00 : f32
    %112 = vector.broadcast %cst_125 : f32 to vector<1x128xf32>
    %113 = arith.maximumf %111, %112 : vector<1x128xf32>
    %114 = arith.truncf %113 : vector<1x128xf32> to vector<1x128xbf16>
    %c0_126 = arith.constant 0 : index
    %c0_127 = arith.constant 0 : index
    %115 = vector.load %arg6[%c0_126, %c0_127] : memref<128x128xbf16, #tpu.memory_space<vmem>>, vector<128x128xbf16>
    %cst_128 = arith.constant dense<0.000000e+00> : vector<1x128xf32>
    %116 = tpu.matmul %114, %115, %cst_128 {dimension_numbers = #tpu.dot_dimension_numbers<[1], [0], [0], [1], [0, 0, 1, 1], [], []>} : vector<1x128xbf16>, vector<128x128xbf16>, vector<1x128xf32> -> vector<1x128xf32>
    %c0_129 = arith.constant 0 : index
    %c0_130 = arith.constant 0 : index
    %117 = vector.load %arg7[%c0_129, %c0_130] : memref<1x128xf32, #tpu.memory_space<vmem>>, vector<1x128xf32>
    %118 = arith.addf %116, %117 : vector<1x128xf32>
    %cst_131 = arith.constant 3.000000e+00 : f32
    %119 = vector.broadcast %cst_131 : f32 to vector<1x128xf32>
    %120 = arith.addf %118, %119 : vector<1x128xf32>
    %cst_132 = arith.constant 0.000000e+00 : f32
    %cst_133 = arith.constant 6.000000e+00 : f32
    %121 = vector.broadcast %cst_132 : f32 to vector<1x128xf32>
    %122 = arith.maximumf %121, %120 : vector<1x128xf32>
    %123 = vector.broadcast %cst_133 : f32 to vector<1x128xf32>
    %124 = arith.minimumf %123, %122 : vector<1x128xf32>
    %cst_134 = arith.constant 0.166666672 : f32
    %125 = vector.broadcast %cst_134 : f32 to vector<1x128xf32>
    %126 = arith.mulf %124, %125 : vector<1x128xf32>
    %127 = vector.shape_cast %126 : vector<1x128xf32> to vector<1x1x128xf32>
    %128 = vector.broadcast %127 : vector<1x1x128xf32> to vector<4x4x128xf32>
    %129 = arith.mulf %101, %128 : vector<4x4x128xf32>
    %130 = arith.truncf %129 : vector<4x4x128xf32> to vector<4x4x128xbf16>
    %131 = vector.shape_cast %130 : vector<4x4x128xbf16> to vector<16x128xbf16>
    %c0_135 = arith.constant 0 : index
    %c0_136 = arith.constant 0 : index
    %132 = vector.load %arg8[%c0_135, %c0_136] : memref<128x128xbf16, #tpu.memory_space<vmem>>, vector<128x128xbf16>
    %cst_137 = arith.constant dense<0.000000e+00> : vector<16x128xf32>
    %133 = tpu.matmul %131, %132, %cst_137 {dimension_numbers = #tpu.dot_dimension_numbers<[1], [0], [0], [1], [0, 0, 1, 1], [], []>} : vector<16x128xbf16>, vector<128x128xbf16>, vector<16x128xf32> -> vector<16x128xf32>
    %c0_138 = arith.constant 0 : index
    %c0_139 = arith.constant 0 : index
    %134 = vector.load %arg9[%c0_138, %c0_139] : memref<1x128xf32, #tpu.memory_space<vmem>>, vector<1x128xf32>
    %135 = vector.broadcast %134 : vector<1x128xf32> to vector<16x128xf32>
    %136 = arith.addf %133, %135 : vector<16x128xf32>
    %cst_140 = arith.constant 0.000000e+00 : f32
    %137 = vector.broadcast %cst_140 : f32 to vector<16x128xf32>
    %138 = arith.maximumf %136, %137 : vector<16x128xf32>
    %139 = vector.shape_cast %138 : vector<16x128xf32> to vector<4x4x128xf32>
    %140 = arith.truncf %139 : vector<4x4x128xf32> to vector<4x4x128xbf16>
    %c0_141 = arith.constant 0 : index
    %c0_142 = arith.constant 0 : index
    %c0_143 = arith.constant 0 : index
    %c0_144 = arith.constant 0 : index
    %141 = vector.load %arg10[%c0_141, %c0_142, %c0_143, %c0_144] : memref<1x4x4x128xbf16, #tpu.memory_space<vmem>>, vector<1x4x4x128xbf16>
    %142 = vector.shape_cast %141 : vector<1x4x4x128xbf16> to vector<4x4x128xbf16>
    %143 = vector.shape_cast %140 : vector<4x4x128xbf16> to vector<1x4x4x128xbf16>
    tpu.vector_store %arg10[%c0_141, %c0_142, %c0_143, %c0_144], %143 {strides = array<i32>} : memref<1x4x4x128xbf16, #tpu.memory_space<vmem>>, vector<1x4x4x128xbf16>,
    return
  }
  func.func @transform_0(%arg0: i32) -> (i32, i32, i32, i32, i32) {
    %c0_i32 = arith.constant 0 : i32
    %c0_i32_0 = arith.constant 0 : i32
    %c0_i32_1 = arith.constant 0 : i32
    %c0_i32_2 = arith.constant 0 : i32
    %c0_i32_3 = arith.constant 0 : i32
    return %arg0, %c0_i32, %c0_i32_0, %c0_i32_1, %c0_i32_2 : i32, i32, i32, i32, i32
  }
  func.func @transform_1(%arg0: i32) -> (i32, i32) {
    %c0_i32 = arith.constant 0 : i32
    %c0_i32_0 = arith.constant 0 : i32
    %c0_i32_1 = arith.constant 0 : i32
    return %c0_i32, %c0_i32_0 : i32, i32
  }
  func.func @transform_2(%arg0: i32) -> (i32, i32) {
    %c0_i32 = arith.constant 0 : i32
    %c0_i32_0 = arith.constant 0 : i32
    %c0_i32_1 = arith.constant 0 : i32
    return %c0_i32, %c0_i32_0 : i32, i32
  }
  func.func @transform_3(%arg0: i32) -> (i32, i32) {
    %c0_i32 = arith.constant 0 : i32
    %c0_i32_0 = arith.constant 0 : i32
    %c0_i32_1 = arith.constant 0 : i32
    return %c0_i32, %c0_i32_0 : i32, i32
  }
  func.func @transform_4(%arg0: i32) -> (i32, i32) {
    %c0_i32 = arith.constant 0 : i32
    %c0_i32_0 = arith.constant 0 : i32
    %c0_i32_1 = arith.constant 0 : i32
    return %c0_i32, %c0_i32_0 : i32, i32
  }
  func.func @transform_5(%arg0: i32) -> (i32, i32) {
    %c0_i32 = arith.constant 0 : i32
    %c0_i32_0 = arith.constant 0 : i32
    %c0_i32_1 = arith.constant 0 : i32
    return %c0_i32, %c0_i32_0 : i32, i32
  }
  func.func @transform_6(%arg0: i32) -> (i32, i32) {
    %c0_i32 = arith.constant 0 : i32
    %c0_i32_0 = arith.constant 0 : i32
    %c0_i32_1 = arith.constant 0 : i32
    return %c0_i32, %c0_i32_0 : i32, i32
  }
  func.func @transform_7(%arg0: i32) -> (i32, i32) {
    %c0_i32 = arith.constant 0 : i32
    %c0_i32_0 = arith.constant 0 : i32
    %c0_i32_1 = arith.constant 0 : i32
    return %c0_i32, %c0_i32_0 : i32, i32
  }
  func.func @transform_8(%arg0: i32) -> (i32, i32) {
    %c0_i32 = arith.constant 0 : i32
    %c0_i32_0 = arith.constant 0 : i32
    %c0_i32_1 = arith.constant 0 : i32
    return %c0_i32, %c0_i32_0 : i32, i32
  }
  func.func @transform_9(%arg0: i32) -> (i32, i32, i32, i32) {
    %c0_i32 = arith.constant 0 : i32
    %c0_i32_0 = arith.constant 0 : i32
    %c0_i32_1 = arith.constant 0 : i32
    %c0_i32_2 = arith.constant 0 : i32
    return %arg0, %c0_i32, %c0_i32_0, %c0_i32_1 : i32, i32, i32, i32
  }
}

module attributes {stable_mosaic.version = 11 : i64} {
  func.func @_block_kernel(%arg0: i32, %arg1: memref<1x4x3x8x128xbf16, #tpu.memory_space<vmem>>, %arg2: memref<4x3x8x1xf32, #tpu.memory_space<vmem>>, %arg3: memref<128x128xbf16, #tpu.memory_space<vmem>>, %arg4: memref<1x128xf32, #tpu.memory_space<vmem>>, %arg5: memref<9x128xf32, #tpu.memory_space<vmem>>, %arg6: memref<1x128xf32, #tpu.memory_space<vmem>>, %arg7: memref<128x128xbf16, #tpu.memory_space<vmem>>, %arg8: memref<1x128xf32, #tpu.memory_space<vmem>>, %arg9: memref<1x2x2x128xbf16, #tpu.memory_space<vmem>>, %arg10: memref<4x3x8x128xbf16, #tpu.memory_space<vmem>>, %arg11: memref<2x2x128xf32, #tpu.memory_space<vmem>>) attributes {dimension_semantics = [#tpu.dimension_semantics<parallel>], iteration_bounds = array<i64: 2>, scalar_prefetch = 0 : i64, scratch_operands = 2 : i64, tpu.core_type = #tpu.core_type<tc>, window_params = [{transform_indices = @transform_0, window_bounds = array<i64: 1, 4, 3, 8, 128>}, {pipeline_mode = #tpu.pipeline_mode<synchronous>, transform_indices = @transform_1, window_bounds = array<i64: 4, 3, 8, 1>}, {pipeline_mode = #tpu.pipeline_mode<synchronous>, transform_indices = @transform_2, window_bounds = array<i64: 128, 128>}, {pipeline_mode = #tpu.pipeline_mode<synchronous>, transform_indices = @transform_3, window_bounds = array<i64: 1, 128>}, {pipeline_mode = #tpu.pipeline_mode<synchronous>, transform_indices = @transform_4, window_bounds = array<i64: 9, 128>}, {pipeline_mode = #tpu.pipeline_mode<synchronous>, transform_indices = @transform_5, window_bounds = array<i64: 1, 128>}, {pipeline_mode = #tpu.pipeline_mode<synchronous>, transform_indices = @transform_6, window_bounds = array<i64: 128, 128>}, {pipeline_mode = #tpu.pipeline_mode<synchronous>, transform_indices = @transform_7, window_bounds = array<i64: 1, 128>}, {transform_indices = @transform_8, window_bounds = array<i64: 1, 2, 2, 128>}]} {
    %c0 = arith.constant 0 : index
    %c0_0 = arith.constant 0 : index
    %c0_1 = arith.constant 0 : index
    %c0_2 = arith.constant 0 : index
    %c0_3 = arith.constant 0 : index
    %0 = vector.load %arg1[%c0, %c0_0, %c0_1, %c0_2, %c0_3] : memref<1x4x3x8x128xbf16, #tpu.memory_space<vmem>>, vector<1x4x3x8x128xbf16>
    %1 = vector.shape_cast %0 : vector<1x4x3x8x128xbf16> to vector<4x3x8x128xbf16>
    %2 = vector.shape_cast %1 : vector<4x3x8x128xbf16> to vector<96x128xbf16>
    %c0_4 = arith.constant 0 : index
    %c0_5 = arith.constant 0 : index
    %3 = vector.load %arg3[%c0_4, %c0_5] : memref<128x128xbf16, #tpu.memory_space<vmem>>, vector<128x128xbf16>
    %cst = arith.constant dense<0.000000e+00> : vector<96x128xf32>
    %4 = tpu.matmul %2, %3, %cst {dimension_numbers = #tpu.dot_dimension_numbers<[1], [0], [0], [1], [0, 0, 1, 1], [], []>} : vector<96x128xbf16>, vector<128x128xbf16>, vector<96x128xf32> -> vector<96x128xf32>
    %c0_6 = arith.constant 0 : index
    %c0_7 = arith.constant 0 : index
    %5 = vector.load %arg4[%c0_6, %c0_7] : memref<1x128xf32, #tpu.memory_space<vmem>>, vector<1x128xf32>
    %6 = vector.broadcast %5 : vector<1x128xf32> to vector<96x128xf32>
    %7 = arith.addf %4, %6 : vector<96x128xf32>
    %cst_8 = arith.constant 0.000000e+00 : f32
    %8 = vector.broadcast %cst_8 : f32 to vector<96x128xf32>
    %9 = arith.maximumf %7, %8 : vector<96x128xf32>
    %10 = vector.shape_cast %9 : vector<96x128xf32> to vector<4x3x8x128xf32>
    %c0_9 = arith.constant 0 : index
    %c0_10 = arith.constant 0 : index
    %c0_11 = arith.constant 0 : index
    %c0_12 = arith.constant 0 : index
    %11 = vector.load %arg2[%c0_9, %c0_10, %c0_11, %c0_12] : memref<4x3x8x1xf32, #tpu.memory_space<vmem>>, vector<4x3x8x1xf32>
    %12 = vector.broadcast %11 : vector<4x3x8x1xf32> to vector<4x3x8x128xf32>
    %13 = arith.mulf %10, %12 : vector<4x3x8x128xf32>
    %14 = arith.truncf %13 : vector<4x3x8x128xf32> to vector<4x3x8x128xbf16>
    %c0_13 = arith.constant 0 : index
    %c0_14 = arith.constant 0 : index
    %c0_15 = arith.constant 0 : index
    %c0_16 = arith.constant 0 : index
    %15 = vector.load %arg10[%c0_13, %c0_14, %c0_15, %c0_16] : memref<4x3x8x128xbf16, #tpu.memory_space<vmem>>, vector<4x3x8x128xbf16>
    tpu.vector_store %arg10[%c0_13, %c0_14, %c0_15, %c0_16], %14 {strides = array<i32>} : memref<4x3x8x128xbf16, #tpu.memory_space<vmem>>, vector<4x3x8x128xbf16>,
    %cst_17 = arith.constant 0.000000e+00 : f32
    %16 = vector.broadcast %cst_17 : f32 to vector<2x2x128xf32>
    %c0_18 = arith.constant 0 : index
    %c0_19 = arith.constant 0 : index
    %c0_20 = arith.constant 0 : index
    %17 = vector.load %arg11[%c0_18, %c0_19, %c0_20] : memref<2x2x128xf32, #tpu.memory_space<vmem>>, vector<2x2x128xf32>
    tpu.vector_store %arg11[%c0_18, %c0_19, %c0_20], %16 {strides = array<i32>} : memref<2x2x128xf32, #tpu.memory_space<vmem>>, vector<2x2x128xf32>,
    %c0_21 = arith.constant 0 : index
    %c0_22 = arith.constant 0 : index
    %c0_23 = arith.constant 0 : index
    %c0_24 = arith.constant 0 : index
    %18 = vector.load %arg10[%c0_21, %c0_22, %c0_23, %c0_24] : memref<4x3x8x128xbf16, #tpu.memory_space<vmem>>, vector<1x2x2x128xbf16>
    %19 = vector.shape_cast %18 : vector<1x2x2x128xbf16> to vector<2x2x128xbf16>
    %20 = arith.extf %19 : vector<2x2x128xbf16> to vector<2x2x128xf32>
    %c0_25 = arith.constant 0 : index
    %c0_26 = arith.constant 0 : index
    %c0_27 = arith.constant 0 : index
    %21 = vector.load %arg11[%c0_25, %c0_26, %c0_27] : memref<2x2x128xf32, #tpu.memory_space<vmem>>, vector<2x2x128xf32>
    %c0_28 = arith.constant 0 : index
    %c0_29 = arith.constant 0 : index
    %22 = vector.load %arg5[%c0_28, %c0_29] : memref<9x128xf32, #tpu.memory_space<vmem>>, vector<1x128xf32>
    %23 = vector.shape_cast %22 : vector<1x128xf32> to vector<1x1x128xf32>
    %24 = vector.broadcast %23 : vector<1x1x128xf32> to vector<2x2x128xf32>
    %25 = arith.mulf %20, %24 : vector<2x2x128xf32>
    %26 = arith.addf %21, %25 : vector<2x2x128xf32>
    %c0_30 = arith.constant 0 : index
    %c0_31 = arith.constant 0 : index
    %c0_32 = arith.constant 0 : index
    %27 = vector.load %arg11[%c0_30, %c0_31, %c0_32] : memref<2x2x128xf32, #tpu.memory_space<vmem>>, vector<2x2x128xf32>
    tpu.vector_store %arg11[%c0_30, %c0_31, %c0_32], %26 {strides = array<i32>} : memref<2x2x128xf32, #tpu.memory_space<vmem>>, vector<2x2x128xf32>,
    %c1 = arith.constant 1 : index
    %c0_33 = arith.constant 0 : index
    %c0_34 = arith.constant 0 : index
    %c0_35 = arith.constant 0 : index
    %28 = vector.load %arg10[%c1, %c0_33, %c0_34, %c0_35] : memref<4x3x8x128xbf16, #tpu.memory_space<vmem>>, vector<1x2x2x128xbf16>
    %29 = vector.shape_cast %28 : vector<1x2x2x128xbf16> to vector<2x2x128xbf16>
    %30 = arith.extf %29 : vector<2x2x128xbf16> to vector<2x2x128xf32>
    %c0_36 = arith.constant 0 : index
    %c0_37 = arith.constant 0 : index
    %c0_38 = arith.constant 0 : index
    %31 = vector.load %arg11[%c0_36, %c0_37, %c0_38] : memref<2x2x128xf32, #tpu.memory_space<vmem>>, vector<2x2x128xf32>
    %c1_39 = arith.constant 1 : index
    %c0_40 = arith.constant 0 : index
    %32 = vector.load %arg5[%c1_39, %c0_40] : memref<9x128xf32, #tpu.memory_space<vmem>>, vector<1x128xf32>
    %33 = vector.shape_cast %32 : vector<1x128xf32> to vector<1x1x128xf32>
    %34 = vector.broadcast %33 : vector<1x1x128xf32> to vector<2x2x128xf32>
    %35 = arith.mulf %30, %34 : vector<2x2x128xf32>
    %36 = arith.addf %31, %35 : vector<2x2x128xf32>
    %c0_41 = arith.constant 0 : index
    %c0_42 = arith.constant 0 : index
    %c0_43 = arith.constant 0 : index
    %37 = vector.load %arg11[%c0_41, %c0_42, %c0_43] : memref<2x2x128xf32, #tpu.memory_space<vmem>>, vector<2x2x128xf32>
    tpu.vector_store %arg11[%c0_41, %c0_42, %c0_43], %36 {strides = array<i32>} : memref<2x2x128xf32, #tpu.memory_space<vmem>>, vector<2x2x128xf32>,
    %c0_44 = arith.constant 0 : index
    %c0_45 = arith.constant 0 : index
    %c1_46 = arith.constant 1 : index
    %c0_47 = arith.constant 0 : index
    %38 = vector.load %arg10[%c0_44, %c0_45, %c1_46, %c0_47] : memref<4x3x8x128xbf16, #tpu.memory_space<vmem>>, vector<1x2x2x128xbf16>
    %39 = vector.shape_cast %38 : vector<1x2x2x128xbf16> to vector<2x2x128xbf16>
    %40 = arith.extf %39 : vector<2x2x128xbf16> to vector<2x2x128xf32>
    %c0_48 = arith.constant 0 : index
    %c0_49 = arith.constant 0 : index
    %c0_50 = arith.constant 0 : index
    %41 = vector.load %arg11[%c0_48, %c0_49, %c0_50] : memref<2x2x128xf32, #tpu.memory_space<vmem>>, vector<2x2x128xf32>
    %c2 = arith.constant 2 : index
    %c0_51 = arith.constant 0 : index
    %42 = vector.load %arg5[%c2, %c0_51] : memref<9x128xf32, #tpu.memory_space<vmem>>, vector<1x128xf32>
    %43 = vector.shape_cast %42 : vector<1x128xf32> to vector<1x1x128xf32>
    %44 = vector.broadcast %43 : vector<1x1x128xf32> to vector<2x2x128xf32>
    %45 = arith.mulf %40, %44 : vector<2x2x128xf32>
    %46 = arith.addf %41, %45 : vector<2x2x128xf32>
    %c0_52 = arith.constant 0 : index
    %c0_53 = arith.constant 0 : index
    %c0_54 = arith.constant 0 : index
    %47 = vector.load %arg11[%c0_52, %c0_53, %c0_54] : memref<2x2x128xf32, #tpu.memory_space<vmem>>, vector<2x2x128xf32>
    tpu.vector_store %arg11[%c0_52, %c0_53, %c0_54], %46 {strides = array<i32>} : memref<2x2x128xf32, #tpu.memory_space<vmem>>, vector<2x2x128xf32>,
    %c2_55 = arith.constant 2 : index
    %c0_56 = arith.constant 0 : index
    %c0_57 = arith.constant 0 : index
    %c0_58 = arith.constant 0 : index
    %48 = vector.load %arg10[%c2_55, %c0_56, %c0_57, %c0_58] : memref<4x3x8x128xbf16, #tpu.memory_space<vmem>>, vector<1x2x2x128xbf16>
    %49 = vector.shape_cast %48 : vector<1x2x2x128xbf16> to vector<2x2x128xbf16>
    %50 = arith.extf %49 : vector<2x2x128xbf16> to vector<2x2x128xf32>
    %c0_59 = arith.constant 0 : index
    %c0_60 = arith.constant 0 : index
    %c0_61 = arith.constant 0 : index
    %51 = vector.load %arg11[%c0_59, %c0_60, %c0_61] : memref<2x2x128xf32, #tpu.memory_space<vmem>>, vector<2x2x128xf32>
    %c3 = arith.constant 3 : index
    %c0_62 = arith.constant 0 : index
    %52 = vector.load %arg5[%c3, %c0_62] : memref<9x128xf32, #tpu.memory_space<vmem>>, vector<1x128xf32>
    %53 = vector.shape_cast %52 : vector<1x128xf32> to vector<1x1x128xf32>
    %54 = vector.broadcast %53 : vector<1x1x128xf32> to vector<2x2x128xf32>
    %55 = arith.mulf %50, %54 : vector<2x2x128xf32>
    %56 = arith.addf %51, %55 : vector<2x2x128xf32>
    %c0_63 = arith.constant 0 : index
    %c0_64 = arith.constant 0 : index
    %c0_65 = arith.constant 0 : index
    %57 = vector.load %arg11[%c0_63, %c0_64, %c0_65] : memref<2x2x128xf32, #tpu.memory_space<vmem>>, vector<2x2x128xf32>
    tpu.vector_store %arg11[%c0_63, %c0_64, %c0_65], %56 {strides = array<i32>} : memref<2x2x128xf32, #tpu.memory_space<vmem>>, vector<2x2x128xf32>,
    %c3_66 = arith.constant 3 : index
    %c0_67 = arith.constant 0 : index
    %c0_68 = arith.constant 0 : index
    %c0_69 = arith.constant 0 : index
    %58 = vector.load %arg10[%c3_66, %c0_67, %c0_68, %c0_69] : memref<4x3x8x128xbf16, #tpu.memory_space<vmem>>, vector<1x2x2x128xbf16>
    %59 = vector.shape_cast %58 : vector<1x2x2x128xbf16> to vector<2x2x128xbf16>
    %60 = arith.extf %59 : vector<2x2x128xbf16> to vector<2x2x128xf32>
    %c0_70 = arith.constant 0 : index
    %c0_71 = arith.constant 0 : index
    %c0_72 = arith.constant 0 : index
    %61 = vector.load %arg11[%c0_70, %c0_71, %c0_72] : memref<2x2x128xf32, #tpu.memory_space<vmem>>, vector<2x2x128xf32>
    %c4 = arith.constant 4 : index
    %c0_73 = arith.constant 0 : index
    %62 = vector.load %arg5[%c4, %c0_73] : memref<9x128xf32, #tpu.memory_space<vmem>>, vector<1x128xf32>
    %63 = vector.shape_cast %62 : vector<1x128xf32> to vector<1x1x128xf32>
    %64 = vector.broadcast %63 : vector<1x1x128xf32> to vector<2x2x128xf32>
    %65 = arith.mulf %60, %64 : vector<2x2x128xf32>
    %66 = arith.addf %61, %65 : vector<2x2x128xf32>
    %c0_74 = arith.constant 0 : index
    %c0_75 = arith.constant 0 : index
    %c0_76 = arith.constant 0 : index
    %67 = vector.load %arg11[%c0_74, %c0_75, %c0_76] : memref<2x2x128xf32, #tpu.memory_space<vmem>>, vector<2x2x128xf32>
    tpu.vector_store %arg11[%c0_74, %c0_75, %c0_76], %66 {strides = array<i32>} : memref<2x2x128xf32, #tpu.memory_space<vmem>>, vector<2x2x128xf32>,
    %c2_77 = arith.constant 2 : index
    %c0_78 = arith.constant 0 : index
    %c1_79 = arith.constant 1 : index
    %c0_80 = arith.constant 0 : index
    %68 = vector.load %arg10[%c2_77, %c0_78, %c1_79, %c0_80] : memref<4x3x8x128xbf16, #tpu.memory_space<vmem>>, vector<1x2x2x128xbf16>
    %69 = vector.shape_cast %68 : vector<1x2x2x128xbf16> to vector<2x2x128xbf16>
    %70 = arith.extf %69 : vector<2x2x128xbf16> to vector<2x2x128xf32>
    %c0_81 = arith.constant 0 : index
    %c0_82 = arith.constant 0 : index
    %c0_83 = arith.constant 0 : index
    %71 = vector.load %arg11[%c0_81, %c0_82, %c0_83] : memref<2x2x128xf32, #tpu.memory_space<vmem>>, vector<2x2x128xf32>
    %c5 = arith.constant 5 : index
    %c0_84 = arith.constant 0 : index
    %72 = vector.load %arg5[%c5, %c0_84] : memref<9x128xf32, #tpu.memory_space<vmem>>, vector<1x128xf32>
    %73 = vector.shape_cast %72 : vector<1x128xf32> to vector<1x1x128xf32>
    %74 = vector.broadcast %73 : vector<1x1x128xf32> to vector<2x2x128xf32>
    %75 = arith.mulf %70, %74 : vector<2x2x128xf32>
    %76 = arith.addf %71, %75 : vector<2x2x128xf32>
    %c0_85 = arith.constant 0 : index
    %c0_86 = arith.constant 0 : index
    %c0_87 = arith.constant 0 : index
    %77 = vector.load %arg11[%c0_85, %c0_86, %c0_87] : memref<2x2x128xf32, #tpu.memory_space<vmem>>, vector<2x2x128xf32>
    tpu.vector_store %arg11[%c0_85, %c0_86, %c0_87], %76 {strides = array<i32>} : memref<2x2x128xf32, #tpu.memory_space<vmem>>, vector<2x2x128xf32>,
    %c0_88 = arith.constant 0 : index
    %c1_89 = arith.constant 1 : index
    %c0_90 = arith.constant 0 : index
    %c0_91 = arith.constant 0 : index
    %78 = vector.load %arg10[%c0_88, %c1_89, %c0_90, %c0_91] : memref<4x3x8x128xbf16, #tpu.memory_space<vmem>>, vector<1x2x2x128xbf16>
    %79 = vector.shape_cast %78 : vector<1x2x2x128xbf16> to vector<2x2x128xbf16>
    %80 = arith.extf %79 : vector<2x2x128xbf16> to vector<2x2x128xf32>
    %c0_92 = arith.constant 0 : index
    %c0_93 = arith.constant 0 : index
    %c0_94 = arith.constant 0 : index
    %81 = vector.load %arg11[%c0_92, %c0_93, %c0_94] : memref<2x2x128xf32, #tpu.memory_space<vmem>>, vector<2x2x128xf32>
    %c6 = arith.constant 6 : index
    %c0_95 = arith.constant 0 : index
    %82 = vector.load %arg5[%c6, %c0_95] : memref<9x128xf32, #tpu.memory_space<vmem>>, vector<1x128xf32>
    %83 = vector.shape_cast %82 : vector<1x128xf32> to vector<1x1x128xf32>
    %84 = vector.broadcast %83 : vector<1x1x128xf32> to vector<2x2x128xf32>
    %85 = arith.mulf %80, %84 : vector<2x2x128xf32>
    %86 = arith.addf %81, %85 : vector<2x2x128xf32>
    %c0_96 = arith.constant 0 : index
    %c0_97 = arith.constant 0 : index
    %c0_98 = arith.constant 0 : index
    %87 = vector.load %arg11[%c0_96, %c0_97, %c0_98] : memref<2x2x128xf32, #tpu.memory_space<vmem>>, vector<2x2x128xf32>
    tpu.vector_store %arg11[%c0_96, %c0_97, %c0_98], %86 {strides = array<i32>} : memref<2x2x128xf32, #tpu.memory_space<vmem>>, vector<2x2x128xf32>,
    %c1_99 = arith.constant 1 : index
    %c1_100 = arith.constant 1 : index
    %c0_101 = arith.constant 0 : index
    %c0_102 = arith.constant 0 : index
    %88 = vector.load %arg10[%c1_99, %c1_100, %c0_101, %c0_102] : memref<4x3x8x128xbf16, #tpu.memory_space<vmem>>, vector<1x2x2x128xbf16>
    %89 = vector.shape_cast %88 : vector<1x2x2x128xbf16> to vector<2x2x128xbf16>
    %90 = arith.extf %89 : vector<2x2x128xbf16> to vector<2x2x128xf32>
    %c0_103 = arith.constant 0 : index
    %c0_104 = arith.constant 0 : index
    %c0_105 = arith.constant 0 : index
    %91 = vector.load %arg11[%c0_103, %c0_104, %c0_105] : memref<2x2x128xf32, #tpu.memory_space<vmem>>, vector<2x2x128xf32>
    %c7 = arith.constant 7 : index
    %c0_106 = arith.constant 0 : index
    %92 = vector.load %arg5[%c7, %c0_106] : memref<9x128xf32, #tpu.memory_space<vmem>>, vector<1x128xf32>
    %93 = vector.shape_cast %92 : vector<1x128xf32> to vector<1x1x128xf32>
    %94 = vector.broadcast %93 : vector<1x1x128xf32> to vector<2x2x128xf32>
    %95 = arith.mulf %90, %94 : vector<2x2x128xf32>
    %96 = arith.addf %91, %95 : vector<2x2x128xf32>
    %c0_107 = arith.constant 0 : index
    %c0_108 = arith.constant 0 : index
    %c0_109 = arith.constant 0 : index
    %97 = vector.load %arg11[%c0_107, %c0_108, %c0_109] : memref<2x2x128xf32, #tpu.memory_space<vmem>>, vector<2x2x128xf32>
    tpu.vector_store %arg11[%c0_107, %c0_108, %c0_109], %96 {strides = array<i32>} : memref<2x2x128xf32, #tpu.memory_space<vmem>>, vector<2x2x128xf32>,
    %c0_110 = arith.constant 0 : index
    %c1_111 = arith.constant 1 : index
    %c1_112 = arith.constant 1 : index
    %c0_113 = arith.constant 0 : index
    %98 = vector.load %arg10[%c0_110, %c1_111, %c1_112, %c0_113] : memref<4x3x8x128xbf16, #tpu.memory_space<vmem>>, vector<1x2x2x128xbf16>
    %99 = vector.shape_cast %98 : vector<1x2x2x128xbf16> to vector<2x2x128xbf16>
    %100 = arith.extf %99 : vector<2x2x128xbf16> to vector<2x2x128xf32>
    %c0_114 = arith.constant 0 : index
    %c0_115 = arith.constant 0 : index
    %c0_116 = arith.constant 0 : index
    %101 = vector.load %arg11[%c0_114, %c0_115, %c0_116] : memref<2x2x128xf32, #tpu.memory_space<vmem>>, vector<2x2x128xf32>
    %c8 = arith.constant 8 : index
    %c0_117 = arith.constant 0 : index
    %102 = vector.load %arg5[%c8, %c0_117] : memref<9x128xf32, #tpu.memory_space<vmem>>, vector<1x128xf32>
    %103 = vector.shape_cast %102 : vector<1x128xf32> to vector<1x1x128xf32>
    %104 = vector.broadcast %103 : vector<1x1x128xf32> to vector<2x2x128xf32>
    %105 = arith.mulf %100, %104 : vector<2x2x128xf32>
    %106 = arith.addf %101, %105 : vector<2x2x128xf32>
    %c0_118 = arith.constant 0 : index
    %c0_119 = arith.constant 0 : index
    %c0_120 = arith.constant 0 : index
    %107 = vector.load %arg11[%c0_118, %c0_119, %c0_120] : memref<2x2x128xf32, #tpu.memory_space<vmem>>, vector<2x2x128xf32>
    tpu.vector_store %arg11[%c0_118, %c0_119, %c0_120], %106 {strides = array<i32>} : memref<2x2x128xf32, #tpu.memory_space<vmem>>, vector<2x2x128xf32>,
    %c0_121 = arith.constant 0 : index
    %c0_122 = arith.constant 0 : index
    %c0_123 = arith.constant 0 : index
    %108 = vector.load %arg11[%c0_121, %c0_122, %c0_123] : memref<2x2x128xf32, #tpu.memory_space<vmem>>, vector<2x2x128xf32>
    %c0_124 = arith.constant 0 : index
    %c0_125 = arith.constant 0 : index
    %109 = vector.load %arg6[%c0_124, %c0_125] : memref<1x128xf32, #tpu.memory_space<vmem>>, vector<1x128xf32>
    %110 = vector.shape_cast %109 : vector<1x128xf32> to vector<1x1x128xf32>
    %111 = vector.broadcast %110 : vector<1x1x128xf32> to vector<2x2x128xf32>
    %112 = arith.addf %108, %111 : vector<2x2x128xf32>
    %cst_126 = arith.constant 0.000000e+00 : f32
    %113 = vector.broadcast %cst_126 : f32 to vector<2x2x128xf32>
    %114 = arith.maximumf %112, %113 : vector<2x2x128xf32>
    %115 = arith.truncf %114 : vector<2x2x128xf32> to vector<2x2x128xbf16>
    %116 = vector.shape_cast %115 : vector<2x2x128xbf16> to vector<4x128xbf16>
    %c0_127 = arith.constant 0 : index
    %c0_128 = arith.constant 0 : index
    %117 = vector.load %arg7[%c0_127, %c0_128] : memref<128x128xbf16, #tpu.memory_space<vmem>>, vector<128x128xbf16>
    %cst_129 = arith.constant dense<0.000000e+00> : vector<4x128xf32>
    %118 = tpu.matmul %116, %117, %cst_129 {dimension_numbers = #tpu.dot_dimension_numbers<[1], [0], [0], [1], [0, 0, 1, 1], [], []>} : vector<4x128xbf16>, vector<128x128xbf16>, vector<4x128xf32> -> vector<4x128xf32>
    %c0_130 = arith.constant 0 : index
    %c0_131 = arith.constant 0 : index
    %119 = vector.load %arg8[%c0_130, %c0_131] : memref<1x128xf32, #tpu.memory_space<vmem>>, vector<1x128xf32>
    %120 = vector.broadcast %119 : vector<1x128xf32> to vector<4x128xf32>
    %121 = arith.addf %118, %120 : vector<4x128xf32>
    %cst_132 = arith.constant 0.000000e+00 : f32
    %122 = vector.broadcast %cst_132 : f32 to vector<4x128xf32>
    %123 = arith.maximumf %121, %122 : vector<4x128xf32>
    %124 = vector.shape_cast %123 : vector<4x128xf32> to vector<2x2x128xf32>
    %125 = arith.truncf %124 : vector<2x2x128xf32> to vector<2x2x128xbf16>
    %c0_133 = arith.constant 0 : index
    %c0_134 = arith.constant 0 : index
    %c0_135 = arith.constant 0 : index
    %c0_136 = arith.constant 0 : index
    %126 = vector.load %arg9[%c0_133, %c0_134, %c0_135, %c0_136] : memref<1x2x2x128xbf16, #tpu.memory_space<vmem>>, vector<1x2x2x128xbf16>
    %127 = vector.shape_cast %126 : vector<1x2x2x128xbf16> to vector<2x2x128xbf16>
    %128 = vector.shape_cast %125 : vector<2x2x128xbf16> to vector<1x2x2x128xbf16>
    tpu.vector_store %arg9[%c0_133, %c0_134, %c0_135, %c0_136], %128 {strides = array<i32>} : memref<1x2x2x128xbf16, #tpu.memory_space<vmem>>, vector<1x2x2x128xbf16>,
    return
  }
  func.func @transform_0(%arg0: i32) -> (i32, i32, i32, i32, i32) {
    %c0_i32 = arith.constant 0 : i32
    %c0_i32_0 = arith.constant 0 : i32
    %c0_i32_1 = arith.constant 0 : i32
    %c0_i32_2 = arith.constant 0 : i32
    %c0_i32_3 = arith.constant 0 : i32
    return %arg0, %c0_i32, %c0_i32_0, %c0_i32_1, %c0_i32_2 : i32, i32, i32, i32, i32
  }
  func.func @transform_1(%arg0: i32) -> (i32, i32, i32, i32) {
    %c0_i32 = arith.constant 0 : i32
    %c0_i32_0 = arith.constant 0 : i32
    %c0_i32_1 = arith.constant 0 : i32
    %c0_i32_2 = arith.constant 0 : i32
    %c0_i32_3 = arith.constant 0 : i32
    return %c0_i32, %c0_i32_0, %c0_i32_1, %c0_i32_2 : i32, i32, i32, i32
  }
  func.func @transform_2(%arg0: i32) -> (i32, i32) {
    %c0_i32 = arith.constant 0 : i32
    %c0_i32_0 = arith.constant 0 : i32
    %c0_i32_1 = arith.constant 0 : i32
    return %c0_i32, %c0_i32_0 : i32, i32
  }
  func.func @transform_3(%arg0: i32) -> (i32, i32) {
    %c0_i32 = arith.constant 0 : i32
    %c0_i32_0 = arith.constant 0 : i32
    %c0_i32_1 = arith.constant 0 : i32
    return %c0_i32, %c0_i32_0 : i32, i32
  }
  func.func @transform_4(%arg0: i32) -> (i32, i32) {
    %c0_i32 = arith.constant 0 : i32
    %c0_i32_0 = arith.constant 0 : i32
    %c0_i32_1 = arith.constant 0 : i32
    return %c0_i32, %c0_i32_0 : i32, i32
  }
  func.func @transform_5(%arg0: i32) -> (i32, i32) {
    %c0_i32 = arith.constant 0 : i32
    %c0_i32_0 = arith.constant 0 : i32
    %c0_i32_1 = arith.constant 0 : i32
    return %c0_i32, %c0_i32_0 : i32, i32
  }
  func.func @transform_6(%arg0: i32) -> (i32, i32) {
    %c0_i32 = arith.constant 0 : i32
    %c0_i32_0 = arith.constant 0 : i32
    %c0_i32_1 = arith.constant 0 : i32
    return %c0_i32, %c0_i32_0 : i32, i32
  }
  func.func @transform_7(%arg0: i32) -> (i32, i32) {
    %c0_i32 = arith.constant 0 : i32
    %c0_i32_0 = arith.constant 0 : i32
    %c0_i32_1 = arith.constant 0 : i32
    return %c0_i32, %c0_i32_0 : i32, i32
  }
  func.func @transform_8(%arg0: i32) -> (i32, i32, i32, i32) {
    %c0_i32 = arith.constant 0 : i32
    %c0_i32_0 = arith.constant 0 : i32
    %c0_i32_1 = arith.constant 0 : i32
    %c0_i32_2 = arith.constant 0 : i32
    return %arg0, %c0_i32, %c0_i32_0, %c0_i32_1 : i32, i32, i32, i32
  }
}

module attributes {stable_mosaic.version = 11 : i64} {
  func.func @_block_kernel(%arg0: i32, %arg1: memref<1x1x4x8x128xbf16, #tpu.memory_space<vmem>>, %arg2: memref<1x4x8x1xf32, #tpu.memory_space<vmem>>, %arg3: memref<128x128xbf16, #tpu.memory_space<vmem>>, %arg4: memref<1x128xf32, #tpu.memory_space<vmem>>, %arg5: memref<9x128xf32, #tpu.memory_space<vmem>>, %arg6: memref<1x128xf32, #tpu.memory_space<vmem>>, %arg7: memref<128x128xbf16, #tpu.memory_space<vmem>>, %arg8: memref<1x128xf32, #tpu.memory_space<vmem>>, %arg9: memref<1x2x2x128xbf16, #tpu.memory_space<vmem>>, %arg10: memref<1x2x2x128xbf16, #tpu.memory_space<vmem>>, %arg11: memref<1x4x8x128xbf16, #tpu.memory_space<vmem>>, %arg12: memref<2x2x128xf32, #tpu.memory_space<vmem>>) attributes {dimension_semantics = [#tpu.dimension_semantics<parallel>], iteration_bounds = array<i64: 2>, scalar_prefetch = 0 : i64, scratch_operands = 2 : i64, tpu.core_type = #tpu.core_type<tc>, window_params = [{transform_indices = @transform_0, window_bounds = array<i64: 1, 1, 4, 8, 128>}, {pipeline_mode = #tpu.pipeline_mode<synchronous>, transform_indices = @transform_1, window_bounds = array<i64: 1, 4, 8, 1>}, {pipeline_mode = #tpu.pipeline_mode<synchronous>, transform_indices = @transform_2, window_bounds = array<i64: 128, 128>}, {pipeline_mode = #tpu.pipeline_mode<synchronous>, transform_indices = @transform_3, window_bounds = array<i64: 1, 128>}, {pipeline_mode = #tpu.pipeline_mode<synchronous>, transform_indices = @transform_4, window_bounds = array<i64: 9, 128>}, {pipeline_mode = #tpu.pipeline_mode<synchronous>, transform_indices = @transform_5, window_bounds = array<i64: 1, 128>}, {pipeline_mode = #tpu.pipeline_mode<synchronous>, transform_indices = @transform_6, window_bounds = array<i64: 128, 128>}, {pipeline_mode = #tpu.pipeline_mode<synchronous>, transform_indices = @transform_7, window_bounds = array<i64: 1, 128>}, {transform_indices = @transform_8, window_bounds = array<i64: 1, 2, 2, 128>}, {transform_indices = @transform_9, window_bounds = array<i64: 1, 2, 2, 128>}]} {
    %c0 = arith.constant 0 : index
    %c0_0 = arith.constant 0 : index
    %c0_1 = arith.constant 0 : index
    %c0_2 = arith.constant 0 : index
    %c0_3 = arith.constant 0 : index
    %0 = vector.load %arg1[%c0, %c0_0, %c0_1, %c0_2, %c0_3] : memref<1x1x4x8x128xbf16, #tpu.memory_space<vmem>>, vector<1x1x4x8x128xbf16>
    %1 = vector.shape_cast %0 : vector<1x1x4x8x128xbf16> to vector<1x4x8x128xbf16>
    %2 = vector.shape_cast %1 : vector<1x4x8x128xbf16> to vector<32x128xbf16>
    %c0_4 = arith.constant 0 : index
    %c0_5 = arith.constant 0 : index
    %3 = vector.load %arg3[%c0_4, %c0_5] : memref<128x128xbf16, #tpu.memory_space<vmem>>, vector<128x128xbf16>
    %cst = arith.constant dense<0.000000e+00> : vector<32x128xf32>
    %4 = tpu.matmul %2, %3, %cst {dimension_numbers = #tpu.dot_dimension_numbers<[1], [0], [0], [1], [0, 0, 1, 1], [], []>} : vector<32x128xbf16>, vector<128x128xbf16>, vector<32x128xf32> -> vector<32x128xf32>
    %c0_6 = arith.constant 0 : index
    %c0_7 = arith.constant 0 : index
    %5 = vector.load %arg4[%c0_6, %c0_7] : memref<1x128xf32, #tpu.memory_space<vmem>>, vector<1x128xf32>
    %6 = vector.broadcast %5 : vector<1x128xf32> to vector<32x128xf32>
    %7 = arith.addf %4, %6 : vector<32x128xf32>
    %cst_8 = arith.constant 0.000000e+00 : f32
    %8 = vector.broadcast %cst_8 : f32 to vector<32x128xf32>
    %9 = arith.maximumf %7, %8 : vector<32x128xf32>
    %10 = vector.shape_cast %9 : vector<32x128xf32> to vector<1x4x8x128xf32>
    %c0_9 = arith.constant 0 : index
    %c0_10 = arith.constant 0 : index
    %c0_11 = arith.constant 0 : index
    %c0_12 = arith.constant 0 : index
    %11 = vector.load %arg2[%c0_9, %c0_10, %c0_11, %c0_12] : memref<1x4x8x1xf32, #tpu.memory_space<vmem>>, vector<1x4x8x1xf32>
    %12 = vector.broadcast %11 : vector<1x4x8x1xf32> to vector<1x4x8x128xf32>
    %13 = arith.mulf %10, %12 : vector<1x4x8x128xf32>
    %14 = arith.truncf %13 : vector<1x4x8x128xf32> to vector<1x4x8x128xbf16>
    %c0_13 = arith.constant 0 : index
    %c0_14 = arith.constant 0 : index
    %c0_15 = arith.constant 0 : index
    %c0_16 = arith.constant 0 : index
    %15 = vector.load %arg11[%c0_13, %c0_14, %c0_15, %c0_16] : memref<1x4x8x128xbf16, #tpu.memory_space<vmem>>, vector<1x4x8x128xbf16>
    tpu.vector_store %arg11[%c0_13, %c0_14, %c0_15, %c0_16], %14 {strides = array<i32>} : memref<1x4x8x128xbf16, #tpu.memory_space<vmem>>, vector<1x4x8x128xbf16>,
    %cst_17 = arith.constant 0.000000e+00 : f32
    %16 = vector.broadcast %cst_17 : f32 to vector<2x2x128xf32>
    %c0_18 = arith.constant 0 : index
    %c0_19 = arith.constant 0 : index
    %c0_20 = arith.constant 0 : index
    %17 = vector.load %arg12[%c0_18, %c0_19, %c0_20] : memref<2x2x128xf32, #tpu.memory_space<vmem>>, vector<2x2x128xf32>
    tpu.vector_store %arg12[%c0_18, %c0_19, %c0_20], %16 {strides = array<i32>} : memref<2x2x128xf32, #tpu.memory_space<vmem>>, vector<2x2x128xf32>,
    %c0_21 = arith.constant 0 : index
    %c0_22 = arith.constant 0 : index
    %c0_23 = arith.constant 0 : index
    %c0_24 = arith.constant 0 : index
    %18 = vector.load %arg11[%c0_21, %c0_22, %c0_23, %c0_24] : memref<1x4x8x128xbf16, #tpu.memory_space<vmem>>, vector<1x2x2x128xbf16>
    %19 = vector.shape_cast %18 : vector<1x2x2x128xbf16> to vector<2x2x128xbf16>
    %20 = arith.extf %19 : vector<2x2x128xbf16> to vector<2x2x128xf32>
    %c0_25 = arith.constant 0 : index
    %c0_26 = arith.constant 0 : index
    %c0_27 = arith.constant 0 : index
    %21 = vector.load %arg12[%c0_25, %c0_26, %c0_27] : memref<2x2x128xf32, #tpu.memory_space<vmem>>, vector<2x2x128xf32>
    %c0_28 = arith.constant 0 : index
    %c0_29 = arith.constant 0 : index
    %22 = vector.load %arg5[%c0_28, %c0_29] : memref<9x128xf32, #tpu.memory_space<vmem>>, vector<1x128xf32>
    %23 = vector.shape_cast %22 : vector<1x128xf32> to vector<1x1x128xf32>
    %24 = vector.broadcast %23 : vector<1x1x128xf32> to vector<2x2x128xf32>
    %25 = arith.mulf %20, %24 : vector<2x2x128xf32>
    %26 = arith.addf %21, %25 : vector<2x2x128xf32>
    %c0_30 = arith.constant 0 : index
    %c0_31 = arith.constant 0 : index
    %c0_32 = arith.constant 0 : index
    %27 = vector.load %arg12[%c0_30, %c0_31, %c0_32] : memref<2x2x128xf32, #tpu.memory_space<vmem>>, vector<2x2x128xf32>
    tpu.vector_store %arg12[%c0_30, %c0_31, %c0_32], %26 {strides = array<i32>} : memref<2x2x128xf32, #tpu.memory_space<vmem>>, vector<2x2x128xf32>,
    %c0_33 = arith.constant 0 : index
    %c0_34 = arith.constant 0 : index
    %c1 = arith.constant 1 : index
    %c0_35 = arith.constant 0 : index
    %28 = vector.load %arg11[%c0_33, %c0_34, %c1, %c0_35] : memref<1x4x8x128xbf16, #tpu.memory_space<vmem>>, vector<1x2x2x128xbf16>
    %29 = vector.shape_cast %28 : vector<1x2x2x128xbf16> to vector<2x2x128xbf16>
    %30 = arith.extf %29 : vector<2x2x128xbf16> to vector<2x2x128xf32>
    %c0_36 = arith.constant 0 : index
    %c0_37 = arith.constant 0 : index
    %c0_38 = arith.constant 0 : index
    %31 = vector.load %arg12[%c0_36, %c0_37, %c0_38] : memref<2x2x128xf32, #tpu.memory_space<vmem>>, vector<2x2x128xf32>
    %c1_39 = arith.constant 1 : index
    %c0_40 = arith.constant 0 : index
    %32 = vector.load %arg5[%c1_39, %c0_40] : memref<9x128xf32, #tpu.memory_space<vmem>>, vector<1x128xf32>
    %33 = vector.shape_cast %32 : vector<1x128xf32> to vector<1x1x128xf32>
    %34 = vector.broadcast %33 : vector<1x1x128xf32> to vector<2x2x128xf32>
    %35 = arith.mulf %30, %34 : vector<2x2x128xf32>
    %36 = arith.addf %31, %35 : vector<2x2x128xf32>
    %c0_41 = arith.constant 0 : index
    %c0_42 = arith.constant 0 : index
    %c0_43 = arith.constant 0 : index
    %37 = vector.load %arg12[%c0_41, %c0_42, %c0_43] : memref<2x2x128xf32, #tpu.memory_space<vmem>>, vector<2x2x128xf32>
    tpu.vector_store %arg12[%c0_41, %c0_42, %c0_43], %36 {strides = array<i32>} : memref<2x2x128xf32, #tpu.memory_space<vmem>>, vector<2x2x128xf32>,
    %c0_44 = arith.constant 0 : index
    %c0_45 = arith.constant 0 : index
    %c2 = arith.constant 2 : index
    %c0_46 = arith.constant 0 : index
    %38 = vector.load %arg11[%c0_44, %c0_45, %c2, %c0_46] : memref<1x4x8x128xbf16, #tpu.memory_space<vmem>>, vector<1x2x2x128xbf16>
    %39 = vector.shape_cast %38 : vector<1x2x2x128xbf16> to vector<2x2x128xbf16>
    %40 = arith.extf %39 : vector<2x2x128xbf16> to vector<2x2x128xf32>
    %c0_47 = arith.constant 0 : index
    %c0_48 = arith.constant 0 : index
    %c0_49 = arith.constant 0 : index
    %41 = vector.load %arg12[%c0_47, %c0_48, %c0_49] : memref<2x2x128xf32, #tpu.memory_space<vmem>>, vector<2x2x128xf32>
    %c2_50 = arith.constant 2 : index
    %c0_51 = arith.constant 0 : index
    %42 = vector.load %arg5[%c2_50, %c0_51] : memref<9x128xf32, #tpu.memory_space<vmem>>, vector<1x128xf32>
    %43 = vector.shape_cast %42 : vector<1x128xf32> to vector<1x1x128xf32>
    %44 = vector.broadcast %43 : vector<1x1x128xf32> to vector<2x2x128xf32>
    %45 = arith.mulf %40, %44 : vector<2x2x128xf32>
    %46 = arith.addf %41, %45 : vector<2x2x128xf32>
    %c0_52 = arith.constant 0 : index
    %c0_53 = arith.constant 0 : index
    %c0_54 = arith.constant 0 : index
    %47 = vector.load %arg12[%c0_52, %c0_53, %c0_54] : memref<2x2x128xf32, #tpu.memory_space<vmem>>, vector<2x2x128xf32>
    tpu.vector_store %arg12[%c0_52, %c0_53, %c0_54], %46 {strides = array<i32>} : memref<2x2x128xf32, #tpu.memory_space<vmem>>, vector<2x2x128xf32>,
    %c0_55 = arith.constant 0 : index
    %c1_56 = arith.constant 1 : index
    %c0_57 = arith.constant 0 : index
    %c0_58 = arith.constant 0 : index
    %48 = vector.load %arg11[%c0_55, %c1_56, %c0_57, %c0_58] : memref<1x4x8x128xbf16, #tpu.memory_space<vmem>>, vector<1x2x2x128xbf16>
    %49 = vector.shape_cast %48 : vector<1x2x2x128xbf16> to vector<2x2x128xbf16>
    %50 = arith.extf %49 : vector<2x2x128xbf16> to vector<2x2x128xf32>
    %c0_59 = arith.constant 0 : index
    %c0_60 = arith.constant 0 : index
    %c0_61 = arith.constant 0 : index
    %51 = vector.load %arg12[%c0_59, %c0_60, %c0_61] : memref<2x2x128xf32, #tpu.memory_space<vmem>>, vector<2x2x128xf32>
    %c3 = arith.constant 3 : index
    %c0_62 = arith.constant 0 : index
    %52 = vector.load %arg5[%c3, %c0_62] : memref<9x128xf32, #tpu.memory_space<vmem>>, vector<1x128xf32>
    %53 = vector.shape_cast %52 : vector<1x128xf32> to vector<1x1x128xf32>
    %54 = vector.broadcast %53 : vector<1x1x128xf32> to vector<2x2x128xf32>
    %55 = arith.mulf %50, %54 : vector<2x2x128xf32>
    %56 = arith.addf %51, %55 : vector<2x2x128xf32>
    %c0_63 = arith.constant 0 : index
    %c0_64 = arith.constant 0 : index
    %c0_65 = arith.constant 0 : index
    %57 = vector.load %arg12[%c0_63, %c0_64, %c0_65] : memref<2x2x128xf32, #tpu.memory_space<vmem>>, vector<2x2x128xf32>
    tpu.vector_store %arg12[%c0_63, %c0_64, %c0_65], %56 {strides = array<i32>} : memref<2x2x128xf32, #tpu.memory_space<vmem>>, vector<2x2x128xf32>,
    %c0_66 = arith.constant 0 : index
    %c1_67 = arith.constant 1 : index
    %c1_68 = arith.constant 1 : index
    %c0_69 = arith.constant 0 : index
    %58 = vector.load %arg11[%c0_66, %c1_67, %c1_68, %c0_69] : memref<1x4x8x128xbf16, #tpu.memory_space<vmem>>, vector<1x2x2x128xbf16>
    %59 = vector.shape_cast %58 : vector<1x2x2x128xbf16> to vector<2x2x128xbf16>
    %60 = arith.extf %59 : vector<2x2x128xbf16> to vector<2x2x128xf32>
    %c0_70 = arith.constant 0 : index
    %c0_71 = arith.constant 0 : index
    %c0_72 = arith.constant 0 : index
    %61 = vector.load %arg12[%c0_70, %c0_71, %c0_72] : memref<2x2x128xf32, #tpu.memory_space<vmem>>, vector<2x2x128xf32>
    %c4 = arith.constant 4 : index
    %c0_73 = arith.constant 0 : index
    %62 = vector.load %arg5[%c4, %c0_73] : memref<9x128xf32, #tpu.memory_space<vmem>>, vector<1x128xf32>
    %63 = vector.shape_cast %62 : vector<1x128xf32> to vector<1x1x128xf32>
    %64 = vector.broadcast %63 : vector<1x1x128xf32> to vector<2x2x128xf32>
    %65 = arith.mulf %60, %64 : vector<2x2x128xf32>
    %66 = arith.addf %61, %65 : vector<2x2x128xf32>
    %c0_74 = arith.constant 0 : index
    %c0_75 = arith.constant 0 : index
    %c0_76 = arith.constant 0 : index
    %67 = vector.load %arg12[%c0_74, %c0_75, %c0_76] : memref<2x2x128xf32, #tpu.memory_space<vmem>>, vector<2x2x128xf32>
    tpu.vector_store %arg12[%c0_74, %c0_75, %c0_76], %66 {strides = array<i32>} : memref<2x2x128xf32, #tpu.memory_space<vmem>>, vector<2x2x128xf32>,
    %c0_77 = arith.constant 0 : index
    %c1_78 = arith.constant 1 : index
    %c2_79 = arith.constant 2 : index
    %c0_80 = arith.constant 0 : index
    %68 = vector.load %arg11[%c0_77, %c1_78, %c2_79, %c0_80] : memref<1x4x8x128xbf16, #tpu.memory_space<vmem>>, vector<1x2x2x128xbf16>
    %69 = vector.shape_cast %68 : vector<1x2x2x128xbf16> to vector<2x2x128xbf16>
    %70 = arith.extf %69 : vector<2x2x128xbf16> to vector<2x2x128xf32>
    %c0_81 = arith.constant 0 : index
    %c0_82 = arith.constant 0 : index
    %c0_83 = arith.constant 0 : index
    %71 = vector.load %arg12[%c0_81, %c0_82, %c0_83] : memref<2x2x128xf32, #tpu.memory_space<vmem>>, vector<2x2x128xf32>
    %c5 = arith.constant 5 : index
    %c0_84 = arith.constant 0 : index
    %72 = vector.load %arg5[%c5, %c0_84] : memref<9x128xf32, #tpu.memory_space<vmem>>, vector<1x128xf32>
    %73 = vector.shape_cast %72 : vector<1x128xf32> to vector<1x1x128xf32>
    %74 = vector.broadcast %73 : vector<1x1x128xf32> to vector<2x2x128xf32>
    %75 = arith.mulf %70, %74 : vector<2x2x128xf32>
    %76 = arith.addf %71, %75 : vector<2x2x128xf32>
    %c0_85 = arith.constant 0 : index
    %c0_86 = arith.constant 0 : index
    %c0_87 = arith.constant 0 : index
    %77 = vector.load %arg12[%c0_85, %c0_86, %c0_87] : memref<2x2x128xf32, #tpu.memory_space<vmem>>, vector<2x2x128xf32>
    tpu.vector_store %arg12[%c0_85, %c0_86, %c0_87], %76 {strides = array<i32>} : memref<2x2x128xf32, #tpu.memory_space<vmem>>, vector<2x2x128xf32>,
    %c0_88 = arith.constant 0 : index
    %c2_89 = arith.constant 2 : index
    %c0_90 = arith.constant 0 : index
    %c0_91 = arith.constant 0 : index
    %78 = vector.load %arg11[%c0_88, %c2_89, %c0_90, %c0_91] : memref<1x4x8x128xbf16, #tpu.memory_space<vmem>>, vector<1x2x2x128xbf16>
    %79 = vector.shape_cast %78 : vector<1x2x2x128xbf16> to vector<2x2x128xbf16>
    %80 = arith.extf %79 : vector<2x2x128xbf16> to vector<2x2x128xf32>
    %c0_92 = arith.constant 0 : index
    %c0_93 = arith.constant 0 : index
    %c0_94 = arith.constant 0 : index
    %81 = vector.load %arg12[%c0_92, %c0_93, %c0_94] : memref<2x2x128xf32, #tpu.memory_space<vmem>>, vector<2x2x128xf32>
    %c6 = arith.constant 6 : index
    %c0_95 = arith.constant 0 : index
    %82 = vector.load %arg5[%c6, %c0_95] : memref<9x128xf32, #tpu.memory_space<vmem>>, vector<1x128xf32>
    %83 = vector.shape_cast %82 : vector<1x128xf32> to vector<1x1x128xf32>
    %84 = vector.broadcast %83 : vector<1x1x128xf32> to vector<2x2x128xf32>
    %85 = arith.mulf %80, %84 : vector<2x2x128xf32>
    %86 = arith.addf %81, %85 : vector<2x2x128xf32>
    %c0_96 = arith.constant 0 : index
    %c0_97 = arith.constant 0 : index
    %c0_98 = arith.constant 0 : index
    %87 = vector.load %arg12[%c0_96, %c0_97, %c0_98] : memref<2x2x128xf32, #tpu.memory_space<vmem>>, vector<2x2x128xf32>
    tpu.vector_store %arg12[%c0_96, %c0_97, %c0_98], %86 {strides = array<i32>} : memref<2x2x128xf32, #tpu.memory_space<vmem>>, vector<2x2x128xf32>,
    %c0_99 = arith.constant 0 : index
    %c2_100 = arith.constant 2 : index
    %c1_101 = arith.constant 1 : index
    %c0_102 = arith.constant 0 : index
    %88 = vector.load %arg11[%c0_99, %c2_100, %c1_101, %c0_102] : memref<1x4x8x128xbf16, #tpu.memory_space<vmem>>, vector<1x2x2x128xbf16>
    %89 = vector.shape_cast %88 : vector<1x2x2x128xbf16> to vector<2x2x128xbf16>
    %90 = arith.extf %89 : vector<2x2x128xbf16> to vector<2x2x128xf32>
    %c0_103 = arith.constant 0 : index
    %c0_104 = arith.constant 0 : index
    %c0_105 = arith.constant 0 : index
    %91 = vector.load %arg12[%c0_103, %c0_104, %c0_105] : memref<2x2x128xf32, #tpu.memory_space<vmem>>, vector<2x2x128xf32>
    %c7 = arith.constant 7 : index
    %c0_106 = arith.constant 0 : index
    %92 = vector.load %arg5[%c7, %c0_106] : memref<9x128xf32, #tpu.memory_space<vmem>>, vector<1x128xf32>
    %93 = vector.shape_cast %92 : vector<1x128xf32> to vector<1x1x128xf32>
    %94 = vector.broadcast %93 : vector<1x1x128xf32> to vector<2x2x128xf32>
    %95 = arith.mulf %90, %94 : vector<2x2x128xf32>
    %96 = arith.addf %91, %95 : vector<2x2x128xf32>
    %c0_107 = arith.constant 0 : index
    %c0_108 = arith.constant 0 : index
    %c0_109 = arith.constant 0 : index
    %97 = vector.load %arg12[%c0_107, %c0_108, %c0_109] : memref<2x2x128xf32, #tpu.memory_space<vmem>>, vector<2x2x128xf32>
    tpu.vector_store %arg12[%c0_107, %c0_108, %c0_109], %96 {strides = array<i32>} : memref<2x2x128xf32, #tpu.memory_space<vmem>>, vector<2x2x128xf32>,
    %c0_110 = arith.constant 0 : index
    %c2_111 = arith.constant 2 : index
    %c2_112 = arith.constant 2 : index
    %c0_113 = arith.constant 0 : index
    %98 = vector.load %arg11[%c0_110, %c2_111, %c2_112, %c0_113] : memref<1x4x8x128xbf16, #tpu.memory_space<vmem>>, vector<1x2x2x128xbf16>
    %99 = vector.shape_cast %98 : vector<1x2x2x128xbf16> to vector<2x2x128xbf16>
    %100 = arith.extf %99 : vector<2x2x128xbf16> to vector<2x2x128xf32>
    %c0_114 = arith.constant 0 : index
    %c0_115 = arith.constant 0 : index
    %c0_116 = arith.constant 0 : index
    %101 = vector.load %arg12[%c0_114, %c0_115, %c0_116] : memref<2x2x128xf32, #tpu.memory_space<vmem>>, vector<2x2x128xf32>
    %c8 = arith.constant 8 : index
    %c0_117 = arith.constant 0 : index
    %102 = vector.load %arg5[%c8, %c0_117] : memref<9x128xf32, #tpu.memory_space<vmem>>, vector<1x128xf32>
    %103 = vector.shape_cast %102 : vector<1x128xf32> to vector<1x1x128xf32>
    %104 = vector.broadcast %103 : vector<1x1x128xf32> to vector<2x2x128xf32>
    %105 = arith.mulf %100, %104 : vector<2x2x128xf32>
    %106 = arith.addf %101, %105 : vector<2x2x128xf32>
    %c0_118 = arith.constant 0 : index
    %c0_119 = arith.constant 0 : index
    %c0_120 = arith.constant 0 : index
    %107 = vector.load %arg12[%c0_118, %c0_119, %c0_120] : memref<2x2x128xf32, #tpu.memory_space<vmem>>, vector<2x2x128xf32>
    tpu.vector_store %arg12[%c0_118, %c0_119, %c0_120], %106 {strides = array<i32>} : memref<2x2x128xf32, #tpu.memory_space<vmem>>, vector<2x2x128xf32>,
    %c0_121 = arith.constant 0 : index
    %c0_122 = arith.constant 0 : index
    %c0_123 = arith.constant 0 : index
    %108 = vector.load %arg12[%c0_121, %c0_122, %c0_123] : memref<2x2x128xf32, #tpu.memory_space<vmem>>, vector<2x2x128xf32>
    %c0_124 = arith.constant 0 : index
    %c0_125 = arith.constant 0 : index
    %109 = vector.load %arg6[%c0_124, %c0_125] : memref<1x128xf32, #tpu.memory_space<vmem>>, vector<1x128xf32>
    %110 = vector.shape_cast %109 : vector<1x128xf32> to vector<1x1x128xf32>
    %111 = vector.broadcast %110 : vector<1x1x128xf32> to vector<2x2x128xf32>
    %112 = arith.addf %108, %111 : vector<2x2x128xf32>
    %cst_126 = arith.constant 0.000000e+00 : f32
    %113 = vector.broadcast %cst_126 : f32 to vector<2x2x128xf32>
    %114 = arith.maximumf %112, %113 : vector<2x2x128xf32>
    %115 = arith.truncf %114 : vector<2x2x128xf32> to vector<2x2x128xbf16>
    %116 = vector.shape_cast %115 : vector<2x2x128xbf16> to vector<4x128xbf16>
    %c0_127 = arith.constant 0 : index
    %c0_128 = arith.constant 0 : index
    %117 = vector.load %arg7[%c0_127, %c0_128] : memref<128x128xbf16, #tpu.memory_space<vmem>>, vector<128x128xbf16>
    %cst_129 = arith.constant dense<0.000000e+00> : vector<4x128xf32>
    %118 = tpu.matmul %116, %117, %cst_129 {dimension_numbers = #tpu.dot_dimension_numbers<[1], [0], [0], [1], [0, 0, 1, 1], [], []>} : vector<4x128xbf16>, vector<128x128xbf16>, vector<4x128xf32> -> vector<4x128xf32>
    %c0_130 = arith.constant 0 : index
    %c0_131 = arith.constant 0 : index
    %119 = vector.load %arg8[%c0_130, %c0_131] : memref<1x128xf32, #tpu.memory_space<vmem>>, vector<1x128xf32>
    %120 = vector.broadcast %119 : vector<1x128xf32> to vector<4x128xf32>
    %121 = arith.addf %118, %120 : vector<4x128xf32>
    %cst_132 = arith.constant 0.000000e+00 : f32
    %122 = vector.broadcast %cst_132 : f32 to vector<4x128xf32>
    %123 = arith.maximumf %121, %122 : vector<4x128xf32>
    %124 = vector.shape_cast %123 : vector<4x128xf32> to vector<2x2x128xf32>
    %c0_133 = arith.constant 0 : index
    %c0_134 = arith.constant 0 : index
    %c0_135 = arith.constant 0 : index
    %c0_136 = arith.constant 0 : index
    %125 = vector.load %arg9[%c0_133, %c0_134, %c0_135, %c0_136] : memref<1x2x2x128xbf16, #tpu.memory_space<vmem>>, vector<1x2x2x128xbf16>
    %126 = vector.shape_cast %125 : vector<1x2x2x128xbf16> to vector<2x2x128xbf16>
    %127 = arith.extf %126 : vector<2x2x128xbf16> to vector<2x2x128xf32>
    %128 = arith.addf %124, %127 : vector<2x2x128xf32>
    %129 = arith.truncf %128 : vector<2x2x128xf32> to vector<2x2x128xbf16>
    %c0_137 = arith.constant 0 : index
    %c0_138 = arith.constant 0 : index
    %c0_139 = arith.constant 0 : index
    %c0_140 = arith.constant 0 : index
    %130 = vector.load %arg10[%c0_137, %c0_138, %c0_139, %c0_140] : memref<1x2x2x128xbf16, #tpu.memory_space<vmem>>, vector<1x2x2x128xbf16>
    %131 = vector.shape_cast %130 : vector<1x2x2x128xbf16> to vector<2x2x128xbf16>
    %132 = vector.shape_cast %129 : vector<2x2x128xbf16> to vector<1x2x2x128xbf16>
    tpu.vector_store %arg10[%c0_137, %c0_138, %c0_139, %c0_140], %132 {strides = array<i32>} : memref<1x2x2x128xbf16, #tpu.memory_space<vmem>>, vector<1x2x2x128xbf16>,
    return
  }
  func.func @transform_0(%arg0: i32) -> (i32, i32, i32, i32, i32) {
    %c0_i32 = arith.constant 0 : i32
    %c0_i32_0 = arith.constant 0 : i32
    %c0_i32_1 = arith.constant 0 : i32
    %c0_i32_2 = arith.constant 0 : i32
    %c0_i32_3 = arith.constant 0 : i32
    return %arg0, %c0_i32, %c0_i32_0, %c0_i32_1, %c0_i32_2 : i32, i32, i32, i32, i32
  }
  func.func @transform_1(%arg0: i32) -> (i32, i32, i32, i32) {
    %c0_i32 = arith.constant 0 : i32
    %c0_i32_0 = arith.constant 0 : i32
    %c0_i32_1 = arith.constant 0 : i32
    %c0_i32_2 = arith.constant 0 : i32
    %c0_i32_3 = arith.constant 0 : i32
    return %c0_i32, %c0_i32_0, %c0_i32_1, %c0_i32_2 : i32, i32, i32, i32
  }
  func.func @transform_2(%arg0: i32) -> (i32, i32) {
    %c0_i32 = arith.constant 0 : i32
    %c0_i32_0 = arith.constant 0 : i32
    %c0_i32_1 = arith.constant 0 : i32
    return %c0_i32, %c0_i32_0 : i32, i32
  }
  func.func @transform_3(%arg0: i32) -> (i32, i32) {
    %c0_i32 = arith.constant 0 : i32
    %c0_i32_0 = arith.constant 0 : i32
    %c0_i32_1 = arith.constant 0 : i32
    return %c0_i32, %c0_i32_0 : i32, i32
  }
  func.func @transform_4(%arg0: i32) -> (i32, i32) {
    %c0_i32 = arith.constant 0 : i32
    %c0_i32_0 = arith.constant 0 : i32
    %c0_i32_1 = arith.constant 0 : i32
    return %c0_i32, %c0_i32_0 : i32, i32
  }
  func.func @transform_5(%arg0: i32) -> (i32, i32) {
    %c0_i32 = arith.constant 0 : i32
    %c0_i32_0 = arith.constant 0 : i32
    %c0_i32_1 = arith.constant 0 : i32
    return %c0_i32, %c0_i32_0 : i32, i32
  }
  func.func @transform_6(%arg0: i32) -> (i32, i32) {
    %c0_i32 = arith.constant 0 : i32
    %c0_i32_0 = arith.constant 0 : i32
    %c0_i32_1 = arith.constant 0 : i32
    return %c0_i32, %c0_i32_0 : i32, i32
  }
  func.func @transform_7(%arg0: i32) -> (i32, i32) {
    %c0_i32 = arith.constant 0 : i32
    %c0_i32_0 = arith.constant 0 : i32
    %c0_i32_1 = arith.constant 0 : i32
    return %c0_i32, %c0_i32_0 : i32, i32
  }
  func.func @transform_8(%arg0: i32) -> (i32, i32, i32, i32) {
    %c0_i32 = arith.constant 0 : i32
    %c0_i32_0 = arith.constant 0 : i32
    %c0_i32_1 = arith.constant 0 : i32
    %c0_i32_2 = arith.constant 0 : i32
    return %arg0, %c0_i32, %c0_i32_0, %c0_i32_1 : i32, i32, i32, i32
  }
  func.func @transform_9(%arg0: i32) -> (i32, i32, i32, i32) {
    %c0_i32 = arith.constant 0 : i32
    %c0_i32_0 = arith.constant 0 : i32
    %c0_i32_1 = arith.constant 0 : i32
    %c0_i32_2 = arith.constant 0 : i32
    return %arg0, %c0_i32, %c0_i32_0, %c0_i32_1 : i32, i32, i32, i32
  }
}

module attributes {stable_mosaic.version = 11 : i64} {
  func.func @_block_kernel(%arg0: i32, %arg1: memref<1x4x3x8x128xbf16, #tpu.memory_space<vmem>>, %arg2: memref<4x3x8x1xf32, #tpu.memory_space<vmem>>, %arg3: memref<128x128xbf16, #tpu.memory_space<vmem>>, %arg4: memref<1x128xf32, #tpu.memory_space<vmem>>, %arg5: memref<25x128xf32, #tpu.memory_space<vmem>>, %arg6: memref<1x128xf32, #tpu.memory_space<vmem>>, %arg7: memref<128x128xbf16, #tpu.memory_space<vmem>>, %arg8: memref<1x128xf32, #tpu.memory_space<vmem>>, %arg9: memref<128x128xbf16, #tpu.memory_space<vmem>>, %arg10: memref<1x128xf32, #tpu.memory_space<vmem>>, %arg11: memref<128x128xbf16, #tpu.memory_space<vmem>>, %arg12: memref<1x128xf32, #tpu.memory_space<vmem>>, %arg13: memref<1x1x1x128xbf16, #tpu.memory_space<vmem>>, %arg14: memref<4x3x8x128xbf16, #tpu.memory_space<vmem>>, %arg15: memref<1x1x128xf32, #tpu.memory_space<vmem>>) attributes {dimension_semantics = [#tpu.dimension_semantics<parallel>], iteration_bounds = array<i64: 2>, scalar_prefetch = 0 : i64, scratch_operands = 2 : i64, tpu.core_type = #tpu.core_type<tc>, window_params = [{transform_indices = @transform_0, window_bounds = array<i64: 1, 4, 3, 8, 128>}, {pipeline_mode = #tpu.pipeline_mode<synchronous>, transform_indices = @transform_1, window_bounds = array<i64: 4, 3, 8, 1>}, {pipeline_mode = #tpu.pipeline_mode<synchronous>, transform_indices = @transform_2, window_bounds = array<i64: 128, 128>}, {pipeline_mode = #tpu.pipeline_mode<synchronous>, transform_indices = @transform_3, window_bounds = array<i64: 1, 128>}, {pipeline_mode = #tpu.pipeline_mode<synchronous>, transform_indices = @transform_4, window_bounds = array<i64: 25, 128>}, {pipeline_mode = #tpu.pipeline_mode<synchronous>, transform_indices = @transform_5, window_bounds = array<i64: 1, 128>}, {pipeline_mode = #tpu.pipeline_mode<synchronous>, transform_indices = @transform_6, window_bounds = array<i64: 128, 128>}, {pipeline_mode = #tpu.pipeline_mode<synchronous>, transform_indices = @transform_7, window_bounds = array<i64: 1, 128>}, {pipeline_mode = #tpu.pipeline_mode<synchronous>, transform_indices = @transform_8, window_bounds = array<i64: 128, 128>}, {pipeline_mode = #tpu.pipeline_mode<synchronous>, transform_indices = @transform_9, window_bounds = array<i64: 1, 128>}, {pipeline_mode = #tpu.pipeline_mode<synchronous>, transform_indices = @transform_10, window_bounds = array<i64: 128, 128>}, {pipeline_mode = #tpu.pipeline_mode<synchronous>, transform_indices = @transform_11, window_bounds = array<i64: 1, 128>}, {transform_indices = @transform_12, window_bounds = array<i64: 1, 1, 1, 128>}]} {
    %c0 = arith.constant 0 : index
    %c0_0 = arith.constant 0 : index
    %c0_1 = arith.constant 0 : index
    %c0_2 = arith.constant 0 : index
    %c0_3 = arith.constant 0 : index
    %0 = vector.load %arg1[%c0, %c0_0, %c0_1, %c0_2, %c0_3] : memref<1x4x3x8x128xbf16, #tpu.memory_space<vmem>>, vector<1x4x3x8x128xbf16>
    %1 = vector.shape_cast %0 : vector<1x4x3x8x128xbf16> to vector<4x3x8x128xbf16>
    %2 = vector.shape_cast %1 : vector<4x3x8x128xbf16> to vector<96x128xbf16>
    %c0_4 = arith.constant 0 : index
    %c0_5 = arith.constant 0 : index
    %3 = vector.load %arg3[%c0_4, %c0_5] : memref<128x128xbf16, #tpu.memory_space<vmem>>, vector<128x128xbf16>
    %cst = arith.constant dense<0.000000e+00> : vector<96x128xf32>
    %4 = tpu.matmul %2, %3, %cst {dimension_numbers = #tpu.dot_dimension_numbers<[1], [0], [0], [1], [0, 0, 1, 1], [], []>} : vector<96x128xbf16>, vector<128x128xbf16>, vector<96x128xf32> -> vector<96x128xf32>
    %c0_6 = arith.constant 0 : index
    %c0_7 = arith.constant 0 : index
    %5 = vector.load %arg4[%c0_6, %c0_7] : memref<1x128xf32, #tpu.memory_space<vmem>>, vector<1x128xf32>
    %6 = vector.broadcast %5 : vector<1x128xf32> to vector<96x128xf32>
    %7 = arith.addf %4, %6 : vector<96x128xf32>
    %cst_8 = arith.constant 3.000000e+00 : f32
    %8 = vector.broadcast %cst_8 : f32 to vector<96x128xf32>
    %9 = arith.addf %7, %8 : vector<96x128xf32>
    %cst_9 = arith.constant 0.000000e+00 : f32
    %cst_10 = arith.constant 6.000000e+00 : f32
    %10 = vector.broadcast %cst_9 : f32 to vector<96x128xf32>
    %11 = arith.maximumf %10, %9 : vector<96x128xf32>
    %12 = vector.broadcast %cst_10 : f32 to vector<96x128xf32>
    %13 = arith.minimumf %12, %11 : vector<96x128xf32>
    %14 = arith.mulf %7, %13 : vector<96x128xf32>
    %cst_11 = arith.constant 0.166666672 : f32
    %15 = vector.broadcast %cst_11 : f32 to vector<96x128xf32>
    %16 = arith.mulf %14, %15 : vector<96x128xf32>
    %17 = vector.shape_cast %16 : vector<96x128xf32> to vector<4x3x8x128xf32>
    %c0_12 = arith.constant 0 : index
    %c0_13 = arith.constant 0 : index
    %c0_14 = arith.constant 0 : index
    %c0_15 = arith.constant 0 : index
    %18 = vector.load %arg2[%c0_12, %c0_13, %c0_14, %c0_15] : memref<4x3x8x1xf32, #tpu.memory_space<vmem>>, vector<4x3x8x1xf32>
    %19 = vector.broadcast %18 : vector<4x3x8x1xf32> to vector<4x3x8x128xf32>
    %20 = arith.mulf %17, %19 : vector<4x3x8x128xf32>
    %21 = arith.truncf %20 : vector<4x3x8x128xf32> to vector<4x3x8x128xbf16>
    %c0_16 = arith.constant 0 : index
    %c0_17 = arith.constant 0 : index
    %c0_18 = arith.constant 0 : index
    %c0_19 = arith.constant 0 : index
    %22 = vector.load %arg14[%c0_16, %c0_17, %c0_18, %c0_19] : memref<4x3x8x128xbf16, #tpu.memory_space<vmem>>, vector<4x3x8x128xbf16>
    tpu.vector_store %arg14[%c0_16, %c0_17, %c0_18, %c0_19], %21 {strides = array<i32>} : memref<4x3x8x128xbf16, #tpu.memory_space<vmem>>, vector<4x3x8x128xbf16>,
    %cst_20 = arith.constant 0.000000e+00 : f32
    %23 = vector.broadcast %cst_20 : f32 to vector<1x1x128xf32>
    %c0_21 = arith.constant 0 : index
    %c0_22 = arith.constant 0 : index
    %c0_23 = arith.constant 0 : index
    %24 = vector.load %arg15[%c0_21, %c0_22, %c0_23] : memref<1x1x128xf32, #tpu.memory_space<vmem>>, vector<1x1x128xf32>
    tpu.vector_store %arg15[%c0_21, %c0_22, %c0_23], %23 {strides = array<i32>} : memref<1x1x128xf32, #tpu.memory_space<vmem>>, vector<1x1x128xf32>,
    %c0_24 = arith.constant 0 : index
    %c0_25 = arith.constant 0 : index
    %c0_26 = arith.constant 0 : index
    %c0_27 = arith.constant 0 : index
    %25 = vector.load %arg14[%c0_24, %c0_25, %c0_26, %c0_27] : memref<4x3x8x128xbf16, #tpu.memory_space<vmem>>, vector<1x1x1x128xbf16>
    %26 = vector.shape_cast %25 : vector<1x1x1x128xbf16> to vector<1x1x128xbf16>
    %27 = arith.extf %26 : vector<1x1x128xbf16> to vector<1x1x128xf32>
    %c0_28 = arith.constant 0 : index
    %c0_29 = arith.constant 0 : index
    %c0_30 = arith.constant 0 : index
    %28 = vector.load %arg15[%c0_28, %c0_29, %c0_30] : memref<1x1x128xf32, #tpu.memory_space<vmem>>, vector<1x1x128xf32>
    %c0_31 = arith.constant 0 : index
    %c0_32 = arith.constant 0 : index
    %29 = vector.load %arg5[%c0_31, %c0_32] : memref<25x128xf32, #tpu.memory_space<vmem>>, vector<1x128xf32>
    %30 = vector.shape_cast %29 : vector<1x128xf32> to vector<1x1x128xf32>
    %31 = arith.mulf %27, %30 : vector<1x1x128xf32>
    %32 = arith.addf %28, %31 : vector<1x1x128xf32>
    %c0_33 = arith.constant 0 : index
    %c0_34 = arith.constant 0 : index
    %c0_35 = arith.constant 0 : index
    %33 = vector.load %arg15[%c0_33, %c0_34, %c0_35] : memref<1x1x128xf32, #tpu.memory_space<vmem>>, vector<1x1x128xf32>
    tpu.vector_store %arg15[%c0_33, %c0_34, %c0_35], %32 {strides = array<i32>} : memref<1x1x128xf32, #tpu.memory_space<vmem>>, vector<1x1x128xf32>,
    %c1 = arith.constant 1 : index
    %c0_36 = arith.constant 0 : index
    %c0_37 = arith.constant 0 : index
    %c0_38 = arith.constant 0 : index
    %34 = vector.load %arg14[%c1, %c0_36, %c0_37, %c0_38] : memref<4x3x8x128xbf16, #tpu.memory_space<vmem>>, vector<1x1x1x128xbf16>
    %35 = vector.shape_cast %34 : vector<1x1x1x128xbf16> to vector<1x1x128xbf16>
    %36 = arith.extf %35 : vector<1x1x128xbf16> to vector<1x1x128xf32>
    %c0_39 = arith.constant 0 : index
    %c0_40 = arith.constant 0 : index
    %c0_41 = arith.constant 0 : index
    %37 = vector.load %arg15[%c0_39, %c0_40, %c0_41] : memref<1x1x128xf32, #tpu.memory_space<vmem>>, vector<1x1x128xf32>
    %c1_42 = arith.constant 1 : index
    %c0_43 = arith.constant 0 : index
    %38 = vector.load %arg5[%c1_42, %c0_43] : memref<25x128xf32, #tpu.memory_space<vmem>>, vector<1x128xf32>
    %39 = vector.shape_cast %38 : vector<1x128xf32> to vector<1x1x128xf32>
    %40 = arith.mulf %36, %39 : vector<1x1x128xf32>
    %41 = arith.addf %37, %40 : vector<1x1x128xf32>
    %c0_44 = arith.constant 0 : index
    %c0_45 = arith.constant 0 : index
    %c0_46 = arith.constant 0 : index
    %42 = vector.load %arg15[%c0_44, %c0_45, %c0_46] : memref<1x1x128xf32, #tpu.memory_space<vmem>>, vector<1x1x128xf32>
    tpu.vector_store %arg15[%c0_44, %c0_45, %c0_46], %41 {strides = array<i32>} : memref<1x1x128xf32, #tpu.memory_space<vmem>>, vector<1x1x128xf32>,
    %c0_47 = arith.constant 0 : index
    %c0_48 = arith.constant 0 : index
    %c1_49 = arith.constant 1 : index
    %c0_50 = arith.constant 0 : index
    %43 = vector.load %arg14[%c0_47, %c0_48, %c1_49, %c0_50] : memref<4x3x8x128xbf16, #tpu.memory_space<vmem>>, vector<1x1x1x128xbf16>
    %44 = vector.shape_cast %43 : vector<1x1x1x128xbf16> to vector<1x1x128xbf16>
    %45 = arith.extf %44 : vector<1x1x128xbf16> to vector<1x1x128xf32>
    %c0_51 = arith.constant 0 : index
    %c0_52 = arith.constant 0 : index
    %c0_53 = arith.constant 0 : index
    %46 = vector.load %arg15[%c0_51, %c0_52, %c0_53] : memref<1x1x128xf32, #tpu.memory_space<vmem>>, vector<1x1x128xf32>
    %c2 = arith.constant 2 : index
    %c0_54 = arith.constant 0 : index
    %47 = vector.load %arg5[%c2, %c0_54] : memref<25x128xf32, #tpu.memory_space<vmem>>, vector<1x128xf32>
    %48 = vector.shape_cast %47 : vector<1x128xf32> to vector<1x1x128xf32>
    %49 = arith.mulf %45, %48 : vector<1x1x128xf32>
    %50 = arith.addf %46, %49 : vector<1x1x128xf32>
    %c0_55 = arith.constant 0 : index
    %c0_56 = arith.constant 0 : index
    %c0_57 = arith.constant 0 : index
    %51 = vector.load %arg15[%c0_55, %c0_56, %c0_57] : memref<1x1x128xf32, #tpu.memory_space<vmem>>, vector<1x1x128xf32>
    tpu.vector_store %arg15[%c0_55, %c0_56, %c0_57], %50 {strides = array<i32>} : memref<1x1x128xf32, #tpu.memory_space<vmem>>, vector<1x1x128xf32>,
    %c1_58 = arith.constant 1 : index
    %c0_59 = arith.constant 0 : index
    %c1_60 = arith.constant 1 : index
    %c0_61 = arith.constant 0 : index
    %52 = vector.load %arg14[%c1_58, %c0_59, %c1_60, %c0_61] : memref<4x3x8x128xbf16, #tpu.memory_space<vmem>>, vector<1x1x1x128xbf16>
    %53 = vector.shape_cast %52 : vector<1x1x1x128xbf16> to vector<1x1x128xbf16>
    %54 = arith.extf %53 : vector<1x1x128xbf16> to vector<1x1x128xf32>
    %c0_62 = arith.constant 0 : index
    %c0_63 = arith.constant 0 : index
    %c0_64 = arith.constant 0 : index
    %55 = vector.load %arg15[%c0_62, %c0_63, %c0_64] : memref<1x1x128xf32, #tpu.memory_space<vmem>>, vector<1x1x128xf32>
    %c3 = arith.constant 3 : index
    %c0_65 = arith.constant 0 : index
    %56 = vector.load %arg5[%c3, %c0_65] : memref<25x128xf32, #tpu.memory_space<vmem>>, vector<1x128xf32>
    %57 = vector.shape_cast %56 : vector<1x128xf32> to vector<1x1x128xf32>
    %58 = arith.mulf %54, %57 : vector<1x1x128xf32>
    %59 = arith.addf %55, %58 : vector<1x1x128xf32>
    %c0_66 = arith.constant 0 : index
    %c0_67 = arith.constant 0 : index
    %c0_68 = arith.constant 0 : index
    %60 = vector.load %arg15[%c0_66, %c0_67, %c0_68] : memref<1x1x128xf32, #tpu.memory_space<vmem>>, vector<1x1x128xf32>
    tpu.vector_store %arg15[%c0_66, %c0_67, %c0_68], %59 {strides = array<i32>} : memref<1x1x128xf32, #tpu.memory_space<vmem>>, vector<1x1x128xf32>,
    %c0_69 = arith.constant 0 : index
    %c0_70 = arith.constant 0 : index
    %c2_71 = arith.constant 2 : index
    %c0_72 = arith.constant 0 : index
    %61 = vector.load %arg14[%c0_69, %c0_70, %c2_71, %c0_72] : memref<4x3x8x128xbf16, #tpu.memory_space<vmem>>, vector<1x1x1x128xbf16>
    %62 = vector.shape_cast %61 : vector<1x1x1x128xbf16> to vector<1x1x128xbf16>
    %63 = arith.extf %62 : vector<1x1x128xbf16> to vector<1x1x128xf32>
    %c0_73 = arith.constant 0 : index
    %c0_74 = arith.constant 0 : index
    %c0_75 = arith.constant 0 : index
    %64 = vector.load %arg15[%c0_73, %c0_74, %c0_75] : memref<1x1x128xf32, #tpu.memory_space<vmem>>, vector<1x1x128xf32>
    %c4 = arith.constant 4 : index
    %c0_76 = arith.constant 0 : index
    %65 = vector.load %arg5[%c4, %c0_76] : memref<25x128xf32, #tpu.memory_space<vmem>>, vector<1x128xf32>
    %66 = vector.shape_cast %65 : vector<1x128xf32> to vector<1x1x128xf32>
    %67 = arith.mulf %63, %66 : vector<1x1x128xf32>
    %68 = arith.addf %64, %67 : vector<1x1x128xf32>
    %c0_77 = arith.constant 0 : index
    %c0_78 = arith.constant 0 : index
    %c0_79 = arith.constant 0 : index
    %69 = vector.load %arg15[%c0_77, %c0_78, %c0_79] : memref<1x1x128xf32, #tpu.memory_space<vmem>>, vector<1x1x128xf32>
    tpu.vector_store %arg15[%c0_77, %c0_78, %c0_79], %68 {strides = array<i32>} : memref<1x1x128xf32, #tpu.memory_space<vmem>>, vector<1x1x128xf32>,
    %c2_80 = arith.constant 2 : index
    %c0_81 = arith.constant 0 : index
    %c0_82 = arith.constant 0 : index
    %c0_83 = arith.constant 0 : index
    %70 = vector.load %arg14[%c2_80, %c0_81, %c0_82, %c0_83] : memref<4x3x8x128xbf16, #tpu.memory_space<vmem>>, vector<1x1x1x128xbf16>
    %71 = vector.shape_cast %70 : vector<1x1x1x128xbf16> to vector<1x1x128xbf16>
    %72 = arith.extf %71 : vector<1x1x128xbf16> to vector<1x1x128xf32>
    %c0_84 = arith.constant 0 : index
    %c0_85 = arith.constant 0 : index
    %c0_86 = arith.constant 0 : index
    %73 = vector.load %arg15[%c0_84, %c0_85, %c0_86] : memref<1x1x128xf32, #tpu.memory_space<vmem>>, vector<1x1x128xf32>
    %c5 = arith.constant 5 : index
    %c0_87 = arith.constant 0 : index
    %74 = vector.load %arg5[%c5, %c0_87] : memref<25x128xf32, #tpu.memory_space<vmem>>, vector<1x128xf32>
    %75 = vector.shape_cast %74 : vector<1x128xf32> to vector<1x1x128xf32>
    %76 = arith.mulf %72, %75 : vector<1x1x128xf32>
    %77 = arith.addf %73, %76 : vector<1x1x128xf32>
    %c0_88 = arith.constant 0 : index
    %c0_89 = arith.constant 0 : index
    %c0_90 = arith.constant 0 : index
    %78 = vector.load %arg15[%c0_88, %c0_89, %c0_90] : memref<1x1x128xf32, #tpu.memory_space<vmem>>, vector<1x1x128xf32>
    tpu.vector_store %arg15[%c0_88, %c0_89, %c0_90], %77 {strides = array<i32>} : memref<1x1x128xf32, #tpu.memory_space<vmem>>, vector<1x1x128xf32>,
    %c3_91 = arith.constant 3 : index
    %c0_92 = arith.constant 0 : index
    %c0_93 = arith.constant 0 : index
    %c0_94 = arith.constant 0 : index
    %79 = vector.load %arg14[%c3_91, %c0_92, %c0_93, %c0_94] : memref<4x3x8x128xbf16, #tpu.memory_space<vmem>>, vector<1x1x1x128xbf16>
    %80 = vector.shape_cast %79 : vector<1x1x1x128xbf16> to vector<1x1x128xbf16>
    %81 = arith.extf %80 : vector<1x1x128xbf16> to vector<1x1x128xf32>
    %c0_95 = arith.constant 0 : index
    %c0_96 = arith.constant 0 : index
    %c0_97 = arith.constant 0 : index
    %82 = vector.load %arg15[%c0_95, %c0_96, %c0_97] : memref<1x1x128xf32, #tpu.memory_space<vmem>>, vector<1x1x128xf32>
    %c6 = arith.constant 6 : index
    %c0_98 = arith.constant 0 : index
    %83 = vector.load %arg5[%c6, %c0_98] : memref<25x128xf32, #tpu.memory_space<vmem>>, vector<1x128xf32>
    %84 = vector.shape_cast %83 : vector<1x128xf32> to vector<1x1x128xf32>
    %85 = arith.mulf %81, %84 : vector<1x1x128xf32>
    %86 = arith.addf %82, %85 : vector<1x1x128xf32>
    %c0_99 = arith.constant 0 : index
    %c0_100 = arith.constant 0 : index
    %c0_101 = arith.constant 0 : index
    %87 = vector.load %arg15[%c0_99, %c0_100, %c0_101] : memref<1x1x128xf32, #tpu.memory_space<vmem>>, vector<1x1x128xf32>
    tpu.vector_store %arg15[%c0_99, %c0_100, %c0_101], %86 {strides = array<i32>} : memref<1x1x128xf32, #tpu.memory_space<vmem>>, vector<1x1x128xf32>,
    %c2_102 = arith.constant 2 : index
    %c0_103 = arith.constant 0 : index
    %c1_104 = arith.constant 1 : index
    %c0_105 = arith.constant 0 : index
    %88 = vector.load %arg14[%c2_102, %c0_103, %c1_104, %c0_105] : memref<4x3x8x128xbf16, #tpu.memory_space<vmem>>, vector<1x1x1x128xbf16>
    %89 = vector.shape_cast %88 : vector<1x1x1x128xbf16> to vector<1x1x128xbf16>
    %90 = arith.extf %89 : vector<1x1x128xbf16> to vector<1x1x128xf32>
    %c0_106 = arith.constant 0 : index
    %c0_107 = arith.constant 0 : index
    %c0_108 = arith.constant 0 : index
    %91 = vector.load %arg15[%c0_106, %c0_107, %c0_108] : memref<1x1x128xf32, #tpu.memory_space<vmem>>, vector<1x1x128xf32>
    %c7 = arith.constant 7 : index
    %c0_109 = arith.constant 0 : index
    %92 = vector.load %arg5[%c7, %c0_109] : memref<25x128xf32, #tpu.memory_space<vmem>>, vector<1x128xf32>
    %93 = vector.shape_cast %92 : vector<1x128xf32> to vector<1x1x128xf32>
    %94 = arith.mulf %90, %93 : vector<1x1x128xf32>
    %95 = arith.addf %91, %94 : vector<1x1x128xf32>
    %c0_110 = arith.constant 0 : index
    %c0_111 = arith.constant 0 : index
    %c0_112 = arith.constant 0 : index
    %96 = vector.load %arg15[%c0_110, %c0_111, %c0_112] : memref<1x1x128xf32, #tpu.memory_space<vmem>>, vector<1x1x128xf32>
    tpu.vector_store %arg15[%c0_110, %c0_111, %c0_112], %95 {strides = array<i32>} : memref<1x1x128xf32, #tpu.memory_space<vmem>>, vector<1x1x128xf32>,
    %c3_113 = arith.constant 3 : index
    %c0_114 = arith.constant 0 : index
    %c1_115 = arith.constant 1 : index
    %c0_116 = arith.constant 0 : index
    %97 = vector.load %arg14[%c3_113, %c0_114, %c1_115, %c0_116] : memref<4x3x8x128xbf16, #tpu.memory_space<vmem>>, vector<1x1x1x128xbf16>
    %98 = vector.shape_cast %97 : vector<1x1x1x128xbf16> to vector<1x1x128xbf16>
    %99 = arith.extf %98 : vector<1x1x128xbf16> to vector<1x1x128xf32>
    %c0_117 = arith.constant 0 : index
    %c0_118 = arith.constant 0 : index
    %c0_119 = arith.constant 0 : index
    %100 = vector.load %arg15[%c0_117, %c0_118, %c0_119] : memref<1x1x128xf32, #tpu.memory_space<vmem>>, vector<1x1x128xf32>
    %c8 = arith.constant 8 : index
    %c0_120 = arith.constant 0 : index
    %101 = vector.load %arg5[%c8, %c0_120] : memref<25x128xf32, #tpu.memory_space<vmem>>, vector<1x128xf32>
    %102 = vector.shape_cast %101 : vector<1x128xf32> to vector<1x1x128xf32>
    %103 = arith.mulf %99, %102 : vector<1x1x128xf32>
    %104 = arith.addf %100, %103 : vector<1x1x128xf32>
    %c0_121 = arith.constant 0 : index
    %c0_122 = arith.constant 0 : index
    %c0_123 = arith.constant 0 : index
    %105 = vector.load %arg15[%c0_121, %c0_122, %c0_123] : memref<1x1x128xf32, #tpu.memory_space<vmem>>, vector<1x1x128xf32>
    tpu.vector_store %arg15[%c0_121, %c0_122, %c0_123], %104 {strides = array<i32>} : memref<1x1x128xf32, #tpu.memory_space<vmem>>, vector<1x1x128xf32>,
    %c2_124 = arith.constant 2 : index
    %c0_125 = arith.constant 0 : index
    %c2_126 = arith.constant 2 : index
    %c0_127 = arith.constant 0 : index
    %106 = vector.load %arg14[%c2_124, %c0_125, %c2_126, %c0_127] : memref<4x3x8x128xbf16, #tpu.memory_space<vmem>>, vector<1x1x1x128xbf16>
    %107 = vector.shape_cast %106 : vector<1x1x1x128xbf16> to vector<1x1x128xbf16>
    %108 = arith.extf %107 : vector<1x1x128xbf16> to vector<1x1x128xf32>
    %c0_128 = arith.constant 0 : index
    %c0_129 = arith.constant 0 : index
    %c0_130 = arith.constant 0 : index
    %109 = vector.load %arg15[%c0_128, %c0_129, %c0_130] : memref<1x1x128xf32, #tpu.memory_space<vmem>>, vector<1x1x128xf32>
    %c9 = arith.constant 9 : index
    %c0_131 = arith.constant 0 : index
    %110 = vector.load %arg5[%c9, %c0_131] : memref<25x128xf32, #tpu.memory_space<vmem>>, vector<1x128xf32>
    %111 = vector.shape_cast %110 : vector<1x128xf32> to vector<1x1x128xf32>
    %112 = arith.mulf %108, %111 : vector<1x1x128xf32>
    %113 = arith.addf %109, %112 : vector<1x1x128xf32>
    %c0_132 = arith.constant 0 : index
    %c0_133 = arith.constant 0 : index
    %c0_134 = arith.constant 0 : index
    %114 = vector.load %arg15[%c0_132, %c0_133, %c0_134] : memref<1x1x128xf32, #tpu.memory_space<vmem>>, vector<1x1x128xf32>
    tpu.vector_store %arg15[%c0_132, %c0_133, %c0_134], %113 {strides = array<i32>} : memref<1x1x128xf32, #tpu.memory_space<vmem>>, vector<1x1x128xf32>,
    %c0_135 = arith.constant 0 : index
    %c1_136 = arith.constant 1 : index
    %c0_137 = arith.constant 0 : index
    %c0_138 = arith.constant 0 : index
    %115 = vector.load %arg14[%c0_135, %c1_136, %c0_137, %c0_138] : memref<4x3x8x128xbf16, #tpu.memory_space<vmem>>, vector<1x1x1x128xbf16>
    %116 = vector.shape_cast %115 : vector<1x1x1x128xbf16> to vector<1x1x128xbf16>
    %117 = arith.extf %116 : vector<1x1x128xbf16> to vector<1x1x128xf32>
    %c0_139 = arith.constant 0 : index
    %c0_140 = arith.constant 0 : index
    %c0_141 = arith.constant 0 : index
    %118 = vector.load %arg15[%c0_139, %c0_140, %c0_141] : memref<1x1x128xf32, #tpu.memory_space<vmem>>, vector<1x1x128xf32>
    %c10 = arith.constant 10 : index
    %c0_142 = arith.constant 0 : index
    %119 = vector.load %arg5[%c10, %c0_142] : memref<25x128xf32, #tpu.memory_space<vmem>>, vector<1x128xf32>
    %120 = vector.shape_cast %119 : vector<1x128xf32> to vector<1x1x128xf32>
    %121 = arith.mulf %117, %120 : vector<1x1x128xf32>
    %122 = arith.addf %118, %121 : vector<1x1x128xf32>
    %c0_143 = arith.constant 0 : index
    %c0_144 = arith.constant 0 : index
    %c0_145 = arith.constant 0 : index
    %123 = vector.load %arg15[%c0_143, %c0_144, %c0_145] : memref<1x1x128xf32, #tpu.memory_space<vmem>>, vector<1x1x128xf32>
    tpu.vector_store %arg15[%c0_143, %c0_144, %c0_145], %122 {strides = array<i32>} : memref<1x1x128xf32, #tpu.memory_space<vmem>>, vector<1x1x128xf32>,
    %c1_146 = arith.constant 1 : index
    %c1_147 = arith.constant 1 : index
    %c0_148 = arith.constant 0 : index
    %c0_149 = arith.constant 0 : index
    %124 = vector.load %arg14[%c1_146, %c1_147, %c0_148, %c0_149] : memref<4x3x8x128xbf16, #tpu.memory_space<vmem>>, vector<1x1x1x128xbf16>
    %125 = vector.shape_cast %124 : vector<1x1x1x128xbf16> to vector<1x1x128xbf16>
    %126 = arith.extf %125 : vector<1x1x128xbf16> to vector<1x1x128xf32>
    %c0_150 = arith.constant 0 : index
    %c0_151 = arith.constant 0 : index
    %c0_152 = arith.constant 0 : index
    %127 = vector.load %arg15[%c0_150, %c0_151, %c0_152] : memref<1x1x128xf32, #tpu.memory_space<vmem>>, vector<1x1x128xf32>
    %c11 = arith.constant 11 : index
    %c0_153 = arith.constant 0 : index
    %128 = vector.load %arg5[%c11, %c0_153] : memref<25x128xf32, #tpu.memory_space<vmem>>, vector<1x128xf32>
    %129 = vector.shape_cast %128 : vector<1x128xf32> to vector<1x1x128xf32>
    %130 = arith.mulf %126, %129 : vector<1x1x128xf32>
    %131 = arith.addf %127, %130 : vector<1x1x128xf32>
    %c0_154 = arith.constant 0 : index
    %c0_155 = arith.constant 0 : index
    %c0_156 = arith.constant 0 : index
    %132 = vector.load %arg15[%c0_154, %c0_155, %c0_156] : memref<1x1x128xf32, #tpu.memory_space<vmem>>, vector<1x1x128xf32>
    tpu.vector_store %arg15[%c0_154, %c0_155, %c0_156], %131 {strides = array<i32>} : memref<1x1x128xf32, #tpu.memory_space<vmem>>, vector<1x1x128xf32>,
    %c0_157 = arith.constant 0 : index
    %c1_158 = arith.constant 1 : index
    %c1_159 = arith.constant 1 : index
    %c0_160 = arith.constant 0 : index
    %133 = vector.load %arg14[%c0_157, %c1_158, %c1_159, %c0_160] : memref<4x3x8x128xbf16, #tpu.memory_space<vmem>>, vector<1x1x1x128xbf16>
    %134 = vector.shape_cast %133 : vector<1x1x1x128xbf16> to vector<1x1x128xbf16>
    %135 = arith.extf %134 : vector<1x1x128xbf16> to vector<1x1x128xf32>
    %c0_161 = arith.constant 0 : index
    %c0_162 = arith.constant 0 : index
    %c0_163 = arith.constant 0 : index
    %136 = vector.load %arg15[%c0_161, %c0_162, %c0_163] : memref<1x1x128xf32, #tpu.memory_space<vmem>>, vector<1x1x128xf32>
    %c12 = arith.constant 12 : index
    %c0_164 = arith.constant 0 : index
    %137 = vector.load %arg5[%c12, %c0_164] : memref<25x128xf32, #tpu.memory_space<vmem>>, vector<1x128xf32>
    %138 = vector.shape_cast %137 : vector<1x128xf32> to vector<1x1x128xf32>
    %139 = arith.mulf %135, %138 : vector<1x1x128xf32>
    %140 = arith.addf %136, %139 : vector<1x1x128xf32>
    %c0_165 = arith.constant 0 : index
    %c0_166 = arith.constant 0 : index
    %c0_167 = arith.constant 0 : index
    %141 = vector.load %arg15[%c0_165, %c0_166, %c0_167] : memref<1x1x128xf32, #tpu.memory_space<vmem>>, vector<1x1x128xf32>
    tpu.vector_store %arg15[%c0_165, %c0_166, %c0_167], %140 {strides = array<i32>} : memref<1x1x128xf32, #tpu.memory_space<vmem>>, vector<1x1x128xf32>,
    %c1_168 = arith.constant 1 : index
    %c1_169 = arith.constant 1 : index
    %c1_170 = arith.constant 1 : index
    %c0_171 = arith.constant 0 : index
    %142 = vector.load %arg14[%c1_168, %c1_169, %c1_170, %c0_171] : memref<4x3x8x128xbf16, #tpu.memory_space<vmem>>, vector<1x1x1x128xbf16>
    %143 = vector.shape_cast %142 : vector<1x1x1x128xbf16> to vector<1x1x128xbf16>
    %144 = arith.extf %143 : vector<1x1x128xbf16> to vector<1x1x128xf32>
    %c0_172 = arith.constant 0 : index
    %c0_173 = arith.constant 0 : index
    %c0_174 = arith.constant 0 : index
    %145 = vector.load %arg15[%c0_172, %c0_173, %c0_174] : memref<1x1x128xf32, #tpu.memory_space<vmem>>, vector<1x1x128xf32>
    %c13 = arith.constant 13 : index
    %c0_175 = arith.constant 0 : index
    %146 = vector.load %arg5[%c13, %c0_175] : memref<25x128xf32, #tpu.memory_space<vmem>>, vector<1x128xf32>
    %147 = vector.shape_cast %146 : vector<1x128xf32> to vector<1x1x128xf32>
    %148 = arith.mulf %144, %147 : vector<1x1x128xf32>
    %149 = arith.addf %145, %148 : vector<1x1x128xf32>
    %c0_176 = arith.constant 0 : index
    %c0_177 = arith.constant 0 : index
    %c0_178 = arith.constant 0 : index
    %150 = vector.load %arg15[%c0_176, %c0_177, %c0_178] : memref<1x1x128xf32, #tpu.memory_space<vmem>>, vector<1x1x128xf32>
    tpu.vector_store %arg15[%c0_176, %c0_177, %c0_178], %149 {strides = array<i32>} : memref<1x1x128xf32, #tpu.memory_space<vmem>>, vector<1x1x128xf32>,
    %c0_179 = arith.constant 0 : index
    %c1_180 = arith.constant 1 : index
    %c2_181 = arith.constant 2 : index
    %c0_182 = arith.constant 0 : index
    %151 = vector.load %arg14[%c0_179, %c1_180, %c2_181, %c0_182] : memref<4x3x8x128xbf16, #tpu.memory_space<vmem>>, vector<1x1x1x128xbf16>
    %152 = vector.shape_cast %151 : vector<1x1x1x128xbf16> to vector<1x1x128xbf16>
    %153 = arith.extf %152 : vector<1x1x128xbf16> to vector<1x1x128xf32>
    %c0_183 = arith.constant 0 : index
    %c0_184 = arith.constant 0 : index
    %c0_185 = arith.constant 0 : index
    %154 = vector.load %arg15[%c0_183, %c0_184, %c0_185] : memref<1x1x128xf32, #tpu.memory_space<vmem>>, vector<1x1x128xf32>
    %c14 = arith.constant 14 : index
    %c0_186 = arith.constant 0 : index
    %155 = vector.load %arg5[%c14, %c0_186] : memref<25x128xf32, #tpu.memory_space<vmem>>, vector<1x128xf32>
    %156 = vector.shape_cast %155 : vector<1x128xf32> to vector<1x1x128xf32>
    %157 = arith.mulf %153, %156 : vector<1x1x128xf32>
    %158 = arith.addf %154, %157 : vector<1x1x128xf32>
    %c0_187 = arith.constant 0 : index
    %c0_188 = arith.constant 0 : index
    %c0_189 = arith.constant 0 : index
    %159 = vector.load %arg15[%c0_187, %c0_188, %c0_189] : memref<1x1x128xf32, #tpu.memory_space<vmem>>, vector<1x1x128xf32>
    tpu.vector_store %arg15[%c0_187, %c0_188, %c0_189], %158 {strides = array<i32>} : memref<1x1x128xf32, #tpu.memory_space<vmem>>, vector<1x1x128xf32>,
    %c2_190 = arith.constant 2 : index
    %c1_191 = arith.constant 1 : index
    %c0_192 = arith.constant 0 : index
    %c0_193 = arith.constant 0 : index
    %160 = vector.load %arg14[%c2_190, %c1_191, %c0_192, %c0_193] : memref<4x3x8x128xbf16, #tpu.memory_space<vmem>>, vector<1x1x1x128xbf16>
    %161 = vector.shape_cast %160 : vector<1x1x1x128xbf16> to vector<1x1x128xbf16>
    %162 = arith.extf %161 : vector<1x1x128xbf16> to vector<1x1x128xf32>
    %c0_194 = arith.constant 0 : index
    %c0_195 = arith.constant 0 : index
    %c0_196 = arith.constant 0 : index
    %163 = vector.load %arg15[%c0_194, %c0_195, %c0_196] : memref<1x1x128xf32, #tpu.memory_space<vmem>>, vector<1x1x128xf32>
    %c15 = arith.constant 15 : index
    %c0_197 = arith.constant 0 : index
    %164 = vector.load %arg5[%c15, %c0_197] : memref<25x128xf32, #tpu.memory_space<vmem>>, vector<1x128xf32>
    %165 = vector.shape_cast %164 : vector<1x128xf32> to vector<1x1x128xf32>
    %166 = arith.mulf %162, %165 : vector<1x1x128xf32>
    %167 = arith.addf %163, %166 : vector<1x1x128xf32>
    %c0_198 = arith.constant 0 : index
    %c0_199 = arith.constant 0 : index
    %c0_200 = arith.constant 0 : index
    %168 = vector.load %arg15[%c0_198, %c0_199, %c0_200] : memref<1x1x128xf32, #tpu.memory_space<vmem>>, vector<1x1x128xf32>
    tpu.vector_store %arg15[%c0_198, %c0_199, %c0_200], %167 {strides = array<i32>} : memref<1x1x128xf32, #tpu.memory_space<vmem>>, vector<1x1x128xf32>,
    %c3_201 = arith.constant 3 : index
    %c1_202 = arith.constant 1 : index
    %c0_203 = arith.constant 0 : index
    %c0_204 = arith.constant 0 : index
    %169 = vector.load %arg14[%c3_201, %c1_202, %c0_203, %c0_204] : memref<4x3x8x128xbf16, #tpu.memory_space<vmem>>, vector<1x1x1x128xbf16>
    %170 = vector.shape_cast %169 : vector<1x1x1x128xbf16> to vector<1x1x128xbf16>
    %171 = arith.extf %170 : vector<1x1x128xbf16> to vector<1x1x128xf32>
    %c0_205 = arith.constant 0 : index
    %c0_206 = arith.constant 0 : index
    %c0_207 = arith.constant 0 : index
    %172 = vector.load %arg15[%c0_205, %c0_206, %c0_207] : memref<1x1x128xf32, #tpu.memory_space<vmem>>, vector<1x1x128xf32>
    %c16 = arith.constant 16 : index
    %c0_208 = arith.constant 0 : index
    %173 = vector.load %arg5[%c16, %c0_208] : memref<25x128xf32, #tpu.memory_space<vmem>>, vector<1x128xf32>
    %174 = vector.shape_cast %173 : vector<1x128xf32> to vector<1x1x128xf32>
    %175 = arith.mulf %171, %174 : vector<1x1x128xf32>
    %176 = arith.addf %172, %175 : vector<1x1x128xf32>
    %c0_209 = arith.constant 0 : index
    %c0_210 = arith.constant 0 : index
    %c0_211 = arith.constant 0 : index
    %177 = vector.load %arg15[%c0_209, %c0_210, %c0_211] : memref<1x1x128xf32, #tpu.memory_space<vmem>>, vector<1x1x128xf32>
    tpu.vector_store %arg15[%c0_209, %c0_210, %c0_211], %176 {strides = array<i32>} : memref<1x1x128xf32, #tpu.memory_space<vmem>>, vector<1x1x128xf32>,
    %c2_212 = arith.constant 2 : index
    %c1_213 = arith.constant 1 : index
    %c1_214 = arith.constant 1 : index
    %c0_215 = arith.constant 0 : index
    %178 = vector.load %arg14[%c2_212, %c1_213, %c1_214, %c0_215] : memref<4x3x8x128xbf16, #tpu.memory_space<vmem>>, vector<1x1x1x128xbf16>
    %179 = vector.shape_cast %178 : vector<1x1x1x128xbf16> to vector<1x1x128xbf16>
    %180 = arith.extf %179 : vector<1x1x128xbf16> to vector<1x1x128xf32>
    %c0_216 = arith.constant 0 : index
    %c0_217 = arith.constant 0 : index
    %c0_218 = arith.constant 0 : index
    %181 = vector.load %arg15[%c0_216, %c0_217, %c0_218] : memref<1x1x128xf32, #tpu.memory_space<vmem>>, vector<1x1x128xf32>
    %c17 = arith.constant 17 : index
    %c0_219 = arith.constant 0 : index
    %182 = vector.load %arg5[%c17, %c0_219] : memref<25x128xf32, #tpu.memory_space<vmem>>, vector<1x128xf32>
    %183 = vector.shape_cast %182 : vector<1x128xf32> to vector<1x1x128xf32>
    %184 = arith.mulf %180, %183 : vector<1x1x128xf32>
    %185 = arith.addf %181, %184 : vector<1x1x128xf32>
    %c0_220 = arith.constant 0 : index
    %c0_221 = arith.constant 0 : index
    %c0_222 = arith.constant 0 : index
    %186 = vector.load %arg15[%c0_220, %c0_221, %c0_222] : memref<1x1x128xf32, #tpu.memory_space<vmem>>, vector<1x1x128xf32>
    tpu.vector_store %arg15[%c0_220, %c0_221, %c0_222], %185 {strides = array<i32>} : memref<1x1x128xf32, #tpu.memory_space<vmem>>, vector<1x1x128xf32>,
    %c3_223 = arith.constant 3 : index
    %c1_224 = arith.constant 1 : index
    %c1_225 = arith.constant 1 : index
    %c0_226 = arith.constant 0 : index
    %187 = vector.load %arg14[%c3_223, %c1_224, %c1_225, %c0_226] : memref<4x3x8x128xbf16, #tpu.memory_space<vmem>>, vector<1x1x1x128xbf16>
    %188 = vector.shape_cast %187 : vector<1x1x1x128xbf16> to vector<1x1x128xbf16>
    %189 = arith.extf %188 : vector<1x1x128xbf16> to vector<1x1x128xf32>
    %c0_227 = arith.constant 0 : index
    %c0_228 = arith.constant 0 : index
    %c0_229 = arith.constant 0 : index
    %190 = vector.load %arg15[%c0_227, %c0_228, %c0_229] : memref<1x1x128xf32, #tpu.memory_space<vmem>>, vector<1x1x128xf32>
    %c18 = arith.constant 18 : index
    %c0_230 = arith.constant 0 : index
    %191 = vector.load %arg5[%c18, %c0_230] : memref<25x128xf32, #tpu.memory_space<vmem>>, vector<1x128xf32>
    %192 = vector.shape_cast %191 : vector<1x128xf32> to vector<1x1x128xf32>
    %193 = arith.mulf %189, %192 : vector<1x1x128xf32>
    %194 = arith.addf %190, %193 : vector<1x1x128xf32>
    %c0_231 = arith.constant 0 : index
    %c0_232 = arith.constant 0 : index
    %c0_233 = arith.constant 0 : index
    %195 = vector.load %arg15[%c0_231, %c0_232, %c0_233] : memref<1x1x128xf32, #tpu.memory_space<vmem>>, vector<1x1x128xf32>
    tpu.vector_store %arg15[%c0_231, %c0_232, %c0_233], %194 {strides = array<i32>} : memref<1x1x128xf32, #tpu.memory_space<vmem>>, vector<1x1x128xf32>,
    %c2_234 = arith.constant 2 : index
    %c1_235 = arith.constant 1 : index
    %c2_236 = arith.constant 2 : index
    %c0_237 = arith.constant 0 : index
    %196 = vector.load %arg14[%c2_234, %c1_235, %c2_236, %c0_237] : memref<4x3x8x128xbf16, #tpu.memory_space<vmem>>, vector<1x1x1x128xbf16>
    %197 = vector.shape_cast %196 : vector<1x1x1x128xbf16> to vector<1x1x128xbf16>
    %198 = arith.extf %197 : vector<1x1x128xbf16> to vector<1x1x128xf32>
    %c0_238 = arith.constant 0 : index
    %c0_239 = arith.constant 0 : index
    %c0_240 = arith.constant 0 : index
    %199 = vector.load %arg15[%c0_238, %c0_239, %c0_240] : memref<1x1x128xf32, #tpu.memory_space<vmem>>, vector<1x1x128xf32>
    %c19 = arith.constant 19 : index
    %c0_241 = arith.constant 0 : index
    %200 = vector.load %arg5[%c19, %c0_241] : memref<25x128xf32, #tpu.memory_space<vmem>>, vector<1x128xf32>
    %201 = vector.shape_cast %200 : vector<1x128xf32> to vector<1x1x128xf32>
    %202 = arith.mulf %198, %201 : vector<1x1x128xf32>
    %203 = arith.addf %199, %202 : vector<1x1x128xf32>
    %c0_242 = arith.constant 0 : index
    %c0_243 = arith.constant 0 : index
    %c0_244 = arith.constant 0 : index
    %204 = vector.load %arg15[%c0_242, %c0_243, %c0_244] : memref<1x1x128xf32, #tpu.memory_space<vmem>>, vector<1x1x128xf32>
    tpu.vector_store %arg15[%c0_242, %c0_243, %c0_244], %203 {strides = array<i32>} : memref<1x1x128xf32, #tpu.memory_space<vmem>>, vector<1x1x128xf32>,
    %c0_245 = arith.constant 0 : index
    %c2_246 = arith.constant 2 : index
    %c0_247 = arith.constant 0 : index
    %c0_248 = arith.constant 0 : index
    %205 = vector.load %arg14[%c0_245, %c2_246, %c0_247, %c0_248] : memref<4x3x8x128xbf16, #tpu.memory_space<vmem>>, vector<1x1x1x128xbf16>
    %206 = vector.shape_cast %205 : vector<1x1x1x128xbf16> to vector<1x1x128xbf16>
    %207 = arith.extf %206 : vector<1x1x128xbf16> to vector<1x1x128xf32>
    %c0_249 = arith.constant 0 : index
    %c0_250 = arith.constant 0 : index
    %c0_251 = arith.constant 0 : index
    %208 = vector.load %arg15[%c0_249, %c0_250, %c0_251] : memref<1x1x128xf32, #tpu.memory_space<vmem>>, vector<1x1x128xf32>
    %c20 = arith.constant 20 : index
    %c0_252 = arith.constant 0 : index
    %209 = vector.load %arg5[%c20, %c0_252] : memref<25x128xf32, #tpu.memory_space<vmem>>, vector<1x128xf32>
    %210 = vector.shape_cast %209 : vector<1x128xf32> to vector<1x1x128xf32>
    %211 = arith.mulf %207, %210 : vector<1x1x128xf32>
    %212 = arith.addf %208, %211 : vector<1x1x128xf32>
    %c0_253 = arith.constant 0 : index
    %c0_254 = arith.constant 0 : index
    %c0_255 = arith.constant 0 : index
    %213 = vector.load %arg15[%c0_253, %c0_254, %c0_255] : memref<1x1x128xf32, #tpu.memory_space<vmem>>, vector<1x1x128xf32>
    tpu.vector_store %arg15[%c0_253, %c0_254, %c0_255], %212 {strides = array<i32>} : memref<1x1x128xf32, #tpu.memory_space<vmem>>, vector<1x1x128xf32>,
    %c1_256 = arith.constant 1 : index
    %c2_257 = arith.constant 2 : index
    %c0_258 = arith.constant 0 : index
    %c0_259 = arith.constant 0 : index
    %214 = vector.load %arg14[%c1_256, %c2_257, %c0_258, %c0_259] : memref<4x3x8x128xbf16, #tpu.memory_space<vmem>>, vector<1x1x1x128xbf16>
    %215 = vector.shape_cast %214 : vector<1x1x1x128xbf16> to vector<1x1x128xbf16>
    %216 = arith.extf %215 : vector<1x1x128xbf16> to vector<1x1x128xf32>
    %c0_260 = arith.constant 0 : index
    %c0_261 = arith.constant 0 : index
    %c0_262 = arith.constant 0 : index
    %217 = vector.load %arg15[%c0_260, %c0_261, %c0_262] : memref<1x1x128xf32, #tpu.memory_space<vmem>>, vector<1x1x128xf32>
    %c21 = arith.constant 21 : index
    %c0_263 = arith.constant 0 : index
    %218 = vector.load %arg5[%c21, %c0_263] : memref<25x128xf32, #tpu.memory_space<vmem>>, vector<1x128xf32>
    %219 = vector.shape_cast %218 : vector<1x128xf32> to vector<1x1x128xf32>
    %220 = arith.mulf %216, %219 : vector<1x1x128xf32>
    %221 = arith.addf %217, %220 : vector<1x1x128xf32>
    %c0_264 = arith.constant 0 : index
    %c0_265 = arith.constant 0 : index
    %c0_266 = arith.constant 0 : index
    %222 = vector.load %arg15[%c0_264, %c0_265, %c0_266] : memref<1x1x128xf32, #tpu.memory_space<vmem>>, vector<1x1x128xf32>
    tpu.vector_store %arg15[%c0_264, %c0_265, %c0_266], %221 {strides = array<i32>} : memref<1x1x128xf32, #tpu.memory_space<vmem>>, vector<1x1x128xf32>,
    %c0_267 = arith.constant 0 : index
    %c2_268 = arith.constant 2 : index
    %c1_269 = arith.constant 1 : index
    %c0_270 = arith.constant 0 : index
    %223 = vector.load %arg14[%c0_267, %c2_268, %c1_269, %c0_270] : memref<4x3x8x128xbf16, #tpu.memory_space<vmem>>, vector<1x1x1x128xbf16>
    %224 = vector.shape_cast %223 : vector<1x1x1x128xbf16> to vector<1x1x128xbf16>
    %225 = arith.extf %224 : vector<1x1x128xbf16> to vector<1x1x128xf32>
    %c0_271 = arith.constant 0 : index
    %c0_272 = arith.constant 0 : index
    %c0_273 = arith.constant 0 : index
    %226 = vector.load %arg15[%c0_271, %c0_272, %c0_273] : memref<1x1x128xf32, #tpu.memory_space<vmem>>, vector<1x1x128xf32>
    %c22 = arith.constant 22 : index
    %c0_274 = arith.constant 0 : index
    %227 = vector.load %arg5[%c22, %c0_274] : memref<25x128xf32, #tpu.memory_space<vmem>>, vector<1x128xf32>
    %228 = vector.shape_cast %227 : vector<1x128xf32> to vector<1x1x128xf32>
    %229 = arith.mulf %225, %228 : vector<1x1x128xf32>
    %230 = arith.addf %226, %229 : vector<1x1x128xf32>
    %c0_275 = arith.constant 0 : index
    %c0_276 = arith.constant 0 : index
    %c0_277 = arith.constant 0 : index
    %231 = vector.load %arg15[%c0_275, %c0_276, %c0_277] : memref<1x1x128xf32, #tpu.memory_space<vmem>>, vector<1x1x128xf32>
    tpu.vector_store %arg15[%c0_275, %c0_276, %c0_277], %230 {strides = array<i32>} : memref<1x1x128xf32, #tpu.memory_space<vmem>>, vector<1x1x128xf32>,
    %c1_278 = arith.constant 1 : index
    %c2_279 = arith.constant 2 : index
    %c1_280 = arith.constant 1 : index
    %c0_281 = arith.constant 0 : index
    %232 = vector.load %arg14[%c1_278, %c2_279, %c1_280, %c0_281] : memref<4x3x8x128xbf16, #tpu.memory_space<vmem>>, vector<1x1x1x128xbf16>
    %233 = vector.shape_cast %232 : vector<1x1x1x128xbf16> to vector<1x1x128xbf16>
    %234 = arith.extf %233 : vector<1x1x128xbf16> to vector<1x1x128xf32>
    %c0_282 = arith.constant 0 : index
    %c0_283 = arith.constant 0 : index
    %c0_284 = arith.constant 0 : index
    %235 = vector.load %arg15[%c0_282, %c0_283, %c0_284] : memref<1x1x128xf32, #tpu.memory_space<vmem>>, vector<1x1x128xf32>
    %c23 = arith.constant 23 : index
    %c0_285 = arith.constant 0 : index
    %236 = vector.load %arg5[%c23, %c0_285] : memref<25x128xf32, #tpu.memory_space<vmem>>, vector<1x128xf32>
    %237 = vector.shape_cast %236 : vector<1x128xf32> to vector<1x1x128xf32>
    %238 = arith.mulf %234, %237 : vector<1x1x128xf32>
    %239 = arith.addf %235, %238 : vector<1x1x128xf32>
    %c0_286 = arith.constant 0 : index
    %c0_287 = arith.constant 0 : index
    %c0_288 = arith.constant 0 : index
    %240 = vector.load %arg15[%c0_286, %c0_287, %c0_288] : memref<1x1x128xf32, #tpu.memory_space<vmem>>, vector<1x1x128xf32>
    tpu.vector_store %arg15[%c0_286, %c0_287, %c0_288], %239 {strides = array<i32>} : memref<1x1x128xf32, #tpu.memory_space<vmem>>, vector<1x1x128xf32>,
    %c0_289 = arith.constant 0 : index
    %c2_290 = arith.constant 2 : index
    %c2_291 = arith.constant 2 : index
    %c0_292 = arith.constant 0 : index
    %241 = vector.load %arg14[%c0_289, %c2_290, %c2_291, %c0_292] : memref<4x3x8x128xbf16, #tpu.memory_space<vmem>>, vector<1x1x1x128xbf16>
    %242 = vector.shape_cast %241 : vector<1x1x1x128xbf16> to vector<1x1x128xbf16>
    %243 = arith.extf %242 : vector<1x1x128xbf16> to vector<1x1x128xf32>
    %c0_293 = arith.constant 0 : index
    %c0_294 = arith.constant 0 : index
    %c0_295 = arith.constant 0 : index
    %244 = vector.load %arg15[%c0_293, %c0_294, %c0_295] : memref<1x1x128xf32, #tpu.memory_space<vmem>>, vector<1x1x128xf32>
    %c24 = arith.constant 24 : index
    %c0_296 = arith.constant 0 : index
    %245 = vector.load %arg5[%c24, %c0_296] : memref<25x128xf32, #tpu.memory_space<vmem>>, vector<1x128xf32>
    %246 = vector.shape_cast %245 : vector<1x128xf32> to vector<1x1x128xf32>
    %247 = arith.mulf %243, %246 : vector<1x1x128xf32>
    %248 = arith.addf %244, %247 : vector<1x1x128xf32>
    %c0_297 = arith.constant 0 : index
    %c0_298 = arith.constant 0 : index
    %c0_299 = arith.constant 0 : index
    %249 = vector.load %arg15[%c0_297, %c0_298, %c0_299] : memref<1x1x128xf32, #tpu.memory_space<vmem>>, vector<1x1x128xf32>
    tpu.vector_store %arg15[%c0_297, %c0_298, %c0_299], %248 {strides = array<i32>} : memref<1x1x128xf32, #tpu.memory_space<vmem>>, vector<1x1x128xf32>,
    %c0_300 = arith.constant 0 : index
    %c0_301 = arith.constant 0 : index
    %c0_302 = arith.constant 0 : index
    %250 = vector.load %arg15[%c0_300, %c0_301, %c0_302] : memref<1x1x128xf32, #tpu.memory_space<vmem>>, vector<1x1x128xf32>
    %c0_303 = arith.constant 0 : index
    %c0_304 = arith.constant 0 : index
    %251 = vector.load %arg6[%c0_303, %c0_304] : memref<1x128xf32, #tpu.memory_space<vmem>>, vector<1x128xf32>
    %252 = vector.shape_cast %251 : vector<1x128xf32> to vector<1x1x128xf32>
    %253 = arith.addf %250, %252 : vector<1x1x128xf32>
    %cst_305 = arith.constant 3.000000e+00 : f32
    %254 = vector.broadcast %cst_305 : f32 to vector<1x1x128xf32>
    %255 = arith.addf %253, %254 : vector<1x1x128xf32>
    %cst_306 = arith.constant 0.000000e+00 : f32
    %cst_307 = arith.constant 6.000000e+00 : f32
    %256 = vector.broadcast %cst_306 : f32 to vector<1x1x128xf32>
    %257 = arith.maximumf %256, %255 : vector<1x1x128xf32>
    %258 = vector.broadcast %cst_307 : f32 to vector<1x1x128xf32>
    %259 = arith.minimumf %258, %257 : vector<1x1x128xf32>
    %260 = arith.mulf %253, %259 : vector<1x1x128xf32>
    %cst_308 = arith.constant 0.166666672 : f32
    %261 = vector.broadcast %cst_308 : f32 to vector<1x1x128xf32>
    %262 = arith.mulf %260, %261 : vector<1x1x128xf32>
    %cst_309 = arith.constant dense<0.000000e+00> : vector<1x128xf32>
    %263 = vector.multi_reduction <add>, %262, %cst_309 [0] : vector<1x1x128xf32> to vector<1x128xf32>
    %cst_310 = arith.constant dense<0.000000e+00> : vector<128xf32>
    %264 = vector.multi_reduction <add>, %263, %cst_310 [0] : vector<1x128xf32> to vector<128xf32>
    %265 = vector.shape_cast %264 : vector<128xf32> to vector<1x128xf32>
    %cst_311 = arith.constant 1.000000e+00 : f32
    %266 = vector.broadcast %cst_311 : f32 to vector<1x128xf32>
    %267 = arith.mulf %265, %266 : vector<1x128xf32>
    %268 = arith.truncf %267 : vector<1x128xf32> to vector<1x128xbf16>
    %c0_312 = arith.constant 0 : index
    %c0_313 = arith.constant 0 : index
    %269 = vector.load %arg7[%c0_312, %c0_313] : memref<128x128xbf16, #tpu.memory_space<vmem>>, vector<128x128xbf16>
    %cst_314 = arith.constant dense<0.000000e+00> : vector<1x128xf32>
    %270 = tpu.matmul %268, %269, %cst_314 {dimension_numbers = #tpu.dot_dimension_numbers<[1], [0], [0], [1], [0, 0, 1, 1], [], []>} : vector<1x128xbf16>, vector<128x128xbf16>, vector<1x128xf32> -> vector<1x128xf32>
    %c0_315 = arith.constant 0 : index
    %c0_316 = arith.constant 0 : index
    %271 = vector.load %arg8[%c0_315, %c0_316] : memref<1x128xf32, #tpu.memory_space<vmem>>, vector<1x128xf32>
    %272 = arith.addf %270, %271 : vector<1x128xf32>
    %cst_317 = arith.constant 0.000000e+00 : f32
    %273 = vector.broadcast %cst_317 : f32 to vector<1x128xf32>
    %274 = arith.maximumf %272, %273 : vector<1x128xf32>
    %275 = arith.truncf %274 : vector<1x128xf32> to vector<1x128xbf16>
    %c0_318 = arith.constant 0 : index
    %c0_319 = arith.constant 0 : index
    %276 = vector.load %arg9[%c0_318, %c0_319] : memref<128x128xbf16, #tpu.memory_space<vmem>>, vector<128x128xbf16>
    %cst_320 = arith.constant dense<0.000000e+00> : vector<1x128xf32>
    %277 = tpu.matmul %275, %276, %cst_320 {dimension_numbers = #tpu.dot_dimension_numbers<[1], [0], [0], [1], [0, 0, 1, 1], [], []>} : vector<1x128xbf16>, vector<128x128xbf16>, vector<1x128xf32> -> vector<1x128xf32>
    %c0_321 = arith.constant 0 : index
    %c0_322 = arith.constant 0 : index
    %278 = vector.load %arg10[%c0_321, %c0_322] : memref<1x128xf32, #tpu.memory_space<vmem>>, vector<1x128xf32>
    %279 = arith.addf %277, %278 : vector<1x128xf32>
    %cst_323 = arith.constant 3.000000e+00 : f32
    %280 = vector.broadcast %cst_323 : f32 to vector<1x128xf32>
    %281 = arith.addf %279, %280 : vector<1x128xf32>
    %cst_324 = arith.constant 0.000000e+00 : f32
    %cst_325 = arith.constant 6.000000e+00 : f32
    %282 = vector.broadcast %cst_324 : f32 to vector<1x128xf32>
    %283 = arith.maximumf %282, %281 : vector<1x128xf32>
    %284 = vector.broadcast %cst_325 : f32 to vector<1x128xf32>
    %285 = arith.minimumf %284, %283 : vector<1x128xf32>
    %cst_326 = arith.constant 0.166666672 : f32
    %286 = vector.broadcast %cst_326 : f32 to vector<1x128xf32>
    %287 = arith.mulf %285, %286 : vector<1x128xf32>
    %288 = vector.shape_cast %287 : vector<1x128xf32> to vector<1x1x128xf32>
    %289 = arith.mulf %262, %288 : vector<1x1x128xf32>
    %290 = arith.truncf %289 : vector<1x1x128xf32> to vector<1x1x128xbf16>
    %291 = vector.shape_cast %290 : vector<1x1x128xbf16> to vector<1x128xbf16>
    %c0_327 = arith.constant 0 : index
    %c0_328 = arith.constant 0 : index
    %292 = vector.load %arg11[%c0_327, %c0_328] : memref<128x128xbf16, #tpu.memory_space<vmem>>, vector<128x128xbf16>
    %cst_329 = arith.constant dense<0.000000e+00> : vector<1x128xf32>
    %293 = tpu.matmul %291, %292, %cst_329 {dimension_numbers = #tpu.dot_dimension_numbers<[1], [0], [0], [1], [0, 0, 1, 1], [], []>} : vector<1x128xbf16>, vector<128x128xbf16>, vector<1x128xf32> -> vector<1x128xf32>
    %c0_330 = arith.constant 0 : index
    %c0_331 = arith.constant 0 : index
    %294 = vector.load %arg12[%c0_330, %c0_331] : memref<1x128xf32, #tpu.memory_space<vmem>>, vector<1x128xf32>
    %295 = arith.addf %293, %294 : vector<1x128xf32>
    %cst_332 = arith.constant 3.000000e+00 : f32
    %296 = vector.broadcast %cst_332 : f32 to vector<1x128xf32>
    %297 = arith.addf %295, %296 : vector<1x128xf32>
    %cst_333 = arith.constant 0.000000e+00 : f32
    %cst_334 = arith.constant 6.000000e+00 : f32
    %298 = vector.broadcast %cst_333 : f32 to vector<1x128xf32>
    %299 = arith.maximumf %298, %297 : vector<1x128xf32>
    %300 = vector.broadcast %cst_334 : f32 to vector<1x128xf32>
    %301 = arith.minimumf %300, %299 : vector<1x128xf32>
    %302 = arith.mulf %295, %301 : vector<1x128xf32>
    %cst_335 = arith.constant 0.166666672 : f32
    %303 = vector.broadcast %cst_335 : f32 to vector<1x128xf32>
    %304 = arith.mulf %302, %303 : vector<1x128xf32>
    %305 = vector.shape_cast %304 : vector<1x128xf32> to vector<1x1x128xf32>
    %306 = arith.truncf %305 : vector<1x1x128xf32> to vector<1x1x128xbf16>
    %c0_336 = arith.constant 0 : index
    %c0_337 = arith.constant 0 : index
    %c0_338 = arith.constant 0 : index
    %c0_339 = arith.constant 0 : index
    %307 = vector.load %arg13[%c0_336, %c0_337, %c0_338, %c0_339] : memref<1x1x1x128xbf16, #tpu.memory_space<vmem>>, vector<1x1x1x128xbf16>
    %308 = vector.shape_cast %307 : vector<1x1x1x128xbf16> to vector<1x1x128xbf16>
    %309 = vector.shape_cast %306 : vector<1x1x128xbf16> to vector<1x1x1x128xbf16>
    tpu.vector_store %arg13[%c0_336, %c0_337, %c0_338, %c0_339], %309 {strides = array<i32>} : memref<1x1x1x128xbf16, #tpu.memory_space<vmem>>, vector<1x1x1x128xbf16>,
    return
  }
  func.func @transform_0(%arg0: i32) -> (i32, i32, i32, i32, i32) {
    %c0_i32 = arith.constant 0 : i32
    %c0_i32_0 = arith.constant 0 : i32
    %c0_i32_1 = arith.constant 0 : i32
    %c0_i32_2 = arith.constant 0 : i32
    %c0_i32_3 = arith.constant 0 : i32
    return %arg0, %c0_i32, %c0_i32_0, %c0_i32_1, %c0_i32_2 : i32, i32, i32, i32, i32
  }
  func.func @transform_1(%arg0: i32) -> (i32, i32, i32, i32) {
    %c0_i32 = arith.constant 0 : i32
    %c0_i32_0 = arith.constant 0 : i32
    %c0_i32_1 = arith.constant 0 : i32
    %c0_i32_2 = arith.constant 0 : i32
    %c0_i32_3 = arith.constant 0 : i32
    return %c0_i32, %c0_i32_0, %c0_i32_1, %c0_i32_2 : i32, i32, i32, i32
  }
  func.func @transform_2(%arg0: i32) -> (i32, i32) {
    %c0_i32 = arith.constant 0 : i32
    %c0_i32_0 = arith.constant 0 : i32
    %c0_i32_1 = arith.constant 0 : i32
    return %c0_i32, %c0_i32_0 : i32, i32
  }
  func.func @transform_3(%arg0: i32) -> (i32, i32) {
    %c0_i32 = arith.constant 0 : i32
    %c0_i32_0 = arith.constant 0 : i32
    %c0_i32_1 = arith.constant 0 : i32
    return %c0_i32, %c0_i32_0 : i32, i32
  }
  func.func @transform_4(%arg0: i32) -> (i32, i32) {
    %c0_i32 = arith.constant 0 : i32
    %c0_i32_0 = arith.constant 0 : i32
    %c0_i32_1 = arith.constant 0 : i32
    return %c0_i32, %c0_i32_0 : i32, i32
  }
  func.func @transform_5(%arg0: i32) -> (i32, i32) {
    %c0_i32 = arith.constant 0 : i32
    %c0_i32_0 = arith.constant 0 : i32
    %c0_i32_1 = arith.constant 0 : i32
    return %c0_i32, %c0_i32_0 : i32, i32
  }
  func.func @transform_6(%arg0: i32) -> (i32, i32) {
    %c0_i32 = arith.constant 0 : i32
    %c0_i32_0 = arith.constant 0 : i32
    %c0_i32_1 = arith.constant 0 : i32
    return %c0_i32, %c0_i32_0 : i32, i32
  }
  func.func @transform_7(%arg0: i32) -> (i32, i32) {
    %c0_i32 = arith.constant 0 : i32
    %c0_i32_0 = arith.constant 0 : i32
    %c0_i32_1 = arith.constant 0 : i32
    return %c0_i32, %c0_i32_0 : i32, i32
  }
  func.func @transform_8(%arg0: i32) -> (i32, i32) {
    %c0_i32 = arith.constant 0 : i32
    %c0_i32_0 = arith.constant 0 : i32
    %c0_i32_1 = arith.constant 0 : i32
    return %c0_i32, %c0_i32_0 : i32, i32
  }
  func.func @transform_9(%arg0: i32) -> (i32, i32) {
    %c0_i32 = arith.constant 0 : i32
    %c0_i32_0 = arith.constant 0 : i32
    %c0_i32_1 = arith.constant 0 : i32
    return %c0_i32, %c0_i32_0 : i32, i32
  }
  func.func @transform_10(%arg0: i32) -> (i32, i32) {
    %c0_i32 = arith.constant 0 : i32
    %c0_i32_0 = arith.constant 0 : i32
    %c0_i32_1 = arith.constant 0 : i32
    return %c0_i32, %c0_i32_0 : i32, i32
  }
  func.func @transform_11(%arg0: i32) -> (i32, i32) {
    %c0_i32 = arith.constant 0 : i32
    %c0_i32_0 = arith.constant 0 : i32
    %c0_i32_1 = arith.constant 0 : i32
    return %c0_i32, %c0_i32_0 : i32, i32
  }
  func.func @transform_12(%arg0: i32) -> (i32, i32, i32, i32) {
    %c0_i32 = arith.constant 0 : i32
    %c0_i32_0 = arith.constant 0 : i32
    %c0_i32_1 = arith.constant 0 : i32
    %c0_i32_2 = arith.constant 0 : i32
    return %arg0, %c0_i32, %c0_i32_0, %c0_i32_1 : i32, i32, i32, i32
  }
}

module attributes {stable_mosaic.version = 11 : i64} {
  func.func @_head_kernel(%arg0: memref<2x1x1x128xbf16, #tpu.memory_space<vmem>>, %arg1: memref<128x256xbf16, #tpu.memory_space<vmem>>, %arg2: memref<1x256xf32, #tpu.memory_space<vmem>>, %arg3: memref<256x128xbf16, #tpu.memory_space<vmem>>, %arg4: memref<1x128xf32, #tpu.memory_space<vmem>>, %arg5: memref<128x128xbf16, #tpu.memory_space<vmem>>, %arg6: memref<1x128xf32, #tpu.memory_space<vmem>>, %arg7: memref<2x128xf32, #tpu.memory_space<vmem>>) attributes {dimension_semantics = [], scalar_prefetch = 0 : i64, scratch_operands = 0 : i64, tpu.core_type = #tpu.core_type<tc>} {
    %c0 = arith.constant 0 : index
    %c0_0 = arith.constant 0 : index
    %c0_1 = arith.constant 0 : index
    %c0_2 = arith.constant 0 : index
    %0 = vector.load %arg0[%c0, %c0_0, %c0_1, %c0_2] : memref<2x1x1x128xbf16, #tpu.memory_space<vmem>>, vector<2x1x1x128xbf16>
    %1 = vector.shape_cast %0 : vector<2x1x1x128xbf16> to vector<2x128xbf16>
    %c0_3 = arith.constant 0 : index
    %c0_4 = arith.constant 0 : index
    %2 = vector.load %arg1[%c0_3, %c0_4] : memref<128x256xbf16, #tpu.memory_space<vmem>>, vector<128x256xbf16>
    %cst = arith.constant dense<0.000000e+00> : vector<2x256xf32>
    %3 = tpu.matmul %1, %2, %cst {dimension_numbers = #tpu.dot_dimension_numbers<[1], [0], [0], [1], [0, 0, 1, 1], [], []>} : vector<2x128xbf16>, vector<128x256xbf16>, vector<2x256xf32> -> vector<2x256xf32>
    %c0_5 = arith.constant 0 : index
    %c0_6 = arith.constant 0 : index
    %4 = vector.load %arg2[%c0_5, %c0_6] : memref<1x256xf32, #tpu.memory_space<vmem>>, vector<1x256xf32>
    %5 = vector.broadcast %4 : vector<1x256xf32> to vector<2x256xf32>
    %6 = arith.addf %3, %5 : vector<2x256xf32>
    %cst_7 = arith.constant 3.000000e+00 : f32
    %7 = vector.broadcast %cst_7 : f32 to vector<2x256xf32>
    %8 = arith.addf %6, %7 : vector<2x256xf32>
    %cst_8 = arith.constant 0.000000e+00 : f32
    %cst_9 = arith.constant 6.000000e+00 : f32
    %9 = vector.broadcast %cst_8 : f32 to vector<2x256xf32>
    %10 = arith.maximumf %9, %8 : vector<2x256xf32>
    %11 = vector.broadcast %cst_9 : f32 to vector<2x256xf32>
    %12 = arith.minimumf %11, %10 : vector<2x256xf32>
    %13 = arith.mulf %6, %12 : vector<2x256xf32>
    %cst_10 = arith.constant 0.166666672 : f32
    %14 = vector.broadcast %cst_10 : f32 to vector<2x256xf32>
    %15 = arith.mulf %13, %14 : vector<2x256xf32>
    %16 = vector.shape_cast %15 : vector<2x256xf32> to vector<2x1x256xf32>
    %cst_11 = arith.constant dense<0.000000e+00> : vector<2x256xf32>
    %17 = vector.multi_reduction <add>, %16, %cst_11 [1] : vector<2x1x256xf32> to vector<2x256xf32>
    %cst_12 = arith.constant 1.000000e+00 : f32
    %18 = vector.broadcast %cst_12 : f32 to vector<2x256xf32>
    %19 = arith.divf %17, %18 : vector<2x256xf32>
    %20 = arith.truncf %19 : vector<2x256xf32> to vector<2x256xbf16>
    %c0_13 = arith.constant 0 : index
    %c0_14 = arith.constant 0 : index
    %21 = vector.load %arg3[%c0_13, %c0_14] : memref<256x128xbf16, #tpu.memory_space<vmem>>, vector<256x128xbf16>
    %cst_15 = arith.constant dense<0.000000e+00> : vector<2x128xf32>
    %22 = tpu.matmul %20, %21, %cst_15 {dimension_numbers = #tpu.dot_dimension_numbers<[1], [0], [0], [1], [0, 0, 1, 1], [], []>} : vector<2x256xbf16>, vector<256x128xbf16>, vector<2x128xf32> -> vector<2x128xf32>
    %c0_16 = arith.constant 0 : index
    %c0_17 = arith.constant 0 : index
    %23 = vector.load %arg4[%c0_16, %c0_17] : memref<1x128xf32, #tpu.memory_space<vmem>>, vector<1x128xf32>
    %24 = vector.broadcast %23 : vector<1x128xf32> to vector<2x128xf32>
    %25 = arith.addf %22, %24 : vector<2x128xf32>
    %cst_18 = arith.constant 3.000000e+00 : f32
    %26 = vector.broadcast %cst_18 : f32 to vector<2x128xf32>
    %27 = arith.addf %25, %26 : vector<2x128xf32>
    %cst_19 = arith.constant 0.000000e+00 : f32
    %cst_20 = arith.constant 6.000000e+00 : f32
    %28 = vector.broadcast %cst_19 : f32 to vector<2x128xf32>
    %29 = arith.maximumf %28, %27 : vector<2x128xf32>
    %30 = vector.broadcast %cst_20 : f32 to vector<2x128xf32>
    %31 = arith.minimumf %30, %29 : vector<2x128xf32>
    %32 = arith.mulf %25, %31 : vector<2x128xf32>
    %cst_21 = arith.constant 0.166666672 : f32
    %33 = vector.broadcast %cst_21 : f32 to vector<2x128xf32>
    %34 = arith.mulf %32, %33 : vector<2x128xf32>
    %35 = arith.truncf %34 : vector<2x128xf32> to vector<2x128xbf16>
    %c0_22 = arith.constant 0 : index
    %c0_23 = arith.constant 0 : index
    %36 = vector.load %arg5[%c0_22, %c0_23] : memref<128x128xbf16, #tpu.memory_space<vmem>>, vector<128x128xbf16>
    %cst_24 = arith.constant dense<0.000000e+00> : vector<2x128xf32>
    %37 = tpu.matmul %35, %36, %cst_24 {dimension_numbers = #tpu.dot_dimension_numbers<[1], [0], [0], [1], [0, 0, 1, 1], [], []>} : vector<2x128xbf16>, vector<128x128xbf16>, vector<2x128xf32> -> vector<2x128xf32>
    %c0_25 = arith.constant 0 : index
    %c0_26 = arith.constant 0 : index
    %38 = vector.load %arg6[%c0_25, %c0_26] : memref<1x128xf32, #tpu.memory_space<vmem>>, vector<1x128xf32>
    %39 = vector.broadcast %38 : vector<1x128xf32> to vector<2x128xf32>
    %40 = arith.addf %37, %39 : vector<2x128xf32>
    %c0_27 = arith.constant 0 : index
    %c0_28 = arith.constant 0 : index
    %41 = vector.load %arg7[%c0_27, %c0_28] : memref<2x128xf32, #tpu.memory_space<vmem>>, vector<2x128xf32>
    tpu.vector_store %arg7[%c0_27, %c0_28], %40 {strides = array<i32>} : memref<2x128xf32, #tpu.memory_space<vmem>>, vector<2x128xf32>,
    return
  }
}

</mosaic_0001>

<bundles_post_ra>
// kernel: mobilenet_v3_forward.6
= control target key start
LH: loop header
LB: loop body
LE: loop exit
PB: predicated region body
PF: predicated region fallthrough
CT: control target
= control target key end

     0   :  { %s2148_s12 = smov 0   ;;  %s2415_s0 = inlined_call_operand.vmem [shape: bf16[2,4,9,16,8], index: 0, kind: input, shape index: {}]   ;;  %s2416_s1 = inlined_call_operand.vmem [shape: bf16[9,8,128], index: 1, kind: input, shape index: {}]   ;;  %s2417_s2 = inlined_call_operand.vmem [shape: f32[1,128], index: 2, kind: input, shape index: {}]   ;;  %s2418_s3 = inlined_call_operand.vmem [shape: bf16[2,8,8,128], index: 3, kind: output, shape index: {}]  }
   0x1 LB: > { %s1689_s13 = sadd.s32 4294967295, %s2126_s12   ;;  %p1693_p0 = scmp.ge.s32.totalorder %s2126_s12, 1  ;;  %s2126_s12 = sphi %s2148_s12, %s13_s12  }
   0x2   : > { %p137_p1 = scmp.lt.s32.totalorder %s2126_s12, 3 }
   0x4   : > { %p138_p2 = pnand %p1693_p0, %p137_p1 }
   0x5   : > { %v1705_v0 = vld [vmem:[%s2416_s1 + $0x4] sm:$0xf] (!%p138_p2)  ;;  %vm225_vm0 = vcmask (!%p138_p2), 1043456   ;;  %v2162_v1 = vld [vmem:[%s2416_s1 + $0x10] sm:$0xf] (!%p138_p2)  ;;  %p161_p3 = scmp.lt.s32.totalorder (!%p138_p2), %s1689_s13, 1 }
   0x6   : > { %141 = sbr.rel (%p138_p2) target bundleno = 326 (0x146), region = 32  ;;  %2077 = vmatprep.subr.msk.bf16.mxu1 (!%p138_p2), %vm225_vm0, %v1705_v0  ;;  %2081 = vmatprep.subr.msk.bf16.mxu0 (!%p138_p2), %vm225_vm0, %v2162_v1  ;;  %v227_v2 = vsel (!%p138_p2), %vm225_vm0, %v1705_v0, 0  ;;  %v2170_v3 = vsel (!%p138_p2), %vm225_vm0, %v2162_v1, 0  ;;  %v180_v4 = vld [vmem:[%s2416_s1] sm:$0xf] (!%p138_p2)  ;;  %vm212_vm1 = vcmask (!%p138_p2), 64512  }
   0x7   : > { %1922 = vmatpush3.bf16.msra.mxu1 (!%p138_p2), %v227_v2  ;;  %1962 = vmatpush3.bf16.msra.mxu0 (!%p138_p2), %v2170_v3  ;;  %v1781_v5 = vld [vmem:[%s2416_s1 + $0x14] sm:$0xf] (!%p138_p2)  ;;  %v327_v6 = vsel (!%p138_p2), %vm225_vm0, %v180_v4, 0  ;;  %v1798_v9 = vld [vmem:[%s2416_s1 + $0x18] sm:$0xf] (!%p138_p2) }
   0x8   : > { %2078 = vmatprep.subr.msk.bf16.mxu1 (!%p138_p2), %vm225_vm0, %v180_v4  ;;  %2083 = vmatprep.subr.msk.bf16.mxu0 (!%p138_p2), %vm225_vm0, %v1781_v5  ;;  %v1020_v7 = vsel (!%p138_p2), %vm225_vm0, %v1781_v5, 0  ;;  %v1722_v10 = vld [vmem:[%s2416_s1 + $0x8] sm:$0xf] (!%p138_p2)  ;;  %vm410_vm2 = vsmask.f32 (!%p138_p2), 3328  ;;  %v2207_v15 = vsel (!%p138_p2), %vm225_vm0, %v1798_v9, 0 }
   0x9   : > { %vm411_vm3 = vsmask.f32 (!%p138_p2), 7440  ;;  %v2210_v16 = vsel (!%p138_p2), %vm225_vm0, %v1722_v10, 0 }
   0xa   : > { %vm2227_vm4 = vmor (!%p138_p2), %vm410_vm2, %vm411_vm3 }
   0xd   : > { %s2422_s13 = smov (!%p161_p3, %s1689_s13), 1 }
   0xe   : > { %s2087_s22 = smul.u32 288, %s2422_s13  ;;  %s1852_s11 = sshll.u32 %s2422_s13, 5 }
   0xf   : > { %s2406_s16 = scalar_lea.vmem %s2418_s3, %s1852_s11 }
  0x10   : > { %s2187_s25 = scalar_lea.vmem %s2415_s0, %s2087_s22 }
  0x11   : > { %v2096_v8 = vld [vmem:[%s2187_s25 + $0x48] ss:$8 sps:$4 sm:$0xff]   ;;  %v2097_v11 = vld [vmem:[%s2187_s25 + $0xd8] ss:$8 sps:$4 sm:$0xff]   ;;  %v1766_v19 = vld [vmem:[%s2187_s25 + $0x94] sm:$0x1] }
  0x12   : > { %1923 = vmatprep.mubr.msk.bf16.mxu1 %vm212_vm1, %v2096_v8  ;;  %v2098_v12 = vld [vmem:[%s2187_s25 + $0x58] ss:$8 sps:$4 sm:$0xff]   ;;  %1963 = vmatprep.mubr.msk.bf16.mxu0 %vm212_vm1, %v2097_v11  ;;  %v2099_v13 = vld [vmem:[%s2187_s25 + $0xe8] ss:$8 sps:$4 sm:$0xff]   ;;  %v1768_v21 = vld [vmem:[%s2187_s25 + $0x9c] sm:$0x1] }
  0x13   : > { %1924 = vmatmul.mubr.msk.bf16.vlgmr.msra.gmra.mrb[0].mxu1 %vm212_vm1, %v2098_v12  ;;  %v2100_v14 = vld [vmem:[%s2187_s25 + $0x68] ss:$8 sps:$4 sm:$0xff]   ;;  %1964 = vmatmul.mubr.msk.bf16.vlgmr.msra.gmra.mrb[0].mxu0 %vm212_vm1, %v2099_v13  ;;  %v2101_v17 = vld [vmem:[%s2187_s25 + $0x78] ss:$8 sps:$4 sm:$0xff]   ;;  %v891_v24 = vshll.u32 %v1766_v19, 16  ;;  %v905_v27 = vshll.u32 %v1768_v21, 16 }
  0x14   : > { %1932 = vmatpush3.bf16.msra.mxu1 %v327_v6  ;;  %1972 = vmatpush3.bf16.msra.mxu0 %v1020_v7  ;;  %v1765_v18 = vld [vmem:[%s2187_s25 + $0x90] sm:$0xf]  ;;  %v1767_v20 = vld [vmem:[%s2187_s25 + $0x98] sm:$0xf]  ;;  %v1769_v28 = vld [vmem:[%s2187_s25 + $0xa0] sm:$0xf] }
  0x15   : > { %1927 = vmatprep.mubr.msk.bf16.mxu1 %vm212_vm1, %v2100_v14  ;;  %v882_v22 = vshrl.u32 %v1765_v18, 16  ;;  %v885_v23 = vshll.u32 %v1765_v18, 16  ;;  %v896_v25 = vshrl.u32 %v1767_v20, 16  ;;  %2084 = vmatprep.subr.msk.bf16.mxu0 %vm225_vm0, %v1798_v9  ;;  %v899_v26 = vshll.u32 %v1767_v20, 16  ;;  %v1770_v29 = vld [vmem:[%s2187_s25 + $0xa4] sm:$0x1] }
  0x16   : > { %2079 = vmatprep.subr.msk.bf16.mxu1 %vm225_vm0, %v1722_v10  ;;  %v893_v32 = vrot.slane %v891_v24, 5  ;;  %v1771_v34 = vld [vmem:[%s2187_s25 + $0xa8] sm:$0xf]  ;;  %v907_v36 = vrot.slane %v905_v27, 5  ;;  %v1772_v37 = vld [vmem:[%s2187_s25 + $0xac] sm:$0x1] }
  0x17   : > { %v884_v30 = vrot.slane %v882_v22, 4  ;;  %v887_v31 = vrot.slane %v885_v23, 5  ;;  %v898_v33 = vrot.slane %v896_v25, 4  ;;  %v901_v35 = vrot.slane %v899_v26, 5  ;;  %v2102_v53 = vld [vmem:[%s2187_s25] ss:$8 sps:$4 sm:$0xff]  }
  0x18   : > { %v910_v38 = vshrl.u32 %v1769_v28, 16  ;;  %v913_v39 = vshll.u32 %v1769_v28, 16  ;;  %v919_v41 = vshll.u32 %v1770_v29, 16  ;;  %v924_v42 = vshrl.u32 %v1771_v34, 16  ;;  %v2103_v59 = vld [vmem:[%s2187_s25 + $0x10] ss:$8 sps:$4 sm:$0xff]  }
  0x19   : > { %v888_v40 = vor.u32 %v887_v31, %v884_v30  ;;  %v927_v43 = vshll.u32 %v1771_v34, 16  ;;  %v902_v45 = vor.u32 %v901_v35, %v898_v33  ;;  %v933_v48 = vshll.u32 %v1772_v37, 16  ;;  %v1773_v60 = vld [vmem:[%s2187_s25 + $0xb0] sm:$0xf]  ;;  %v1774_v61 = vld [vmem:[%s2187_s25 + $0xb4] sm:$0x1] }
  0x1a   : > { %v912_v46 = vrot.slane %v910_v38, 4  ;;  %v915_v47 = vrot.slane %v913_v39, 5  ;;  %v921_v50 = vrot.slane %v919_v41, 5  ;;  %v926_v51 = vrot.slane %v924_v42, 4  ;;  %v1775_v0 = vld [vmem:[%s2187_s25 + $0xb8] sm:$0xf] }
  0x1b   : > { %1928 = vmatmul.mubr.msk.bf16.gmra.mrb[4].mxu1 %vm212_vm1, %v2101_v17  ;;  %v889_v49 = vrot.slane %v888_v40, 4  ;;  %v929_v52 = vrot.slane %v927_v43, 5  ;;  %v903_v54 = vrot.slane %v902_v45, 4  ;;  %v935_v56 = vrot.slane %v933_v48, 5  ;;  %v1776_v2 = vld [vmem:[%s2187_s25 + $0xbc] sm:$0x1] }
  0x1c   : > { %v916_v55 = vor.u32 %v915_v47, %v912_v46  ;;  %1933 = vmatprep.mubr.msk.bf16.mxu1 %vm212_vm1, %v2102_v53  ;;  %v938_v4 = vshrl.u32 %v1773_v60, 16  ;;  %v941_v7 = vshll.u32 %v1773_v60, 16  ;;  %v947_v8 = vshll.u32 %v1774_v61, 16  ;;  %v1777_v9 = vld [vmem:[%s2187_s25 + $0xc0] sm:$0xf] }
  0x1d   : > { %v894_v57 = vsel %vm2227_vm4, %v889_v49, %v893_v32  ;;  %v930_v58 = vor.u32 %v929_v52, %v926_v51  ;;  %v908_v62 = vsel %vm2227_vm4, %v903_v54, %v907_v36  ;;  %v2246_v10 = vld [vmem:[%s2416_s1 + $0xc] sm:$0xf]  ;;  %v952_v13 = vshrl.u32 %v1775_v0, 16  ;;  %v1778_v17 = vld [vmem:[%s2187_s25 + $0xc4] sm:$0x1] }
  0x1e   : > { %v917_v63 = vrot.slane %v916_v55, 4  ;;  %v1782_v5 = vcombine.low %v894_v57, %v908_v62  ;;  %v940_v12 = vrot.slane %v938_v4, 4  ;;  %v955_v14 = vshll.u32 %v1775_v0, 16  ;;  %v1779_v22 = vld [vmem:[%s2187_s25 + $0xc8] sm:$0xf] }
  0x1f   : > { %v931_v6 = vrot.slane %v930_v58, 4  ;;  %v943_v19 = vrot.slane %v941_v7, 5  ;;  %v949_v20 = vrot.slane %v947_v8, 5  ;;  %v961_v21 = vshll.u32 %v1776_v2, 16  ;;  %v2258_v23 = vld [vmem:[%s2416_s1 + $0x1c] sm:$0xf] }
  0x20   : > { %v922_v11 = vsel %vm2227_vm4, %v917_v63, %v921_v50  ;;  %1973 = vmatprep.mubr.msk.bf16.mxu0 %vm212_vm1, %v1782_v5  ;;  %v954_v25 = vrot.slane %v952_v13, 4  ;;  %v957_v26 = vrot.slane %v955_v14, 5  ;;  %v1780_v27 = vld [vmem:[%s2187_s25 + $0xcc] sm:$0x1]  ;;  %v966_v28 = vshrl.u32 %v1777_v9, 16 }
  0x21   : > { %v936_v18 = vsel %vm2227_vm4, %v931_v6, %v935_v56  ;;  %v944_v29 = vor.u32 %v943_v19, %v940_v12  ;;  %v963_v30 = vrot.slane %v961_v21, 5  ;;  %v969_v31 = vshll.u32 %v1777_v9, 16  ;;  %v2106_v53 = vld [vmem:[%s2187_s25 + $0x8] ss:$8 sps:$4 sm:$0xff]   ;;  %v394_v54 = vld [vmem:[%s2187_s25] sm:$0xf] }
  0x22   : > { %v1783_v24 = vcombine.low %v922_v11, %v936_v18  ;;  %v975_v32 = vshll.u32 %v1778_v17, 16  ;;  %v958_v33 = vor.u32 %v957_v26, %v954_v25  ;;  %v968_v34 = vrot.slane %v966_v28, 4  ;;  %v395_v56 = vld [vmem:[%s2187_s25 + $0x4] sm:$0x1]  ;;  %v396_v57 = vld [vmem:[%s2187_s25 + $0x8] sm:$0xf] }
  0x23   : > { %1934 = vmatmul.mubr.msk.bf16.vlgmr.msra.gmra.mrb[0].mxu1 %vm212_vm1, %v2103_v59  ;;  %v980_v35 = vshrl.u32 %v1779_v22, 16  ;;  %v983_v36 = vshll.u32 %v1779_v22, 16  ;;  %v945_v37 = vrot.slane %v944_v29, 4  ;;  %v971_v38 = vrot.slane %v969_v31, 5  ;;  %v397_v58 = vld [vmem:[%s2187_s25 + $0xc] sm:$0x1] }
  0x24   : > { %1942 = vmatpush3.bf16.msra.mxu1 %v2210_v16  ;;  %1974 = vmatmul.mubr.msk.bf16.vlgmr.msra.gmra.mrb[0].mxu0 %vm212_vm1, %v1783_v24  ;;  %v989_v39 = vshll.u32 %v1780_v27, 16  ;;  %v2104_v16 = vld [vmem:[%s2187_s25 + $0x20] ss:$8 sps:$4 sm:$0xff]   ;;  %v959_v40 = vrot.slane %v958_v33, 4  ;;  %v977_v46 = vrot.slane %v975_v32, 5  ;;  %v414_v60 = vshrl.u32 %v394_v54, 16 }
  0x25   : > { %2080 = vmatprep.subr.msk.bf16.mxu1 %vm225_vm0, %v2246_v10  ;;  %1982 = vmatpush3.bf16.msra.mxu0 %v2207_v15  ;;  %v982_v41 = vrot.slane %v980_v35, 4  ;;  %v985_v42 = vrot.slane %v983_v36, 5  ;;  %v950_v43 = vsel %vm2227_vm4, %v945_v37, %v949_v20  ;;  %v972_v45 = vor.u32 %v971_v38, %v968_v34  ;;  %v2105_v15 = vld [vmem:[%s2187_s25 + $0x30] ss:$8 sps:$4 sm:$0xff]   ;;  %v399_v6 = vld [vmem:[%s2187_s25 + $0x14] sm:$0x1] }
  0x26   : > { %2085 = vmatprep.subr.msk.bf16.mxu0 %vm225_vm0, %v2258_v23  ;;  %1937 = vmatprep.mubr.msk.bf16.mxu1 %vm212_vm1, %v2104_v16  ;;  %v964_v47 = vsel %vm2227_vm4, %v959_v40, %v963_v30  ;;  %v991_v49 = vrot.slane %v989_v39, 5  ;;  %v417_v61 = vshll.u32 %v394_v54, 16  ;;  %v423_v62 = vshll.u32 %v395_v56, 16  ;;  %v398_v63 = vld [vmem:[%s2187_s25 + $0x10] sm:$0xf] }
  0x27   : > { %v986_v48 = vor.u32 %v985_v42, %v982_v41  ;;  %v1784_v50 = vcombine.low %v950_v43, %v964_v47  ;;  %v973_v51 = vrot.slane %v972_v45, 4  ;;  %v428_v2 = vshrl.u32 %v396_v57, 16  ;;  %v400_v11 = vld [vmem:[%s2187_s25 + $0x18] sm:$0xf]  ;;  %v401_v18 = vld [vmem:[%s2187_s25 + $0x1c] sm:$0x1] }
  0x28   : > { %v431_v4 = vshll.u32 %v396_v57, 16  ;;  %v437_v5 = vshll.u32 %v397_v58, 16  ;;  %v416_v7 = vrot.slane %v414_v60, 4  ;;  %v419_v8 = vrot.slane %v417_v61, 5  ;;  %v2107_v29 = vld [vmem:[%s2187_s25 + $0x18] ss:$8 sps:$4 sm:$0xff]  }
  0x29   : > { %v987_v52 = vrot.slane %v986_v48, 4  ;;  %1977 = vmatprep.mubr.msk.bf16.mxu0 %vm212_vm1, %v1784_v50  ;;  %v978_v55 = vsel %vm2227_vm4, %v973_v51, %v977_v46  ;;  %v425_v9 = vrot.slane %v423_v62, 5  ;;  %v442_v12 = vshrl.u32 %v398_v63, 16  ;;  %v2108_v37 = vld [vmem:[%s2187_s25 + $0x28] ss:$8 sps:$4 sm:$0xff]  }
  0x2a   : > { %v430_v13 = vrot.slane %v428_v2, 4  ;;  %v433_v14 = vrot.slane %v431_v4, 5  ;;  %v439_v17 = vrot.slane %v437_v5, 5  ;;  %v445_v19 = vshll.u32 %v398_v63, 16  ;;  %v402_v40 = vld [vmem:[%s2187_s25 + $0x20] sm:$0xf] }
  0x2b   : > { %1938 = vmatmul.mubr.msk.bf16.gmra.mrb[4].mxu1 %vm212_vm1, %v2105_v15  ;;  %v992_v59 = vsel %vm2227_vm4, %v987_v52, %v991_v49  ;;  %v420_v20 = vor.u32 %v419_v8, %v416_v7  ;;  %v444_v21 = vrot.slane %v442_v12, 4  ;;  %v451_v22 = vshll.u32 %v399_v6, 16  ;;  %v403_v45 = vld [vmem:[%s2187_s25 + $0x24] sm:$0x1]  ;;  %v404_v46 = vld [vmem:[%s2187_s25 + $0x28] sm:$0xf] }
  0x2c   : > { %v1785_v0 = vcombine.low %v978_v55, %v992_v59  ;;  %v456_v24 = vshrl.u32 %v400_v11, 16  ;;  %v434_v25 = vor.u32 %v433_v14, %v430_v13  ;;  %v447_v26 = vrot.slane %v445_v19, 5  ;;  %v405_v48 = vld [vmem:[%s2187_s25 + $0x2c] sm:$0x1]  ;;  %v406_v55 = vld [vmem:[%s2187_s25 + $0x30] sm:$0xf] }
  0x2d   : > { %v459_v27 = vshll.u32 %v400_v11, 16  ;;  %v465_v28 = vshll.u32 %v401_v18, 16  ;;  %v1258_v30 = vsel %vm225_vm0, %v2258_v23, 0  ;;  %v421_v31 = vrot.slane %v420_v20, 4  ;;  %v2305_v23 = vld [vmem:[%s2416_s1 + $0x20] sm:$0xf] }
  0x2e   : > { %1978 = vmatmul.mubr.msk.bf16.gmra.mrb[4].mxu0 %vm212_vm1, %v1785_v0  ;;  %v453_v32 = vrot.slane %v451_v22, 5  ;;  %v458_v33 = vrot.slane %v456_v24, 4  ;;  %v435_v34 = vrot.slane %v434_v25, 4  ;;  %v448_v35 = vor.u32 %v447_v26, %v444_v21  ;;  %v407_v60 = vld [vmem:[%s2187_s25 + $0x34] sm:$0x1] }
  0x2f   : > { %1983 = vmatprep.mubr.msk.bf16.mxu0 %vm212_vm1, %v2106_v53  ;;  %v461_v36 = vrot.slane %v459_v27, 5  ;;  %v426_v38 = vsel %vm2227_vm4, %v421_v31, %v425_v9  ;;  %v467_v39 = vrot.slane %v465_v28, 5  ;;  %v671_v16 = vsel %vm225_vm0, %v2246_v10, 0  ;;  %v2109_v62 = vld [vmem:[%s2187_s25 + $0x38] ss:$8 sps:$4 sm:$0xff]  }
  0x30   : > { %v440_v41 = vsel %vm2227_vm4, %v435_v34, %v439_v17  ;;  %v449_v42 = vrot.slane %v448_v35, 4  ;;  %v470_v15 = vshrl.u32 %v402_v40, 16  ;;  %v473_v49 = vshll.u32 %v402_v40, 16  ;;  %v408_v0 = vld [vmem:[%s2187_s25 + $0x38] sm:$0xf] }
  0x31   : > { %v462_v43 = vor.u32 %v461_v36, %v458_v33  ;;  %v1723_v47 = vcombine.low %v426_v38, %v440_v41  ;;  %v479_v10 = vshll.u32 %v403_v45, 16  ;;  %v484_v50 = vshrl.u32 %v404_v46, 16  ;;  %v409_v2 = vld [vmem:[%s2187_s25 + $0x3c] sm:$0x1]  ;;  %v2110_v14 = vld [vmem:[%s2187_s25 + $0x50] ss:$8 sps:$4 sm:$0xff]  }
  0x32   : > { %v454_v51 = vsel %vm2227_vm4, %v449_v42, %v453_v32  ;;  %v472_v53 = vrot.slane %v470_v15, 4  ;;  %v487_v54 = vshll.u32 %v404_v46, 16  ;;  %v475_v56 = vrot.slane %v473_v49, 5  ;;  %v2111_v35 = vld [vmem:[%s2187_s25 + $0x60] ss:$8 sps:$4 sm:$0xff]  }
  0x33   : > { %v463_v52 = vrot.slane %v462_v43, 4  ;;  %1943 = vmatprep.mubr.msk.bf16.mxu1 %vm212_vm1, %v1723_v47  ;;  %v481_v57 = vrot.slane %v479_v10, 5  ;;  %v486_v58 = vrot.slane %v484_v50, 4  ;;  %v493_v59 = vshll.u32 %v405_v48, 16  ;;  %v1825_v40 = vld [vmem:[%s2187_s25 + $0xc] sm:$0x1] }
  0x34   : > { %v489_v63 = vrot.slane %v487_v54, 5  ;;  %v498_v4 = vshrl.u32 %v406_v55, 16  ;;  %v476_v6 = vor.u32 %v475_v56, %v472_v53  ;;  %v501_v8 = vshll.u32 %v406_v55, 16  ;;  %v1826_v41 = vld [vmem:[%s2187_s25 + $0x10] sm:$0xf] }
  0x35   : > { %v468_v61 = vsel %vm2227_vm4, %v463_v52, %v467_v39  ;;  %v495_v7 = vrot.slane %v493_v59, 5  ;;  %v507_v12 = vshll.u32 %v407_v60, 16  ;;  %v512_v13 = vshrl.u32 %v408_v0, 16  ;;  %v2114_v39 = vld [vmem:[%s2187_s25 + $0x70] ss:$8 sps:$4 sm:$0xff]  }
  0x36   : > { %1984 = vmatmul.mubr.msk.bf16.vlgmr.msra.gmra.mrb[0].mxu0 %vm212_vm1, %v2107_v29  ;;  %v1724_v5 = vcombine.low %v454_v51, %v468_v61  ;;  %v490_v9 = vor.u32 %v489_v63, %v486_v58  ;;  %v500_v11 = vrot.slane %v498_v4, 4  ;;  %v477_v17 = vrot.slane %v476_v6, 4  ;;  %v1827_v42 = vld [vmem:[%s2187_s25 + $0x14] sm:$0x1]  ;;  %v1828_v48 = vld [vmem:[%s2187_s25 + $0x18] sm:$0xf] }
  0x37   : > { %1992 = vmatpush3.bf16.msra.mxu0 %v1258_v30  ;;  %1987 = vmatprep.mubr.msk.bf16.mxu0 %vm212_vm1, %v2108_v37  ;;  %v503_v18 = vrot.slane %v501_v8, 5  ;;  %v515_v19 = vshll.u32 %v408_v0, 16  ;;  %v521_v20 = vshll.u32 %v409_v2, 16  ;;  %v514_v22 = vrot.slane %v512_v13, 4  ;;  %v2112_v37 = vld [vmem:[%s2187_s25 + $0x90] ss:$8 sps:$4 sm:$0xff]  }
  0x38   : > { %2086 = vmatprep.subr.msk.bf16.mxu0 %vm225_vm0, %v2305_v23  ;;  %1944 = vmatmul.mubr.msk.bf16.vlgmr.msra.gmra.mrb[0].mxu1 %vm212_vm1, %v1724_v5  ;;  %v491_v21 = vrot.slane %v490_v9, 4  ;;  %v482_v24 = vsel %vm2227_vm4, %v477_v17, %v481_v57  ;;  %v509_v26 = vrot.slane %v507_v12, 5  ;;  %v1488_v34 = vsel %vm225_vm0, %v2305_v23, 0  ;;  %v1829_v50 = vld [vmem:[%s2187_s25 + $0x1c] sm:$0x1] }
  0x39   : > { %1952 = vmatpush3.bf16.msra.mxu1 %v671_v16  ;;  %v504_v25 = vor.u32 %v503_v18, %v500_v11  ;;  %v517_v27 = vrot.slane %v515_v19, 5  ;;  %v523_v32 = vrot.slane %v521_v20, 5  ;;  %v1824_v16 = vld [vmem:[%s2187_s25 + $0x8] sm:$0xf]  ;;  %v1359_v23 = vshll.u32 %v1825_v40, 16 }
  0x3a   : > { %2082 = vmatprep.subr.msk.bf16.mxu1 %vm225_vm0, %v2162_v1  ;;  %v496_v28 = vsel %vm2227_vm4, %v491_v21, %v495_v7  ;;  %v1350_v43 = vshrl.u32 %v1824_v16, 16  ;;  %v1353_v45 = vshll.u32 %v1824_v16, 16  ;;  %v1364_v46 = vshrl.u32 %v1826_v41, 16  ;;  %v1830_v51 = vld [vmem:[%s2187_s25 + $0x20] sm:$0xf] }
  0x3b   : > { %v1725_v29 = vcombine.low %v482_v24, %v496_v28  ;;  %v505_v30 = vrot.slane %v504_v25, 4  ;;  %v518_v31 = vor.u32 %v517_v27, %v514_v22  ;;  %v1367_v15 = vshll.u32 %v1826_v41, 16  ;;  %v2113_v52 = vld [vmem:[%s2187_s25 + $0xa0] ss:$8 sps:$4 sm:$0xff]   ;;  %v1831_v58 = vld [vmem:[%s2187_s25 + $0x24] sm:$0x1] }
  0x3c   : > { %v1373_v47 = vshll.u32 %v1827_v42, 16  ;;  %v1352_v49 = vrot.slane %v1350_v43, 4  ;;  %v1355_v10 = vrot.slane %v1353_v45, 5  ;;  %v2115_v53 = vld [vmem:[%s2187_s25 + $0x80] ss:$8 sps:$4 sm:$0xff]   ;;  %v1361_v54 = vrot.slane %v1359_v23, 5 }
  0x3d   : > { %1947 = vmatprep.mubr.msk.bf16.mxu1 %vm212_vm1, %v1725_v29  ;;  %v510_v1 = vsel %vm2227_vm4, %v505_v30, %v509_v26  ;;  %v519_v33 = vrot.slane %v518_v31, 4  ;;  %v1366_v55 = vrot.slane %v1364_v46, 4  ;;  %v1369_v56 = vrot.slane %v1367_v15, 5  ;;  %v2116_v5 = vld [vmem:[%s2187_s25 + $0xb0] ss:$8 sps:$4 sm:$0xff]  }
  0x3e   : > { %1988 = vmatmul.mubr.msk.bf16.gmra.mrb[4].mxu0 %vm212_vm1, %v2109_v62  ;;  %v1375_v57 = vrot.slane %v1373_v47, 5  ;;  %v1356_v59 = vor.u32 %v1355_v10, %v1352_v49  ;;  %v1378_v60 = vshrl.u32 %v1828_v48, 16  ;;  %v1381_v61 = vshll.u32 %v1828_v48, 16  ;;  %v1832_v17 = vld [vmem:[%s2187_s25 + $0x28] sm:$0xf] }
  0x3f   : > { %1993 = vmatprep.mubr.msk.bf16.mxu0 %vm212_vm1, %v2110_v14  ;;  %v524_v36 = vsel %vm2227_vm4, %v519_v33, %v523_v32  ;;  %v1387_v62 = vshll.u32 %v1829_v50, 16  ;;  %v1370_v63 = vor.u32 %v1369_v56, %v1366_v55  ;;  %v1392_v0 = vshrl.u32 %v1830_v51, 16  ;;  %v1833_v20 = vld [vmem:[%s2187_s25 + $0x2c] sm:$0x1]  ;;  %v1834_v21 = vld [vmem:[%s2187_s25 + $0x30] sm:$0xf] }
  0x40   : > { %v1726_v38 = vcombine.low %v510_v1, %v524_v36  ;;  %v1395_v2 = vshll.u32 %v1830_v51, 16  ;;  %v1401_v4 = vshll.u32 %v1831_v58, 16  ;;  %v1357_v6 = vrot.slane %v1356_v59, 4  ;;  %v1835_v22 = vld [vmem:[%s2187_s25 + $0x34] sm:$0x1] }
  0x41   : > { %v1380_v7 = vrot.slane %v1378_v60, 4  ;;  %v1383_v8 = vrot.slane %v1381_v61, 5  ;;  %v1389_v9 = vrot.slane %v1387_v62, 5  ;;  %v1371_v11 = vrot.slane %v1370_v63, 4  ;;  %v2117_v32 = vld [vmem:[%s2187_s25 + $0xc0] ss:$8 sps:$4 sm:$0xff]  }
  0x42   : > { %1948 = vmatmul.mubr.msk.bf16.gmra.mrb[4].mxu1 %vm212_vm1, %v1726_v38  ;;  %v1394_v12 = vrot.slane %v1392_v0, 4  ;;  %v1397_v13 = vrot.slane %v1395_v2, 5  ;;  %v1403_v14 = vrot.slane %v1401_v4, 5  ;;  %v1362_v18 = vsel %vm2227_vm4, %v1357_v6, %v1361_v54  ;;  %v1836_v36 = vld [vmem:[%s2187_s25 + $0x38] sm:$0xf] }
  0x43   : > { %1953 = vmatprep.mubr.msk.bf16.mxu1 %vm212_vm1, %v2112_v37  ;;  %v1384_v19 = vor.u32 %v1383_v8, %v1380_v7  ;;  %v1376_v24 = vsel %vm2227_vm4, %v1371_v11, %v1375_v57  ;;  %v1406_v26 = vshrl.u32 %v1832_v17, 16  ;;  %v1409_v27 = vshll.u32 %v1832_v17, 16  ;;  %v1837_v16 = vld [vmem:[%s2187_s25 + $0x3c] sm:$0x1]  ;;  %v1838_v43 = vld [vmem:[%s2187_s25 + $0x40] sm:$0xf] }
  0x44   : > { %v1398_v25 = vor.u32 %v1397_v13, %v1394_v12  ;;  %v1841_v28 = vcombine.low %v1362_v18, %v1376_v24  ;;  %v1415_v30 = vshll.u32 %v1833_v20, 16  ;;  %v1420_v31 = vshrl.u32 %v1834_v21, 16  ;;  %v1839_v45 = vld [vmem:[%s2187_s25 + $0x44] sm:$0x1]  ;;  %v2118_v15 = vld [vmem:[%s2187_s25 + $0xf8] ss:$8 sps:$4 sm:$0xff]  }
  0x45   : > { %v1385_v29 = vrot.slane %v1384_v19, 4  ;;  %v1408_v33 = vrot.slane %v1406_v26, 4  ;;  %v1434_v23 = vshrl.u32 %v1836_v36, 16  ;;  %v1437_v48 = vshll.u32 %v1836_v36, 16  ;;  %v2119_v8 = vld [vmem:[%s2187_s25 + $0x108] ss:$8 sps:$4 sm:$0xff]  }
  0x46   : > { %1994 = vmatmul.mubr.msk.bf16.vlgmr.msra.gmra.mrb[0].mxu0 %vm212_vm1, %v2111_v35  ;;  %v1399_v1 = vrot.slane %v1398_v25, 4  ;;  %v1423_v35 = vshll.u32 %v1834_v21, 16  ;;  %v1417_v37 = vrot.slane %v1415_v30, 5  ;;  %v1422_v38 = vrot.slane %v1420_v31, 4  ;;  %v1849_v18 = vld [vmem:[%s2417_s2] ss:$0 sm:$0xff] }
  0x47   : > { %2002 = vmatpush3.bf16.msra.mxu0 %v1488_v34  ;;  %1997 = vmatprep.mubr.msk.bf16.mxu0 %vm212_vm1, %v2114_v39  ;;  %v1411_v34 = vrot.slane %v1409_v27, 5  ;;  %v1429_v39 = vshll.u32 %v1835_v22, 16  ;;  %v1443_v49 = vshll.u32 %v1837_v16, 16  ;;  %v1436_v51 = vrot.slane %v1434_v23, 4 }
  0x48   : > { %v1404_v40 = vsel %vm2227_vm4, %v1399_v1, %v1403_v14  ;;  %v1425_v42 = vrot.slane %v1423_v35, 5  ;;  %v1451_v54 = vshll.u32 %v1838_v43, 16  ;;  %v1457_v55 = vshll.u32 %v1839_v45, 16 }
  0x49   : > { %v1412_v41 = vor.u32 %v1411_v34, %v1408_v33  ;;  %v1431_v47 = vrot.slane %v1429_v39, 5  ;;  %v1445_v60 = vrot.slane %v1443_v49, 5 }
  0x4a   : > { %1954 = vmatmul.mubr.msk.bf16.vlgmr.msra.gmra.mrb[0].mxu1 %vm212_vm1, %v2113_v52  ;;  %v1426_v50 = vor.u32 %v1425_v42, %v1422_v38  ;;  %v1448_v52 = vshrl.u32 %v1838_v43, 16  ;;  %v1453_v61 = vrot.slane %v1451_v54, 5  ;;  %v1459_v4 = vrot.slane %v1457_v55, 5 }
  0x4b   : > { %2012 = vmatpush3.bf16.msra.mxu1 %v2170_v3  ;;  %1957 = vmatprep.mubr.msk.bf16.mxu1 %vm212_vm1, %v2116_v5  ;;  %v1390_v3 = vsel %vm2227_vm4, %v1385_v29, %v1389_v9  ;;  %v1413_v10 = vrot.slane %v1412_v41, 4 }
  0x4c   : > { %v1842_v46 = vcombine.low %v1390_v3, %v1404_v40  ;;  %v1427_v57 = vrot.slane %v1426_v50, 4  ;;  %v1450_v58 = vrot.slane %v1448_v52, 4 }
  0x4d   : > { %v1418_v56 = vsel %vm2227_vm4, %v1413_v10, %v1417_v37 }
  0x4e   : > { %1998 = vmatmul.mubr.msk.bf16.gmra.mrb[4].mxu0 %vm212_vm1, %v2115_v53  ;;  %v1439_v53 = vrot.slane %v1437_v48, 5  ;;  %v1432_v62 = vsel %vm2227_vm4, %v1427_v57, %v1431_v47  ;;  %v1454_v2 = vor.u32 %v1453_v61, %v1450_v58 }
  0x4f   : > { %2003 = vmatprep.mubr.msk.bf16.mxu0 %vm212_vm1, %v1841_v28  ;;  %v1843_v63 = vcombine.low %v1418_v56, %v1432_v62 }
  0x50   : > { %v1440_v59 = vor.u32 %v1439_v53, %v1436_v51  ;;  %v1455_v6 = vrot.slane %v1454_v2, 4 }
  0x52   : > { %1958 = vmatmul.mubr.msk.bf16.gmra.mrb[4].mxu1 %vm212_vm1, %v2117_v32  ;;  %v1441_v0 = vrot.slane %v1440_v59, 4  ;;  %v1460_v7 = vsel %vm2227_vm4, %v1455_v6, %v1459_v4 }
  0x53   : > { %1967 = vmatprep.mubr.msk.bf16.mxu1 %vm212_vm1, %v2118_v15 }
  0x54   : > { %v1446_v5 = vsel %vm2227_vm4, %v1441_v0, %v1445_v60 }
  0x55   : > { %v1844_v9 = vcombine.low %v1446_v5, %v1460_v7 }
  0x56   : > { %2004 = vmatmul.mubr.msk.bf16.vlgmr.msra.gmra.mrb[0].mxu0 %vm212_vm1, %v1842_v46 }
  0x57   : > { %2007 = vmatprep.mubr.msk.bf16.mxu0 %vm212_vm1, %v1843_v63 }
  0x5e   : > { %2008 = vmatmul.mubr.msk.bf16.gmra.mrb[4].mxu0 %vm212_vm1, %v1844_v9  ;;  %1968 = vmatmul.mubr.msk.bf16.vlgmr.msra.gmra.mrb[4].mxu1 %vm212_vm1, %v2119_v8 }
 0x11d   : > { %v1955_v11 = vpop.f32.mrb[0].mxu1 }
 0x11e   : > { %v707_v12 = vpop.f32.mrb[1].mxu1 }
 0x11f   : > { %v1956_v13 = vpop.f32.mrb[2].mxu1 }
 0x120   : > { %v710_v14 = vpop.f32.mrb[3].mxu1 }
 0x129   : > { %v2005_v17 = vpop.f32.mrb[0].mxu0 }
 0x12a   : > { %v2013_v19 = vadd.f32 %v2005_v17, %v1955_v11  ;;  %v1524_v20 = vpop.f32.mrb[1].mxu0 }
 0x12b   : > { %v2014_v21 = vadd.f32 %v1524_v20, %v707_v12  ;;  %v2006_v44 = vpop.f32.mrb[2].mxu0 }
 0x12c   : > { %v1572_v22 = vadd.f32 %v2013_v19, %v1849_v18  ;;  %v2015_v24 = vadd.f32 %v2006_v44, %v1956_v13  ;;  %v1527_v25 = vpop.f32.mrb[3].mxu0 }
 0x12d   : > { %v1570_v26 = vadd.f32 %v2014_v21, %v1849_v18  ;;  %v2016_v27 = vadd.f32 %v1527_v25, %v710_v14 }
 0x12e   : > { %v1580_v28 = vadd.f32 3.0, %v1572_v22  ;;  %v1573_v29 = vadd.f32 %v2015_v24, %v1849_v18 }
 0x12f   : > { %v1578_v30 = vadd.f32 3.0, %v1570_v26  ;;  %v1571_v31 = vadd.f32 %v2016_v27, %v1849_v18 }
 0x130   : > { %v1588_v32 = vmax.f32 %v1580_v28, 0.0  ;;  %v1581_v1 = vadd.f32 3.0, %v1573_v29 }
 0x131   : > { %v1586_v33 = vmax.f32 %v1578_v30, 0.0  ;;  %v1579_v34 = vadd.f32 3.0, %v1571_v31  ;;  %v2009_v38 = vpop.f32.mrb[4].mxu0  ;;  %v1969_v43 = vpop.f32.mrb[4].mxu1 }
 0x132   : > { %v1596_v35 = vmin.f32 %v1588_v32, 6.0  ;;  %v1589_v36 = vmax.f32 %v1581_v1, 0.0  ;;  %v1540_v40 = vpop.f32.mrb[5].mxu0  ;;  %v2017_v46 = vadd.f32 %v2009_v38, %v1969_v43  ;;  %v842_v15 = vpop.f32.mrb[5].mxu1 }
 0x133   : > { %v1594_v3 = vmin.f32 %v1586_v33, 6.0  ;;  %v1587_v37 = vmax.f32 %v1579_v34, 0.0  ;;  %v2010_v45 = vpop.f32.mrb[6].mxu0  ;;  %v2018_v49 = vadd.f32 %v1540_v40, %v842_v15  ;;  %v1970_v10 = vpop.f32.mrb[6].mxu1 }
 0x134   : > { %v1604_v39 = vmul.f32 %v1596_v35, %v1572_v22  ;;  %v1597_v16 = vmin.f32 %v1589_v36, 6.0  ;;  %v1543_v47 = vpop.f32.mrb[7].mxu0  ;;  %v1576_v52 = vadd.f32 %v2017_v46, %v1849_v18  ;;  %v2019_v53 = vadd.f32 %v2010_v45, %v1970_v10  ;;  %v845_v54 = vpop.f32.mrb[7].mxu1 }
 0x135   : > { %v1602_v41 = vmul.f32 %v1594_v3, %v1570_v26  ;;  %v1595_v42 = vmin.f32 %v1587_v37, 6.0  ;;  %v1574_v57 = vadd.f32 %v2018_v49, %v1849_v18  ;;  %v2020_v58 = vadd.f32 %v1543_v47, %v845_v54 }
 0x136   : > { %v1605_v23 = vmul.f32 %v1597_v16, %v1573_v29  ;;  %v1612_v50 = vmul.f32 0.16666667, %v1604_v39  ;;  %v1584_v60 = vadd.f32 3.0, %v1576_v52  ;;  %v1577_v61 = vadd.f32 %v2019_v53, %v1849_v18 }
 0x137   : > { %v1603_v48 = vmul.f32 %v1595_v42, %v1571_v31  ;;  %v1610_v55 = vmul.f32 0.16666667, %v1602_v41  ;;  %v1582_v63 = vadd.f32 3.0, %v1574_v57  ;;  %v1575_v0 = vadd.f32 %v2020_v58, %v1849_v18 }
 0x138   : > { %v1613_v51 = vmul.f32 0.16666667, %v1605_v23  ;;  %v1592_v2 = vmax.f32 %v1584_v60, 0.0  ;;  %v1585_v4 = vadd.f32 3.0, %v1577_v61 }
 0x139   : > { %v1611_v56 = vmul.f32 0.16666667, %v1603_v48  ;;  %v1590_v5 = vmax.f32 %v1582_v63, 0.0  ;;  %v1583_v6 = vadd.f32 3.0, %v1575_v0 }
 0x13a   : > { %v1861_v59 = vpack.c.bf16 %v1613_v51, %v1612_v50  ;;  %v1600_v7 = vmin.f32 %v1592_v2, 6.0  ;;  %v1593_v8 = vmax.f32 %v1585_v4, 0.0 }
 0x13b   : > { %v1856_v62 = vpack.c.bf16 %v1611_v56, %v1610_v55  ;;  %v1598_v9 = vmin.f32 %v1590_v5, 6.0  ;;  %v1591_v11 = vmax.f32 %v1583_v6, 0.0 }
 0x13c   : > { %1873 = vst [vmem:[%s2406_s16 + $0x8] sm:$0xff] %v1861_v59   ;;  %v1608_v12 = vmul.f32 %v1600_v7, %v1576_v52  ;;  %v1601_v13 = vmin.f32 %v1593_v8, 6.0 }
 0x13d   : > { %1857 = vst [vmem:[%s2406_s16] sm:$0xff] %v1856_v62   ;;  %v1606_v14 = vmul.f32 %v1598_v9, %v1574_v57  ;;  %v1599_v17 = vmin.f32 %v1591_v11, 6.0 }
 0x13e   : > { %v1609_v19 = vmul.f32 %v1601_v13, %v1577_v61  ;;  %v1616_v21 = vmul.f32 0.16666667, %v1608_v12 }
 0x13f   : > { %v1607_v20 = vmul.f32 %v1599_v17, %v1575_v0  ;;  %v1614_v44 = vmul.f32 0.16666667, %v1606_v14 }
 0x140   : > { %v1617_v18 = vmul.f32 0.16666667, %v1609_v19 }
 0x141   : > { %v1615_v22 = vmul.f32 0.16666667, %v1607_v20 }
 0x142   : > { %v1871_v24 = vpack.c.bf16 %v1617_v18, %v1616_v21 }
 0x143   : > { %v1866_v25 = vpack.c.bf16 %v1615_v22, %v1614_v44 }
 0x144   : > { %1875 = vst [vmem:[%s2406_s16 + $0x18] sm:$0xff] %v1871_v24  }
 0x145   : > { %1874 = vst [vmem:[%s2406_s16 + $0x10] sm:$0xff] %v1866_v25  }
 0x146 PF: > { %s13_s12 = sadd.s32 1, %s2126_s12  }
 0x147   : > { %p10_p4 = scmp.ge.s32.totalorder %s13_s12, 4  }
 0x149   :  { %12 = sbr.rel (!%p10_p4) target bundleno = 1 (0x1), region = 75 }

// kernel: mobilenet_v3_forward.7
= control target key start
LH: loop header
LB: loop body
LE: loop exit
PB: predicated region body
PF: predicated region fallthrough
CT: control target
= control target key end

     0   :  { %s1381_s30 = smov 0   ;;  %s1575_s0 = inlined_call_operand.vmem [shape: bf16[2,4,5,8,128], index: 0, kind: input, shape index: {}]   ;;  %s1576_s1 = inlined_call_operand.vmem [shape: f32[9,128], index: 1, kind: input, shape index: {}]   ;;  %s1577_s2 = inlined_call_operand.vmem [shape: f32[1,128], index: 2, kind: input, shape index: {}]   ;;  %s1578_s3 = inlined_call_operand.vmem [shape: bf16[128,128], index: 3, kind: input, shape index: {}]   ;;  %s1579_s4 = inlined_call_operand.vmem [shape: f32[1,128], index: 4, kind: input, shape index: {}]   ;;  %s1580_s5 = inlined_call_operand.vmem [shape: bf16[128,128], index: 5, kind: input, shape index: {}]   ;;  %s1581_s6 = inlined_call_operand.vmem [shape: f32[1,128], index: 6, kind: input, shape index: {}]   ;;  %s1582_s7 = inlined_call_operand.vmem [shape: bf16[128,128], index: 7, kind: input, shape index: {}]   ;;  %s1583_s8 = inlined_call_operand.vmem [shape: f32[1,128], index: 8, kind: input, shape index: {}]   ;;  %s1584_s9 = inlined_call_operand.vmem [shape: bf16[2,4,4,128], index: 9, kind: output, shape index: {}]  }
   0x1 LB: > { %s1149_s10 = sadd.s32 4294967295, %s1326_s30   ;;  %p1153_p0 = scmp.ge.s32.totalorder %s1326_s30, 1  ;;  %s1326_s30 = sphi %s1381_s30, %s19_s30  }
   0x2   : > { %p287_p1 = scmp.lt.s32.totalorder %s1326_s30, 3 }
   0x4   : > { %p288_p2 = pnand %p1153_p0, %p287_p1 }
   0x5   : > { %v1296_v0 = vld [vmem:[%s1578_s3] sm:$0xff] (!%p288_p2)   ;;  %v1328_v1 = vmov (!%p288_p2), 0.0   ;;  %v1297_v2 = vld [vmem:[%s1578_s3 + $0x8] sm:$0xff] (!%p288_p2)   ;;  %vm1329_vm0 = vmmov (!%p288_p2), 0   ;;  %p323_p3 = scmp.lt.s32.totalorder (!%p288_p2), %s1149_s10, 1  ;;  %v1298_v3 = vld [vmem:[%s1578_s3 + $0x10] sm:$0xff] (!%p288_p2)  }
   0x6   : > { %291 = sbr.rel (%p288_p2) target bundleno = 821 (0x335), region = 56  ;;  %1224 = vmatprep.subr.bf16.mxu0 (!%p288_p2), %v1328_v1  ;;  %374 = vst [vmem:[#allocation3] sm:$0xf] (!%p288_p2), %v1328_v1  ;;  %375 = vst [vmem:[#allocation3 + $0x4] sm:$0xf] (!%p288_p2), %v1328_v1  ;;  %1244 = vmatprep.subr.bf16.mxu1 (!%p288_p2), %v1328_v1  ;;  %v1299_v4 = vld [vmem:[%s1578_s3 + $0x18] sm:$0xff] (!%p288_p2)  }
   0x7   : > { %376 = vst [vmem:[#allocation3 + $0x8] sm:$0xf] (!%p288_p2), %v1328_v1  ;;  %377 = vst [vmem:[#allocation3 + $0xc] sm:$0xf] (!%p288_p2), %v1328_v1  ;;  %1225 = vmatpush3.bf16.msra.mxu0 (!%p288_p2), %v1296_v0  ;;  %1240 = vmatprep.mubr.msk.bf16.mxu0 (!%p288_p2), %vm1329_vm0, %v1328_v1  ;;  %v1300_v14 = vld [vmem:[%s1578_s3 + $0x20] sm:$0xff] (!%p288_p2)   ;;  %v1301_v20 = vld [vmem:[%s1578_s3 + $0x28] sm:$0xff] (!%p288_p2)  }
   0x8   : > { %1226 = vmatprep.subr.bf16.mxu0 (!%p288_p2), %v1328_v1  ;;  %1260 = vmatprep.mubr.msk.bf16.mxu1 (!%p288_p2), %vm1329_vm0, %v1328_v1  ;;  %v1157_v15 = vld [vmem:[%s1576_s1] ss:$0 sm:$0xff] (!%p288_p2)  ;;  %v1302_v37 = vld [vmem:[%s1578_s3 + $0x30] sm:$0xff] (!%p288_p2)   ;;  %v1158_v50 = vld [vmem:[%s1576_s1 + $0x1] ss:$0 sm:$0xff] (!%p288_p2)  ;;  %vm699_vm1 = vcmask (!%p288_p2), 1043456  }
   0x9   : > { %v1304_v16 = vld [vmem:[%s1580_s5] sm:$0xff] (!%p288_p2)   ;;  %v1303_v52 = vld [vmem:[%s1578_s3 + $0x38] sm:$0xff] (!%p288_p2)   ;;  %v1305_v63 = vld [vmem:[%s1580_s5 + $0x8] sm:$0xff] (!%p288_p2)  }
   0xa   : > { %1245 = vmatpush3.bf16.msra.mxu1 (!%p288_p2), %v1304_v16  ;;  %v1159_v56 = vld [vmem:[%s1576_s1 + $0x2] ss:$0 sm:$0xff] (!%p288_p2) }
   0xb   : > { %1227 = vmatpush3.bf16.msra.mxu0 (!%p288_p2), %v1297_v2  ;;  %1246 = vmatprep.subr.bf16.mxu1 (!%p288_p2), %v1328_v1 }
   0xc   : > { %1228 = vmatprep.subr.bf16.mxu0 (!%p288_p2), %v1328_v1 }
   0xd   : > { %s1586_s10 = smov (!%p323_p3, %s1149_s10), 1  ;;  %v386_v26 = vld [vmem:[#allocation3] sm:$0xf]  ;;  %v387_v27 = vld [vmem:[#allocation3 + $0x4] sm:$0xf] }
   0xe   : > { %s1284_s17 = smul.u32 80, %s1586_s10  ;;  %v388_v28 = vld [vmem:[#allocation3 + $0x8] sm:$0xf]  ;;  %v389_v29 = vld [vmem:[#allocation3 + $0xc] sm:$0xf]  ;;  %1247 = vmatpush3.bf16.msra.mxu1 %v1305_v63  ;;  %s1196_s13 = sshll.u32 %s1586_s10, 3 }
   0xf   : > { %1229 = vmatpush3.bf16.msra.mxu0 %v1298_v3  ;;  %1248 = vmatprep.subr.bf16.mxu1 %v1328_v1  ;;  %s332_s16 = scalar_lea.vmem %s1584_s9, %s1196_s13 }
  0x10   : > { %s327_s22 = scalar_lea.vmem %s1575_s0, %s1284_s17  ;;  %1230 = vmatprep.subr.bf16.mxu0 %v1328_v1 }
  0x11   : > { %v334_v5 = vld [vmem:[%s327_s22] sm:$0xff]   ;;  %v336_v6 = vld [vmem:[%s327_s22 + $0x8] sm:$0xff]   ;;  %v338_v7 = vld [vmem:[%s327_s22 + $0x10] sm:$0xff]  }
  0x12   : > { %v340_v8 = vld [vmem:[%s327_s22 + $0x18] sm:$0xff]   ;;  %v342_v9 = vld [vmem:[%s327_s22 + $0x20] sm:$0xff]   ;;  %v344_v10 = vld [vmem:[%s327_s22 + $0x28] sm:$0xff]   ;;  %354 = vst [vmem:[#allocation2] sm:$0xff] %v334_v5  }
  0x13   : > { %356 = vst [vmem:[#allocation2 + $0x8] sm:$0xff] %v336_v6   ;;  %358 = vst [vmem:[#allocation2 + $0x10] sm:$0xff] %v338_v7   ;;  %v346_v11 = vld [vmem:[%s327_s22 + $0x30] sm:$0xff]   ;;  %v349_v12 = vld [vmem:[%s327_s22 + $0x3c] sm:$0xff]   ;;  %1231 = vmatpush3.bf16.msra.mxu0 %v1299_v4 }
  0x14   : > { %v351_v13 = vld [vmem:[%s327_s22 + $0x44] sm:$0xff]   ;;  %360 = vst [vmem:[#allocation2 + $0x18] sm:$0xff] %v340_v8   ;;  %362 = vst [vmem:[#allocation2 + $0x20] sm:$0xff] %v342_v9   ;;  %1232 = vmatprep.subr.bf16.mxu0 %v1328_v1 }
  0x15   : > { %364 = vst [vmem:[#allocation2 + $0x28] sm:$0xff] %v344_v10   ;;  %366 = vst [vmem:[#allocation2 + $0x30] sm:$0xff] %v346_v11   ;;  %v1306_v11 = vld [vmem:[%s1580_s5 + $0x10] sm:$0xff]  }
  0x16   : > { %369 = vst [vmem:[#allocation2 + $0x3c] sm:$0xff] %v349_v12   ;;  %371 = vst [vmem:[#allocation2 + $0x44] sm:$0xff] %v351_v13   ;;  %1249 = vmatpush3.bf16.msra.mxu1 %v1306_v11 }
  0x17   : > { %1233 = vmatpush3.bf16.msra.mxu0 %v1300_v14  ;;  %1250 = vmatprep.subr.bf16.mxu1 %v1328_v1 }
  0x18   : > { %1234 = vmatprep.subr.bf16.mxu0 %v1328_v1 }
  0x19   : > { %v378_v17 = vld [vmem:[#allocation2] sm:$0x3]  ;;  %v379_v18 = vld [vmem:[#allocation2 + $0x4] sm:$0x3] }
  0x1a   : > { %v380_v19 = vld [vmem:[#allocation2 + $0x8] sm:$0x3]  ;;  %v381_v21 = vld [vmem:[#allocation2 + $0xc] sm:$0x3]  ;;  %v382_v22 = vunpack.c.l.bf16 %v378_v17  ;;  %v383_v23 = vunpack.c.l.bf16 %v379_v18  ;;  %v408_v34 = vld [vmem:[#allocation2 + $0x14] sm:$0x3] }
  0x1b   : > { %v384_v24 = vunpack.c.l.bf16 %v380_v19  ;;  %v385_v25 = vunpack.c.l.bf16 %v381_v21  ;;  %v409_v35 = vld [vmem:[#allocation2 + $0x18] sm:$0x3]  ;;  %v410_v36 = vld [vmem:[#allocation2 + $0x1c] sm:$0x3]  ;;  %1235 = vmatpush3.bf16.msra.mxu0 %v1301_v20  ;;  %v411_v41 = vld [vmem:[#allocation2 + $0x20] sm:$0x3]  ;;  %v412_v44 = vunpack.c.l.bf16 %v408_v34 }
  0x1c   : > { %v395_v30 = vmul.f32 %v1157_v15, %v382_v22  ;;  %v396_v31 = vmul.f32 %v1157_v15, %v383_v23  ;;  %1236 = vmatprep.subr.bf16.mxu0 %v1328_v1  ;;  %v437_v43 = vld [vmem:[#allocation2] sm:$0x7]  ;;  %v413_v45 = vunpack.c.l.bf16 %v409_v35  ;;  %v414_v46 = vunpack.c.l.bf16 %v410_v36  ;;  %v438_v47 = vld [vmem:[#allocation2 + $0x4] sm:$0x7]  ;;  %v439_v48 = vld [vmem:[#allocation2 + $0x8] sm:$0x7] }
  0x1d   : > { %v397_v32 = vmul.f32 %v1157_v15, %v384_v24  ;;  %v398_v33 = vmul.f32 %v1157_v15, %v385_v25  ;;  %v415_v49 = vunpack.c.l.bf16 %v411_v41  ;;  %v440_v51 = vld [vmem:[#allocation2 + $0xc] sm:$0x7]  ;;  %v441_v53 = vunpack.c.l.bf16 %v437_v43  ;;  %v1307_v17 = vld [vmem:[%s1580_s5 + $0x18] sm:$0xff]   ;;  %v1308_v18 = vld [vmem:[%s1580_s5 + $0x20] sm:$0xff]  }
  0x1e   : > { %v399_v38 = vadd.f32 %v395_v30, %v386_v26  ;;  %v400_v39 = vadd.f32 %v396_v31, %v387_v27  ;;  %v442_v54 = vunpack.c.l.bf16 %v438_v47  ;;  %v443_v55 = vunpack.c.l.bf16 %v439_v48  ;;  %v479_v19 = vld [vmem:[#allocation2 + $0x28] sm:$0x3]  ;;  %v480_v20 = vld [vmem:[#allocation2 + $0x2c] sm:$0x3]  ;;  %v481_v21 = vld [vmem:[#allocation2 + $0x30] sm:$0x3]  ;;  %1251 = vmatpush3.bf16.msra.mxu1 %v1307_v17 }
  0x1f   : > { %v401_v40 = vadd.f32 %v397_v32, %v388_v28  ;;  %v402_v42 = vadd.f32 %v398_v33, %v389_v29  ;;  %1237 = vmatpush3.bf16.msra.mxu0 %v1302_v37  ;;  %v425_v57 = vmul.f32 %v1158_v50, %v412_v44  ;;  %v426_v58 = vmul.f32 %v1158_v50, %v413_v45  ;;  %v482_v29 = vld [vmem:[#allocation2 + $0x34] sm:$0x3]  ;;  %v1309_v31 = vld [vmem:[%s1580_s5 + $0x28] sm:$0xff]   ;;  %v1160_v36 = vld [vmem:[%s1576_s1 + $0x3] ss:$0 sm:$0xff] }
  0x20   : > { %403 = vst [vmem:[#allocation3] sm:$0xf] %v399_v38  ;;  %404 = vst [vmem:[#allocation3 + $0x4] sm:$0xf] %v400_v39  ;;  %1238 = vmatprep.subr.bf16.mxu0 %v1328_v1  ;;  %v427_v59 = vmul.f32 %v1158_v50, %v414_v46  ;;  %v444_v60 = vunpack.c.l.bf16 %v440_v51  ;;  %v428_v61 = vmul.f32 %v1158_v50, %v415_v49  ;;  %1252 = vmatprep.subr.bf16.mxu1 %v1328_v1  ;;  %v509_v41 = vld [vmem:[#allocation2 + $0x3c] sm:$0x3] }
  0x21   : > { %405 = vst [vmem:[#allocation3 + $0x8] sm:$0xf] %v401_v40  ;;  %406 = vst [vmem:[#allocation3 + $0xc] sm:$0xf] %v402_v42  ;;  %v454_v62 = vmul.f32 %v1159_v56, %v441_v53  ;;  %v455_v4 = vmul.f32 %v1159_v56, %v442_v54  ;;  %v456_v5 = vmul.f32 %v1159_v56, %v443_v55  ;;  %v483_v32 = vunpack.c.l.bf16 %v479_v19  ;;  %v510_v42 = vld [vmem:[#allocation2 + $0x40] sm:$0x3] }
  0x22   : > { %v457_v10 = vmul.f32 %v1159_v56, %v444_v60  ;;  %v484_v33 = vunpack.c.l.bf16 %v480_v20  ;;  %v485_v34 = vunpack.c.l.bf16 %v481_v21  ;;  %1253 = vmatpush3.bf16.msra.mxu1 %v1308_v18  ;;  %v486_v35 = vunpack.c.l.bf16 %v482_v29  ;;  %v511_v43 = vld [vmem:[#allocation2 + $0x44] sm:$0x3]  ;;  %v512_v51 = vld [vmem:[#allocation2 + $0x48] sm:$0x3]  ;;  %v540_v60 = vld [vmem:[#allocation2 + $0x30] sm:$0x7] }
  0x23   : > { %1239 = vmatpush3.bf16.msra.mxu0 %v1303_v52  ;;  %v462_v13 = vrot.slane %v454_v62, 1  ;;  %v463_v14 = vrot.slane %v455_v4, 1  ;;  %v464_v15 = vrot.slane %v456_v5, 1  ;;  %1254 = vmatprep.subr.bf16.mxu1 %v1328_v1  ;;  %v496_v37 = vmul.f32 %v1160_v36, %v483_v32 }
  0x24   : > { %1264 = vmatprep.subr.bf16.mxu0 %v1328_v1  ;;  %v465_v16 = vrot.slane %v457_v10, 1  ;;  %v497_v38 = vmul.f32 %v1160_v36, %v484_v33  ;;  %v498_v39 = vmul.f32 %v1160_v36, %v485_v34  ;;  %v499_v40 = vmul.f32 %v1160_v36, %v486_v35  ;;  %v583_v34 = vld [vmem:[#allocation2 + $0x10] sm:$0x3] }
  0x25   : > { %v513_v53 = vunpack.c.l.bf16 %v509_v41  ;;  %v514_v54 = vunpack.c.l.bf16 %v510_v42  ;;  %v515_v55 = vunpack.c.l.bf16 %v511_v43  ;;  %v516_v56 = vunpack.c.l.bf16 %v512_v51 }
  0x26   : > { %1255 = vmatpush3.bf16.msra.mxu1 %v1309_v31  ;;  %v544_v5 = vunpack.c.l.bf16 %v540_v60 }
  0x27   : > { %v416_v0 = vld [vmem:[#allocation3] sm:$0xf]  ;;  %v417_v2 = vld [vmem:[#allocation3 + $0x4] sm:$0xf]  ;;  %1256 = vmatprep.subr.bf16.mxu1 %v1328_v1 }
  0x28   : > { %v418_v3 = vld [vmem:[#allocation3 + $0x8] sm:$0xf]  ;;  %v419_v6 = vld [vmem:[#allocation3 + $0xc] sm:$0xf]  ;;  %v429_v7 = vadd.f32 %v425_v57, %v416_v0  ;;  %v430_v8 = vadd.f32 %v426_v58, %v417_v2  ;;  %v1161_v57 = vld [vmem:[%s1576_s1 + $0x4] ss:$0 sm:$0xff] }
  0x29   : > { %v431_v9 = vadd.f32 %v427_v59, %v418_v3  ;;  %v432_v12 = vadd.f32 %v428_v61, %v419_v6  ;;  %v538_v58 = vld [vmem:[#allocation2 + $0x28] sm:$0x7]  ;;  %v539_v59 = vld [vmem:[#allocation2 + $0x2c] sm:$0x7]  ;;  %v526_v61 = vmul.f32 %v1161_v57, %v513_v53  ;;  %v527_v62 = vmul.f32 %v1161_v57, %v514_v54  ;;  %v541_v0 = vld [vmem:[#allocation2 + $0x34] sm:$0x7] }
  0x2a   : > { %433 = vst [vmem:[#allocation3] sm:$0xf] %v429_v7  ;;  %434 = vst [vmem:[#allocation3 + $0x4] sm:$0xf] %v430_v8  ;;  %v528_v63 = vmul.f32 %v1161_v57, %v515_v55  ;;  %v529_v2 = vmul.f32 %v1161_v57, %v516_v56  ;;  %v542_v3 = vunpack.c.l.bf16 %v538_v58  ;;  %v543_v4 = vunpack.c.l.bf16 %v539_v59  ;;  %v1162_v6 = vld [vmem:[%s1576_s1 + $0x5] ss:$0 sm:$0xff] }
  0x2b   : > { %435 = vst [vmem:[#allocation3 + $0x8] sm:$0xf] %v431_v9  ;;  %436 = vst [vmem:[#allocation3 + $0xc] sm:$0xf] %v432_v12  ;;  %v545_v10 = vunpack.c.l.bf16 %v541_v0  ;;  %v557_v18 = vmul.f32 %v1162_v6, %v544_v5  ;;  %v613_v55 = vld [vmem:[#allocation2 + $0x24] sm:$0x3] }
  0x2c   : > { %v556_v17 = vmul.f32 %v1162_v6, %v543_v4  ;;  %v617_v60 = vunpack.c.l.bf16 %v613_v55  ;;  %v641_v0 = vld [vmem:[#allocation2 + $0xc] sm:$0x7]  ;;  %v642_v5 = vld [vmem:[#allocation2 + $0x10] sm:$0x7] }
  0x2d   : > { %v558_v19 = vmul.f32 %v1162_v6, %v545_v10  ;;  %v1165_v10 = vld [vmem:[%s1576_s1 + $0x8] ss:$0 sm:$0xff] }
  0x2e   : > { %v564_v21 = vrot.slane %v556_v17, 1 }
  0x31   : > { %v445_v22 = vld [vmem:[#allocation3] sm:$0xf]  ;;  %v446_v23 = vld [vmem:[#allocation3 + $0x4] sm:$0xf] }
  0x32   : > { %v447_v24 = vld [vmem:[#allocation3 + $0x8] sm:$0xf]  ;;  %v448_v25 = vld [vmem:[#allocation3 + $0xc] sm:$0xf]  ;;  %v470_v26 = vadd.f32 %v462_v13, %v445_v22  ;;  %v471_v27 = vadd.f32 %v463_v14, %v446_v23  ;;  %v565_v22 = vrot.slane %v557_v18, 1  ;;  %v566_v23 = vrot.slane %v558_v19, 1 }
  0x33   : > { %v472_v28 = vadd.f32 %v464_v15, %v447_v24  ;;  %v473_v30 = vadd.f32 %v465_v16, %v448_v25  ;;  %v555_v16 = vmul.f32 %v1162_v6, %v542_v3  ;;  %v580_v24 = vld [vmem:[#allocation2 + $0x4] sm:$0x3]  ;;  %v581_v25 = vld [vmem:[#allocation2 + $0x8] sm:$0x3] }
  0x34   : > { %474 = vst [vmem:[#allocation3] sm:$0xf] %v470_v26  ;;  %475 = vst [vmem:[#allocation3 + $0x4] sm:$0xf] %v471_v27  ;;  %v582_v26 = vld [vmem:[#allocation2 + $0xc] sm:$0x3]  ;;  %v584_v36 = vunpack.c.l.bf16 %v580_v24 }
  0x35   : > { %476 = vst [vmem:[#allocation3 + $0x8] sm:$0xf] %v472_v28  ;;  %477 = vst [vmem:[#allocation3 + $0xc] sm:$0xf] %v473_v30  ;;  %v563_v20 = vrot.slane %v555_v16, 1 }
  0x3b   : > { %v487_v44 = vld [vmem:[#allocation3] sm:$0xf]  ;;  %v488_v45 = vld [vmem:[#allocation3 + $0x4] sm:$0xf] }
  0x3c   : > { %v489_v46 = vld [vmem:[#allocation3 + $0x8] sm:$0xf]  ;;  %v490_v47 = vld [vmem:[#allocation3 + $0xc] sm:$0xf]  ;;  %v500_v48 = vadd.f32 %v496_v37, %v487_v44  ;;  %v501_v49 = vadd.f32 %v497_v38, %v488_v45  ;;  %v585_v37 = vunpack.c.l.bf16 %v581_v25  ;;  %v586_v38 = vunpack.c.l.bf16 %v582_v26 }
  0x3d   : > { %v502_v50 = vadd.f32 %v498_v39, %v489_v46  ;;  %v503_v52 = vadd.f32 %v499_v40, %v490_v47  ;;  %v587_v39 = vunpack.c.l.bf16 %v583_v34  ;;  %v1163_v40 = vld [vmem:[%s1576_s1 + $0x6] ss:$0 sm:$0xff]  ;;  %v610_v45 = vld [vmem:[#allocation2 + $0x18] sm:$0x3]  ;;  %v611_v46 = vld [vmem:[#allocation2 + $0x1c] sm:$0x3] }
  0x3e   : > { %504 = vst [vmem:[#allocation3] sm:$0xf] %v500_v48  ;;  %505 = vst [vmem:[#allocation3 + $0x4] sm:$0xf] %v501_v49  ;;  %v597_v41 = vmul.f32 %v1163_v40, %v584_v36  ;;  %v598_v42 = vmul.f32 %v1163_v40, %v585_v37  ;;  %v599_v43 = vmul.f32 %v1163_v40, %v586_v38  ;;  %v612_v47 = vld [vmem:[#allocation2 + $0x20] sm:$0x3]  ;;  %v614_v57 = vunpack.c.l.bf16 %v610_v45 }
  0x3f   : > { %506 = vst [vmem:[#allocation3 + $0x8] sm:$0xf] %v502_v50  ;;  %507 = vst [vmem:[#allocation3 + $0xc] sm:$0xf] %v503_v52  ;;  %v600_v44 = vmul.f32 %v1163_v40, %v587_v39  ;;  %v615_v58 = vunpack.c.l.bf16 %v611_v46  ;;  %v616_v59 = vunpack.c.l.bf16 %v612_v47  ;;  %v1166_v36 = vld [vmem:[%s1577_s2] ss:$0 sm:$0xff] }
  0x45   : > { %v517_v7 = vld [vmem:[#allocation3] sm:$0xf]  ;;  %v518_v8 = vld [vmem:[#allocation3 + $0x4] sm:$0xf] }
  0x46   : > { %v519_v9 = vld [vmem:[#allocation3 + $0x8] sm:$0xf]  ;;  %v520_v11 = vld [vmem:[#allocation3 + $0xc] sm:$0xf]  ;;  %v530_v12 = vadd.f32 %v526_v61, %v517_v7  ;;  %v531_v13 = vadd.f32 %v527_v62, %v518_v8  ;;  %v1164_v61 = vld [vmem:[%s1576_s1 + $0x7] ss:$0 sm:$0xff] }
  0x47   : > { %v532_v14 = vadd.f32 %v528_v63, %v519_v9  ;;  %v533_v15 = vadd.f32 %v529_v2, %v520_v11  ;;  %v639_v62 = vld [vmem:[#allocation2 + $0x4] sm:$0x7]  ;;  %v640_v63 = vld [vmem:[#allocation2 + $0x8] sm:$0x7]  ;;  %v627_v2 = vmul.f32 %v1164_v61, %v614_v57  ;;  %v628_v3 = vmul.f32 %v1164_v61, %v615_v58 }
  0x48   : > { %534 = vst [vmem:[#allocation3] sm:$0xf] %v530_v12  ;;  %535 = vst [vmem:[#allocation3 + $0x4] sm:$0xf] %v531_v13  ;;  %v629_v4 = vmul.f32 %v1164_v61, %v616_v59  ;;  %v630_v6 = vmul.f32 %v1164_v61, %v617_v60  ;;  %v643_v7 = vunpack.c.l.bf16 %v639_v62  ;;  %v644_v8 = vunpack.c.l.bf16 %v640_v63 }
  0x49   : > { %536 = vst [vmem:[#allocation3 + $0x8] sm:$0xf] %v532_v14  ;;  %537 = vst [vmem:[#allocation3 + $0xc] sm:$0xf] %v533_v15  ;;  %v645_v9 = vunpack.c.l.bf16 %v641_v0  ;;  %v646_v14 = vunpack.c.l.bf16 %v642_v5  ;;  %v1313_v5 = vld [vmem:[%s1582_s7 + $0x8] sm:$0xff]  }
  0x4f   : > { %v546_v27 = vld [vmem:[#allocation3] sm:$0xf]  ;;  %v547_v28 = vld [vmem:[#allocation3 + $0x4] sm:$0xf] }
  0x50   : > { %v548_v29 = vld [vmem:[#allocation3 + $0x8] sm:$0xf]  ;;  %v549_v30 = vld [vmem:[#allocation3 + $0xc] sm:$0xf]  ;;  %v571_v31 = vadd.f32 %v563_v20, %v546_v27  ;;  %v572_v32 = vadd.f32 %v564_v21, %v547_v28  ;;  %v656_v20 = vmul.f32 %v1165_v10, %v643_v7  ;;  %v657_v21 = vmul.f32 %v1165_v10, %v644_v8  ;;  %v732_v7 = vld [vmem:[%s1579_s4] sm:$0x1] }
  0x51   : > { %v573_v33 = vadd.f32 %v565_v22, %v548_v29  ;;  %v574_v35 = vadd.f32 %v566_v23, %v549_v30  ;;  %v658_v22 = vmul.f32 %v1165_v10, %v645_v9  ;;  %v659_v23 = vmul.f32 %v1165_v10, %v646_v14 }
  0x52   : > { %575 = vst [vmem:[#allocation3] sm:$0xf] %v571_v31  ;;  %576 = vst [vmem:[#allocation3 + $0x4] sm:$0xf] %v572_v32  ;;  %v664_v24 = vrot.slane %v656_v20, 1  ;;  %v665_v25 = vrot.slane %v657_v21, 1  ;;  %v932_v21 = vlaneseq }
  0x53   : > { %577 = vst [vmem:[#allocation3 + $0x8] sm:$0xf] %v573_v33  ;;  %578 = vst [vmem:[#allocation3 + $0xc] sm:$0xf] %v574_v35  ;;  %v666_v26 = vrot.slane %v658_v22, 1  ;;  %v667_v27 = vrot.slane %v659_v23, 1 }
  0x54   : > { %v839_v20 = vld [vmem:[%s1581_s6] sm:$0x1] }
  0x59   : > { %v588_v48 = vld [vmem:[#allocation3] sm:$0xf]  ;;  %v589_v49 = vld [vmem:[#allocation3 + $0x4] sm:$0xf] }
  0x5a   : > { %v590_v50 = vld [vmem:[#allocation3 + $0x8] sm:$0xf]  ;;  %v591_v51 = vld [vmem:[#allocation3 + $0xc] sm:$0xf]  ;;  %v601_v52 = vadd.f32 %v597_v41, %v588_v48  ;;  %v602_v53 = vadd.f32 %v598_v42, %v589_v49 }
  0x5b   : > { %v603_v54 = vadd.f32 %v599_v43, %v590_v50  ;;  %v604_v56 = vadd.f32 %v600_v44, %v591_v51 }
  0x5c   : > { %605 = vst [vmem:[#allocation3] sm:$0xf] %v601_v52  ;;  %606 = vst [vmem:[#allocation3 + $0x4] sm:$0xf] %v602_v53 }
  0x5d   : > { %607 = vst [vmem:[#allocation3 + $0x8] sm:$0xf] %v603_v54  ;;  %608 = vst [vmem:[#allocation3 + $0xc] sm:$0xf] %v604_v56 }
  0x63   : > { %v618_v11 = vld [vmem:[#allocation3] sm:$0xf]  ;;  %v619_v12 = vld [vmem:[#allocation3 + $0x4] sm:$0xf] }
  0x64   : > { %v620_v13 = vld [vmem:[#allocation3 + $0x8] sm:$0xf]  ;;  %v621_v15 = vld [vmem:[#allocation3 + $0xc] sm:$0xf]  ;;  %v631_v16 = vadd.f32 %v627_v2, %v618_v11  ;;  %v632_v17 = vadd.f32 %v628_v3, %v619_v12  ;;  %v1310_v2 = vld [vmem:[%s1580_s5 + $0x30] sm:$0xff]  }
  0x65   : > { %v633_v18 = vadd.f32 %v629_v4, %v620_v13  ;;  %v634_v19 = vadd.f32 %v630_v6, %v621_v15  ;;  %1257 = vmatpush3.bf16.msra.mxu1 %v1310_v2  ;;  %v1311_v3 = vld [vmem:[%s1580_s5 + $0x38] sm:$0xff]   ;;  %v1312_v4 = vld [vmem:[%s1582_s7] sm:$0xff]   ;;  %v1314_v6 = vld [vmem:[%s1582_s7 + $0x10] sm:$0xff]  }
  0x66   : > { %635 = vst [vmem:[#allocation3] sm:$0xf] %v631_v16  ;;  %636 = vst [vmem:[#allocation3 + $0x4] sm:$0xf] %v632_v17  ;;  %1258 = vmatprep.subr.bf16.mxu1 %v1328_v1  ;;  %v1315_v15 = vld [vmem:[%s1582_s7 + $0x18] sm:$0xff]   ;;  %v1316_v16 = vld [vmem:[%s1582_s7 + $0x20] sm:$0xff]  }
  0x67   : > { %637 = vst [vmem:[#allocation3 + $0x8] sm:$0xf] %v633_v18  ;;  %638 = vst [vmem:[#allocation3 + $0xc] sm:$0xf] %v634_v19  ;;  %v1317_v17 = vld [vmem:[%s1582_s7 + $0x28] sm:$0xff]   ;;  %v1318_v18 = vld [vmem:[%s1582_s7 + $0x30] sm:$0xff]  }
  0x68   : > { %v1319_v19 = vld [vmem:[%s1582_s7 + $0x38] sm:$0xff]  }
  0x69   : > { %1259 = vmatpush3.bf16.msra.mxu1 %v1311_v3 }
  0x6d   : > { %v647_v28 = vld [vmem:[#allocation3] sm:$0xf]  ;;  %v648_v29 = vld [vmem:[#allocation3 + $0x4] sm:$0xf] }
  0x6e   : > { %v649_v30 = vld [vmem:[#allocation3 + $0x8] sm:$0xf]  ;;  %v650_v31 = vld [vmem:[#allocation3 + $0xc] sm:$0xf]  ;;  %v672_v32 = vadd.f32 %v664_v24, %v647_v28  ;;  %v673_v33 = vadd.f32 %v665_v25, %v648_v29  ;;  %v1330_v29 = vmov 1983009808  }
  0x6f   : > { %v674_v34 = vadd.f32 %v666_v26, %v649_v30  ;;  %v675_v35 = vadd.f32 %v667_v27, %v650_v31  ;;  %v933_v27 = vshrl.u32 %v932_v21, 7  ;;  %v974_v30 = vunpack.c.l.s4 %v1330_v29 }
  0x70   : > { %676 = vst [vmem:[#allocation3] sm:$0xf] %v672_v32  ;;  %677 = vst [vmem:[#allocation3 + $0x4] sm:$0xf] %v673_v33 }
  0x71   : > { %678 = vst [vmem:[#allocation3 + $0x8] sm:$0xf] %v674_v34  ;;  %679 = vst [vmem:[#allocation3 + $0xc] sm:$0xf] %v675_v35  ;;  %v934_v33 = vsub.s32 0, %v933_v27  ;;  %v975_v34 = vunpack.c.0.s8 %v974_v30 }
  0x77   : > { %v680_v37 = vld [vmem:[#allocation3] sm:$0xf]  ;;  %v681_v38 = vld [vmem:[#allocation3 + $0x4] sm:$0xf] }
  0x78   : > { %v682_v39 = vld [vmem:[#allocation3 + $0x8] sm:$0xf]  ;;  %v683_v40 = vld [vmem:[#allocation3 + $0xc] sm:$0xf]  ;;  %v1491_v41 = vadd.f32 %v1166_v36, %v680_v37  ;;  %v1493_v42 = vadd.f32 %v1166_v36, %v681_v38 }
  0x79   : > { %v1495_v43 = vadd.f32 %v1166_v36, %v682_v39  ;;  %v1497_v44 = vadd.f32 %v1166_v36, %v683_v40  ;;  %v978_v36 = vsub.s32 %v975_v34, %v933_v27 }
  0x7a   : > { %v695_v45 = vmax.f32 %v1491_v41, 0.0  ;;  %v696_v46 = vmax.f32 %v1493_v42, 0.0  ;;  %v1183_v41 = vld [vmem:[%s1583_s8] ss:$0 sm:$0xff] }
  0x7b   : > { %v697_v47 = vmax.f32 %v1495_v43, 0.0  ;;  %v698_v48 = vmax.f32 %v1497_v44, 0.0 }
  0x7c   : > { %v700_v49 = vsel %vm699_vm1, %v695_v45, 0.0  ;;  %v701_v50 = vsel %vm699_vm1, %v696_v46, 0.0 }
  0x7d   : > { %v703_v51 = vsel %vm699_vm1, %v697_v47, 0.0  ;;  %v702_v52 = vadd.f32 %v701_v50, %v700_v49  ;;  %v705_v53 = vsel %vm699_vm1, %v698_v48, 0.0 }
  0x7f   : > { %v704_v54 = vadd.f32 %v703_v51, %v702_v52 }
  0x81   : > { %v706_v55 = vadd.f32 %v705_v53, %v704_v54 }
  0x83   : > { %v707_v56 = vsel %vm699_vm1, %v706_v55, 0.0 }
  0x84   : > { %v708_v57 = vrot.slane %v707_v56, 4 }
  0x86   : > { %v709_v58 = vadd.f32 %v708_v57, %v707_v56 }
  0x88   : > { %v710_v59 = vrot.slane %v709_v58, 2 }
  0x8a   : > { %v711_v60 = vadd.f32 %v710_v59, %v709_v58 }
  0x8c   : > { %v712_v61 = vrot.slane %v711_v60, 1 }
  0x8e   : > { %v713_v62 = vadd.f32 %v712_v61, %v711_v60 }
  0x90   : > { %v714_v63 = vmul.f32 0.0625, %v713_v62 }
  0x92   : > { %v715_v0 = vpack.c.bf16 %v714_v63, %v714_v63 }
  0x94   : > { %1241 = vmatmul.mubr.bf16.vlgmr.msra.gmra.mrb[0].mxu0 %v715_v0 }
  0x95   : > { %1280 = vmatprep.mubr.msk.bf16.mxu0 %vm1329_vm0, %v1328_v1  ;;  %1265 = vmatpush3.bf16.msra.mxu0 %v1312_v4 }
  0x96   : > { %1266 = vmatprep.subr.bf16.mxu0 %v1328_v1 }
  0x99   : > { %1267 = vmatpush3.bf16.msra.mxu0 %v1313_v5 }
  0x9a   : > { %1268 = vmatprep.subr.bf16.mxu0 %v1328_v1 }
  0x9d   : > { %1269 = vmatpush3.bf16.msra.mxu0 %v1314_v6 }
  0x9e   : > { %1270 = vmatprep.subr.bf16.mxu0 %v1328_v1 }
  0xa1   : > { %1271 = vmatpush3.bf16.msra.mxu0 %v1315_v15 }
  0xa2   : > { %1272 = vmatprep.subr.bf16.mxu0 %v1328_v1 }
  0xa5   : > { %1273 = vmatpush3.bf16.msra.mxu0 %v1316_v16 }
  0xa6   : > { %1274 = vmatprep.subr.bf16.mxu0 %v1328_v1 }
  0xa9   : > { %1275 = vmatpush3.bf16.msra.mxu0 %v1317_v17 }
  0xaa   : > { %1276 = vmatprep.subr.bf16.mxu0 %v1328_v1 }
  0xad   : > { %1277 = vmatpush3.bf16.msra.mxu0 %v1318_v18 }
  0xae   : > { %1278 = vmatprep.subr.bf16.mxu0 %v1328_v1 }
  0xb1   : > { %1279 = vmatpush3.bf16.msra.mxu0 %v1319_v19 }
 0x167   : > { %v815_v8 = vpop.f32.mrb[0].mxu0 }
 0x168   : > { %v816_v9 = vadd.f32 %v815_v8, %v732_v7  ;;  %v1242_v10 = vpop.f32.mrb[1].mxu0 }
 0x169   : > { %v818_v11 = vpop.f32.mrb[2].mxu0 }
 0x16a   : > { %v821_v12 = vmax.f32 %v816_v9, 0.0  ;;  %v1243_v13 = vpop.f32.mrb[3].mxu0 }
 0x16c   : > { %v822_v14 = vpack.c.bf16 %v821_v12, %v821_v12 }
 0x16e   : > { %1261 = vmatmul.mubr.bf16.vlgmr.msra.gmra.mrb[0].mxu1 %v822_v14 }
 0x241   : > { %v922_v22 = vpop.f32.mrb[0].mxu1 }
 0x242   : > { %v923_v23 = vadd.f32 %v922_v22, %v839_v20  ;;  %v1262_v24 = vpop.f32.mrb[1].mxu1 }
 0x243   : > { %v925_v25 = vpop.f32.mrb[2].mxu1 }
 0x244   : > { %v928_v26 = vadd.f32 3.0, %v923_v23  ;;  %v1263_v28 = vpop.f32.mrb[3].mxu1 }
 0x246   : > { %v929_v31 = vmax.f32 %v928_v26, 0.0 }
 0x248   : > { %v930_v32 = vmin.f32 %v929_v31, 6.0 }
 0x24a   : > { %v931_v1 = vmul.f32 0.16666667, %v930_v32 }
 0x24c   : > { %v935_v35 = vrot.slane %v931_v1, %v934_v33 }
 0x24e   : > { %v936_v37 = vmul.f32 %v935_v35, %v695_v45  ;;  %v937_v38 = vmul.f32 %v935_v35, %v696_v46  ;;  %v938_v39 = vmul.f32 %v935_v35, %v697_v47  ;;  %v939_v40 = vmul.f32 %v935_v35, %v698_v48 }
 0x250   : > { %v1184_v49 = vpack.c.bf16 %v937_v38, %v936_v37  ;;  %v1185_v50 = vpack.c.bf16 %v939_v40, %v938_v39 }
 0x252   : > { %v979_v51 = vrot.slane %v1184_v49, %v978_v36  ;;  %v986_v52 = vrot.slane %v1185_v50, %v978_v36 }
 0x254   : > { %v987_v53 = vcombine.low %v979_v51, %v986_v52 }
 0x256   : > { %1281 = vmatmul.mubr.bf16.vlgmr.msra.gmra.mrb[4].mxu0 %v987_v53 }
 0x329   : > { %v1071_v45 = vpop.f32.mrb[4].mxu0 }
 0x32a   : > { %v1072_v42 = vadd.f32 %v1183_v41, %v1071_v45  ;;  %v1282_v46 = vpop.f32.mrb[5].mxu0 }
 0x32b   : > { %v1074_v54 = vpop.f32.mrb[6].mxu0 }
 0x32c   : > { %v1078_v43 = vmax.f32 %v1072_v42, 0.0  ;;  %v1075_v47 = vadd.f32 %v1183_v41, %v1074_v54  ;;  %v1283_v55 = vpop.f32.mrb[7].mxu0 }
 0x32e   : > { %v1082_v44 = vcombine.high %v1078_v43, %v1078_v43  ;;  %v1086_v48 = vpack.c.bf16 %v1078_v43, %v1078_v43  ;;  %v1079_v56 = vmax.f32 %v1075_v47, 0.0 }
 0x330   : > { %v1087_v57 = vpack.c.bf16 %v1082_v44, %v1082_v44  ;;  %1090 = vst [vmem:[%s332_s16] sm:$0x3] %v1086_v48  ;;  %v1083_v58 = vcombine.high %v1079_v56, %v1079_v56  ;;  %v1088_v59 = vpack.c.bf16 %v1079_v56, %v1079_v56 }
 0x332   : > { %1091 = vst [vmem:[%s332_s16 + $0x2] sm:$0x3] %v1087_v57  ;;  %v1089_v60 = vpack.c.bf16 %v1083_v58, %v1083_v58  ;;  %1092 = vst [vmem:[%s332_s16 + $0x4] sm:$0x3] %v1088_v59 }
 0x334   : > { %1093 = vst [vmem:[%s332_s16 + $0x6] sm:$0x3] %v1089_v60 }
 0x335 PF: > { %s19_s30 = sadd.s32 1, %s1326_s30  }
 0x336   : > { %p16_p4 = scmp.ge.s32.totalorder %s19_s30, 4  }
 0x338   :  { %18 = sbr.rel (!%p16_p4) target bundleno = 1 (0x1), region = 91 }

// kernel: mobilenet_v3_forward.8
= control target key start
LH: loop header
LB: loop body
LE: loop exit
PB: predicated region body
PF: predicated region fallthrough
CT: control target
= control target key end

     0   :  { %s1262_s27 = smov 0   ;;  %s1425_s0 = inlined_call_operand.vmem [shape: bf16[2,4,3,8,128], index: 0, kind: input, shape index: {}]   ;;  %s1426_s1 = inlined_call_operand.vmem [shape: f32[4,3,8,1], index: 1, kind: input, shape index: {}]   ;;  %s1427_s2 = inlined_call_operand.vmem [shape: bf16[128,128], index: 2, kind: input, shape index: {}]   ;;  %s1428_s3 = inlined_call_operand.vmem [shape: f32[1,128], index: 3, kind: input, shape index: {}]   ;;  %s1429_s4 = inlined_call_operand.vmem [shape: f32[9,128], index: 4, kind: input, shape index: {}]   ;;  %s1430_s5 = inlined_call_operand.vmem [shape: f32[1,128], index: 5, kind: input, shape index: {}]   ;;  %s1431_s6 = inlined_call_operand.vmem [shape: bf16[128,128], index: 6, kind: input, shape index: {}]   ;;  %s1432_s7 = inlined_call_operand.vmem [shape: f32[1,128], index: 7, kind: input, shape index: {}]   ;;  %s1433_s8 = inlined_call_operand.vmem [shape: bf16[2,2,2,128], index: 8, kind: output, shape index: {}]  }
   0x1 LB: > { %s1016_s28 = sadd.s32 4294967295, %s1210_s27   ;;  %p1020_p0 = scmp.ge.s32.totalorder %s1210_s27, 1  ;;  %s1210_s27 = sphi %s1262_s27, %s18_s27  }
   0x2   : > { %p262_p1 = scmp.lt.s32.totalorder %s1210_s27, 3 }
   0x4   : > { %p263_p2 = pnand %p1020_p0, %p262_p1 }
   0x5   : > { %v1182_v0 = vld [vmem:[%s1427_s2] sm:$0xff] (!%p263_p2)   ;;  %p295_p3 = scmp.lt.s32.totalorder (!%p263_p2), %s1016_s28, 1  ;;  %v1183_v1 = vld [vmem:[%s1427_s2 + $0x8] sm:$0xff] (!%p263_p2)   ;;  %v1212_v2 = vmov (!%p263_p2), 0   ;;  %v1184_v3 = vld [vmem:[%s1427_s2 + $0x10] sm:$0xff] (!%p263_p2)   ;;  %v1213_v27 = vmov (!%p263_p2), 0.0  }
   0x6   : > { %266 = sbr.rel (%p263_p2) target bundleno = 596 (0x254), region = 52  ;;  %1118 = vmatprep.subr.bf16.mxu0 (!%p263_p2), %v1182_v0  ;;  %1180 = vset.pattern.permute.xlu0 (!%p263_p2), %v1212_v2  ;;  %v1185_v4 = vld [vmem:[%s1427_s2 + $0x18] sm:$0xff] (!%p263_p2)   ;;  %v1186_v6 = vld [vmem:[%s1427_s2 + $0x20] sm:$0xff] (!%p263_p2)   ;;  %v519_v8 = vld [vmem:[%s1426_s1 + $0x10] sm:$0xff] (!%p263_p2)  ;;  %625 = vst [vmem:[#allocation3] sm:$0x3] (!%p263_p2), %v1213_v27 }
   0x7   : > { %1119 = vmatpush3.bf16.msra.mxu0 (!%p263_p2), %v1182_v0  ;;  %1181 = vset.pattern.permute.xlu1 (!%p263_p2), %v1212_v2  ;;  %v517_v7 = vld [vmem:[%s1426_s1] sm:$0xff] (!%p263_p2)  ;;  %v1187_v9 = vld [vmem:[%s1427_s2 + $0x28] sm:$0xff] (!%p263_p2)   ;;  %v520_v11 = vld [vmem:[%s1426_s1 + $0x18] sm:$0xff] (!%p263_p2)  ;;  %626 = vst [vmem:[#allocation3 + $0x2] sm:$0x3] (!%p263_p2), %v1213_v27  ;;  %vm1214_vm0 = vmmov (!%p263_p2), 0  }
   0x8   : > { %1120 = vmatprep.subr.bf16.mxu0 (!%p263_p2), %v1183_v1  ;;  %531 = vperm.xlu0 (!%p263_p2), %1180, %v517_v7   ;;  %v518_v10 = vld [vmem:[%s1426_s1 + $0x8] sm:$0xff] (!%p263_p2)  ;;  %v1188_v12 = vld [vmem:[%s1427_s2 + $0x30] sm:$0xff] (!%p263_p2)   ;;  %v521_v13 = vld [vmem:[%s1426_s1 + $0x20] sm:$0xff] (!%p263_p2) }
   0x9   : > { %541 = vperm.xlu1 (!%p263_p2), %1181, %v519_v8   ;;  %v522_v14 = vld [vmem:[%s1426_s1 + $0x28] sm:$0xff] (!%p263_p2)  ;;  %v1189_v15 = vld [vmem:[%s1427_s2 + $0x38] sm:$0xff] (!%p263_p2)   ;;  %v523_v16 = vld [vmem:[%s1426_s1 + $0x30] sm:$0xff] (!%p263_p2)  ;;  %1146 = vmatprep.subr.bf16.mxu1 (!%p263_p2), %v1213_v27 }
   0xa   : > { %v524_v17 = vld [vmem:[%s1426_s1 + $0x38] sm:$0xff] (!%p263_p2)  ;;  %v525_v18 = vld [vmem:[%s1426_s1 + $0x40] sm:$0xff] (!%p263_p2)  ;;  %v526_v19 = vld [vmem:[%s1426_s1 + $0x48] sm:$0xff] (!%p263_p2)  ;;  %1162 = vmatprep.mubr.msk.bf16.mxu1 (!%p263_p2), %vm1214_vm0, %v1213_v27 }
   0xb   : > { %1121 = vmatpush3.bf16.msra.mxu0 (!%p263_p2), %v1183_v1  ;;  %v527_v22 = vld [vmem:[%s1426_s1 + $0x50] sm:$0xff] (!%p263_p2)  ;;  %v528_v23 = vld [vmem:[%s1426_s1 + $0x58] sm:$0xff] (!%p263_p2)  ;;  %v1196_v28 = vld [vmem:[%s1431_s6] sm:$0xff] (!%p263_p2)  }
   0xc   : > { %1122 = vmatprep.subr.bf16.mxu0 (!%p263_p2), %v1184_v3  ;;  %536 = vperm.xlu0 (!%p263_p2), %1180, %v518_v10   ;;  %v1197_v29 = vld [vmem:[%s1431_s6 + $0x8] sm:$0xff] (!%p263_p2)   ;;  %v1198_v30 = vld [vmem:[%s1431_s6 + $0x10] sm:$0xff] (!%p263_p2)   ;;  %v1199_v31 = vld [vmem:[%s1431_s6 + $0x18] sm:$0xff] (!%p263_p2)  }
   0xd   : > { %s1435_s28 = smov (!%p295_p3, %s1016_s28), 1  ;;  %546 = vperm.xlu1 %1181, %v520_v11   ;;  %1147 = vmatpush3.bf16.msra.mxu1 %v1196_v28  ;;  %v1200_v32 = vld [vmem:[%s1431_s6 + $0x20] sm:$0xff]   ;;  %v1201_v33 = vld [vmem:[%s1431_s6 + $0x28] sm:$0xff]   ;;  %v1202_v34 = vld [vmem:[%s1431_s6 + $0x30] sm:$0xff]  }
   0xe   : > { %s1166_s13 = smul.u32 48, %s1435_s28  ;;  %1148 = vmatprep.subr.bf16.mxu1 %v1213_v27  ;;  %v1203_v35 = vld [vmem:[%s1431_s6 + $0x38] sm:$0xff]   ;;  %v1371_v38 = vld [vmem:[%s1428_s3] ss:$0 sm:$0xff]  ;;  %s1022_s12 = sshll.u32 %s1435_s28, 1 }
   0xf   : > { %1123 = vmatpush3.bf16.msra.mxu0 %v1184_v3  ;;  %s303_s15 = scalar_lea.vmem %s1433_s8, %s1022_s12 }
  0x10   : > { %s1285_s16 = scalar_lea.vmem %s1425_s0, %s1166_s13  ;;  %1124 = vmatprep.subr.bf16.mxu0 %v1185_v4  ;;  %551 = vperm.xlu0 %1180, %v521_v13  }
  0x11   : > { %v1190_v5 = vld [vmem:[%s1285_s16] sm:$0xff]   ;;  %556 = vperm.xlu1 %1181, %v522_v14   ;;  %v1191_v20 = vld [vmem:[%s1285_s16 + $0x8] sm:$0xff]   ;;  %v1192_v21 = vld [vmem:[%s1285_s16 + $0x10] sm:$0xff]   ;;  %1149 = vmatpush3.bf16.msra.mxu1 %v1197_v29 }
  0x12   : > { %1134 = vmatprep.mubr.bf16.mxu0 %v1190_v5  ;;  %v1193_v24 = vld [vmem:[%s1285_s16 + $0x18] sm:$0xff]   ;;  %v1194_v25 = vld [vmem:[%s1285_s16 + $0x20] sm:$0xff]   ;;  %v1195_v26 = vld [vmem:[%s1285_s16 + $0x28] sm:$0xff]   ;;  %1150 = vmatprep.subr.bf16.mxu1 %v1213_v27 }
  0x13   : > { %1125 = vmatpush3.bf16.msra.mxu0 %v1185_v4 }
  0x14   : > { %1126 = vmatprep.subr.bf16.mxu0 %v1186_v6  ;;  %561 = vperm.xlu0 %1180, %v523_v16  }
  0x15   : > { %566 = vperm.xlu1 %1181, %v524_v17   ;;  %1151 = vmatpush3.bf16.msra.mxu1 %v1198_v30 }
  0x16   : > { %1152 = vmatprep.subr.bf16.mxu1 %v1213_v27 }
  0x17   : > { %1127 = vmatpush3.bf16.msra.mxu0 %v1186_v6 }
  0x18   : > { %1128 = vmatprep.subr.bf16.mxu0 %v1187_v9  ;;  %571 = vperm.xlu0 %1180, %v525_v18  }
  0x19   : > { %576 = vperm.xlu1 %1181, %v526_v19   ;;  %1153 = vmatpush3.bf16.msra.mxu1 %v1199_v31 }
  0x1a   : > { %1154 = vmatprep.subr.bf16.mxu1 %v1213_v27 }
  0x1b   : > { %1129 = vmatpush3.bf16.msra.mxu0 %v1187_v9 }
  0x1c   : > { %1130 = vmatprep.subr.bf16.mxu0 %v1188_v12  ;;  %581 = vperm.xlu0 %1180, %v527_v22  }
  0x1d   : > { %586 = vperm.xlu1 %1181, %v528_v23   ;;  %1155 = vmatpush3.bf16.msra.mxu1 %v1200_v32  ;;  %v631_v32 = vld [vmem:[#allocation3] sm:$0x3] }
  0x1e   : > { %1156 = vmatprep.subr.bf16.mxu1 %v1213_v27 }
  0x1f   : > { %1131 = vmatpush3.bf16.msra.mxu0 %v1188_v12 }
  0x20   : > { %1132 = vmatprep.subr.bf16.mxu0 %v1189_v15 }
  0x21   : > { %1157 = vmatpush3.bf16.msra.mxu1 %v1201_v33  ;;  %v632_v33 = vld [vmem:[#allocation3 + $0x2] sm:$0x3] }
  0x22   : > { %1158 = vmatprep.subr.bf16.mxu1 %v1213_v27 }
  0x23   : > { %1133 = vmatpush3.bf16.msra.mxu0 %v1189_v15 }
  0x25   : > { %1159 = vmatpush3.bf16.msra.mxu1 %v1202_v34 }
  0x26   : > { %1135 = vmatmul.mubr.bf16.vlgmr.msra.gmra.mrb[0].mxu0 %v1191_v20  ;;  %1160 = vmatprep.subr.bf16.mxu1 %v1213_v27 }
  0x27   : > { %1138 = vmatprep.mubr.bf16.mxu0 %v1192_v21  ;;  %v1038_v21 = vld [vmem:[%s1429_s4] ss:$0 sm:$0xff] }
  0x29   : > { %1161 = vmatpush3.bf16.msra.mxu1 %v1203_v35 }
  0x2e   : > { %1139 = vmatmul.mubr.bf16.gmra.mrb[4].mxu0 %v1193_v24 }
  0x2f   : > { %1142 = vmatprep.mubr.bf16.mxu0 %v1194_v25 }
  0x36   : > { %1143 = vmatmul.mubr.bf16.gmra.mrb[8].mxu0 %v1195_v26 }
  0x87   : > { %v532_v36 = vpop.permute.xlu0 %531 }
  0x88   : > { %v542_v37 = vpop.permute.xlu1 %541 }
  0x8b   : > { %v537_v40 = vpop.permute.xlu0 %536 }
  0x8c   : > { %v547_v43 = vpop.permute.xlu1 %546 }
  0x8f   : > { %v552_v53 = vpop.permute.xlu0 %551 }
  0x90   : > { %v557_v56 = vpop.permute.xlu1 %556 }
  0x93   : > { %v562_v8 = vpop.permute.xlu0 %561 }
  0x94   : > { %v567_v9 = vpop.permute.xlu1 %566 }
  0x97   : > { %v572_v29 = vpop.permute.xlu0 %571 }
  0x98   : > { %v577_v30 = vpop.permute.xlu1 %576 }
  0xf9   : > { %v1136_v39 = vpop.f32.mrb[0].mxu0 }
  0xfa   : > { %v467_v41 = vadd.f32 %v1136_v39, %v1371_v38  ;;  %v458_v42 = vpop.f32.mrb[1].mxu0 }
  0xfb   : > { %v459_v44 = vadd.f32 %v1371_v38, %v458_v42  ;;  %v1137_v45 = vpop.f32.mrb[2].mxu0 }
  0xfc   : > { %v507_v46 = vmax.f32 %v467_v41, 0.0  ;;  %v470_v47 = vadd.f32 %v1137_v45, %v1371_v38  ;;  %v461_v48 = vpop.f32.mrb[3].mxu0  ;;  %v582_v45 = vpop.permute.xlu0 %581 }
  0xfd   : > { %v505_v49 = vmax.f32 %v459_v44, 0.0  ;;  %v462_v50 = vadd.f32 %v1371_v38, %v461_v48 }
  0xfe   : > { %v508_v51 = vmax.f32 %v470_v47, 0.0  ;;  %v591_v54 = vmul.f32 %v542_v37, %v507_v46  ;;  %v587_v46 = vpop.permute.xlu1 %586 }
  0xff   : > { %v506_v52 = vmax.f32 %v462_v50, 0.0  ;;  %v589_v57 = vmul.f32 %v532_v36, %v505_v49 }
 0x100   : > { %v592_v55 = vmul.f32 %v547_v43, %v508_v51 }
 0x101   : > { %v590_v58 = vmul.f32 %v537_v40, %v506_v52  ;;  %v1140_v59 = vpop.f32.mrb[4].mxu0 }
 0x102   : > { %v1068_v60 = vpack.c.bf16 %v592_v55, %v591_v54  ;;  %v483_v61 = vadd.f32 %v1140_v59, %v1371_v38  ;;  %v474_v62 = vpop.f32.mrb[5].mxu0 }
 0x103   : > { %v1063_v63 = vpack.c.bf16 %v590_v58, %v589_v57  ;;  %v475_v0 = vadd.f32 %v1371_v38, %v474_v62  ;;  %v1141_v1 = vpop.f32.mrb[6].mxu0 }
 0x104   : > { %1090 = vst [vmem:[#allocation2 + $0x8] sm:$0xff] %v1068_v60   ;;  %v511_v2 = vmax.f32 %v483_v61, 0.0  ;;  %v486_v3 = vadd.f32 %v1141_v1, %v1371_v38  ;;  %v477_v4 = vpop.f32.mrb[7].mxu0  ;;  %v1040_v1 = vld [vmem:[%s1429_s4 + $0x2] ss:$0 sm:$0xff] }
 0x105   : > { %1064 = vst [vmem:[#allocation2] sm:$0xff] %v1063_v63   ;;  %v509_v5 = vmax.f32 %v475_v0, 0.0  ;;  %v478_v6 = vadd.f32 %v1371_v38, %v477_v4 }
 0x106   : > { %v512_v7 = vmax.f32 %v486_v3, 0.0  ;;  %v595_v11 = vmul.f32 %v562_v8, %v511_v2 }
 0x107   : > { %v510_v10 = vmax.f32 %v478_v6, 0.0  ;;  %v593_v13 = vmul.f32 %v552_v53, %v509_v5 }
 0x108   : > { %v596_v12 = vmul.f32 %v567_v9, %v512_v7 }
 0x109   : > { %v594_v14 = vmul.f32 %v557_v56, %v510_v10  ;;  %v1144_v15 = vpop.f32.mrb[8].mxu0 }
 0x10a   : > { %v1078_v16 = vpack.c.bf16 %v596_v12, %v595_v11  ;;  %v490_v17 = vpop.f32.mrb[9].mxu0  ;;  %v499_v27 = vadd.f32 %v1144_v15, %v1371_v38 }
 0x10b   : > { %v1073_v18 = vpack.c.bf16 %v594_v14, %v593_v13  ;;  %v1145_v24 = vpop.f32.mrb[10].mxu0  ;;  %v491_v31 = vadd.f32 %v1371_v38, %v490_v17  ;;  %v645_v40 = vld [vmem:[#allocation2 + $0xc] sm:$0x1]  ;;  %v1041_v14 = vld [vmem:[%s1429_s4 + $0x3] ss:$0 sm:$0xff] }
 0x10c   : > { %v627_v19 = vld [vmem:[#allocation2] sm:$0x1]  ;;  %v628_v20 = vld [vmem:[#allocation2 + $0x4] sm:$0x1]  ;;  %1092 = vst [vmem:[#allocation2 + $0x18] sm:$0xff] %v1078_v16   ;;  %v493_v28 = vpop.f32.mrb[11].mxu0  ;;  %v502_v34 = vadd.f32 %v1145_v24, %v1371_v38  ;;  %v647_v47 = vunpack.c.l.bf16 %v645_v40 }
 0x10d   : > { %v629_v22 = vunpack.c.l.bf16 %v627_v19  ;;  %v630_v23 = vunpack.c.l.bf16 %v628_v20  ;;  %1091 = vst [vmem:[#allocation2 + $0x10] sm:$0xff] %v1073_v18   ;;  %v494_v35 = vadd.f32 %v1371_v38, %v493_v28  ;;  %v515_v36 = vmax.f32 %v499_v27, 0.0  ;;  %v1039_v38 = vld [vmem:[%s1429_s4 + $0x1] ss:$0 sm:$0xff]  ;;  %v663_v55 = vld [vmem:[#allocation2 + $0x4] sm:$0x3] }
 0x10e   : > { %v513_v42 = vmax.f32 %v491_v31, 0.0  ;;  %v516_v43 = vmax.f32 %v502_v34, 0.0  ;;  %v662_v54 = vld [vmem:[#allocation2] sm:$0x3]  ;;  %v656_v57 = vmul.f32 %v1039_v38, %v647_v47  ;;  %v665_v62 = vunpack.c.l.bf16 %v663_v55  ;;  %v745_v47 = vld [vmem:[#allocation2 + $0x4] sm:$0x1] }
 0x10f   : > { %v638_v25 = vmul.f32 %v1038_v21, %v629_v22  ;;  %v639_v26 = vmul.f32 %v1038_v21, %v630_v23  ;;  %v514_v44 = vmax.f32 %v494_v35, 0.0  ;;  %v599_v49 = vmul.f32 %v582_v45, %v515_v36  ;;  %v1043_v36 = vld [vmem:[%s1429_s4 + $0x5] ss:$0 sm:$0xff] }
 0x110   : > { %v600_v50 = vmul.f32 %v587_v46, %v516_v43  ;;  %v597_v51 = vmul.f32 %v572_v29, %v513_v42  ;;  %v664_v61 = vunpack.c.l.bf16 %v662_v54  ;;  %v674_v3 = vmul.f32 %v1040_v1, %v665_v62  ;;  %v746_v46 = vld [vmem:[#allocation2 + $0x8] sm:$0x1]  ;;  %v780_v62 = vld [vmem:[#allocation2 + $0x4] sm:$0x3] }
 0x111   : > { %v640_v37 = vadd.f32 %v638_v25, %v631_v32  ;;  %v641_v39 = vadd.f32 %v639_v26, %v632_v33  ;;  %v598_v52 = vmul.f32 %v577_v30, %v514_v44  ;;  %v1042_v25 = vld [vmem:[%s1429_s4 + $0x4] ss:$0 sm:$0xff] }
 0x112   : > { %v1088_v53 = vpack.c.bf16 %v600_v50, %v599_v49  ;;  %v673_v2 = vmul.f32 %v1040_v1, %v664_v61  ;;  %v678_v5 = vrot.slane %v674_v3, 1  ;;  %v747_v49 = vunpack.c.l.bf16 %v745_v47  ;;  %v1044_v50 = vld [vmem:[%s1429_s4 + $0x6] ss:$0 sm:$0xff]  ;;  %v781_v61 = vld [vmem:[#allocation2 + $0x8] sm:$0x3] }
 0x113   : > { %642 = vst [vmem:[#allocation3] sm:$0x3] %v640_v37  ;;  %643 = vst [vmem:[#allocation3 + $0x2] sm:$0x3] %v641_v39  ;;  %v1083_v56 = vpack.c.bf16 %v598_v52, %v597_v51  ;;  %v686_v10 = vld [vmem:[#allocation2 + $0x18] sm:$0x1]  ;;  %v783_v3 = vunpack.c.l.bf16 %v781_v61 }
 0x114   : > { %v646_v41 = vld [vmem:[#allocation2 + $0x10] sm:$0x1]  ;;  %1094 = vst [vmem:[#allocation2 + $0x28] sm:$0xff] %v1088_v53   ;;  %v677_v4 = vrot.slane %v673_v2, 1  ;;  %v687_v11 = vld [vmem:[#allocation2 + $0x1c] sm:$0x1]  ;;  %v688_v12 = vunpack.c.l.bf16 %v686_v10  ;;  %v756_v51 = vmul.f32 %v1044_v50, %v747_v49 }
 0x115   : > { %v648_v48 = vunpack.c.l.bf16 %v646_v41  ;;  %1093 = vst [vmem:[#allocation2 + $0x20] sm:$0xff] %v1083_v56   ;;  %v689_v13 = vunpack.c.l.bf16 %v687_v11  ;;  %v721_v26 = vld [vmem:[#allocation2 + $0x18] sm:$0x3]  ;;  %v722_v27 = vld [vmem:[#allocation2 + $0x1c] sm:$0x3] }
 0x116   : > { %v697_v15 = vmul.f32 %v1041_v14, %v688_v12  ;;  %v723_v32 = vunpack.c.l.bf16 %v721_v26  ;;  %v724_v33 = vunpack.c.l.bf16 %v722_v27  ;;  %v763_v56 = vld [vmem:[#allocation2 + $0x10] sm:$0x1] }
 0x117   : > { %v657_v58 = vmul.f32 %v1039_v38, %v648_v48  ;;  %v698_v16 = vmul.f32 %v1041_v14, %v689_v13  ;;  %v748_v48 = vunpack.c.l.bf16 %v746_v46 }
 0x118   : > { %v732_v37 = vmul.f32 %v1043_v36, %v723_v32  ;;  %v733_v39 = vmul.f32 %v1043_v36, %v724_v33  ;;  %v1216_v32 = vmov 1983009808  }
 0x119   : > { %v757_v38 = vmul.f32 %v1044_v50, %v748_v48  ;;  %v950_v33 = vunpack.c.l.s4 %v1216_v32 }
 0x11a   : > { %v649_v59 = vld [vmem:[#allocation3] sm:$0x3]  ;;  %v650_v60 = vld [vmem:[#allocation3 + $0x2] sm:$0x3]  ;;  %v736_v40 = vrot.slane %v732_v37, 1  ;;  %v737_v41 = vrot.slane %v733_v39, 1 }
 0x11b   : > { %v658_v63 = vadd.f32 %v656_v57, %v649_v59  ;;  %v659_v0 = vadd.f32 %v657_v58, %v650_v60  ;;  %v705_v21 = vld [vmem:[#allocation2 + $0x28] sm:$0x1]  ;;  %v764_v57 = vld [vmem:[#allocation2 + $0x14] sm:$0x1]  ;;  %v765_v58 = vunpack.c.l.bf16 %v763_v56  ;;  %v1045_v60 = vld [vmem:[%s1429_s4 + $0x7] ss:$0 sm:$0xff] }
 0x11c   : > { %v704_v22 = vld [vmem:[#allocation2 + $0x24] sm:$0x1]  ;;  %v707_v23 = vunpack.c.l.bf16 %v705_v21  ;;  %v766_v59 = vunpack.c.l.bf16 %v764_v57 }
 0x11d   : > { %660 = vst [vmem:[#allocation3] sm:$0x3] %v658_v63  ;;  %661 = vst [vmem:[#allocation3 + $0x2] sm:$0x3] %v659_v0  ;;  %v706_v24 = vunpack.c.l.bf16 %v704_v22  ;;  %v774_v63 = vmul.f32 %v1045_v60, %v765_v58 }
 0x11e   : > { %v716_v28 = vmul.f32 %v1042_v25, %v707_v23  ;;  %v775_v0 = vmul.f32 %v1045_v60, %v766_v59 }
 0x11f   : > { %v715_v29 = vmul.f32 %v1042_v25, %v706_v24 }
 0x124   : > { %v666_v6 = vld [vmem:[#allocation3] sm:$0x3]  ;;  %v667_v7 = vld [vmem:[#allocation3 + $0x2] sm:$0x3] }
 0x125   : > { %v681_v8 = vadd.f32 %v677_v4, %v666_v6  ;;  %v682_v9 = vadd.f32 %v678_v5, %v667_v7  ;;  %v782_v4 = vunpack.c.l.bf16 %v780_v62  ;;  %v1046_v7 = vld [vmem:[%s1429_s4 + $0x8] ss:$0 sm:$0xff] }
 0x127   : > { %683 = vst [vmem:[#allocation3] sm:$0x3] %v681_v8  ;;  %684 = vst [vmem:[#allocation3 + $0x2] sm:$0x3] %v682_v9  ;;  %v792_v8 = vmul.f32 %v1046_v7, %v783_v3  ;;  %v791_v9 = vmul.f32 %v1046_v7, %v782_v4 }
 0x129   : > { %v796_v10 = vrot.slane %v792_v8, 1  ;;  %v795_v11 = vrot.slane %v791_v9, 1 }
 0x12e   : > { %v690_v17 = vld [vmem:[#allocation3] sm:$0x3]  ;;  %v691_v18 = vld [vmem:[#allocation3 + $0x2] sm:$0x3] }
 0x12f   : > { %v699_v19 = vadd.f32 %v697_v15, %v690_v17  ;;  %v700_v20 = vadd.f32 %v698_v16, %v691_v18  ;;  %v1215_v16 = vmov 1966171168   ;;  %v847_v18 = vlaneseq }
 0x130   : > { %v845_v17 = vunpack.c.l.s4 %v1215_v16 }
 0x131   : > { %701 = vst [vmem:[#allocation3] sm:$0x3] %v699_v19  ;;  %702 = vst [vmem:[#allocation3 + $0x2] sm:$0x3] %v700_v20  ;;  %v1047_v19 = vld [vmem:[%s1430_s5] ss:$0 sm:$0xff] }
 0x132   : > { %v846_v20 = vunpack.c.0.s8 %v845_v17  ;;  %v848_v21 = vshrl.u32 %v847_v18, 7 }
 0x138   : > { %v708_v30 = vld [vmem:[#allocation3] sm:$0x3]  ;;  %v709_v31 = vld [vmem:[#allocation3 + $0x2] sm:$0x3] }
 0x139   : > { %v717_v34 = vadd.f32 %v715_v29, %v708_v30  ;;  %v718_v35 = vadd.f32 %v716_v28, %v709_v31  ;;  %v849_v28 = vsub.s32 %v846_v20, %v848_v21 }
 0x13b   : > { %719 = vst [vmem:[#allocation3] sm:$0x3] %v717_v34  ;;  %720 = vst [vmem:[#allocation3 + $0x2] sm:$0x3] %v718_v35  ;;  %v951_v34 = vunpack.c.0.s8 %v950_v33  ;;  %v1048_v35 = vld [vmem:[%s1432_s7] ss:$0 sm:$0xff] }
 0x13d   : > { %v954_v39 = vsub.s32 %v951_v34, %v848_v21 }
 0x142   : > { %v725_v42 = vld [vmem:[#allocation3] sm:$0x3]  ;;  %v726_v43 = vld [vmem:[#allocation3 + $0x2] sm:$0x3] }
 0x143   : > { %v740_v44 = vadd.f32 %v736_v40, %v725_v42  ;;  %v741_v45 = vadd.f32 %v737_v41, %v726_v43 }
 0x145   : > { %742 = vst [vmem:[#allocation3] sm:$0x3] %v740_v44  ;;  %743 = vst [vmem:[#allocation3 + $0x2] sm:$0x3] %v741_v45 }
 0x14c   : > { %v749_v52 = vld [vmem:[#allocation3] sm:$0x3]  ;;  %v750_v53 = vld [vmem:[#allocation3 + $0x2] sm:$0x3] }
 0x14d   : > { %v758_v54 = vadd.f32 %v756_v51, %v749_v52  ;;  %v759_v55 = vadd.f32 %v757_v38, %v750_v53 }
 0x14f   : > { %760 = vst [vmem:[#allocation3] sm:$0x3] %v758_v54  ;;  %761 = vst [vmem:[#allocation3 + $0x2] sm:$0x3] %v759_v55 }
 0x156   : > { %v767_v1 = vld [vmem:[#allocation3] sm:$0x3]  ;;  %v768_v2 = vld [vmem:[#allocation3 + $0x2] sm:$0x3] }
 0x157   : > { %v776_v5 = vadd.f32 %v774_v63, %v767_v1  ;;  %v777_v6 = vadd.f32 %v775_v0, %v768_v2 }
 0x159   : > { %778 = vst [vmem:[#allocation3] sm:$0x3] %v776_v5  ;;  %779 = vst [vmem:[#allocation3 + $0x2] sm:$0x3] %v777_v6 }
 0x160   : > { %v784_v12 = vld [vmem:[#allocation3] sm:$0x3]  ;;  %v785_v13 = vld [vmem:[#allocation3 + $0x2] sm:$0x3] }
 0x161   : > { %v799_v14 = vadd.f32 %v795_v11, %v784_v12  ;;  %v800_v15 = vadd.f32 %v796_v10, %v785_v13 }
 0x163   : > { %801 = vst [vmem:[#allocation3] sm:$0x3] %v799_v14  ;;  %802 = vst [vmem:[#allocation3 + $0x2] sm:$0x3] %v800_v15 }
 0x16a   : > { %v803_v22 = vld [vmem:[#allocation3] sm:$0x3]  ;;  %v804_v23 = vld [vmem:[#allocation3 + $0x2] sm:$0x3] }
 0x16b   : > { %v812_v24 = vadd.f32 %v1047_v19, %v803_v22  ;;  %v813_v25 = vadd.f32 %v1047_v19, %v804_v23 }
 0x16d   : > { %v814_v26 = vmax.f32 %v812_v24, 0.0  ;;  %v815_v27 = vmax.f32 %v813_v25, 0.0 }
 0x16f   : > { %v1049_v29 = vpack.c.bf16 %v815_v27, %v814_v26 }
 0x171   : > { %v850_v30 = vrot.slane %v1049_v29, %v849_v28 }
 0x173   : > { %v857_v31 = vrot.slane %v850_v30, %v849_v28 }
 0x175   : > { %1163 = vmatmul.mubr.bf16.vlgmr.msra.gmra.mrb[0].mxu1 %v857_v31 }
 0x248   : > { %v941_v36 = vpop.f32.mrb[0].mxu1 }
 0x249   : > { %v942_v37 = vadd.f32 %v1048_v35, %v941_v36  ;;  %v1164_v40 = vpop.f32.mrb[1].mxu1 }
 0x24a   : > { %v944_v41 = vpop.f32.mrb[2].mxu1 }
 0x24b   : > { %v947_v42 = vmax.f32 %v942_v37, 0.0  ;;  %v1165_v43 = vpop.f32.mrb[3].mxu1 }
 0x24d   : > { %v955_v44 = vrot.slane %v947_v42, %v954_v39 }
 0x24f   : > { %v956_v45 = vcombine.high %v955_v44, %v955_v44  ;;  %v959_v46 = vpack.c.bf16 %v955_v44, %v955_v44 }
 0x251   : > { %v960_v47 = vpack.c.bf16 %v956_v45, %v956_v45  ;;  %961 = vst [vmem:[%s303_s15] sm:$0x1] %v959_v46 }
 0x253   : > { %962 = vst [vmem:[%s303_s15 + $0x1] sm:$0x1] %v960_v47 }
 0x254 PF: > { %s18_s27 = sadd.s32 1, %s1210_s27  }
 0x255   : > { %p15_p4 = scmp.ge.s32.totalorder %s18_s27, 4  }
 0x257   :  { %17 = sbr.rel (!%p15_p4) target bundleno = 1 (0x1), region = 87 }

// kernel: mobilenet_v3_forward.9
= control target key start
LH: loop header
LB: loop body
LE: loop exit
PB: predicated region body
PF: predicated region fallthrough
CT: control target
= control target key end

     0   :  { %s1158_s30 = smov 0   ;;  %s1278_s0 = inlined_call_operand.vmem [shape: bf16[2,1,4,8,128], index: 0, kind: input, shape index: {}]   ;;  %s1279_s1 = inlined_call_operand.vmem [shape: f32[1,4,8,1], index: 1, kind: input, shape index: {}]   ;;  %s1280_s2 = inlined_call_operand.vmem [shape: bf16[128,128], index: 2, kind: input, shape index: {}]   ;;  %s1281_s3 = inlined_call_operand.vmem [shape: f32[1,128], index: 3, kind: input, shape index: {}]   ;;  %s1282_s4 = inlined_call_operand.vmem [shape: f32[9,128], index: 4, kind: input, shape index: {}]   ;;  %s1283_s5 = inlined_call_operand.vmem [shape: f32[1,128], index: 5, kind: input, shape index: {}]   ;;  %s1284_s6 = inlined_call_operand.vmem [shape: bf16[128,128], index: 6, kind: input, shape index: {}]   ;;  %s1285_s7 = inlined_call_operand.vmem [shape: f32[1,128], index: 7, kind: input, shape index: {}]   ;;  %s1286_s8 = inlined_call_operand.vmem [shape: bf16[2,2,2,128], index: 8, kind: input, shape index: {}]   ;;  %s1287_s9 = inlined_call_operand.vmem [shape: bf16[2,2,2,128], index: 9, kind: output, shape index: {}]  }
   0x1 LB: > { %s949_s10 = sadd.s32 4294967295, %s1101_s30   ;;  %p953_p0 = scmp.ge.s32.totalorder %s1101_s30, 1  ;;  %s1101_s30 = sphi %s1158_s30, %s19_s30  }
   0x2   : > { %p296_p1 = scmp.lt.s32.totalorder %s1101_s30, 3 }
   0x4   : > { %p297_p2 = pnand %p953_p0, %p296_p1 }
   0x5   : > { %v1077_v0 = vld [vmem:[%s1280_s2] sm:$0xff] (!%p297_p2)   ;;  %p335_p3 = scmp.lt.s32.totalorder (!%p297_p2), %s949_s10, 1  ;;  %v1078_v1 = vld [vmem:[%s1280_s2 + $0x8] sm:$0xff] (!%p297_p2)   ;;  %v1103_v2 = vmov (!%p297_p2), 0   ;;  %v1079_v3 = vld [vmem:[%s1280_s2 + $0x10] sm:$0xff] (!%p297_p2)   ;;  %v1104_v15 = vmov (!%p297_p2), 0.0  }
   0x6   : > { %300 = sbr.rel (%p297_p2) target bundleno = 598 (0x256), region = 56  ;;  %1022 = vmatprep.subr.bf16.mxu0 (!%p297_p2), %v1077_v0  ;;  %1075 = vset.pattern.permute.xlu0 (!%p297_p2), %v1103_v2  ;;  %v1080_v4 = vld [vmem:[%s1280_s2 + $0x18] sm:$0xff] (!%p297_p2)   ;;  %v1081_v6 = vld [vmem:[%s1280_s2 + $0x20] sm:$0xff] (!%p297_p2)   ;;  %v491_v8 = vld [vmem:[%s1279_s1 + $0x10] sm:$0xff] (!%p297_p2)  ;;  %525 = vst [vmem:[#allocation3] sm:$0x3] (!%p297_p2), %v1104_v15 }
   0x7   : > { %1023 = vmatpush3.bf16.msra.mxu0 (!%p297_p2), %v1077_v0  ;;  %1076 = vset.pattern.permute.xlu1 (!%p297_p2), %v1103_v2  ;;  %v489_v7 = vld [vmem:[%s1279_s1] sm:$0xff] (!%p297_p2)  ;;  %v490_v9 = vld [vmem:[%s1279_s1 + $0x8] sm:$0xff] (!%p297_p2)  ;;  %v492_v10 = vld [vmem:[%s1279_s1 + $0x18] sm:$0xff] (!%p297_p2)  ;;  %526 = vst [vmem:[#allocation3 + $0x2] sm:$0x3] (!%p297_p2), %v1104_v15  ;;  %vm1105_vm0 = vmmov (!%p297_p2), 0  }
   0x8   : > { %1024 = vmatprep.subr.bf16.mxu0 (!%p297_p2), %v1078_v1  ;;  %495 = vperm.xlu0 (!%p297_p2), %1075, %v489_v7   ;;  %v1082_v11 = vld [vmem:[%s1280_s2 + $0x28] sm:$0xff] (!%p297_p2)   ;;  %v1083_v12 = vld [vmem:[%s1280_s2 + $0x30] sm:$0xff] (!%p297_p2)   ;;  %v1084_v13 = vld [vmem:[%s1280_s2 + $0x38] sm:$0xff] (!%p297_p2)  }
   0x9   : > { %505 = vperm.xlu1 (!%p297_p2), %1076, %v491_v8   ;;  %1042 = vmatprep.subr.bf16.mxu1 (!%p297_p2), %v1104_v15  ;;  %v1087_v16 = vld [vmem:[%s1284_s6] sm:$0xff] (!%p297_p2)   ;;  %v1088_v17 = vld [vmem:[%s1284_s6 + $0x8] sm:$0xff] (!%p297_p2)   ;;  %v1089_v18 = vld [vmem:[%s1284_s6 + $0x10] sm:$0xff] (!%p297_p2)  }
   0xa   : > { %1058 = vmatprep.mubr.msk.bf16.mxu1 (!%p297_p2), %vm1105_vm0, %v1104_v15  ;;  %1043 = vmatpush3.bf16.msra.mxu1 (!%p297_p2), %v1087_v16  ;;  %v1090_v19 = vld [vmem:[%s1284_s6 + $0x18] sm:$0xff] (!%p297_p2)   ;;  %v1091_v20 = vld [vmem:[%s1284_s6 + $0x20] sm:$0xff] (!%p297_p2)   ;;  %v1092_v21 = vld [vmem:[%s1284_s6 + $0x28] sm:$0xff] (!%p297_p2)  }
   0xb   : > { %1025 = vmatpush3.bf16.msra.mxu0 (!%p297_p2), %v1078_v1  ;;  %1044 = vmatprep.subr.bf16.mxu1 (!%p297_p2), %v1104_v15  ;;  %v1093_v22 = vld [vmem:[%s1284_s6 + $0x30] sm:$0xff] (!%p297_p2)   ;;  %v1094_v23 = vld [vmem:[%s1284_s6 + $0x38] sm:$0xff] (!%p297_p2)   ;;  %v958_v24 = vld [vmem:[%s1281_s3] ss:$0 sm:$0xff] (!%p297_p2) }
   0xc   : > { %1026 = vmatprep.subr.bf16.mxu0 (!%p297_p2), %v1079_v3  ;;  %500 = vperm.xlu0 (!%p297_p2), %1075, %v490_v9   ;;  %v969_v51 = vld [vmem:[%s1282_s4] ss:$0 sm:$0xff] (!%p297_p2)  ;;  %v970_v62 = vld [vmem:[%s1282_s4 + $0x1] ss:$0 sm:$0xff] (!%p297_p2) }
   0xd   : > { %s1289_s10 = smov (!%p335_p3, %s949_s10), 1  ;;  %510 = vperm.xlu1 %1076, %v492_v10   ;;  %v531_v54 = vld [vmem:[#allocation3] sm:$0x3] }
   0xe   : > { %s991_s17 = sshll.u32 %s1289_s10, 4  ;;  %1045 = vmatpush3.bf16.msra.mxu1 %v1088_v17  ;;  %v532_v57 = vld [vmem:[#allocation3 + $0x2] sm:$0x3]  ;;  %s956_s21 = sshll.u32 %s1289_s10, 1 }
   0xf   : > { %s339_s20 = scalar_lea.vmem %s1278_s0, %s991_s17  ;;  %1027 = vmatpush3.bf16.msra.mxu0 %v1079_v3  ;;  %1046 = vmatprep.subr.bf16.mxu1 %v1104_v15  ;;  %s343_s24 = scalar_lea.vmem %s1286_s8, %s956_s21 }
  0x10   : > { %v1085_v5 = vld [vmem:[%s339_s20] sm:$0xff]   ;;  %1028 = vmatprep.subr.bf16.mxu0 %v1080_v4  ;;  %v1086_v14 = vld [vmem:[%s339_s20 + $0x8] sm:$0xff]   ;;  %s347_s27 = scalar_lea.vmem %s1287_s9, %s956_s21 }
  0x11   : > { %1038 = vmatprep.mubr.bf16.mxu0 %v1085_v5 }
  0x12   : > { %1047 = vmatpush3.bf16.msra.mxu1 %v1089_v18 }
  0x13   : > { %1029 = vmatpush3.bf16.msra.mxu0 %v1080_v4  ;;  %1048 = vmatprep.subr.bf16.mxu1 %v1104_v15 }
  0x14   : > { %1030 = vmatprep.subr.bf16.mxu0 %v1081_v6 }
  0x16   : > { %1049 = vmatpush3.bf16.msra.mxu1 %v1090_v19 }
  0x17   : > { %1031 = vmatpush3.bf16.msra.mxu0 %v1081_v6  ;;  %1050 = vmatprep.subr.bf16.mxu1 %v1104_v15 }
  0x18   : > { %1032 = vmatprep.subr.bf16.mxu0 %v1082_v11 }
  0x1a   : > { %1051 = vmatpush3.bf16.msra.mxu1 %v1091_v20 }
  0x1b   : > { %1033 = vmatpush3.bf16.msra.mxu0 %v1082_v11  ;;  %1052 = vmatprep.subr.bf16.mxu1 %v1104_v15  ;;  %v971_v11 = vld [vmem:[%s1282_s4 + $0x2] ss:$0 sm:$0xff] }
  0x1c   : > { %1034 = vmatprep.subr.bf16.mxu0 %v1083_v12 }
  0x1e   : > { %1053 = vmatpush3.bf16.msra.mxu1 %v1092_v21 }
  0x1f   : > { %1035 = vmatpush3.bf16.msra.mxu0 %v1083_v12  ;;  %1054 = vmatprep.subr.bf16.mxu1 %v1104_v15 }
  0x20   : > { %1036 = vmatprep.subr.bf16.mxu0 %v1084_v13 }
  0x22   : > { %1055 = vmatpush3.bf16.msra.mxu1 %v1093_v22 }
  0x23   : > { %1037 = vmatpush3.bf16.msra.mxu0 %v1084_v13  ;;  %1056 = vmatprep.subr.bf16.mxu1 %v1104_v15 }
  0x26   : > { %1039 = vmatmul.mubr.bf16.vlgmr.msra.gmra.mrb[0].mxu0 %v1086_v14  ;;  %1057 = vmatpush3.bf16.msra.mxu1 %v1094_v23 }
  0x87   : > { %v496_v27 = vpop.permute.xlu0 %495 }
  0x88   : > { %v506_v25 = vpop.permute.xlu1 %505 }
  0x8b   : > { %v501_v41 = vpop.permute.xlu0 %500 }
  0x8c   : > { %v511_v37 = vpop.permute.xlu1 %510 }
  0xf9   : > { %v1040_v26 = vpop.f32.mrb[0].mxu0 }
  0xfa   : > { %v479_v28 = vadd.f32 %v1040_v26, %v958_v24  ;;  %v470_v29 = vpop.f32.mrb[1].mxu0 }
  0xfb   : > { %v471_v30 = vadd.f32 %v958_v24, %v470_v29  ;;  %v1041_v31 = vpop.f32.mrb[2].mxu0 }
  0xfc   : > { %v487_v32 = vmax.f32 %v479_v28, 0.0  ;;  %v482_v33 = vadd.f32 %v1041_v31, %v958_v24  ;;  %v473_v34 = vpop.f32.mrb[3].mxu0 }
  0xfd   : > { %v485_v35 = vmax.f32 %v471_v30, 0.0  ;;  %v474_v36 = vadd.f32 %v958_v24, %v473_v34  ;;  %v972_v24 = vld [vmem:[%s1282_s4 + $0x3] ss:$0 sm:$0xff] }
  0xfe   : > { %v488_v38 = vmax.f32 %v482_v33, 0.0  ;;  %v515_v40 = vmul.f32 %v506_v25, %v487_v32 }
  0xff   : > { %v486_v39 = vmax.f32 %v474_v36, 0.0  ;;  %v513_v43 = vmul.f32 %v496_v27, %v485_v35  ;;  %v973_v35 = vld [vmem:[%s1282_s4 + $0x4] ss:$0 sm:$0xff] }
 0x100   : > { %v516_v42 = vmul.f32 %v511_v37, %v488_v38 }
 0x101   : > { %v514_v44 = vmul.f32 %v501_v41, %v486_v39 }
 0x102   : > { %v1000_v45 = vpack.c.bf16 %v516_v42, %v515_v40 }
 0x103   : > { %v995_v46 = vpack.c.bf16 %v514_v44, %v513_v43 }
 0x104   : > { %1002 = vst [vmem:[#allocation2 + $0x8] sm:$0xff] %v1000_v45  }
 0x105   : > { %996 = vst [vmem:[#allocation2] sm:$0xff] %v995_v46  }
 0x10b   : > { %v592_v21 = vld [vmem:[#allocation2 + $0x8] sm:$0x1]  ;;  %v632_v39 = vld [vmem:[#allocation2 + $0x8] sm:$0x2] }
 0x10c   : > { %v527_v47 = vld [vmem:[#allocation2] sm:$0x1]  ;;  %v528_v48 = vld [vmem:[#allocation2 + $0x4] sm:$0x1]  ;;  %v567_v1 = vld [vmem:[#allocation2] sm:$0x2]  ;;  %v594_v23 = vunpack.c.l.bf16 %v592_v21  ;;  %v634_v45 = vunpack.c.l.bf16 %v632_v39 }
 0x10d   : > { %v529_v49 = vunpack.c.l.bf16 %v527_v47  ;;  %v530_v50 = vunpack.c.l.bf16 %v528_v48  ;;  %v544_v55 = vld [vmem:[#allocation2] sm:$0x3]  ;;  %v545_v56 = vld [vmem:[#allocation2 + $0x4] sm:$0x3]  ;;  %v569_v7 = vunpack.c.l.bf16 %v567_v1  ;;  %v609_v26 = vld [vmem:[#allocation2 + $0x8] sm:$0x3] }
 0x10e   : > { %v546_v58 = vunpack.c.l.bf16 %v544_v55  ;;  %v547_v59 = vunpack.c.l.bf16 %v545_v56  ;;  %v568_v2 = vld [vmem:[#allocation2 + $0x4] sm:$0x2]  ;;  %v591_v20 = vld [vmem:[#allocation2 + $0x4] sm:$0x1]  ;;  %v603_v28 = vmul.f32 %v972_v24, %v594_v23  ;;  %v611_v32 = vunpack.c.l.bf16 %v609_v26  ;;  %v977_v21 = vld [vmem:[%s1282_s4 + $0x8] ss:$0 sm:$0xff] }
 0x10f   : > { %v538_v52 = vmul.f32 %v969_v51, %v529_v49  ;;  %v539_v53 = vmul.f32 %v969_v51, %v530_v50  ;;  %v570_v8 = vunpack.c.l.bf16 %v568_v2  ;;  %v578_v12 = vmul.f32 %v971_v11, %v569_v7  ;;  %v608_v25 = vld [vmem:[#allocation2 + $0x4] sm:$0x3] }
 0x110   : > { %v555_v63 = vmul.f32 %v970_v62, %v546_v58  ;;  %v556_v0 = vmul.f32 %v970_v62, %v547_v59  ;;  %v593_v22 = vunpack.c.l.bf16 %v591_v20  ;;  %v610_v31 = vunpack.c.l.bf16 %v608_v25  ;;  %v631_v38 = vld [vmem:[#allocation2 + $0x4] sm:$0x2]  ;;  %v656_v58 = vld [vmem:[#allocation2 + $0xc] sm:$0x1]  ;;  %v672_v62 = vld [vmem:[#allocation2 + $0x8] sm:$0x3] }
 0x111   : > { %v540_v60 = vadd.f32 %v538_v52, %v531_v54  ;;  %v541_v61 = vadd.f32 %v539_v53, %v532_v57  ;;  %v579_v13 = vmul.f32 %v971_v11, %v570_v8  ;;  %v582_v14 = vrot.slane %v578_v12, 2  ;;  %v974_v48 = vld [vmem:[%s1282_s4 + $0x5] ss:$0 sm:$0xff]  ;;  %v655_v57 = vld [vmem:[#allocation2 + $0x8] sm:$0x1] }
 0x112   : > { %v559_v3 = vrot.slane %v555_v63, 1  ;;  %v560_v4 = vrot.slane %v556_v0, 1  ;;  %v602_v27 = vmul.f32 %v972_v24, %v593_v22  ;;  %v619_v36 = vmul.f32 %v973_v35, %v610_v31  ;;  %v673_v63 = vld [vmem:[#allocation2 + $0xc] sm:$0x3]  ;;  %v976_v8 = vld [vmem:[%s1282_s4 + $0x7] ss:$0 sm:$0xff] }
 0x113   : > { %542 = vst [vmem:[#allocation3] sm:$0x3] %v540_v60  ;;  %543 = vst [vmem:[#allocation3 + $0x2] sm:$0x3] %v541_v61  ;;  %v583_v15 = vrot.slane %v579_v13, 2  ;;  %v620_v37 = vmul.f32 %v973_v35, %v611_v32  ;;  %v633_v44 = vunpack.c.l.bf16 %v631_v38  ;;  %v643_v50 = vmul.f32 %v974_v48, %v634_v45 }
 0x114   : > { %v623_v40 = vrot.slane %v619_v36, 1  ;;  %v657_v59 = vunpack.c.l.bf16 %v655_v57  ;;  %v658_v60 = vunpack.c.l.bf16 %v656_v58  ;;  %v975_v61 = vld [vmem:[%s1282_s4 + $0x6] ss:$0 sm:$0xff]  ;;  %v695_v11 = vld [vmem:[#allocation2 + $0x8] sm:$0x2]  ;;  %v762_v32 = vlaneseq }
 0x115   : > { %v624_v41 = vrot.slane %v620_v37, 1  ;;  %v642_v49 = vmul.f32 %v974_v48, %v633_v44  ;;  %v647_v52 = vrot.slane %v643_v50, 2  ;;  %v696_v12 = vld [vmem:[#allocation2 + $0xc] sm:$0x2] }
 0x116   : > { %v666_v0 = vmul.f32 %v975_v61, %v657_v59  ;;  %v667_v1 = vmul.f32 %v975_v61, %v658_v60  ;;  %v763_v35 = vshrl.u32 %v762_v32, 7 }
 0x117   : > { %v646_v51 = vrot.slane %v642_v49, 2  ;;  %v979_v49 = vld [vmem:[%s1285_s7] ss:$0 sm:$0xff] }
 0x11a   : > { %v548_v5 = vld [vmem:[#allocation3] sm:$0x3]  ;;  %v549_v6 = vld [vmem:[#allocation3 + $0x2] sm:$0x3] }
 0x11b   : > { %v563_v9 = vadd.f32 %v559_v3, %v548_v5  ;;  %v564_v10 = vadd.f32 %v560_v4, %v549_v6  ;;  %v674_v4 = vunpack.c.l.bf16 %v672_v62  ;;  %v675_v5 = vunpack.c.l.bf16 %v673_v63 }
 0x11d   : > { %565 = vst [vmem:[#allocation3] sm:$0x3] %v563_v9  ;;  %566 = vst [vmem:[#allocation3 + $0x2] sm:$0x3] %v564_v10  ;;  %v683_v9 = vmul.f32 %v976_v8, %v674_v4  ;;  %v684_v10 = vmul.f32 %v976_v8, %v675_v5 }
 0x11f   : > { %v687_v13 = vrot.slane %v683_v9, 1 }
 0x124   : > { %v571_v16 = vld [vmem:[#allocation3] sm:$0x3]  ;;  %v572_v17 = vld [vmem:[#allocation3 + $0x2] sm:$0x3] }
 0x125   : > { %v586_v18 = vadd.f32 %v582_v14, %v571_v16  ;;  %v587_v19 = vadd.f32 %v583_v15, %v572_v17  ;;  %v688_v14 = vrot.slane %v684_v10, 1  ;;  %v697_v17 = vunpack.c.l.bf16 %v695_v11 }
 0x127   : > { %588 = vst [vmem:[#allocation3] sm:$0x3] %v586_v18  ;;  %589 = vst [vmem:[#allocation3 + $0x2] sm:$0x3] %v587_v19  ;;  %v698_v18 = vunpack.c.l.bf16 %v696_v12  ;;  %v706_v22 = vmul.f32 %v977_v21, %v697_v17 }
 0x129   : > { %v707_v23 = vmul.f32 %v977_v21, %v698_v18  ;;  %v710_v24 = vrot.slane %v706_v22, 2 }
 0x12b   : > { %v711_v25 = vrot.slane %v707_v23, 2 }
 0x12e   : > { %v595_v29 = vld [vmem:[#allocation3] sm:$0x3]  ;;  %v596_v30 = vld [vmem:[#allocation3 + $0x2] sm:$0x3] }
 0x12f   : > { %v604_v33 = vadd.f32 %v602_v27, %v595_v29  ;;  %v605_v34 = vadd.f32 %v603_v28, %v596_v30  ;;  %v1106_v30 = vmov 1966171168  }
 0x130   : > { %v760_v31 = vunpack.c.l.s4 %v1106_v30 }
 0x131   : > { %606 = vst [vmem:[#allocation3] sm:$0x3] %v604_v33  ;;  %607 = vst [vmem:[#allocation3 + $0x2] sm:$0x3] %v605_v34  ;;  %v978_v33 = vld [vmem:[%s1283_s5] ss:$0 sm:$0xff] }
 0x132   : > { %v761_v34 = vunpack.c.0.s8 %v760_v31 }
 0x138   : > { %v612_v42 = vld [vmem:[#allocation3] sm:$0x3]  ;;  %v613_v43 = vld [vmem:[#allocation3 + $0x2] sm:$0x3] }
 0x139   : > { %v627_v46 = vadd.f32 %v623_v40, %v612_v42  ;;  %v628_v47 = vadd.f32 %v624_v41, %v613_v43  ;;  %v764_v42 = vsub.s32 %v761_v34, %v763_v35 }
 0x13b   : > { %629 = vst [vmem:[#allocation3] sm:$0x3] %v627_v46  ;;  %630 = vst [vmem:[#allocation3 + $0x2] sm:$0x3] %v628_v47  ;;  %v1107_v46 = vmov 1983009808  }
 0x13c   : > { %v865_v47 = vunpack.c.l.s4 %v1107_v46 }
 0x13e   : > { %v866_v48 = vunpack.c.0.s8 %v865_v47 }
 0x142   : > { %v635_v53 = vld [vmem:[#allocation3] sm:$0x3]  ;;  %v636_v54 = vld [vmem:[#allocation3 + $0x2] sm:$0x3] }
 0x143   : > { %v650_v55 = vadd.f32 %v646_v51, %v635_v53  ;;  %v651_v56 = vadd.f32 %v647_v52, %v636_v54  ;;  %v874_v51 = vld [vmem:[%s343_s24] sm:$0x1]  ;;  %v869_v53 = vsub.s32 %v866_v48, %v763_v35 }
 0x144   : > { %v876_v58 = vunpack.c.l.bf16 %v874_v51 }
 0x145   : > { %652 = vst [vmem:[#allocation3] sm:$0x3] %v650_v55  ;;  %653 = vst [vmem:[#allocation3 + $0x2] sm:$0x3] %v651_v56  ;;  %v875_v55 = vld [vmem:[%s343_s24 + $0x1] sm:$0x1] }
 0x146   : > { %v877_v61 = vunpack.c.l.bf16 %v875_v55 }
 0x14c   : > { %v659_v2 = vld [vmem:[#allocation3] sm:$0x3]  ;;  %v660_v3 = vld [vmem:[#allocation3 + $0x2] sm:$0x3] }
 0x14d   : > { %v668_v6 = vadd.f32 %v666_v0, %v659_v2  ;;  %v669_v7 = vadd.f32 %v667_v1, %v660_v3 }
 0x14f   : > { %670 = vst [vmem:[#allocation3] sm:$0x3] %v668_v6  ;;  %671 = vst [vmem:[#allocation3 + $0x2] sm:$0x3] %v669_v7 }
 0x156   : > { %v676_v15 = vld [vmem:[#allocation3] sm:$0x3]  ;;  %v677_v16 = vld [vmem:[#allocation3 + $0x2] sm:$0x3] }
 0x157   : > { %v691_v19 = vadd.f32 %v687_v13, %v676_v15  ;;  %v692_v20 = vadd.f32 %v688_v14, %v677_v16 }
 0x159   : > { %693 = vst [vmem:[#allocation3] sm:$0x3] %v691_v19  ;;  %694 = vst [vmem:[#allocation3 + $0x2] sm:$0x3] %v692_v20 }
 0x160   : > { %v699_v26 = vld [vmem:[#allocation3] sm:$0x3]  ;;  %v700_v27 = vld [vmem:[#allocation3 + $0x2] sm:$0x3] }
 0x161   : > { %v714_v28 = vadd.f32 %v710_v24, %v699_v26  ;;  %v715_v29 = vadd.f32 %v711_v25, %v700_v27 }
 0x163   : > { %716 = vst [vmem:[#allocation3] sm:$0x3] %v714_v28  ;;  %717 = vst [vmem:[#allocation3 + $0x2] sm:$0x3] %v715_v29 }
 0x16a   : > { %v718_v36 = vld [vmem:[#allocation3] sm:$0x3]  ;;  %v719_v37 = vld [vmem:[#allocation3 + $0x2] sm:$0x3] }
 0x16b   : > { %v727_v38 = vadd.f32 %v978_v33, %v718_v36  ;;  %v728_v39 = vadd.f32 %v978_v33, %v719_v37 }
 0x16d   : > { %v729_v40 = vmax.f32 %v727_v38, 0.0  ;;  %v730_v41 = vmax.f32 %v728_v39, 0.0 }
 0x16f   : > { %v980_v43 = vpack.c.bf16 %v730_v41, %v729_v40 }
 0x171   : > { %v765_v44 = vrot.slane %v980_v43, %v764_v42 }
 0x173   : > { %v772_v45 = vrot.slane %v765_v44, %v764_v42 }
 0x175   : > { %1059 = vmatmul.mubr.bf16.vlgmr.msra.gmra.mrb[0].mxu1 %v772_v45 }
 0x248   : > { %v856_v50 = vpop.f32.mrb[0].mxu1 }
 0x249   : > { %v857_v52 = vadd.f32 %v979_v49, %v856_v50  ;;  %v1060_v54 = vpop.f32.mrb[1].mxu1 }
 0x24a   : > { %v859_v56 = vpop.f32.mrb[2].mxu1 }
 0x24b   : > { %v862_v57 = vmax.f32 %v857_v52, 0.0  ;;  %v1061_v59 = vpop.f32.mrb[3].mxu1 }
 0x24d   : > { %v870_v60 = vrot.slane %v862_v57, %v869_v53 }
 0x24f   : > { %v871_v62 = vcombine.high %v870_v60, %v870_v60  ;;  %v878_v63 = vadd.f32 %v876_v58, %v870_v60 }
 0x251   : > { %v879_v0 = vadd.f32 %v877_v61, %v871_v62  ;;  %v880_v1 = vpack.c.bf16 %v878_v63, %v878_v63 }
 0x253   : > { %v881_v2 = vpack.c.bf16 %v879_v0, %v879_v0  ;;  %882 = vst [vmem:[%s347_s27] sm:$0x1] %v880_v1 }
 0x255   : > { %883 = vst [vmem:[%s347_s27 + $0x1] sm:$0x1] %v881_v2 }
 0x256 PF: > { %s19_s30 = sadd.s32 1, %s1101_s30  }
 0x257   : > { %p16_p4 = scmp.ge.s32.totalorder %s19_s30, 4  }
 0x259   :  { %18 = sbr.rel (!%p16_p4) target bundleno = 1 (0x1), region = 91 }

// kernel: mobilenet_v3_forward.11
= control target key start
LH: loop header
LB: loop body
LE: loop exit
PB: predicated region body
PF: predicated region fallthrough
CT: control target
= control target key end

     0   :  { %v709_v2 = vmov 0   ;;  %v48_v3 = vlaneseq  ;;  %v710_v5 = vmov 1966171168   ;;  %vm91_vm0 = vcmask 1041409   ;;  %s907_s0 = inlined_call_operand.vmem [shape: bf16[2,1,1,128], index: 0, kind: input, shape index: {}]   ;;  %s908_s1 = inlined_call_operand.vmem [shape: bf16[128,256], index: 1, kind: input, shape index: {}]   ;;  %s909_s2 = inlined_call_operand.vmem [shape: f32[1,256], index: 2, kind: input, shape index: {}]   ;;  %s910_s3 = inlined_call_operand.vmem [shape: bf16[256,128], index: 3, kind: input, shape index: {}]   ;;  %s911_s4 = inlined_call_operand.vmem [shape: f32[1,128], index: 4, kind: input, shape index: {}]   ;;  %s912_s5 = inlined_call_operand.vmem [shape: bf16[128,128], index: 5, kind: input, shape index: {}]   ;;  %s913_s6 = inlined_call_operand.vmem [shape: f32[1,128], index: 6, kind: input, shape index: {}]   ;;  %s914_s7 = inlined_call_operand.hbm [shape: f32[2,128], index: 7, kind: output, shape index: {}]  }
   0x1   :  { %v637_v0 = vld [vmem:[%s908_s1 + $0x4] ss:$8 sps:$4 sm:$0xff]   ;;  %v639_v1 = vld [vmem:[%s908_s1] ss:$8 sps:$4 sm:$0xff]   ;;  %207 = vmatprep.mubr.bf16.mxu0 %v709_v2  ;;  %v640_v4 = vld [vmem:[%s908_s1 + $0x14] ss:$8 sps:$4 sm:$0xff]   ;;  %v68_v6 = vunpack.c.l.s4 %v710_v5 }
   0x2   :  { %175 = vmatprep.subr.bf16.mxu0 %v637_v0  ;;  %v642_v7 = vld [vmem:[%s908_s1 + $0x10] ss:$8 sps:$4 sm:$0xff]   ;;  %v643_v8 = vld [vmem:[%s908_s1 + $0x24] ss:$8 sps:$4 sm:$0xff]   ;;  %v769_v9 = vshrl.u32 %v48_v3, 7 }
   0x3   :  { %176 = vmatpush1.bf16.msra.mxu0 %v639_v1  ;;  %v69_v10 = vunpack.c.0.s8 %v68_v6  ;;  %v645_v11 = vld [vmem:[%s908_s1 + $0x20] ss:$8 sps:$4 sm:$0xff]   ;;  %v646_v12 = vld [vmem:[%s908_s1 + $0x34] ss:$8 sps:$4 sm:$0xff]   ;;  %v648_v14 = vld [vmem:[%s908_s1 + $0x30] ss:$8 sps:$4 sm:$0xff]  }
   0x4   :  { %177 = vmatprep.subr.bf16.mxu0 %v640_v4  ;;  %v649_v15 = vld [vmem:[%s908_s1 + $0x44] ss:$8 sps:$4 sm:$0xff]   ;;  %v538_v16 = vld.sshfl [vmem:[%s907_s0 + $0x1] sm:$0x1 pattern:$0x75316420] }
   0x5   :  { %v72_v13 = vsub.s32 %v69_v10, %v769_v9  ;;  %v661_v17 = vld [vmem:[%s910_s3 + $0x40] sm:$0xff]   ;;  %v652_v21 = vld [vmem:[%s908_s1 + $0x54] ss:$8 sps:$4 sm:$0xff]   ;;  %v663_v23 = vld [vmem:[%s910_s3 + $0x48] sm:$0xff]  }
   0x6   :  { %v662_v18 = vld [vmem:[%s910_s3] sm:$0xff]   ;;  %581 = vmatprep.subr.bf16.mxu1 %v661_v17  ;;  %v664_v25 = vld [vmem:[%s910_s3 + $0x8] sm:$0xff]   ;;  %v665_v26 = vld [vmem:[%s910_s3 + $0x50] sm:$0xff]  }
   0x7   :  { %178 = vmatpush1.bf16.msra.mxu0 %v642_v7  ;;  %v651_v19 = vld [vmem:[%s908_s1 + $0x40] ss:$8 sps:$4 sm:$0xff]   ;;  %v87_v20 = vrot.slane %v538_v16, %v72_v13  ;;  %582 = vmatpush3.bf16.msra.mxu1 %v662_v18  ;;  %v654_v27 = vld [vmem:[%s908_s1 + $0x50] ss:$8 sps:$4 sm:$0xff]   ;;  %v655_v28 = vld [vmem:[%s908_s1 + $0x64] ss:$8 sps:$4 sm:$0xff]  }
   0x8   :  { %179 = vmatprep.subr.bf16.mxu0 %v643_v8  ;;  %v537_v22 = vld.sshfl [vmem:[%s907_s0] sm:$0x1 pattern:$0x75316420]  ;;  %583 = vmatprep.subr.bf16.mxu1 %v663_v23  ;;  %v666_v31 = vld [vmem:[%s910_s3 + $0x10] sm:$0xff]   ;;  %v667_v32 = vld [vmem:[%s910_s3 + $0x58] sm:$0xff]  }
   0x9   :  { %v89_v24 = vunpack.c.l.b16 %v87_v20  ;;  %v73_v29 = vrot.slane %v537_v22, %v72_v13  ;;  %v657_v33 = vld [vmem:[%s908_s1 + $0x60] ss:$8 sps:$4 sm:$0xff]   ;;  %v668_v34 = vld [vmem:[%s910_s3 + $0x18] sm:$0xff]  }
   0xa   :  { %v658_v35 = vld [vmem:[%s908_s1 + $0x74] ss:$8 sps:$4 sm:$0xff]   ;;  %v660_v37 = vld [vmem:[%s908_s1 + $0x70] ss:$8 sps:$4 sm:$0xff]  }
   0xb   :  { %180 = vmatpush1.bf16.msra.mxu0 %v645_v11  ;;  %v90_v30 = vrot.slane %v89_v24, 7  ;;  %584 = vmatpush3.bf16.msra.mxu1 %v664_v25  ;;  %v88_v36 = vunpack.c.l.b16 %v73_v29 }
   0xc   :  { %181 = vmatprep.subr.bf16.mxu0 %v646_v12  ;;  %585 = vmatprep.subr.bf16.mxu1 %v665_v26 }
   0xd   :  { %v92_v38 = vsel %vm91_vm0, %v90_v30, %v88_v36 }
   0xe   :  { %v93_v39 = vpack.c.b16 %v92_v38, %v92_v38 }
   0xf   :  { %182 = vmatpush1.bf16.msra.mxu0 %v648_v14  ;;  %586 = vmatpush3.bf16.msra.mxu1 %v666_v31 }
  0x10   :  { %183 = vmatprep.subr.bf16.mxu0 %v649_v15  ;;  %587 = vmatprep.subr.bf16.mxu1 %v667_v32 }
  0x13   :  { %184 = vmatpush1.bf16.msra.mxu0 %v651_v19  ;;  %588 = vmatpush3.bf16.msra.mxu1 %v668_v34 }
  0x14   :  { %185 = vmatprep.subr.bf16.mxu0 %v652_v21 }
  0x17   :  { %186 = vmatpush1.bf16.msra.mxu0 %v654_v27 }
  0x18   :  { %187 = vmatprep.subr.bf16.mxu0 %v655_v28 }
  0x1b   :  { %188 = vmatpush1.bf16.msra.mxu0 %v657_v33 }
  0x1c   :  { %189 = vmatprep.subr.bf16.mxu0 %v658_v35 }
  0x1d   :  { %12 = vsyncpa [#allocation3], 0  ;;  %v669_v40 = vld [vmem:[%s910_s3 + $0x60] sm:$0xff]   ;;  %v671_v42 = vld [vmem:[%s910_s3 + $0x68] sm:$0xff]   ;;  %v711_v49 = vmov 0.0   ;;  %v50_v53 = vsub.s32 0, %v769_v9 }
  0x1e   :  { %v670_v41 = vld [vmem:[%s910_s3 + $0x20] sm:$0xff]   ;;  %589 = vmatprep.subr.bf16.mxu1 %v669_v40  ;;  %v672_v43 = vld [vmem:[%s910_s3 + $0x28] sm:$0xff]   ;;  %v673_v44 = vld [vmem:[%s910_s3 + $0x70] sm:$0xff]   ;;  %v54_v55 = vsub.s32 1, %v769_v9  ;;  %vm712_vm1 = vmmov 0   ;;  %s713_s0 = smov [#allocation2]  }
  0x1f   :  { %190 = vmatpush1.bf16.msra.mxu0 %v660_v37  ;;  %590 = vmatpush3.bf16.msra.mxu1 %v670_v41  ;;  %v674_v45 = vld [vmem:[%s910_s3 + $0x30] sm:$0xff]   ;;  %v675_v46 = vld [vmem:[%s910_s3 + $0x78] sm:$0xff]   ;;  %v677_v48 = vld [vmem:[%s912_s5] sm:$0xff]   ;;  %s529_s15 = sshll.u32 %s713_s0, 4  ;;  %s530_s15 = int_to_ptr.vmem [resolvable:$true] %s529_s15 }
  0x20   :  { %591 = vmatprep.subr.bf16.mxu1 %v671_v42  ;;  %v676_v47 = vld [vmem:[%s910_s3 + $0x38] sm:$0xff]   ;;  %612 = vmatprep.subr.bf16.mxu0 %v711_v49  ;;  %v678_v50 = vld [vmem:[%s912_s5 + $0x8] sm:$0xff]   ;;  %v679_v51 = vld [vmem:[%s912_s5 + $0x10] sm:$0xff]   ;;  %p690_p1 = scmp.lt.s32.totalorder %s530_s15, %s530_s15 }
  0x21   :  { %v680_v52 = vld [vmem:[%s912_s5 + $0x18] sm:$0xff]   ;;  %v46_v54 = vld [vmem:[%s909_s2] sm:$0x3]  ;;  %v682_v13 = vld [vmem:[%s912_s5 + $0x28] sm:$0xff]  }
  0x22   :  { %208 = vmatmul.mubr.bf16.vlgmr.msra.gmra.mrb[0].mxu0 %v93_v39  ;;  %v51_v56 = vrot.slane %v46_v54, %v50_v53  ;;  %v55_v57 = vrot.slane %v46_v54, %v54_v55  ;;  %v681_v12 = vld [vmem:[%s912_s5 + $0x20] sm:$0xff]   ;;  %v683_v14 = vld [vmem:[%s912_s5 + $0x30] sm:$0xff]   ;;  %v684_v15 = vld [vmem:[%s912_s5 + $0x38] sm:$0xff]  }
  0x23   :  { %592 = vmatpush3.bf16.msra.mxu1 %v672_v43  ;;  %613 = vmatpush3.bf16.msra.mxu0 %v677_v48  ;;  %v555_v17 = vld [vmem:[%s911_s4] ss:$0 sm:$0xff]  ;;  %s685_s4 = scalar_lea.vmem %s530_s15, 32 }
  0x24   :  { %593 = vmatprep.subr.bf16.mxu1 %v673_v44  ;;  %614 = vmatprep.subr.bf16.mxu0 %v711_v49  ;;  %v572_v29 = vld [vmem:[%s913_s6] ss:$0 sm:$0xff]  ;;  %p686_p0 = scmp.ne.s32.totalorder %s530_s15, %s685_s4  ;;  %p691_p2 = scmp.lt.s32.totalorder %s685_s4, %s685_s4 }
  0x25   :  { %628 = vmatprep.mubr.msk.bf16.mxu0 %vm712_vm1, %v711_v49 }
  0x26   :  { %p692_p3 = por %p691_p2, %p690_p1 }
  0x27   :  { %594 = vmatpush3.bf16.msra.mxu1 %v674_v45  ;;  %615 = vmatpush3.bf16.msra.mxu0 %v678_v50 }
  0x28   :  { %595 = vmatprep.subr.bf16.mxu1 %v675_v46  ;;  %616 = vmatprep.subr.bf16.mxu0 %v711_v49  ;;  %p693_p4 = pnand %p692_p3, %p686_p0 }
  0x2b   :  { %596 = vmatpush3.bf16.msra.mxu1 %v676_v47  ;;  %617 = vmatpush3.bf16.msra.mxu0 %v679_v51 }
  0x2c   :  { %618 = vmatprep.subr.bf16.mxu0 %v711_v49 }
  0x2f   :  { %619 = vmatpush3.bf16.msra.mxu0 %v680_v52 }
  0x30   :  { %620 = vmatprep.subr.bf16.mxu0 %v711_v49 }
  0x33   :  { %621 = vmatpush3.bf16.msra.mxu0 %v681_v12 }
  0x34   :  { %622 = vmatprep.subr.bf16.mxu0 %v711_v49 }
  0x37   :  { %623 = vmatpush3.bf16.msra.mxu0 %v682_v13 }
  0x38   :  { %624 = vmatprep.subr.bf16.mxu0 %v711_v49 }
  0x3b   :  { %625 = vmatpush3.bf16.msra.mxu0 %v683_v14 }
  0x3c   :  { %626 = vmatprep.subr.bf16.mxu0 %v711_v49 }
  0x3f   :  { %627 = vmatpush3.bf16.msra.mxu0 %v684_v15 }
  0xf5   :  { %v209_v58 = vpop.f32.mrb[0].mxu0 }
  0xf6   :  { %v210_v59 = vadd.f32 %v209_v58, %v51_v56  ;;  %v211_v60 = vpop.f32.mrb[1].mxu0 }
  0xf7   :  { %v212_v61 = vadd.f32 %v211_v60, %v55_v57  ;;  %v213_v62 = vpop.f32.mrb[2].mxu0 }
  0xf8   :  { %v216_v63 = vadd.f32 3.0, %v210_v59  ;;  %v214_v0 = vpop.f32.mrb[3].mxu0 }
  0xf9   :  { %v217_v1 = vadd.f32 3.0, %v212_v61 }
  0xfa   :  { %v218_v2 = vmax.f32 %v216_v63, 0.0 }
  0xfb   :  { %v219_v3 = vmax.f32 %v217_v1, 0.0 }
  0xfc   :  { %v220_v4 = vmin.f32 %v218_v2, 6.0 }
  0xfd   :  { %v221_v5 = vmin.f32 %v219_v3, 6.0 }
  0xfe   :  { %v222_v6 = vmul.f32 %v220_v4, %v210_v59 }
  0xff   :  { %v223_v7 = vmul.f32 %v221_v5, %v212_v61 }
 0x100   :  { %v224_v8 = vmul.f32 0.16666667, %v222_v6 }
 0x101   :  { %v225_v10 = vmul.f32 0.16666667, %v223_v7 }
 0x102   :  { %v228_v9 = vpack.c.bf16 %v224_v8, %v224_v8 }
 0x103   :  { %v229_v11 = vpack.c.bf16 %v225_v10, %v225_v10 }
 0x105   :  { %397 = vmatprep.mubr.bf16.mxu1 %v229_v11 }
 0x106   :  { %398 = vmatmul.mubr.bf16.vlgmr.msra.gmra.mrb[0].mxu1 %v228_v9 }
 0x1d9   :  { %v597_v16 = vpop.f32.mrb[0].mxu1 }
 0x1da   :  { %v598_v18 = vpop.f32.mrb[1].mxu1 }
 0x1db   :  { %v599_v19 = vadd.f32 %v598_v18, %v597_v16  ;;  %v600_v20 = vpop.f32.mrb[2].mxu1 }
 0x1dc   :  { %v601_v21 = vpop.f32.mrb[3].mxu1 }
 0x1dd   :  { %v400_v22 = vadd.f32 %v599_v19, %v555_v17 }
 0x1df   :  { %v405_v23 = vadd.f32 3.0, %v400_v22 }
 0x1e1   :  { %v406_v24 = vmax.f32 %v405_v23, 0.0 }
 0x1e3   :  { %v407_v25 = vmin.f32 %v406_v24, 6.0 }
 0x1e5   :  { %v408_v26 = vmul.f32 %v407_v25, %v400_v22 }
 0x1e7   :  { %v409_v27 = vmul.f32 0.16666667, %v408_v26 }
 0x1e9   :  { %v410_v28 = vpack.c.bf16 %v409_v27, %v409_v27 }
 0x1eb   :  { %629 = vmatmul.mubr.bf16.vlgmr.msra.gmra.mrb[4].mxu0 %v410_v28 }
 0x2be   :  { %v516_v30 = vpop.f32.mrb[4].mxu0 }
 0x2bf   :  { %v517_v31 = vadd.f32 %v572_v29, %v516_v30  ;;  %v630_v32 = vpop.f32.mrb[5].mxu0 }
 0x2c0   :  { %v519_v33 = vpop.f32.mrb[6].mxu0 }
 0x2c1   :  { %522 = vst [vmem:[#allocation2] sm:$0x3] %v517_v31  ;;  %v631_v34 = vpop.f32.mrb[7].mxu0 }
 0x2c2   :  { %696 = shalt.err (!%p693_p4)
}
 0x2c3   :  { %s697_s6 = scalar_lea.hbm %s914_s7, 32 }
 0x2c4   :  { %p698_p5 = scmp.ne.s32.totalorder %s914_s7, %s697_s6  ;;  %p701_p6 = scmp.lt.u32.totalorder %s697_s6, %s914_s7 }
 0x2c6   :  { %p703_p7 = pnand %p701_p6, %p698_p5 }
 0x2c8   :  { %706 = shalt.err (!%p703_p7)
}
 0x2c9   :  { %532 = dma.vmem_to_hbm [thread:$0]  %s530_s15, 32, %s914_s7, [#allocation3]  }
 0x2ca   :  { %707 = dma.done.wait [#allocation3], 32  }
 0x2cb   :  { %708 = vsyncadd [#allocation3], 4294967264 }
 0x2cc   :  { %536 = vsyncpa [#allocation3], 1 }

// kernel: mobilenet_v3_forward.10
= control target key start
LH: loop header
LB: loop body
LE: loop exit
PB: predicated region body
PF: predicated region fallthrough
CT: control target
= control target key end

     0   :  { %s1998_s21 = smov 0   ;;  %s2332_s0 = inlined_call_operand.vmem [shape: bf16[2,4,3,8,128], index: 0, kind: input, shape index: {}]   ;;  %s2333_s1 = inlined_call_operand.vmem [shape: f32[4,3,8,1], index: 1, kind: input, shape index: {}]   ;;  %s2334_s2 = inlined_call_operand.vmem [shape: bf16[128,128], index: 2, kind: input, shape index: {}]   ;;  %s2335_s3 = inlined_call_operand.vmem [shape: f32[1,128], index: 3, kind: input, shape index: {}]   ;;  %s2336_s4 = inlined_call_operand.vmem [shape: f32[25,128], index: 4, kind: input, shape index: {}]   ;;  %s2337_s5 = inlined_call_operand.vmem [shape: f32[1,128], index: 5, kind: input, shape index: {}]   ;;  %s2338_s6 = inlined_call_operand.vmem [shape: bf16[128,128], index: 6, kind: input, shape index: {}]   ;;  %s2339_s7 = inlined_call_operand.vmem [shape: f32[1,128], index: 7, kind: input, shape index: {}]   ;;  %s2340_s8 = inlined_call_operand.vmem [shape: bf16[128,128], index: 8, kind: input, shape index: {}]   ;;  %s2341_s9 = inlined_call_operand.vmem [shape: f32[1,128], index: 9, kind: input, shape index: {}]   ;;  %s2342_s10 = inlined_call_operand.vmem [shape: bf16[128,128], index: 10, kind: input, shape index: {}]   ;;  %s2343_s11 = inlined_call_operand.vmem [shape: f32[1,128], index: 11, kind: input, shape index: {}]   ;;  %s2344_s12 = inlined_call_operand.vmem [shape: bf16[2,1,1,128], index: 12, kind: output, shape index: {}]  }
   0x1 LB: > { %s1657_s22 = sadd.s32 4294967295, %s1927_s21   ;;  %p1661_p0 = scmp.ge.s32.totalorder %s1927_s21, 1  ;;  %s1927_s21 = sphi %s1998_s21, %s22_s21  }
   0x2   : > { %p362_p1 = scmp.lt.s32.totalorder %s1927_s21, 3 }
   0x4   : > { %p363_p2 = pnand %p1661_p0, %p362_p1 }
   0x5   : > { %v1883_v0 = vld [vmem:[%s2334_s2] sm:$0xff] (!%p363_p2)   ;;  %p402_p3 = scmp.lt.s32.totalorder (!%p363_p2), %s1657_s22, 1  ;;  %v1884_v1 = vld [vmem:[%s2334_s2 + $0x8] sm:$0xff] (!%p363_p2)   ;;  %v1929_v2 = vmov (!%p363_p2), 0   ;;  %v1885_v3 = vld [vmem:[%s2334_s2 + $0x10] sm:$0xff] (!%p363_p2)   ;;  %v1930_v27 = vmov (!%p363_p2), 0.0  }
   0x6   : > { %366 = sbr.rel (%p363_p2) target bundleno = 1217 (0x4c1), region = 68  ;;  %1780 = vmatprep.subr.bf16.mxu0 (!%p363_p2), %v1883_v0  ;;  %1881 = vset.pattern.permute.xlu0 (!%p363_p2), %v1929_v2  ;;  %v1886_v4 = vld [vmem:[%s2334_s2 + $0x18] sm:$0xff] (!%p363_p2)   ;;  %v1887_v6 = vld [vmem:[%s2334_s2 + $0x20] sm:$0xff] (!%p363_p2)   ;;  %v673_v8 = vld [vmem:[%s2333_s1 + $0x10] sm:$0xff] (!%p363_p2)  ;;  %779 = vst [vmem:[#allocation3] sm:$0x1] (!%p363_p2), %v1930_v27 }
   0x7   : > { %1781 = vmatpush3.bf16.msra.mxu0 (!%p363_p2), %v1883_v0  ;;  %1882 = vset.pattern.permute.xlu1 (!%p363_p2), %v1929_v2  ;;  %v671_v7 = vld [vmem:[%s2333_s1] sm:$0xff] (!%p363_p2)  ;;  %v1888_v9 = vld [vmem:[%s2334_s2 + $0x28] sm:$0xff] (!%p363_p2)   ;;  %v674_v11 = vld [vmem:[%s2333_s1 + $0x18] sm:$0xff] (!%p363_p2)  ;;  %vm1932_vm0 = vmmov (!%p363_p2), 0   ;;  %vm1604_vm1 = vcmask (!%p363_p2), 1040384  }
   0x8   : > { %1782 = vmatprep.subr.bf16.mxu0 (!%p363_p2), %v1884_v1  ;;  %685 = vperm.xlu0 (!%p363_p2), %1881, %v671_v7   ;;  %v672_v10 = vld [vmem:[%s2333_s1 + $0x8] sm:$0xff] (!%p363_p2)  ;;  %v1889_v12 = vld [vmem:[%s2334_s2 + $0x30] sm:$0xff] (!%p363_p2)   ;;  %v678_v14 = vld [vmem:[%s2333_s1 + $0x38] sm:$0xff] (!%p363_p2)  ;;  %vm1605_vm2 = vsmask.f32 (!%p363_p2), 256 }
   0x9   : > { %695 = vperm.xlu1 (!%p363_p2), %1882, %v673_v8   ;;  %v677_v13 = vld [vmem:[%s2333_s1 + $0x30] sm:$0xff] (!%p363_p2)  ;;  %v1890_v15 = vld [vmem:[%s2334_s2 + $0x38] sm:$0xff] (!%p363_p2)   ;;  %v679_v16 = vld [vmem:[%s2333_s1 + $0x40] sm:$0xff] (!%p363_p2)  ;;  %1808 = vmatprep.subr.bf16.mxu1 (!%p363_p2), %v1930_v27 }
   0xa   : > { %v680_v17 = vld [vmem:[%s2333_s1 + $0x48] sm:$0xff] (!%p363_p2)  ;;  %v675_v18 = vld [vmem:[%s2333_s1 + $0x20] sm:$0xff] (!%p363_p2)  ;;  %v681_v22 = vld [vmem:[%s2333_s1 + $0x50] sm:$0xff] (!%p363_p2)  ;;  %1824 = vmatprep.mubr.msk.bf16.mxu1 (!%p363_p2), %vm1932_vm0, %v1930_v27 }
   0xb   : > { %1783 = vmatpush3.bf16.msra.mxu0 (!%p363_p2), %v1884_v1  ;;  %v676_v19 = vld [vmem:[%s2333_s1 + $0x28] sm:$0xff] (!%p363_p2)  ;;  %v682_v23 = vld [vmem:[%s2333_s1 + $0x58] sm:$0xff] (!%p363_p2)  ;;  %v2086_v29 = vld [vmem:[%s2335_s3] ss:$0 sm:$0xff] (!%p363_p2) }
   0xc   : > { %1784 = vmatprep.subr.bf16.mxu0 (!%p363_p2), %v1885_v3  ;;  %690 = vperm.xlu0 (!%p363_p2), %1881, %v672_v10   ;;  %vm1606_vm3 = vmand (!%p363_p2), %vm1604_vm1, %vm1605_vm2 }
   0xd   : > { %s2346_s22 = smov (!%p402_p3, %s1657_s22), 1  ;;  %700 = vperm.xlu1 %1882, %v674_v11  }
   0xe   : > { %s1868_s29 = smul.u32 48, %s2346_s22  ;;  %s409_s17 = scalar_lea.vmem %s2344_s12, %s2346_s22 }
   0xf   : > { %1785 = vmatpush3.bf16.msra.mxu0 %v1885_v3 }
  0x10   : > { %s2021_s14 = scalar_lea.vmem %s2332_s0, %s1868_s29  ;;  %1786 = vmatprep.subr.bf16.mxu0 %v1886_v4  ;;  %715 = vperm.xlu0 %1881, %v677_v13  }
  0x11   : > { %v1891_v5 = vld [vmem:[%s2021_s14] sm:$0xff]   ;;  %720 = vperm.xlu1 %1882, %v678_v14   ;;  %v1892_v20 = vld [vmem:[%s2021_s14 + $0x8] sm:$0xff]   ;;  %v1893_v21 = vld [vmem:[%s2021_s14 + $0x10] sm:$0xff]  }
  0x12   : > { %1796 = vmatprep.mubr.bf16.mxu0 %v1891_v5  ;;  %v1894_v24 = vld [vmem:[%s2021_s14 + $0x18] sm:$0xff]   ;;  %v1895_v25 = vld [vmem:[%s2021_s14 + $0x20] sm:$0xff]   ;;  %v1896_v26 = vld [vmem:[%s2021_s14 + $0x28] sm:$0xff]  }
  0x13   : > { %1787 = vmatpush3.bf16.msra.mxu0 %v1886_v4 }
  0x14   : > { %1788 = vmatprep.subr.bf16.mxu0 %v1887_v6  ;;  %725 = vperm.xlu0 %1881, %v679_v16  }
  0x15   : > { %730 = vperm.xlu1 %1882, %v680_v17  }
  0x17   : > { %1789 = vmatpush3.bf16.msra.mxu0 %v1887_v6 }
  0x18   : > { %1790 = vmatprep.subr.bf16.mxu0 %v1888_v9  ;;  %705 = vperm.xlu0 %1881, %v675_v18  }
  0x19   : > { %710 = vperm.xlu1 %1882, %v676_v19  }
  0x1b   : > { %1791 = vmatpush3.bf16.msra.mxu0 %v1888_v9 }
  0x1c   : > { %1792 = vmatprep.subr.bf16.mxu0 %v1889_v12  ;;  %735 = vperm.xlu0 %1881, %v681_v22  }
  0x1d   : > { %740 = vperm.xlu1 %1882, %v682_v23  }
  0x1f   : > { %1793 = vmatpush3.bf16.msra.mxu0 %v1889_v12 }
  0x20   : > { %1794 = vmatprep.subr.bf16.mxu0 %v1890_v15 }
  0x23   : > { %1795 = vmatpush3.bf16.msra.mxu0 %v1890_v15 }
  0x24   : > { %1828 = vmatprep.subr.bf16.mxu0 %v1930_v27 }
  0x26   : > { %1797 = vmatmul.mubr.bf16.vlgmr.msra.gmra.mrb[0].mxu0 %v1892_v20 }
  0x27   : > { %1800 = vmatprep.mubr.bf16.mxu0 %v1893_v21 }
  0x2e   : > { %1801 = vmatmul.mubr.bf16.gmra.mrb[4].mxu0 %v1894_v24 }
  0x2f   : > { %1804 = vmatprep.mubr.bf16.mxu0 %v1895_v25 }
  0x36   : > { %1805 = vmatmul.mubr.bf16.gmra.mrb[8].mxu0 %v1896_v26 }
  0x37   : > { %1844 = vmatprep.mubr.msk.bf16.mxu0 %vm1932_vm0, %v1930_v27 }
  0x87   : > { %v686_v28 = vpop.permute.xlu0 %685 }
  0x88   : > { %v696_v30 = vpop.permute.xlu1 %695 }
  0x8b   : > { %v691_v39 = vpop.permute.xlu0 %690 }
  0x8c   : > { %v701_v44 = vpop.permute.xlu1 %700 }
  0x8f   : > { %v716_v56 = vpop.permute.xlu0 %715 }
  0x90   : > { %v721_v0 = vpop.permute.xlu1 %720 }
  0x93   : > { %v2096_v18 = vpop.permute.xlu0 %725 }
  0x94   : > { %v2098_v26 = vpop.permute.xlu1 %730 }
  0xf9   : > { %v1798_v31 = vpop.f32.mrb[0].mxu0 }
  0xfa   : > { %v573_v32 = vadd.f32 %v1798_v31, %v2086_v29  ;;  %v564_v33 = vpop.f32.mrb[1].mxu0 }
  0xfb   : > { %v565_v34 = vadd.f32 %v2086_v29, %v564_v33  ;;  %v1799_v35 = vpop.f32.mrb[2].mxu0 }
  0xfc   : > { %v613_v36 = vadd.f32 3.0, %v573_v32  ;;  %v576_v37 = vadd.f32 %v1799_v35, %v2086_v29  ;;  %v567_v38 = vpop.f32.mrb[3].mxu0 }
  0xfd   : > { %v611_v40 = vadd.f32 3.0, %v565_v34  ;;  %v568_v41 = vadd.f32 %v2086_v29, %v567_v38 }
  0xfe   : > { %v625_v42 = vmax.f32 %v613_v36, 0.0  ;;  %v614_v43 = vadd.f32 3.0, %v576_v37 }
  0xff   : > { %v623_v45 = vmax.f32 %v611_v40, 0.0  ;;  %v612_v46 = vadd.f32 3.0, %v568_v41 }
 0x100   : > { %v637_v47 = vmin.f32 %v625_v42, 6.0  ;;  %v626_v48 = vmax.f32 %v614_v43, 0.0 }
 0x101   : > { %v635_v49 = vmin.f32 %v623_v45, 6.0  ;;  %v624_v50 = vmax.f32 %v612_v46, 0.0  ;;  %v1802_v51 = vpop.f32.mrb[4].mxu0 }
 0x102   : > { %v649_v52 = vmul.f32 %v637_v47, %v573_v32  ;;  %v638_v53 = vmin.f32 %v626_v48, 6.0  ;;  %v589_v54 = vadd.f32 %v1802_v51, %v2086_v29  ;;  %v580_v55 = vpop.f32.mrb[5].mxu0  ;;  %v783_v51 = vld [vmem:[%s2336_s4] sm:$0x1] }
 0x103   : > { %v647_v57 = vmul.f32 %v635_v49, %v565_v34  ;;  %v636_v58 = vmin.f32 %v624_v50, 6.0  ;;  %v581_v59 = vadd.f32 %v2086_v29, %v580_v55  ;;  %v1803_v60 = vpop.f32.mrb[6].mxu0  ;;  %v1931_v55 = vmov 1966171168  }
 0x104   : > { %v661_v61 = vmul.f32 0.16666667, %v649_v52  ;;  %v650_v62 = vmul.f32 %v638_v53, %v576_v37  ;;  %v617_v63 = vadd.f32 3.0, %v589_v54  ;;  %v592_v1 = vadd.f32 %v1803_v60, %v2086_v29  ;;  %v583_v2 = vpop.f32.mrb[7].mxu0 }
 0x105   : > { %v659_v3 = vmul.f32 0.16666667, %v647_v57  ;;  %v648_v4 = vmul.f32 %v636_v58, %v568_v41  ;;  %v615_v5 = vadd.f32 3.0, %v581_v59  ;;  %v584_v6 = vadd.f32 %v2086_v29, %v583_v2  ;;  %v706_v41 = vpop.permute.xlu0 %705 }
 0x106   : > { %v662_v7 = vmul.f32 0.16666667, %v650_v62  ;;  %v629_v8 = vmax.f32 %v617_v63, 0.0  ;;  %v618_v9 = vadd.f32 3.0, %v592_v1  ;;  %v745_v13 = vmul.f32 %v696_v30, %v661_v61  ;;  %v798_v62 = vld [vmem:[%s2336_s4 + $0x2] sm:$0x1] }
 0x107   : > { %v660_v10 = vmul.f32 0.16666667, %v648_v4  ;;  %v627_v11 = vmax.f32 %v615_v5, 0.0  ;;  %v616_v12 = vadd.f32 3.0, %v584_v6  ;;  %v743_v17 = vmul.f32 %v686_v28, %v659_v3 }
 0x108   : > { %v746_v14 = vmul.f32 %v701_v44, %v662_v7  ;;  %v641_v15 = vmin.f32 %v629_v8, 6.0  ;;  %v630_v16 = vmax.f32 %v618_v9, 0.0  ;;  %v711_v44 = vpop.permute.xlu1 %710  ;;  %v800_v5 = vrot.slane %v798_v62, 7 }
 0x109   : > { %v744_v19 = vmul.f32 %v691_v39, %v660_v10  ;;  %v639_v20 = vmin.f32 %v627_v11, 6.0  ;;  %v628_v21 = vmax.f32 %v616_v12, 0.0  ;;  %v1806_v22 = vpop.f32.mrb[8].mxu0  ;;  %v791_v11 = vld [vmem:[%s2336_s4 + $0x1] sm:$0x1] }
 0x10a   : > { %v1712_v23 = vpack.c.bf16 %v746_v14, %v745_v13  ;;  %v653_v24 = vmul.f32 %v641_v15, %v589_v54  ;;  %v642_v25 = vmin.f32 %v630_v16, 6.0  ;;  %v596_v31 = vpop.f32.mrb[9].mxu0  ;;  %v605_v48 = vadd.f32 %v1806_v22, %v2086_v29  ;;  %v782_v54 = vld [vmem:[#allocation3] sm:$0x1] }
 0x10b   : > { %v1707_v32 = vpack.c.bf16 %v744_v19, %v743_v17  ;;  %v651_v33 = vmul.f32 %v639_v20, %v581_v59  ;;  %v640_v34 = vmin.f32 %v628_v21, 6.0  ;;  %v1807_v30 = vpop.f32.mrb[10].mxu0  ;;  %v597_v57 = vadd.f32 %v2086_v29, %v596_v31  ;;  %v825_v17 = vld [vmem:[%s2336_s4 + $0x3] sm:$0x1] }
 0x10c   : > { %1734 = vst [vmem:[#allocation2 + $0x8] sm:$0xff] %v1712_v23   ;;  %v665_v35 = vmul.f32 0.16666667, %v653_v24  ;;  %v654_v36 = vmul.f32 %v642_v25, %v592_v1  ;;  %v599_v28 = vpop.f32.mrb[11].mxu0  ;;  %v608_v53 = vadd.f32 %v1807_v30, %v2086_v29  ;;  %v807_v59 = vlaneseq }
 0x10d   : > { %1708 = vst [vmem:[#allocation2] sm:$0xff] %v1707_v32   ;;  %v663_v37 = vmul.f32 0.16666667, %v651_v33  ;;  %v652_v38 = vmul.f32 %v640_v34, %v584_v6  ;;  %v621_v60 = vadd.f32 3.0, %v605_v48  ;;  %v619_v3 = vadd.f32 3.0, %v597_v57 }
 0x10e   : > { %v666_v39 = vmul.f32 0.16666667, %v654_v36  ;;  %v749_v42 = vmul.f32 %v716_v56, %v665_v35  ;;  %v805_v56 = vunpack.c.l.s4 %v1931_v55  ;;  %v808_v6 = vshrl.u32 %v807_v59, 7 }
 0x10f   : > { %v664_v40 = vmul.f32 0.16666667, %v652_v38  ;;  %v747_v45 = vmul.f32 %v706_v41, %v663_v37  ;;  %v633_v7 = vmax.f32 %v621_v60, 0.0  ;;  %v600_v8 = vadd.f32 %v2086_v29, %v599_v28 }
 0x110   : > { %v750_v43 = vmul.f32 %v721_v0, %v666_v39  ;;  %v622_v0 = vadd.f32 3.0, %v608_v53  ;;  %v806_v1 = vunpack.c.0.s8 %v805_v56  ;;  %v631_v12 = vmax.f32 %v619_v3, 0.0  ;;  %v736_v39 = vpop.permute.xlu0 %735 }
 0x111   : > { %v748_v46 = vmul.f32 %v711_v44, %v664_v40  ;;  %v645_v15 = vmin.f32 %v633_v7, 6.0  ;;  %v620_v16 = vadd.f32 3.0, %v600_v8  ;;  %v827_v32 = vrot.slane %v825_v17, 7  ;;  %v852_v44 = vld [vmem:[%s2336_s4 + $0x4] sm:$0x1] }
 0x112   : > { %v1722_v47 = vpack.c.bf16 %v750_v43, %v749_v42  ;;  %v634_v10 = vmax.f32 %v622_v0, 0.0  ;;  %v2113_v14 = vsub.s32 %v806_v1, %v808_v6  ;;  %v643_v22 = vmin.f32 %v631_v12, 6.0  ;;  %v741_v42 = vpop.permute.xlu1 %740 }
 0x113   : > { %v1717_v49 = vpack.c.bf16 %v748_v46, %v747_v45  ;;  %v788_v2 = vld [vmem:[#allocation2 + $0xc] sm:$0x1]  ;;  %v657_v25 = vmul.f32 %v645_v15, %v605_v48  ;;  %v632_v31 = vmax.f32 %v620_v16, 0.0  ;;  %v854_v56 = vrot.slane %v852_v44, 6  ;;  %v888_v15 = vld [vmem:[%s2336_s4 + $0x6] sm:$0x1] }
 0x114   : > { %v780_v50 = vld [vmem:[#allocation2] sm:$0x1]  ;;  %1736 = vst [vmem:[#allocation2 + $0x18] sm:$0xff] %v1722_v47   ;;  %v789_v9 = vunpack.c.l.bf16 %v788_v2  ;;  %v646_v20 = vmin.f32 %v634_v10, 6.0  ;;  %v822_v29 = vld [vmem:[#allocation2 + $0xc] sm:$0x1]  ;;  %v655_v30 = vmul.f32 %v643_v22, %v597_v57 }
 0x115   : > { %v781_v52 = vunpack.c.l.bf16 %v780_v50  ;;  %1735 = vst [vmem:[#allocation2 + $0x10] sm:$0xff] %v1717_v49   ;;  %v795_v61 = vld [vmem:[#allocation2] sm:$0x1]  ;;  %v823_v33 = vunpack.c.l.bf16 %v822_v29  ;;  %v669_v36 = vmul.f32 0.16666667, %v657_v25  ;;  %v644_v28 = vmin.f32 %v632_v31, 6.0 }
 0x116   : > { %v796_v4 = vunpack.c.l.bf16 %v795_v61  ;;  %v792_v19 = vmul.f32 %v791_v11, %v789_v9  ;;  %v658_v34 = vmul.f32 %v646_v20, %v608_v53  ;;  %v667_v40 = vmul.f32 0.16666667, %v655_v30  ;;  %v849_v47 = vld [vmem:[#allocation2] sm:$0x2] }
 0x117   : > { %v784_v58 = vmul.f32 %v783_v51, %v781_v52  ;;  %v829_v37 = vmul.f32 %v827_v32, %v823_v33  ;;  %v656_v41 = vmul.f32 %v644_v28, %v600_v8  ;;  %v753_v45 = vmul.f32 %v736_v39, %v669_v36  ;;  %v895_v8 = vld [vmem:[%s2336_s4 + $0x7] sm:$0x1] }
 0x118   : > { %v802_v13 = vmul.f32 %v800_v5, %v796_v4  ;;  %v670_v38 = vmul.f32 0.16666667, %v658_v34  ;;  %v751_v53 = vmul.f32 %v2096_v18, %v667_v40  ;;  %v850_v55 = vunpack.c.l.bf16 %v849_v47  ;;  %v880_v4 = vld [vmem:[%s2336_s4 + $0x5] sm:$0x1]  ;;  %v949_v34 = vld [vmem:[%s2336_s4 + $0x9] sm:$0x1] }
 0x119   : > { %v785_v63 = vadd.f32 %v784_v58, %v782_v54  ;;  %v668_v49 = vmul.f32 0.16666667, %v656_v41  ;;  %v837_v51 = vrot.slane %v829_v37, %v2113_v14  ;;  %v897_v12 = vrot.slane %v895_v8, 7 }
 0x11a   : > { %v810_v23 = vrot.slane %v802_v13, %v2113_v14  ;;  %v754_v46 = vmul.f32 %v741_v42, %v670_v38  ;;  %v856_v59 = vmul.f32 %v854_v56, %v850_v55  ;;  %v951_v37 = vrot.slane %v949_v34, 6  ;;  %v992_v55 = vld [vmem:[%s2336_s4 + $0xc] sm:$0x1] }
 0x11b   : > { %786 = vst [vmem:[#allocation3] sm:$0x1] %v785_v63  ;;  %v752_v54 = vmul.f32 %v2098_v26, %v668_v49  ;;  %v838_v58 = vcombine.high %v837_v51, %v837_v51  ;;  %v877_v2 = vld [vmem:[#allocation2 + $0x18] sm:$0x1]  ;;  %v946_v33 = vld [vmem:[#allocation2 + $0x18] sm:$0x2] }
 0x11c   : > { %v811_v35 = vcombine.high %v810_v23, %v810_v23  ;;  %v1732_v52 = vpack.c.bf16 %v754_v46, %v753_v45  ;;  %v864_v62 = vrot.slane %v856_v59, %v2113_v14  ;;  %v878_v3 = vunpack.c.l.bf16 %v877_v2  ;;  %v892_v7 = vld [vmem:[#allocation2 + $0x18] sm:$0x1]  ;;  %v977_v51 = vld [vmem:[%s2336_s4 + $0xa] sm:$0x1]  ;;  %v982_v59 = vld [vmem:[#allocation2 + $0x10] sm:$0x1] }
 0x11d   : > { %v1727_v57 = vpack.c.bf16 %v752_v54, %v751_v53  ;;  %v845_v60 = vrot.slane %v838_v58, %v2113_v14  ;;  %v893_v11 = vunpack.c.l.bf16 %v892_v7  ;;  %v947_v28 = vunpack.c.l.bf16 %v946_v33  ;;  %v989_v54 = vld [vmem:[#allocation2 + $0x4] sm:$0x1]  ;;  %v1899_v58 = vld [vmem:[%s2338_s6 + $0x10] sm:$0xff]   ;;  %v1019_v2 = vld [vmem:[%s2336_s4 + $0xd] sm:$0x1] }
 0x11e   : > { %v818_v43 = vrot.slane %v811_v35, %v2113_v14  ;;  %1738 = vst [vmem:[#allocation2 + $0x28] sm:$0xff] %v1732_v52   ;;  %v871_v0 = vrot.slane %v864_v62, %v2113_v14  ;;  %v881_v5 = vmul.f32 %v880_v4, %v878_v3  ;;  %v1898_v52 = vld [vmem:[%s2338_s6 + $0x8] sm:$0xff]   ;;  %v983_v62 = vunpack.c.l.bf16 %v982_v59  ;;  %v1016_v3 = vld [vmem:[#allocation2 + $0x10] sm:$0x1] }
 0x11f   : > { %1737 = vst [vmem:[#allocation2 + $0x20] sm:$0xff] %v1727_v57   ;;  %v899_v16 = vmul.f32 %v897_v12, %v893_v11  ;;  %v953_v39 = vmul.f32 %v951_v37, %v947_v28  ;;  %v1021_v7 = vrot.slane %v1019_v2, 7  ;;  %v1017_v8 = vunpack.c.l.bf16 %v1016_v3  ;;  %v1903_v12 = vld [vmem:[%s2338_s6 + $0x30] sm:$0xff]  }
 0x120   : > { %v872_v18 = vcombine.high %v871_v0, %v871_v0  ;;  %v985_v0 = vld [vmem:[%s2336_s4 + $0xb] sm:$0x1]  ;;  %v1143_v2 = vld [vmem:[%s2336_s4 + $0x13] sm:$0x1] }
 0x121   : > { %v907_v29 = vrot.slane %v899_v16, %v2113_v14  ;;  %v961_v42 = vrot.slane %v953_v39, %v2113_v14  ;;  %v1023_v11 = vmul.f32 %v1021_v7, %v1017_v8  ;;  %v1046_v16 = vld [vmem:[%s2336_s4 + $0xe] sm:$0x1]  ;;  %v1907_v39 = vld [vmem:[%s2340_s8 + $0x10] sm:$0xff]   ;;  %v1145_v7 = vrot.slane %v1143_v2, 6 }
 0x122   : > { %v790_v21 = vld [vmem:[#allocation3] sm:$0x1] }
 0x123   : > { %v793_v24 = vadd.f32 %v792_v19, %v790_v21  ;;  %v922_v21 = vld [vmem:[%s2336_s4 + $0x8] sm:$0x1]  ;;  %v908_v25 = vcombine.high %v907_v29, %v907_v29  ;;  %v968_v44 = vrot.slane %v961_v42, %v2113_v14  ;;  %v1908_v42 = vld [vmem:[%s2340_s8 + $0x18] sm:$0xff]  }
 0x125   : > { %794 = vst [vmem:[#allocation3] sm:$0x1] %v793_v24  ;;  %v924_v24 = vrot.slane %v922_v21, 7  ;;  %v915_v32 = vrot.slane %v908_v25, %v2113_v14  ;;  %v969_v45 = vcombine.high %v968_v44, %v968_v44  ;;  %v1904_v21 = vld [vmem:[%s2338_s6 + $0x38] sm:$0xff]   ;;  %v1113_v59 = vld [vmem:[#allocation2 + $0x28] sm:$0x1] }
 0x126   : > { %v885_v10 = vld [vmem:[#allocation2 + $0x24] sm:$0x1]  ;;  %v1086_v44 = vld [vmem:[#allocation2 + $0x1c] sm:$0x1] }
 0x127   : > { %v886_v13 = vunpack.c.l.bf16 %v885_v10  ;;  %v919_v20 = vld [vmem:[#allocation2 + $0x24] sm:$0x1] }
 0x128   : > { %v920_v23 = vunpack.c.l.bf16 %v919_v20 }
 0x129   : > { %v889_v17 = vmul.f32 %v888_v15, %v886_v13  ;;  %v1043_v15 = vld [vmem:[#allocation2 + $0x4] sm:$0x2] }
 0x12a   : > { %v926_v31 = vmul.f32 %v924_v24, %v920_v23  ;;  %v1044_v29 = vunpack.c.l.bf16 %v1043_v15 }
 0x12c   : > { %v797_v48 = vld [vmem:[#allocation3] sm:$0x1]  ;;  %v934_v36 = vrot.slane %v926_v31, %v2113_v14 }
 0x12d   : > { %v820_v50 = vadd.f32 %v818_v43, %v797_v48  ;;  %v974_v48 = vld [vmem:[#allocation2 + $0x4] sm:$0x1] }
 0x12e   : > { %v935_v38 = vcombine.high %v934_v36, %v934_v36  ;;  %v975_v49 = vunpack.c.l.bf16 %v974_v48  ;;  %v1906_v36 = vld [vmem:[%s2340_s8 + $0x8] sm:$0xff]   ;;  %v1909_v48 = vld [vmem:[%s2340_s8 + $0x20] sm:$0xff]  }
 0x12f   : > { %821 = vst [vmem:[#allocation3] sm:$0x1] %v820_v50  ;;  %v1897_v50 = vld [vmem:[%s2338_s6] sm:$0xff]  }
 0x130   : > { %v942_v40 = vrot.slane %v935_v38, %v2113_v14  ;;  %1809 = vmatpush3.bf16.msra.mxu1 %v1897_v50  ;;  %v978_v53 = vmul.f32 %v977_v51, %v975_v49  ;;  %v1071_v38 = vld [vmem:[#allocation2 + $0x1c] sm:$0x1]  ;;  %v1079_v49 = vld [vmem:[#allocation2 + $0x28] sm:$0x1]  ;;  %v1087_v50 = vunpack.c.l.bf16 %v1086_v44 }
 0x131   : > { %1810 = vmatprep.subr.bf16.mxu1 %v1930_v27 }
 0x134   : > { %1811 = vmatpush3.bf16.msra.mxu1 %v1898_v52  ;;  %v1080_v52 = vunpack.c.l.bf16 %v1079_v49 }
 0x135   : > { %1812 = vmatprep.subr.bf16.mxu1 %v1930_v27 }
 0x136   : > { %v824_v61 = vld [vmem:[#allocation3] sm:$0x1] }
 0x137   : > { %v847_v63 = vadd.f32 %v845_v60, %v824_v61  ;;  %v990_v60 = vunpack.c.l.bf16 %v989_v54  ;;  %v994_v61 = vrot.slane %v992_v55, 7  ;;  %v1082_v54 = vld [vmem:[%s2336_s4 + $0x10] sm:$0x1] }
 0x138   : > { %1813 = vmatpush3.bf16.msra.mxu1 %v1899_v58 }
 0x139   : > { %848 = vst [vmem:[#allocation3] sm:$0x1] %v847_v63  ;;  %v1900_v63 = vld [vmem:[%s2338_s6 + $0x18] sm:$0xff]   ;;  %1814 = vmatprep.subr.bf16.mxu1 %v1930_v27 }
 0x13c   : > { %1815 = vmatpush3.bf16.msra.mxu1 %v1900_v63  ;;  %v1114_v63 = vunpack.c.l.bf16 %v1113_v59 }
 0x13d   : > { %1816 = vmatprep.subr.bf16.mxu1 %v1930_v27 }
 0x140   : > { %v851_v1 = vld [vmem:[#allocation3] sm:$0x1] }
 0x141   : > { %v874_v26 = vadd.f32 %v872_v18, %v851_v1  ;;  %v996_v18 = vmul.f32 %v994_v61, %v990_v60  ;;  %v986_v1 = vmul.f32 %v985_v0, %v983_v62 }
 0x143   : > { %875 = vst [vmem:[#allocation3] sm:$0x1] %v874_v26  ;;  %v1901_v26 = vld [vmem:[%s2338_s6 + $0x20] sm:$0xff]  }
 0x144   : > { %1817 = vmatpush3.bf16.msra.mxu1 %v1901_v26  ;;  %v1140_v26 = vld [vmem:[#allocation2 + $0x1c] sm:$0x2] }
 0x145   : > { %1818 = vmatprep.subr.bf16.mxu1 %v1930_v27 }
 0x14a   : > { %v879_v6 = vld [vmem:[#allocation3] sm:$0x1] }
 0x14b   : > { %v882_v9 = vadd.f32 %v881_v5, %v879_v6  ;;  %v1004_v5 = vrot.slane %v996_v18, %v2113_v14 }
 0x14d   : > { %883 = vst [vmem:[#allocation3] sm:$0x1] %v882_v9  ;;  %v1902_v9 = vld [vmem:[%s2338_s6 + $0x28] sm:$0xff]   ;;  %v1005_v10 = vcombine.high %v1004_v5, %v1004_v5 }
 0x14e   : > { %1819 = vmatpush3.bf16.msra.mxu1 %v1902_v9 }
 0x14f   : > { %1820 = vmatprep.subr.bf16.mxu1 %v1930_v27  ;;  %v1012_v13 = vrot.slane %v1005_v10, %v2113_v14 }
 0x152   : > { %1821 = vmatpush3.bf16.msra.mxu1 %v1903_v12 }
 0x153   : > { %1822 = vmatprep.subr.bf16.mxu1 %v1930_v27 }
 0x154   : > { %v887_v19 = vld [vmem:[#allocation3] sm:$0x1] }
 0x155   : > { %v890_v22 = vadd.f32 %v889_v17, %v887_v19  ;;  %v1031_v19 = vrot.slane %v1023_v11, %v2113_v14 }
 0x156   : > { %1823 = vmatpush3.bf16.msra.mxu1 %v1904_v21 }
 0x157   : > { %891 = vst [vmem:[#allocation3] sm:$0x1] %v890_v22  ;;  %v1048_v22 = vrot.slane %v1046_v16, 6  ;;  %v1032_v23 = vcombine.high %v1031_v19, %v1031_v19  ;;  %1848 = vmatprep.subr.bf16.mxu1 %v1930_v27 }
 0x159   : > { %v1050_v24 = vmul.f32 %v1048_v22, %v1044_v29  ;;  %v1039_v25 = vrot.slane %v1032_v23, %v2113_v14  ;;  %v1171_v29 = vld [vmem:[%s2336_s4 + $0x14] sm:$0x1]  ;;  %v1186_v23 = vld [vmem:[%s2336_s4 + $0x16] sm:$0x1] }
 0x15e   : > { %v894_v30 = vld [vmem:[#allocation3] sm:$0x1] }
 0x15f   : > { %v917_v35 = vadd.f32 %v915_v32, %v894_v30  ;;  %v1058_v32 = vrot.slane %v1050_v24, %v2113_v14  ;;  %v1905_v30 = vld [vmem:[%s2340_s8] sm:$0xff]   ;;  %v1183_v24 = vld [vmem:[#allocation2 + $0x8] sm:$0x1] }
 0x160   : > { %1829 = vmatpush3.bf16.msra.mxu0 %v1905_v30 }
 0x161   : > { %918 = vst [vmem:[#allocation3] sm:$0x1] %v917_v35  ;;  %v1065_v34 = vrot.slane %v1058_v32, %v2113_v14  ;;  %1830 = vmatprep.subr.bf16.mxu0 %v1930_v27  ;;  %v1176_v32 = vld [vmem:[#allocation2 + $0x14] sm:$0x1] }
 0x162   : > { %v1177_v30 = vunpack.c.l.bf16 %v1176_v32 }
 0x163   : > { %v1066_v35 = vcombine.high %v1065_v34, %v1065_v34  ;;  %v1184_v34 = vunpack.c.l.bf16 %v1183_v24  ;;  %v1920_v24 = vld [vmem:[%s2342_s10 + $0x38] sm:$0xff]  }
 0x164   : > { %1831 = vmatpush3.bf16.msra.mxu0 %v1906_v36 }
 0x165   : > { %1832 = vmatprep.subr.bf16.mxu0 %v1930_v27 }
 0x168   : > { %v921_v41 = vld [vmem:[#allocation3] sm:$0x1]  ;;  %1833 = vmatpush3.bf16.msra.mxu0 %v1907_v39 }
 0x169   : > { %v944_v43 = vadd.f32 %v942_v40, %v921_v41  ;;  %v1072_v40 = vunpack.c.l.bf16 %v1071_v38  ;;  %v1074_v41 = vld [vmem:[%s2336_s4 + $0xf] sm:$0x1]  ;;  %1834 = vmatprep.subr.bf16.mxu0 %v1930_v27  ;;  %v1210_v38 = vld [vmem:[#allocation2 + $0x14] sm:$0x1] }
 0x16b   : > { %945 = vst [vmem:[#allocation3] sm:$0x1] %v944_v43  ;;  %v1075_v43 = vmul.f32 %v1074_v41, %v1072_v40 }
 0x16c   : > { %1835 = vmatpush3.bf16.msra.mxu0 %v1908_v42 }
 0x16d   : > { %1836 = vmatprep.subr.bf16.mxu0 %v1930_v27 }
 0x170   : > { %1837 = vmatpush3.bf16.msra.mxu0 %v1909_v48  ;;  %v1237_v48 = vld [vmem:[#allocation2 + $0x8] sm:$0x2] }
 0x171   : > { %1838 = vmatprep.subr.bf16.mxu0 %v1930_v27 }
 0x172   : > { %v948_v46 = vld [vmem:[#allocation3] sm:$0x1] }
 0x173   : > { %v971_v47 = vadd.f32 %v969_v45, %v948_v46  ;;  %v1089_v45 = vld [vmem:[%s2336_s4 + $0x11] sm:$0x1] }
 0x174   : > { %v1091_v51 = vrot.slane %v1089_v45, 7 }
 0x175   : > { %972 = vst [vmem:[#allocation3] sm:$0x1] %v971_v47 }
 0x176   : > { %v1093_v55 = vmul.f32 %v1091_v51, %v1087_v50 }
 0x178   : > { %v1101_v60 = vrot.slane %v1093_v55, %v2113_v14 }
 0x17a   : > { %v1102_v0 = vcombine.high %v1101_v60, %v1101_v60 }
 0x17c   : > { %v976_v56 = vld [vmem:[#allocation3] sm:$0x1] }
 0x17d   : > { %v979_v57 = vadd.f32 %v978_v53, %v976_v56  ;;  %v1910_v53 = vld [vmem:[%s2340_s8 + $0x28] sm:$0xff]   ;;  %v1083_v56 = vmul.f32 %v1082_v54, %v1080_v52 }
 0x17e   : > { %1839 = vmatpush3.bf16.msra.mxu0 %v1910_v53  ;;  %v1238_v53 = vunpack.c.l.bf16 %v1237_v48 }
 0x17f   : > { %980 = vst [vmem:[#allocation3] sm:$0x1] %v979_v57  ;;  %v1116_v57 = vld [vmem:[%s2336_s4 + $0x12] sm:$0x1]  ;;  %1840 = vmatprep.subr.bf16.mxu0 %v1930_v27 }
 0x180   : > { %v1118_v62 = vrot.slane %v1116_v57, 7 }
 0x182   : > { %v1120_v18 = vmul.f32 %v1118_v62, %v1114_v63 }
 0x184   : > { %v1128_v5 = vrot.slane %v1120_v18, %v2113_v14 }
 0x186   : > { %v984_v4 = vld [vmem:[#allocation3] sm:$0x1]  ;;  %v1129_v8 = vcombine.high %v1128_v5, %v1128_v5 }
 0x187   : > { %v987_v6 = vadd.f32 %v986_v1, %v984_v4  ;;  %v1109_v1 = vrot.slane %v1102_v0, %v2113_v14  ;;  %v1265_v0 = vld [vmem:[%s2337_s5] sm:$0x1] }
 0x188   : > { %v1136_v10 = vrot.slane %v1129_v8, %v2113_v14  ;;  %v1913_v8 = vld [vmem:[%s2342_s10] sm:$0xff]  }
 0x189   : > { %988 = vst [vmem:[#allocation3] sm:$0x1] %v987_v6  ;;  %v1141_v6 = vunpack.c.l.bf16 %v1140_v26 }
 0x18b   : > { %v1147_v9 = vmul.f32 %v1145_v7, %v1141_v6  ;;  %v1912_v7 = vld [vmem:[%s2340_s8 + $0x38] sm:$0xff]  }
 0x18d   : > { %v1155_v12 = vrot.slane %v1147_v9, %v2113_v14  ;;  %v1914_v9 = vld [vmem:[%s2342_s10 + $0x8] sm:$0xff]  }
 0x18f   : > { %v1162_v15 = vrot.slane %v1155_v12, %v2113_v14  ;;  %v1291_v12 = vld [vmem:[%s2339_s7] sm:$0x1] }
 0x190   : > { %v991_v17 = vld [vmem:[#allocation3] sm:$0x1] }
 0x191   : > { %v1014_v20 = vadd.f32 %v1012_v13, %v991_v17  ;;  %v1163_v16 = vcombine.high %v1162_v15, %v1162_v15 }
 0x193   : > { %1015 = vst [vmem:[#allocation3] sm:$0x1] %v1014_v20  ;;  %v1168_v20 = vld [vmem:[#allocation2 + $0x8] sm:$0x1] }
 0x194   : > { %v1169_v21 = vunpack.c.l.bf16 %v1168_v20 }
 0x196   : > { %v1172_v22 = vmul.f32 %v1171_v29, %v1169_v21  ;;  %v1917_v29 = vld [vmem:[%s2342_s10 + $0x20] sm:$0xff]  }
 0x19a   : > { %v1018_v31 = vld [vmem:[#allocation3] sm:$0x1] }
 0x19b   : > { %v1041_v33 = vadd.f32 %v1039_v25, %v1018_v31 }
 0x19d   : > { %1042 = vst [vmem:[#allocation3] sm:$0x1] %v1041_v33  ;;  %v1188_v33 = vrot.slane %v1186_v23, 7  ;;  %v1919_v23 = vld [vmem:[%s2342_s10 + $0x30] sm:$0xff]  }
 0x19f   : > { %v1190_v36 = vmul.f32 %v1188_v33, %v1184_v34 }
 0x1a1   : > { %v1198_v40 = vrot.slane %v1190_v36, %v2113_v14 }
 0x1a3   : > { %v1199_v44 = vcombine.high %v1198_v40, %v1198_v40 }
 0x1a4   : > { %v1045_v28 = vld [vmem:[#allocation3] sm:$0x1] }
 0x1a5   : > { %v1068_v37 = vadd.f32 %v1066_v35, %v1045_v28  ;;  %v1179_v35 = vld [vmem:[%s2336_s4 + $0x15] sm:$0x1] }
 0x1a6   : > { %v1180_v28 = vmul.f32 %v1179_v35, %v1177_v30 }
 0x1a7   : > { %1069 = vst [vmem:[#allocation3] sm:$0x1] %v1068_v37  ;;  %v1213_v37 = vld [vmem:[%s2336_s4 + $0x17] sm:$0x1] }
 0x1a8   : > { %v1215_v42 = vrot.slane %v1213_v37, 7 }
 0x1ae   : > { %v1073_v46 = vld [vmem:[#allocation3] sm:$0x1] }
 0x1af   : > { %v1076_v47 = vadd.f32 %v1075_v43, %v1073_v46  ;;  %v1211_v43 = vunpack.c.l.bf16 %v1210_v38  ;;  %v1206_v46 = vrot.slane %v1199_v44, %v2113_v14 }
 0x1b1   : > { %1077 = vst [vmem:[#allocation3] sm:$0x1] %v1076_v47  ;;  %v1217_v45 = vmul.f32 %v1215_v42, %v1211_v43  ;;  %v1240_v47 = vld [vmem:[%s2336_s4 + $0x18] sm:$0x1] }
 0x1b2   : > { %v1242_v52 = vrot.slane %v1240_v47, 6 }
 0x1b3   : > { %v1225_v50 = vrot.slane %v1217_v45, %v2113_v14 }
 0x1b4   : > { %v1244_v55 = vmul.f32 %v1242_v52, %v1238_v53 }
 0x1b5   : > { %v1226_v54 = vcombine.high %v1225_v50, %v1225_v50  ;;  %v1607_v50 = vld [vmem:[%s409_s17] sm:$0x1] }
 0x1b8   : > { %v1081_v58 = vld [vmem:[#allocation3] sm:$0x1] }
 0x1b9   : > { %v1084_v61 = vadd.f32 %v1083_v56, %v1081_v58  ;;  %v1233_v56 = vrot.slane %v1226_v54, %v2113_v14  ;;  %v1252_v58 = vrot.slane %v1244_v55, %v2113_v14 }
 0x1bb   : > { %1085 = vst [vmem:[#allocation3] sm:$0x1] %v1084_v61  ;;  %v1259_v60 = vrot.slane %v1252_v58, %v2113_v14  ;;  %v1911_v14 = vld [vmem:[%s2340_s8 + $0x30] sm:$0xff]  }
 0x1bc   : > { %1841 = vmatpush3.bf16.msra.mxu0 %v1911_v14 }
 0x1bd   : > { %v1260_v61 = vcombine.high %v1259_v60, %v1259_v60  ;;  %1842 = vmatprep.subr.bf16.mxu0 %v1930_v27 }
 0x1c0   : > { %1843 = vmatpush3.bf16.msra.mxu0 %v1912_v7 }
 0x1c2   : > { %v1088_v3 = vld [vmem:[#allocation3] sm:$0x1] }
 0x1c3   : > { %v1111_v4 = vadd.f32 %v1109_v1, %v1088_v3 }
 0x1c5   : > { %1112 = vst [vmem:[#allocation3] sm:$0x1] %v1111_v4 }
 0x1cc   : > { %v1115_v11 = vld [vmem:[#allocation3] sm:$0x1] }
 0x1cd   : > { %v1138_v13 = vadd.f32 %v1136_v10, %v1115_v11  ;;  %v1915_v10 = vld [vmem:[%s2342_s10 + $0x10] sm:$0xff]   ;;  %v1916_v11 = vld [vmem:[%s2342_s10 + $0x18] sm:$0xff]  }
 0x1cf   : > { %1139 = vst [vmem:[#allocation3] sm:$0x1] %v1138_v13 }
 0x1d6   : > { %v1142_v17 = vld [vmem:[#allocation3] sm:$0x1] }
 0x1d7   : > { %v1165_v19 = vadd.f32 %v1163_v16, %v1142_v17 }
 0x1d9   : > { %1166 = vst [vmem:[#allocation3] sm:$0x1] %v1165_v19 }
 0x1e0   : > { %v1170_v25 = vld [vmem:[#allocation3] sm:$0x1] }
 0x1e1   : > { %v1173_v31 = vadd.f32 %v1172_v22, %v1170_v25  ;;  %v1918_v22 = vld [vmem:[%s2342_s10 + $0x28] sm:$0xff]   ;;  %v1398_v25 = vld [vmem:[%s2341_s9] sm:$0x1] }
 0x1e3   : > { %1174 = vst [vmem:[#allocation3] sm:$0x1] %v1173_v31 }
 0x1ea   : > { %v1178_v39 = vld [vmem:[#allocation3] sm:$0x1] }
 0x1eb   : > { %v1181_v41 = vadd.f32 %v1180_v28, %v1178_v39 }
 0x1ed   : > { %1182 = vst [vmem:[#allocation3] sm:$0x1] %v1181_v41 }
 0x1f4   : > { %v1185_v49 = vld [vmem:[#allocation3] sm:$0x1] }
 0x1f5   : > { %v1208_v51 = vadd.f32 %v1206_v46, %v1185_v49 }
 0x1f7   : > { %1209 = vst [vmem:[#allocation3] sm:$0x1] %v1208_v51 }
 0x1fe   : > { %v1212_v57 = vld [vmem:[#allocation3] sm:$0x1] }
 0x1ff   : > { %v1235_v59 = vadd.f32 %v1233_v56, %v1212_v57 }
 0x201   : > { %1236 = vst [vmem:[#allocation3] sm:$0x1] %v1235_v59 }
 0x208   : > { %v1239_v62 = vld [vmem:[#allocation3] sm:$0x1] }
 0x209   : > { %v1262_v63 = vadd.f32 %v1260_v61, %v1239_v62 }
 0x20b   : > { %1263 = vst [vmem:[#allocation3] sm:$0x1] %v1262_v63 }
 0x212   : > { %v1264_v18 = vld [vmem:[#allocation3] sm:$0x1] }
 0x213   : > { %v1266_v1 = vadd.f32 %v1265_v0, %v1264_v18 }
 0x215   : > { %v1267_v26 = vadd.f32 3.0, %v1266_v1 }
 0x217   : > { %v1268_v2 = vmax.f32 %v1267_v26, 0.0 }
 0x219   : > { %v1269_v3 = vmin.f32 %v1268_v2, 6.0 }
 0x21b   : > { %v1270_v4 = vmul.f32 %v1269_v3, %v1266_v1 }
 0x21d   : > { %v1271_v5 = vmul.f32 0.16666667, %v1270_v4 }
 0x21f   : > { %v1274_v6 = vpack.c.bf16 %v1271_v5, %v1271_v5 }
 0x221   : > { %1825 = vmatmul.mubr.bf16.vlgmr.msra.gmra.mrb[0].mxu1 %v1274_v6 }
 0x222   : > { %1864 = vmatprep.mubr.msk.bf16.mxu1 %vm1932_vm0, %v1930_v27  ;;  %1849 = vmatpush3.bf16.msra.mxu1 %v1913_v8 }
 0x223   : > { %1850 = vmatprep.subr.bf16.mxu1 %v1930_v27 }
 0x226   : > { %1851 = vmatpush3.bf16.msra.mxu1 %v1914_v9 }
 0x227   : > { %1852 = vmatprep.subr.bf16.mxu1 %v1930_v27 }
 0x22a   : > { %1853 = vmatpush3.bf16.msra.mxu1 %v1915_v10 }
 0x22b   : > { %1854 = vmatprep.subr.bf16.mxu1 %v1930_v27 }
 0x22e   : > { %1855 = vmatpush3.bf16.msra.mxu1 %v1916_v11 }
 0x22f   : > { %1856 = vmatprep.subr.bf16.mxu1 %v1930_v27 }
 0x232   : > { %1857 = vmatpush3.bf16.msra.mxu1 %v1917_v29 }
 0x233   : > { %1858 = vmatprep.subr.bf16.mxu1 %v1930_v27 }
 0x236   : > { %1859 = vmatpush3.bf16.msra.mxu1 %v1918_v22 }
 0x237   : > { %1860 = vmatprep.subr.bf16.mxu1 %v1930_v27 }
 0x23a   : > { %1861 = vmatpush3.bf16.msra.mxu1 %v1919_v23 }
 0x23b   : > { %1862 = vmatprep.subr.bf16.mxu1 %v1930_v27  ;;  %v1509_v27 = vld [vmem:[%s2343_s11] sm:$0x1] }
 0x23e   : > { %1863 = vmatpush3.bf16.msra.mxu1 %v1920_v24 }
 0x2f4   : > { %v1374_v13 = vpop.f32.mrb[0].mxu1 }
 0x2f5   : > { %v1375_v15 = vadd.f32 %v1374_v13, %v1291_v12  ;;  %v1826_v16 = vpop.f32.mrb[1].mxu1 }
 0x2f6   : > { %v1377_v17 = vpop.f32.mrb[2].mxu1 }
 0x2f7   : > { %v1380_v19 = vmax.f32 %v1375_v15, 0.0  ;;  %v1827_v20 = vpop.f32.mrb[3].mxu1 }
 0x2f9   : > { %v1381_v21 = vpack.c.bf16 %v1380_v19, %v1380_v19 }
 0x2fb   : > { %1845 = vmatmul.mubr.bf16.vlgmr.msra.gmra.mrb[12].mxu0 %v1381_v21 }
 0x3ce   : > { %v1481_v31 = vpop.f32.mrb[12].mxu0 }
 0x3cf   : > { %v1482_v32 = vadd.f32 %v1481_v31, %v1398_v25  ;;  %v1846_v33 = vpop.f32.mrb[13].mxu0 }
 0x3d0   : > { %v1484_v34 = vpop.f32.mrb[14].mxu0 }
 0x3d1   : > { %v1487_v30 = vadd.f32 3.0, %v1482_v32  ;;  %v1847_v35 = vpop.f32.mrb[15].mxu0 }
 0x3d3   : > { %v1488_v36 = vmax.f32 %v1487_v30, 0.0 }
 0x3d5   : > { %v1489_v28 = vmin.f32 %v1488_v36, 6.0 }
 0x3d7   : > { %v1490_v37 = vmul.f32 0.16666667, %v1489_v28 }
 0x3d9   : > { %v1491_v38 = vmul.f32 %v1490_v37, %v1271_v5 }
 0x3db   : > { %v1492_v39 = vpack.c.bf16 %v1491_v38, %v1491_v38 }
 0x3dd   : > { %1865 = vmatmul.mubr.bf16.vlgmr.msra.gmra.mrb[4].mxu1 %v1492_v39 }
 0x4b0   : > { %v1592_v40 = vpop.f32.mrb[4].mxu1 }
 0x4b1   : > { %v1593_v41 = vadd.f32 %v1592_v40, %v1509_v27  ;;  %v1866_v42 = vpop.f32.mrb[5].mxu1 }
 0x4b2   : > { %v1595_v43 = vpop.f32.mrb[6].mxu1 }
 0x4b3   : > { %v1598_v44 = vadd.f32 3.0, %v1593_v41  ;;  %v1867_v45 = vpop.f32.mrb[7].mxu1 }
 0x4b5   : > { %v1599_v46 = vmax.f32 %v1598_v44, 0.0 }
 0x4b7   : > { %v1600_v47 = vmin.f32 %v1599_v46, 6.0 }
 0x4b9   : > { %v1601_v48 = vmul.f32 %v1600_v47, %v1593_v41 }
 0x4bb   : > { %v1602_v49 = vmul.f32 0.16666667, %v1601_v48 }
 0x4bd   : > { %v1603_v51 = vpack.c.bf16 %v1602_v49, %v1602_v49 }
 0x4bf   : > { %v1608_v52 = vsel %vm1606_vm3, %v1603_v51, %v1607_v50 }
 0x4c0   : > { %1609 = vst [vmem:[%s409_s17] sm:$0x1] %v1608_v52 }
 0x4c1 PF: > { %s22_s21 = sadd.s32 1, %s1927_s21  }
 0x4c2   : > { %p19_p4 = scmp.ge.s32.totalorder %s22_s21, 4  }
 0x4c4   :  { %21 = sbr.rel (!%p19_p4) target bundleno = 1 (0x1), region = 107 }

</bundles_post_ra>
